<compile_context>
chip_gen: v7x
topology: tpu7x:2x2x1
jax: 0.10.0
libtpu: 0.0.40
codegen_flags: <defaults>
</compile_context>

<pallas_src>
import functools

import jax
import jax.numpy as jnp
import numpy as np
from jax.experimental import pallas as pl
from jax.experimental.pallas import tpu as pltpu


def _round_up(x, m):
    return (x + m - 1) // m * m


def _compiler_params(semantics):
    return pltpu.CompilerParams(
        dimension_semantics=semantics,
        vmem_limit_bytes=32 * 1024 * 1024,
    )


# ----------------------------------------------------------------------------
# Pallas kernel 1: single-step matmul + bias + optional ReLU (every conv)
# ----------------------------------------------------------------------------
def _matmul_bias_act_kernel(x_ref, w_ref, b_ref, o_ref, *, apply_relu):
    # bf16 x bf16 -> f32 accumulation on the MXU (DEFAULT precision).
    acc = jnp.dot(x_ref[...], w_ref[...], preferred_element_type=jnp.float32)
    acc = acc + b_ref[...]
    if apply_relu:
        acc = jnp.maximum(acc, 0.0)
    o_ref[...] = acc.astype(o_ref.dtype)


def _pick_tm(M):
    """M-tile: <=256 rows, multiple of 16, and >=2 tiles whenever M allows."""
    tm = min(256, _round_up(max(M, 1), 16))
    if M > 16 and -(-M // tm) < 2:
        tm = _round_up((M + 1) // 2, 16)
    return tm


def matmul_bias_act(patches, w2d, bias, *, apply_relu):
    """patches: (M, K) bf16, w2d: (K, Cout) bf16, bias: (Cout,) f32 -> (M, Cout) f32."""
    M, K = patches.shape
    Cout = w2d.shape[1]
    tm = _pick_tm(M)
    grid_m = -(-M // tm)          # partial edge block handled by Pallas
    b2d = bias.reshape(1, Cout).astype(jnp.float32)

    return pl.pallas_call(
        functools.partial(_matmul_bias_act_kernel, apply_relu=apply_relu),
        out_shape=jax.ShapeDtypeStruct((M, Cout), jnp.float32),
        grid_spec=pltpu.PrefetchScalarGridSpec(
            num_scalar_prefetch=0,
            grid=(grid_m,),
            in_specs=[
                pl.BlockSpec((tm, K), lambda i: (i, 0)),      # LHS M tile, full K
                pl.BlockSpec((K, Cout), lambda i: (0, 0)),    # weight resident
                pl.BlockSpec((1, Cout), lambda i: (0, 0)),    # bias resident
            ],
            out_specs=pl.BlockSpec((tm, Cout), lambda i: (i, 0)),
        ),
        compiler_params=_compiler_params(("parallel",)),
    )(patches, w2d, b2d)


def conv2d_pallas(x, w, b, *, padding, apply_relu):
    """x: (N, H, W, Cin) NHWC f32; w: (KH, KW, Cin, Cout) HWIO f32; stride 1."""
    N, H, W, Cin = x.shape
    KH, KW, _, Cout = w.shape
    # Cast once to bf16 so the pad copy and the im2col materialization are half-size.
    xp = jnp.pad(
        x.astype(jnp.bfloat16),
        ((0, 0), (padding, padding), (padding, padding), (0, 0)),
    )
    Ho = H + 2 * padding - KH + 1
    Wo = W + 2 * padding - KW + 1
    # TODO(synk): fuse im2col into the matmul grid (per-kernel-position manual-DMA
    #             accumulation over shifted slabs) to kill the KH*KW HBM blowup at
    #             real EfficientAD resolutions; kept as XLA glue here.
    cols = [
        xp[:, kh : kh + Ho, kw : kw + Wo, :]
        for kh in range(KH)
        for kw in range(KW)
    ]
    patches = jnp.stack(cols, axis=3).reshape(N * Ho * Wo, KH * KW * Cin)
    w2d = w.astype(jnp.bfloat16).reshape(KH * KW * Cin, Cout)
    out = matmul_bias_act(patches, w2d, b, apply_relu=apply_relu)
    return out.reshape(N, Ho, Wo, Cout)


# ----------------------------------------------------------------------------
# Pallas kernel 2: AvgPool2d(kernel=2, stride=2, padding=1), count_include_pad
# ----------------------------------------------------------------------------
def _avgpool_kernel(x_ref, o_ref):
    c = o_ref.shape[-1]
    v = x_ref[...]            # (1, th, 2, Wo, 2*C) — 2x2 window packed in dims 2 & lanes
    top = v[:, :, 0, :, :]
    bot = v[:, :, 1, :, :]
    s = top[..., :c] + top[..., c:] + bot[..., :c] + bot[..., c:]
    o_ref[...] = s * 0.25     # divisor 4 == count_include_pad=True


def avgpool2x2_pallas(x):
    """x: (N, H, W, C) NHWC f32 -> (N, H//2 + 1, W//2 + 1, C)."""
    N, H, W, C = x.shape
    Ho, Wo = H // 2 + 1, W // 2 + 1
    # rows per block: keep the f32 input block around <= 2 MiB
    th = max(1, min(Ho, (2 * 1024 * 1024) // max(1, 16 * Wo * C)))
    Ho_p = _round_up(Ho, th)
    # Single zero-pad (top/left 1, bottom/right to reach 2*Ho_p / 2*Wo);
    # the reshape below is contiguous (free), so no strided-slice temporaries.
    xp = jnp.pad(x, ((0, 0), (1, 2 * Ho_p - H - 1), (1, 2 * Wo - W - 1), (0, 0)))
    xr = xp.reshape(N, Ho_p, 2, Wo, 2 * C)

    out = pl.pallas_call(
        _avgpool_kernel,
        out_shape=jax.ShapeDtypeStruct((N, Ho_p, Wo, C), x.dtype),
        grid_spec=pltpu.PrefetchScalarGridSpec(
            num_scalar_prefetch=0,
            grid=(N, Ho_p // th),
            in_specs=[
                pl.BlockSpec((1, th, 2, Wo, 2 * C), lambda n, i: (n, i, 0, 0, 0)),
            ],
            out_specs=pl.BlockSpec((1, th, Wo, C), lambda n, i: (n, i, 0, 0)),
        ),
        compiler_params=_compiler_params(("parallel", "parallel")),
    )(xr)
    return out[:, :Ho]


# ----------------------------------------------------------------------------
# PDN_S forward
# ----------------------------------------------------------------------------
def init_params(key, last_kernel_size=384):
    # Conv weight shapes, stored directly in HWIO layout.
    shapes = [
        (4, 4, 3, 128),
        (4, 4, 128, 256),
        (3, 3, 256, 256),
        (4, 4, 256, last_kernel_size),
    ]
    params = {}
    for i, s in enumerate(shapes, start=1):
        key, kw, kb = jax.random.split(key, 3)
        fan_in = s[0] * s[1] * s[2]
        bound = 1.0 / np.sqrt(fan_in)  # PyTorch default conv init range
        params[f"w{i}"] = jax.random.uniform(kw, s, jnp.float32, -bound, bound)
        params[f"b{i}"] = jax.random.uniform(kb, (s[3],), jnp.float32, -bound, bound)
    return params


def pdn_s_forward(x_nchw, params):
    x = jnp.transpose(x_nchw, (0, 2, 3, 1))  # NCHW -> NHWC
    x = conv2d_pallas(x, params["w1"], params["b1"], padding=3, apply_relu=True)
    x = avgpool2x2_pallas(x)
    x = conv2d_pallas(x, params["w2"], params["b2"], padding=3, apply_relu=True)
    x = avgpool2x2_pallas(x)
    x = conv2d_pallas(x, params["w3"], params["b3"], padding=1, apply_relu=True)
    x = conv2d_pallas(x, params["w4"], params["b4"], padding=0, apply_relu=False)
    return jnp.transpose(x, (0, 3, 1, 2))  # NHWC -> NCHW


# ----------------------------------------------------------------------------
# Pure-XLA reference (high precision, for numerical verification)
# ----------------------------------------------------------------------------
def _ref_conv(x, w, b, pad):
    y = jax.lax.conv_general_dilated(
        x,
        w,
        window_strides=(1, 1),
        padding=[(pad, pad), (pad, pad)],
        dimension_numbers=("NHWC", "HWIO", "NHWC"),
        precision=jax.lax.Precision.HIGHEST,
    )
    return y + b.reshape(1, 1, 1, -1)


def _ref_pool(x):
    s = jax.lax.reduce_window(
        x,
        0.0,
        jax.lax.add,
        window_dimensions=(1, 2, 2, 1),
        window_strides=(1, 2, 2, 1),
        padding=[(0, 0), (1, 1), (1, 1), (0, 0)],
    )
    return s * 0.25


def pdn_s_reference(x_nchw, params):
    x = jnp.transpose(x_nchw, (0, 2, 3, 1))
    x = jax.nn.relu(_ref_conv(x, params["w1"], params["b1"], 3))
    x = _ref_pool(x)
    x = jax.nn.relu(_ref_conv(x, params["w2"], params["b2"], 3))
    x = _ref_pool(x)
    x = jax.nn.relu(_ref_conv(x, params["w3"], params["b3"], 1))
    x = _ref_conv(x, params["w4"], params["b4"], 0)
    return jnp.transpose(x, (0, 3, 1, 2))


if __name__ == "__main__":
    key = jax.random.PRNGKey(0)
    pkey, xkey = jax.random.split(key)
    params = init_params(pkey)
    # Small NCHW input consistent with the module: batch=2, 3 channels, 16x16.
    x = jax.random.normal(xkey, (2, 3, 16, 16), jnp.float32)

    out = jax.block_until_ready(jax.jit(pdn_s_forward)(x, params))
    assert out.shape == (2, 384, 4, 4), out.shape
    assert bool(jnp.all(jnp.isfinite(out)))

    ref = jax.block_until_ready(jax.jit(pdn_s_reference)(x, params))
    err = float(jnp.max(jnp.abs(out - ref)))
    scale = float(jnp.max(jnp.abs(ref))) + 1e-6
    # bf16 MXU operands vs. a HIGHEST-precision reference: allow bf16-level error.
    assert err <= 3e-2 * scale + 2e-3, (err, scale)

    print("KERNEL_OK")
</pallas_src>

<mosaic_0001>
module attributes {stable_mosaic.version = 11 : i64} {
  func.func @_matmul_bias_act_kernel(%arg0: i32, %arg1: memref<256x48xbf16, #tpu.memory_space<vmem>>, %arg2: memref<48x128xbf16, #tpu.memory_space<vmem>>, %arg3: memref<1x128xf32, #tpu.memory_space<vmem>>, %arg4: memref<256x128xf32, #tpu.memory_space<vmem>>) attributes {dimension_semantics = [#tpu.dimension_semantics<parallel>], iteration_bounds = array<i64: 3>, scalar_prefetch = 0 : i64, scratch_operands = 0 : i64, tpu.core_type = #tpu.core_type<tc>, window_params = [{transform_indices = @transform_0, window_bounds = array<i64: 256, 48>}, {pipeline_mode = #tpu.pipeline_mode<synchronous>, transform_indices = @transform_1, window_bounds = array<i64: 48, 128>}, {pipeline_mode = #tpu.pipeline_mode<synchronous>, transform_indices = @transform_2, window_bounds = array<i64: 1, 128>}, {transform_indices = @transform_3, window_bounds = array<i64: 256, 128>}]} {
    %c0 = arith.constant 0 : index
    %c0_0 = arith.constant 0 : index
    %0 = vector.load %arg1[%c0, %c0_0] : memref<256x48xbf16, #tpu.memory_space<vmem>>, vector<256x48xbf16>
    %c0_1 = arith.constant 0 : index
    %c0_2 = arith.constant 0 : index
    %1 = vector.load %arg2[%c0_1, %c0_2] : memref<48x128xbf16, #tpu.memory_space<vmem>>, vector<48x128xbf16>
    %cst = arith.constant dense<0.000000e+00> : vector<256x128xf32>
    %2 = tpu.matmul %0, %1, %cst {dimension_numbers = #tpu.dot_dimension_numbers<[1], [0], [0], [1], [0, 0, 1, 1], [], []>} : vector<256x48xbf16>, vector<48x128xbf16>, vector<256x128xf32> -> vector<256x128xf32>
    %c0_3 = arith.constant 0 : index
    %c0_4 = arith.constant 0 : index
    %3 = vector.load %arg3[%c0_3, %c0_4] : memref<1x128xf32, #tpu.memory_space<vmem>>, vector<1x128xf32>
    %4 = vector.broadcast %3 : vector<1x128xf32> to vector<256x128xf32>
    %5 = arith.addf %2, %4 : vector<256x128xf32>
    %cst_5 = arith.constant 0.000000e+00 : f32
    %6 = vector.broadcast %cst_5 : f32 to vector<256x128xf32>
    %7 = arith.maximumf %5, %6 : vector<256x128xf32>
    %c0_6 = arith.constant 0 : index
    %c0_7 = arith.constant 0 : index
    %8 = vector.load %arg4[%c0_6, %c0_7] : memref<256x128xf32, #tpu.memory_space<vmem>>, vector<256x128xf32>
    tpu.vector_store %arg4[%c0_6, %c0_7], %7 {strides = array<i32>} : memref<256x128xf32, #tpu.memory_space<vmem>>, vector<256x128xf32>,
    return
  }
  func.func @transform_0(%arg0: i32) -> (i32, i32) {
    %c0_i32 = arith.constant 0 : i32
    %c0_i32_0 = arith.constant 0 : i32
    return %arg0, %c0_i32 : i32, i32
  }
  func.func @transform_1(%arg0: i32) -> (i32, i32) {
    %c0_i32 = arith.constant 0 : i32
    %c0_i32_0 = arith.constant 0 : i32
    %c0_i32_1 = arith.constant 0 : i32
    return %c0_i32, %c0_i32_0 : i32, i32
  }
  func.func @transform_2(%arg0: i32) -> (i32, i32) {
    %c0_i32 = arith.constant 0 : i32
    %c0_i32_0 = arith.constant 0 : i32
    %c0_i32_1 = arith.constant 0 : i32
    return %c0_i32, %c0_i32_0 : i32, i32
  }
  func.func @transform_3(%arg0: i32) -> (i32, i32) {
    %c0_i32 = arith.constant 0 : i32
    %c0_i32_0 = arith.constant 0 : i32
    return %arg0, %c0_i32 : i32, i32
  }
}

module attributes {stable_mosaic.version = 11 : i64} {
  func.func @_avgpool_kernel(%arg0: i32, %arg1: i32, %arg2: memref<1x10x2x10x256xf32, #tpu.memory_space<vmem>>, %arg3: memref<1x10x10x128xf32, #tpu.memory_space<vmem>>) attributes {dimension_semantics = [#tpu.dimension_semantics<parallel>, #tpu.dimension_semantics<parallel>], iteration_bounds = array<i64: 2, 1>, scalar_prefetch = 0 : i64, scratch_operands = 0 : i64, tpu.core_type = #tpu.core_type<tc>, window_params = [{transform_indices = @transform_0, window_bounds = array<i64: 1, 10, 2, 10, 256>}, {transform_indices = @transform_1, window_bounds = array<i64: 1, 10, 10, 128>}]} {
    %c0 = arith.constant 0 : index
    %c0_0 = arith.constant 0 : index
    %c0_1 = arith.constant 0 : index
    %c0_2 = arith.constant 0 : index
    %c0_3 = arith.constant 0 : index
    %0 = vector.load %arg2[%c0, %c0_0, %c0_1, %c0_2, %c0_3] : memref<1x10x2x10x256xf32, #tpu.memory_space<vmem>>, vector<1x10x2x10x256xf32>
    %1 = vector.extract_strided_slice %0 {offsets = [0, 0, 0, 0, 0], sizes = [1, 10, 1, 10, 256], strides = [1, 1, 1, 1, 1]} : vector<1x10x2x10x256xf32> to vector<1x10x1x10x256xf32>
    %2 = vector.shape_cast %1 : vector<1x10x1x10x256xf32> to vector<1x10x10x256xf32>
    %3 = vector.extract_strided_slice %0 {offsets = [0, 0, 1, 0, 0], sizes = [1, 10, 1, 10, 256], strides = [1, 1, 1, 1, 1]} : vector<1x10x2x10x256xf32> to vector<1x10x1x10x256xf32>
    %4 = vector.shape_cast %3 : vector<1x10x1x10x256xf32> to vector<1x10x10x256xf32>
    %5 = vector.extract_strided_slice %2 {offsets = [0, 0, 0, 0], sizes = [1, 10, 10, 128], strides = [1, 1, 1, 1]} : vector<1x10x10x256xf32> to vector<1x10x10x128xf32>
    %6 = vector.extract_strided_slice %2 {offsets = [0, 0, 0, 128], sizes = [1, 10, 10, 128], strides = [1, 1, 1, 1]} : vector<1x10x10x256xf32> to vector<1x10x10x128xf32>
    %7 = arith.addf %5, %6 : vector<1x10x10x128xf32>
    %8 = vector.extract_strided_slice %4 {offsets = [0, 0, 0, 0], sizes = [1, 10, 10, 128], strides = [1, 1, 1, 1]} : vector<1x10x10x256xf32> to vector<1x10x10x128xf32>
    %9 = arith.addf %7, %8 : vector<1x10x10x128xf32>
    %10 = vector.extract_strided_slice %4 {offsets = [0, 0, 0, 128], sizes = [1, 10, 10, 128], strides = [1, 1, 1, 1]} : vector<1x10x10x256xf32> to vector<1x10x10x128xf32>
    %11 = arith.addf %9, %10 : vector<1x10x10x128xf32>
    %cst = arith.constant 2.500000e-01 : f32
    %12 = vector.broadcast %cst : f32 to vector<1x10x10x128xf32>
    %13 = arith.mulf %11, %12 : vector<1x10x10x128xf32>
    %c0_4 = arith.constant 0 : index
    %c0_5 = arith.constant 0 : index
    %c0_6 = arith.constant 0 : index
    %c0_7 = arith.constant 0 : index
    %14 = vector.load %arg3[%c0_4, %c0_5, %c0_6, %c0_7] : memref<1x10x10x128xf32, #tpu.memory_space<vmem>>, vector<1x10x10x128xf32>
    tpu.vector_store %arg3[%c0_4, %c0_5, %c0_6, %c0_7], %13 {strides = array<i32>} : memref<1x10x10x128xf32, #tpu.memory_space<vmem>>, vector<1x10x10x128xf32>,
    return
  }
  func.func @transform_0(%arg0: i32, %arg1: i32) -> (i32, i32, i32, i32, i32) {
    %c0_i32 = arith.constant 0 : i32
    %c0_i32_0 = arith.constant 0 : i32
    %c0_i32_1 = arith.constant 0 : i32
    %c0_i32_2 = arith.constant 0 : i32
    return %arg0, %arg1, %c0_i32, %c0_i32_0, %c0_i32_1 : i32, i32, i32, i32, i32
  }
  func.func @transform_1(%arg0: i32, %arg1: i32) -> (i32, i32, i32, i32) {
    %c0_i32 = arith.constant 0 : i32
    %c0_i32_0 = arith.constant 0 : i32
    %c0_i32_1 = arith.constant 0 : i32
    return %arg0, %arg1, %c0_i32, %c0_i32_0 : i32, i32, i32, i32
  }
}

module attributes {stable_mosaic.version = 11 : i64} {
  func.func @_matmul_bias_act_kernel(%arg0: i32, %arg1: memref<256x2048xbf16, #tpu.memory_space<vmem>>, %arg2: memref<2048x256xbf16, #tpu.memory_space<vmem>>, %arg3: memref<1x256xf32, #tpu.memory_space<vmem>>, %arg4: memref<256x256xf32, #tpu.memory_space<vmem>>) attributes {dimension_semantics = [#tpu.dimension_semantics<parallel>], iteration_bounds = array<i64: 2>, scalar_prefetch = 0 : i64, scratch_operands = 0 : i64, tpu.core_type = #tpu.core_type<tc>, window_params = [{transform_indices = @transform_0, window_bounds = array<i64: 256, 2048>}, {pipeline_mode = #tpu.pipeline_mode<synchronous>, transform_indices = @transform_1, window_bounds = array<i64: 2048, 256>}, {pipeline_mode = #tpu.pipeline_mode<synchronous>, transform_indices = @transform_2, window_bounds = array<i64: 1, 256>}, {transform_indices = @transform_3, window_bounds = array<i64: 256, 256>}]} {
    %c0 = arith.constant 0 : index
    %c0_0 = arith.constant 0 : index
    %0 = vector.load %arg1[%c0, %c0_0] : memref<256x2048xbf16, #tpu.memory_space<vmem>>, vector<256x2048xbf16>
    %c0_1 = arith.constant 0 : index
    %c0_2 = arith.constant 0 : index
    %1 = vector.load %arg2[%c0_1, %c0_2] : memref<2048x256xbf16, #tpu.memory_space<vmem>>, vector<2048x256xbf16>
    %cst = arith.constant dense<0.000000e+00> : vector<256x256xf32>
    %2 = tpu.matmul %0, %1, %cst {dimension_numbers = #tpu.dot_dimension_numbers<[1], [0], [0], [1], [0, 0, 1, 1], [], []>} : vector<256x2048xbf16>, vector<2048x256xbf16>, vector<256x256xf32> -> vector<256x256xf32>
    %c0_3 = arith.constant 0 : index
    %c0_4 = arith.constant 0 : index
    %3 = vector.load %arg3[%c0_3, %c0_4] : memref<1x256xf32, #tpu.memory_space<vmem>>, vector<1x256xf32>
    %4 = vector.broadcast %3 : vector<1x256xf32> to vector<256x256xf32>
    %5 = arith.addf %2, %4 : vector<256x256xf32>
    %cst_5 = arith.constant 0.000000e+00 : f32
    %6 = vector.broadcast %cst_5 : f32 to vector<256x256xf32>
    %7 = arith.maximumf %5, %6 : vector<256x256xf32>
    %c0_6 = arith.constant 0 : index
    %c0_7 = arith.constant 0 : index
    %8 = vector.load %arg4[%c0_6, %c0_7] : memref<256x256xf32, #tpu.memory_space<vmem>>, vector<256x256xf32>
    tpu.vector_store %arg4[%c0_6, %c0_7], %7 {strides = array<i32>} : memref<256x256xf32, #tpu.memory_space<vmem>>, vector<256x256xf32>,
    return
  }
  func.func @transform_0(%arg0: i32) -> (i32, i32) {
    %c0_i32 = arith.constant 0 : i32
    %c0_i32_0 = arith.constant 0 : i32
    return %arg0, %c0_i32 : i32, i32
  }
  func.func @transform_1(%arg0: i32) -> (i32, i32) {
    %c0_i32 = arith.constant 0 : i32
    %c0_i32_0 = arith.constant 0 : i32
    %c0_i32_1 = arith.constant 0 : i32
    return %c0_i32, %c0_i32_0 : i32, i32
  }
  func.func @transform_2(%arg0: i32) -> (i32, i32) {
    %c0_i32 = arith.constant 0 : i32
    %c0_i32_0 = arith.constant 0 : i32
    %c0_i32_1 = arith.constant 0 : i32
    return %c0_i32, %c0_i32_0 : i32, i32
  }
  func.func @transform_3(%arg0: i32) -> (i32, i32) {
    %c0_i32 = arith.constant 0 : i32
    %c0_i32_0 = arith.constant 0 : i32
    return %arg0, %c0_i32 : i32, i32
  }
}

module attributes {stable_mosaic.version = 11 : i64} {
  func.func @_avgpool_kernel(%arg0: i32, %arg1: i32, %arg2: memref<1x7x2x7x512xf32, #tpu.memory_space<vmem>>, %arg3: memref<1x7x7x256xf32, #tpu.memory_space<vmem>>) attributes {dimension_semantics = [#tpu.dimension_semantics<parallel>, #tpu.dimension_semantics<parallel>], iteration_bounds = array<i64: 2, 1>, scalar_prefetch = 0 : i64, scratch_operands = 0 : i64, tpu.core_type = #tpu.core_type<tc>, window_params = [{transform_indices = @transform_0, window_bounds = array<i64: 1, 7, 2, 7, 512>}, {transform_indices = @transform_1, window_bounds = array<i64: 1, 7, 7, 256>}]} {
    %c0 = arith.constant 0 : index
    %c0_0 = arith.constant 0 : index
    %c0_1 = arith.constant 0 : index
    %c0_2 = arith.constant 0 : index
    %c0_3 = arith.constant 0 : index
    %0 = vector.load %arg2[%c0, %c0_0, %c0_1, %c0_2, %c0_3] : memref<1x7x2x7x512xf32, #tpu.memory_space<vmem>>, vector<1x7x2x7x512xf32>
    %1 = vector.extract_strided_slice %0 {offsets = [0, 0, 0, 0, 0], sizes = [1, 7, 1, 7, 512], strides = [1, 1, 1, 1, 1]} : vector<1x7x2x7x512xf32> to vector<1x7x1x7x512xf32>
    %2 = vector.shape_cast %1 : vector<1x7x1x7x512xf32> to vector<1x7x7x512xf32>
    %3 = vector.extract_strided_slice %0 {offsets = [0, 0, 1, 0, 0], sizes = [1, 7, 1, 7, 512], strides = [1, 1, 1, 1, 1]} : vector<1x7x2x7x512xf32> to vector<1x7x1x7x512xf32>
    %4 = vector.shape_cast %3 : vector<1x7x1x7x512xf32> to vector<1x7x7x512xf32>
    %5 = vector.extract_strided_slice %2 {offsets = [0, 0, 0, 0], sizes = [1, 7, 7, 256], strides = [1, 1, 1, 1]} : vector<1x7x7x512xf32> to vector<1x7x7x256xf32>
    %6 = vector.extract_strided_slice %2 {offsets = [0, 0, 0, 256], sizes = [1, 7, 7, 256], strides = [1, 1, 1, 1]} : vector<1x7x7x512xf32> to vector<1x7x7x256xf32>
    %7 = arith.addf %5, %6 : vector<1x7x7x256xf32>
    %8 = vector.extract_strided_slice %4 {offsets = [0, 0, 0, 0], sizes = [1, 7, 7, 256], strides = [1, 1, 1, 1]} : vector<1x7x7x512xf32> to vector<1x7x7x256xf32>
    %9 = arith.addf %7, %8 : vector<1x7x7x256xf32>
    %10 = vector.extract_strided_slice %4 {offsets = [0, 0, 0, 256], sizes = [1, 7, 7, 256], strides = [1, 1, 1, 1]} : vector<1x7x7x512xf32> to vector<1x7x7x256xf32>
    %11 = arith.addf %9, %10 : vector<1x7x7x256xf32>
    %cst = arith.constant 2.500000e-01 : f32
    %12 = vector.broadcast %cst : f32 to vector<1x7x7x256xf32>
    %13 = arith.mulf %11, %12 : vector<1x7x7x256xf32>
    %c0_4 = arith.constant 0 : index
    %c0_5 = arith.constant 0 : index
    %c0_6 = arith.constant 0 : index
    %c0_7 = arith.constant 0 : index
    %14 = vector.load %arg3[%c0_4, %c0_5, %c0_6, %c0_7] : memref<1x7x7x256xf32, #tpu.memory_space<vmem>>, vector<1x7x7x256xf32>
    tpu.vector_store %arg3[%c0_4, %c0_5, %c0_6, %c0_7], %13 {strides = array<i32>} : memref<1x7x7x256xf32, #tpu.memory_space<vmem>>, vector<1x7x7x256xf32>,
    return
  }
  func.func @transform_0(%arg0: i32, %arg1: i32) -> (i32, i32, i32, i32, i32) {
    %c0_i32 = arith.constant 0 : i32
    %c0_i32_0 = arith.constant 0 : i32
    %c0_i32_1 = arith.constant 0 : i32
    %c0_i32_2 = arith.constant 0 : i32
    return %arg0, %arg1, %c0_i32, %c0_i32_0, %c0_i32_1 : i32, i32, i32, i32, i32
  }
  func.func @transform_1(%arg0: i32, %arg1: i32) -> (i32, i32, i32, i32) {
    %c0_i32 = arith.constant 0 : i32
    %c0_i32_0 = arith.constant 0 : i32
    %c0_i32_1 = arith.constant 0 : i32
    return %arg0, %arg1, %c0_i32, %c0_i32_0 : i32, i32, i32, i32
  }
}

module attributes {stable_mosaic.version = 11 : i64} {
  func.func @_matmul_bias_act_kernel(%arg0: i32, %arg1: memref<64x2304xbf16, #tpu.memory_space<vmem>>, %arg2: memref<2304x256xbf16, #tpu.memory_space<vmem>>, %arg3: memref<1x256xf32, #tpu.memory_space<vmem>>, %arg4: memref<64x256xf32, #tpu.memory_space<vmem>>) attributes {dimension_semantics = [#tpu.dimension_semantics<parallel>], iteration_bounds = array<i64: 2>, scalar_prefetch = 0 : i64, scratch_operands = 0 : i64, tpu.core_type = #tpu.core_type<tc>, window_params = [{transform_indices = @transform_0, window_bounds = array<i64: 64, 2304>}, {pipeline_mode = #tpu.pipeline_mode<synchronous>, transform_indices = @transform_1, window_bounds = array<i64: 2304, 256>}, {pipeline_mode = #tpu.pipeline_mode<synchronous>, transform_indices = @transform_2, window_bounds = array<i64: 1, 256>}, {transform_indices = @transform_3, window_bounds = array<i64: 64, 256>}]} {
    %c0 = arith.constant 0 : index
    %c0_0 = arith.constant 0 : index
    %0 = vector.load %arg1[%c0, %c0_0] : memref<64x2304xbf16, #tpu.memory_space<vmem>>, vector<64x2304xbf16>
    %c0_1 = arith.constant 0 : index
    %c0_2 = arith.constant 0 : index
    %1 = vector.load %arg2[%c0_1, %c0_2] : memref<2304x256xbf16, #tpu.memory_space<vmem>>, vector<2304x256xbf16>
    %cst = arith.constant dense<0.000000e+00> : vector<64x256xf32>
    %2 = tpu.matmul %0, %1, %cst {dimension_numbers = #tpu.dot_dimension_numbers<[1], [0], [0], [1], [0, 0, 1, 1], [], []>} : vector<64x2304xbf16>, vector<2304x256xbf16>, vector<64x256xf32> -> vector<64x256xf32>
    %c0_3 = arith.constant 0 : index
    %c0_4 = arith.constant 0 : index
    %3 = vector.load %arg3[%c0_3, %c0_4] : memref<1x256xf32, #tpu.memory_space<vmem>>, vector<1x256xf32>
    %4 = vector.broadcast %3 : vector<1x256xf32> to vector<64x256xf32>
    %5 = arith.addf %2, %4 : vector<64x256xf32>
    %cst_5 = arith.constant 0.000000e+00 : f32
    %6 = vector.broadcast %cst_5 : f32 to vector<64x256xf32>
    %7 = arith.maximumf %5, %6 : vector<64x256xf32>
    %c0_6 = arith.constant 0 : index
    %c0_7 = arith.constant 0 : index
    %8 = vector.load %arg4[%c0_6, %c0_7] : memref<64x256xf32, #tpu.memory_space<vmem>>, vector<64x256xf32>
    tpu.vector_store %arg4[%c0_6, %c0_7], %7 {strides = array<i32>} : memref<64x256xf32, #tpu.memory_space<vmem>>, vector<64x256xf32>,
    return
  }
  func.func @transform_0(%arg0: i32) -> (i32, i32) {
    %c0_i32 = arith.constant 0 : i32
    %c0_i32_0 = arith.constant 0 : i32
    return %arg0, %c0_i32 : i32, i32
  }
  func.func @transform_1(%arg0: i32) -> (i32, i32) {
    %c0_i32 = arith.constant 0 : i32
    %c0_i32_0 = arith.constant 0 : i32
    %c0_i32_1 = arith.constant 0 : i32
    return %c0_i32, %c0_i32_0 : i32, i32
  }
  func.func @transform_2(%arg0: i32) -> (i32, i32) {
    %c0_i32 = arith.constant 0 : i32
    %c0_i32_0 = arith.constant 0 : i32
    %c0_i32_1 = arith.constant 0 : i32
    return %c0_i32, %c0_i32_0 : i32, i32
  }
  func.func @transform_3(%arg0: i32) -> (i32, i32) {
    %c0_i32 = arith.constant 0 : i32
    %c0_i32_0 = arith.constant 0 : i32
    return %arg0, %c0_i32 : i32, i32
  }
}

module attributes {stable_mosaic.version = 11 : i64} {
  func.func @_matmul_bias_act_kernel(%arg0: i32, %arg1: memref<16x4096xbf16, #tpu.memory_space<vmem>>, %arg2: memref<4096x384xbf16, #tpu.memory_space<vmem>>, %arg3: memref<1x384xf32, #tpu.memory_space<vmem>>, %arg4: memref<16x384xf32, #tpu.memory_space<vmem>>) attributes {dimension_semantics = [#tpu.dimension_semantics<parallel>], iteration_bounds = array<i64: 2>, scalar_prefetch = 0 : i64, scratch_operands = 0 : i64, tpu.core_type = #tpu.core_type<tc>, window_params = [{transform_indices = @transform_0, window_bounds = array<i64: 16, 4096>}, {pipeline_mode = #tpu.pipeline_mode<synchronous>, transform_indices = @transform_1, window_bounds = array<i64: 4096, 384>}, {pipeline_mode = #tpu.pipeline_mode<synchronous>, transform_indices = @transform_2, window_bounds = array<i64: 1, 384>}, {transform_indices = @transform_3, window_bounds = array<i64: 16, 384>}]} {
    %c0 = arith.constant 0 : index
    %c0_0 = arith.constant 0 : index
    %0 = vector.load %arg1[%c0, %c0_0] : memref<16x4096xbf16, #tpu.memory_space<vmem>>, vector<16x4096xbf16>
    %c0_1 = arith.constant 0 : index
    %c0_2 = arith.constant 0 : index
    %1 = vector.load %arg2[%c0_1, %c0_2] : memref<4096x384xbf16, #tpu.memory_space<vmem>>, vector<4096x384xbf16>
    %cst = arith.constant dense<0.000000e+00> : vector<16x384xf32>
    %2 = tpu.matmul %0, %1, %cst {dimension_numbers = #tpu.dot_dimension_numbers<[1], [0], [0], [1], [0, 0, 1, 1], [], []>} : vector<16x4096xbf16>, vector<4096x384xbf16>, vector<16x384xf32> -> vector<16x384xf32>
    %c0_3 = arith.constant 0 : index
    %c0_4 = arith.constant 0 : index
    %3 = vector.load %arg3[%c0_3, %c0_4] : memref<1x384xf32, #tpu.memory_space<vmem>>, vector<1x384xf32>
    %4 = vector.broadcast %3 : vector<1x384xf32> to vector<16x384xf32>
    %5 = arith.addf %2, %4 : vector<16x384xf32>
    %c0_5 = arith.constant 0 : index
    %c0_6 = arith.constant 0 : index
    %6 = vector.load %arg4[%c0_5, %c0_6] : memref<16x384xf32, #tpu.memory_space<vmem>>, vector<16x384xf32>
    tpu.vector_store %arg4[%c0_5, %c0_6], %5 {strides = array<i32>} : memref<16x384xf32, #tpu.memory_space<vmem>>, vector<16x384xf32>,
    return
  }
  func.func @transform_0(%arg0: i32) -> (i32, i32) {
    %c0_i32 = arith.constant 0 : i32
    %c0_i32_0 = arith.constant 0 : i32
    return %arg0, %c0_i32 : i32, i32
  }
  func.func @transform_1(%arg0: i32) -> (i32, i32) {
    %c0_i32 = arith.constant 0 : i32
    %c0_i32_0 = arith.constant 0 : i32
    %c0_i32_1 = arith.constant 0 : i32
    return %c0_i32, %c0_i32_0 : i32, i32
  }
  func.func @transform_2(%arg0: i32) -> (i32, i32) {
    %c0_i32 = arith.constant 0 : i32
    %c0_i32_0 = arith.constant 0 : i32
    %c0_i32_1 = arith.constant 0 : i32
    return %c0_i32, %c0_i32_0 : i32, i32
  }
  func.func @transform_3(%arg0: i32) -> (i32, i32) {
    %c0_i32 = arith.constant 0 : i32
    %c0_i32_0 = arith.constant 0 : i32
    return %arg0, %c0_i32 : i32, i32
  }
}

</mosaic_0001>

<bundles_post_ra>
// kernel: pdn_s_forward.6
= control target key start
LH: loop header
LB: loop body
LE: loop exit
PB: predicated region body
PF: predicated region fallthrough
CT: control target
= control target key end

     0   :  { %s1290_s12 = smov 0   ;;  %s1292_s13 = smov 0   ;;  %s1581_s0 = inlined_call_operand.vmem [shape: bf16[722,48], index: 0, kind: input, shape index: {}]   ;;  %s1582_s1 = inlined_call_operand.vmem [shape: bf16[48,128], index: 1, kind: input, shape index: {}]   ;;  %s1583_s2 = inlined_call_operand.vmem [shape: f32[1,128], index: 2, kind: input, shape index: {}]   ;;  %s1584_s3 = inlined_call_operand.vmem [shape: f32[722,128], index: 3, kind: output, shape index: {}]  }
   0x1   :  { %s1294_s14 = smov 0  }
   0x2 LB: > { %s1303_s15 = sadd.s32 4294967295, %s1236_s14   ;;  %s1305_s16 = sadd.s32 1, %s1236_s14   ;;  %s1236_s14 = sphi %s1294_s14, %s1593_s14   ;;  %s1232_s13 = sphi %s1292_s13, %s1592_s13   ;;  %s1228_s12 = sphi %s1290_s12, %s1591_s12  }
   0x3   : > { %s85_s17 = ssub.s32 %s1236_s14, %s1305_s16  ;;  %s88_s18 = sadd.s32 1, %s1232_s13 }
   0x4   : > { %p86_p0 = scmp.eq.s32.totalorder %s85_s17, 0  ;;  %p98_p1 = scmp.ne.s32.totalorder %s1232_s13, %s1228_s12 }
   0x5   : > { %p99_p2 = scmp.eq.s32.totalorder %s1303_s15, 2  ;;  %p952_p3 = scmp.ge.s32.totalorder %s1236_s14, 1 }
   0x6   : > { %s1313_s19 = scalar_select %p86_p0, %s1232_s13, %s88_s18  }
   0x7   : > { %p1315_p4 = por %p99_p2, %p98_p1  ;;  %p146_p5 = scmp.lt.s32.totalorder %s1236_s14, 4 }
   0x9   : > { %p147_p6 = pnand %p952_p3, %p146_p5 }
   0xa   : > { %v1163_v0 = vld [vmem:[%s1582_s1] sm:$0xff] (!%p147_p6)   ;;  %s1323_s23 = sshll.u32 (!%p147_p6), %s1303_s15, 5  ;;  %v1164_v1 = vld [vmem:[%s1582_s1 + $0x8] sm:$0xff] (!%p147_p6)   ;;  %v1165_v2 = vld [vmem:[%s1582_s1 + $0x10] sm:$0xff] (!%p147_p6)   ;;  %vm336_vm0 = vcmask (!%p147_p6), 392192   ;;  %s170_s6 = sand.u32 (!%p147_p6), 1, %s1228_s12  }
   0xb   : > { %150 = sbr.rel (%p147_p6) target bundleno = 325 (0x145), region = 32  ;;  %p178_p7 = scmp.lt.s32.totalorder (!%p147_p6), %s1323_s23, 90  ;;  %1031 = vmatprep.subr.bf16.mxu0 (!%p147_p6), %v1163_v0  ;;  %1069 = vmatprep.subr.bf16.mxu1 (!%p147_p6), %v1163_v0  ;;  %v1374_v19 = vld [vmem:[%s1583_s2] ss:$0 sm:$0xff] (!%p147_p6) }
   0xc   : > { %1032 = vmatpush3.bf16.msra.mxu0 (!%p147_p6), %v1163_v0  ;;  %1072 = vmatpush3.bf16.msra.mxu1 (!%p147_p6), %v1163_v0  ;;  %s953_s9 = sshll.u32 (!%p147_p6), %s170_s6, 8 }
   0xd   : > { %1033 = vmatprep.subr.bf16.mxu0 (!%p147_p6), %v1164_v1  ;;  %1070 = vmatprep.subr.bf16.mxu1 (!%p147_p6), %v1164_v1  ;;  %s1384_s10 = scalar_lea.vmem (!%p147_p6), [#allocation2], %s953_s9  }
  0x10   : > { %1034 = vmatpush3.bf16.msra.mxu0 (!%p147_p6), %v1164_v1  ;;  %1073 = vmatpush3.bf16.msra.mxu1 (!%p147_p6), %v1164_v1 }
  0x11   : > { %1035 = vmatprep.subr.bf16.mxu0 (!%p147_p6), %v1165_v2  ;;  %1071 = vmatprep.subr.bf16.mxu1 (!%p147_p6), %v1165_v2 }
  0x12   : > { %s179_s26 = scalar_select %p178_p7, %s1323_s23, 90 }
  0x13   : > { %s618_s11 = ssub.s32 (%p1315_p4), 91, %s1323_s23  ;;  %s1009_s12 = sshll.u32 (%p1315_p4), %s1303_s15, 8 }
  0x14   : > { %s955_s29 = sshll.u32 %s179_s26, 2  ;;  %1036 = vmatpush3.bf16.msra.mxu0 %v1165_v2  ;;  %1074 = vmatpush3.bf16.msra.mxu1 %v1165_v2  ;;  %p619_p8 = scmp.lt.s32.totalorder (%p1315_p4), %s618_s11, 32 }
  0x15   : > { %s1336_s5 = scalar_lea.vmem %s1581_s0, %s955_s29  ;;  %s1449_s18 = scalar_lea.vmem (%p1315_p4), %s1584_s3, %s1009_s12  }
  0x16   : > { %v1166_v3 = vld [vmem:[%s1336_s5] sm:$0xff]   ;;  %v1168_v5 = vld [vmem:[%s1336_s5 + $0x8] sm:$0xff]   ;;  %v1170_v7 = vld [vmem:[%s1336_s5 + $0x10] sm:$0xff]  }
  0x17   : > { %v1167_v4 = vld [vmem:[%s1336_s5 + $0x40] sm:$0xff]   ;;  %1037 = vmatprep.mubr.msk.bf16.mxu0 %vm336_vm0, %v1166_v3  ;;  %v1169_v6 = vld [vmem:[%s1336_s5 + $0x48] sm:$0xff]   ;;  %v1171_v8 = vld [vmem:[%s1336_s5 + $0x50] sm:$0xff]  }
  0x18   : > { %1053 = vmatprep.mubr.msk.bf16.mxu1 %vm336_vm0, %v1167_v4  ;;  %1038 = vmatmul.mubr.msk.bf16.vlgmr.msra.gmra.mrb[0].mxu0 %vm336_vm0, %v1168_v5  ;;  %v1172_v9 = vld [vmem:[%s1336_s5 + $0x18] sm:$0xff]   ;;  %v1174_v11 = vld [vmem:[%s1336_s5 + $0x20] sm:$0xff]   ;;  %v1176_v13 = vld [vmem:[%s1336_s5 + $0x28] sm:$0xff]  }
  0x19   : > { %1054 = vmatmul.mubr.msk.bf16.vlgmr.msra.gmra.mrb[0].mxu1 %vm336_vm0, %v1169_v6  ;;  %1041 = vmatprep.mubr.msk.bf16.mxu0 %vm336_vm0, %v1170_v7  ;;  %v1173_v10 = vld [vmem:[%s1336_s5 + $0x58] sm:$0xff]   ;;  %v1175_v12 = vld [vmem:[%s1336_s5 + $0x60] sm:$0xff]   ;;  %v1177_v14 = vld [vmem:[%s1336_s5 + $0x68] sm:$0xff]  }
  0x1a   : > { %1057 = vmatprep.mubr.msk.bf16.mxu1 %vm336_vm0, %v1171_v8  ;;  %v1178_v15 = vld [vmem:[%s1336_s5 + $0x30] sm:$0xff]   ;;  %v1180_v17 = vld [vmem:[%s1336_s5 + $0x38] sm:$0xff]  }
  0x1b   : > { %v1179_v16 = vld [vmem:[%s1336_s5 + $0x70] sm:$0xff]   ;;  %v1181_v18 = vld [vmem:[%s1336_s5 + $0x78] sm:$0xff]  }
  0x20   : > { %1042 = vmatmul.mubr.msk.bf16.gmra.mrb[4].mxu0 %vm336_vm0, %v1172_v9 }
  0x21   : > { %1058 = vmatmul.mubr.msk.bf16.gmra.mrb[4].mxu1 %vm336_vm0, %v1173_v10  ;;  %1045 = vmatprep.mubr.msk.bf16.mxu0 %vm336_vm0, %v1174_v11 }
  0x22   : > { %1061 = vmatprep.mubr.msk.bf16.mxu1 %vm336_vm0, %v1175_v12 }
  0x28   : > { %1046 = vmatmul.mubr.msk.bf16.gmra.mrb[8].mxu0 %vm336_vm0, %v1176_v13 }
  0x29   : > { %1062 = vmatmul.mubr.msk.bf16.gmra.mrb[8].mxu1 %vm336_vm0, %v1177_v14  ;;  %1049 = vmatprep.mubr.msk.bf16.mxu0 %vm336_vm0, %v1178_v15 }
  0x2a   : > { %1065 = vmatprep.mubr.msk.bf16.mxu1 %vm336_vm0, %v1179_v16 }
  0x30   : > { %1050 = vmatmul.mubr.msk.bf16.gmra.mrb[12].mxu0 %vm336_vm0, %v1180_v17 }
  0x31   : > { %1066 = vmatmul.mubr.msk.bf16.gmra.mrb[12].mxu1 %vm336_vm0, %v1181_v18 }
  0xeb   : > { %v1039_v20 = vpop.f32.mrb[0].mxu0 }
  0xec   : > { %v1055_v21 = vpop.f32.mrb[0].mxu1  ;;  %v428_v22 = vadd.f32 %v1039_v20, %v1374_v19  ;;  %v419_v24 = vpop.f32.mrb[1].mxu0 }
  0xed   : > { %v492_v23 = vadd.f32 %v1055_v21, %v1374_v19  ;;  %v483_v25 = vpop.f32.mrb[1].mxu1  ;;  %v420_v26 = vadd.f32 %v1374_v19, %v419_v24  ;;  %v1040_v28 = vpop.f32.mrb[2].mxu0 }
  0xee   : > { %v484_v27 = vadd.f32 %v1374_v19, %v483_v25  ;;  %v1056_v29 = vpop.f32.mrb[2].mxu1  ;;  %v548_v30 = vmax.f32 %v428_v22, 0.0  ;;  %v431_v32 = vadd.f32 %v1040_v28, %v1374_v19  ;;  %v422_v34 = vpop.f32.mrb[3].mxu0 }
  0xef   : > { %v564_v31 = vmax.f32 %v492_v23, 0.0  ;;  %v495_v33 = vadd.f32 %v1056_v29, %v1374_v19  ;;  %v486_v35 = vpop.f32.mrb[3].mxu1  ;;  %v546_v36 = vmax.f32 %v420_v26, 0.0  ;;  %v423_v38 = vadd.f32 %v1374_v19, %v422_v34 }
  0xf0   : > { %v562_v37 = vmax.f32 %v484_v27, 0.0  ;;  %v487_v39 = vadd.f32 %v1374_v19, %v486_v35  ;;  %580 = vst [vmem:[%s1384_s10 + $0x10] sm:$0xff] %v548_v30  ;;  %v549_v40 = vmax.f32 %v431_v32, 0.0 }
  0xf1   : > { %596 = vst [vmem:[%s1384_s10 + $0x90] sm:$0xff] %v564_v31  ;;  %v565_v41 = vmax.f32 %v495_v33, 0.0  ;;  %578 = vst [vmem:[%s1384_s10] sm:$0xff] %v546_v36  ;;  %v547_v42 = vmax.f32 %v423_v38, 0.0 }
  0xf2   : > { %594 = vst [vmem:[%s1384_s10 + $0x80] sm:$0xff] %v562_v37  ;;  %v563_v43 = vmax.f32 %v487_v39, 0.0  ;;  %581 = vst [vmem:[%s1384_s10 + $0x18] sm:$0xff] %v549_v40 }
  0xf3   : > { %597 = vst [vmem:[%s1384_s10 + $0x98] sm:$0xff] %v565_v41  ;;  %579 = vst [vmem:[%s1384_s10 + $0x8] sm:$0xff] %v547_v42  ;;  %v1043_v44 = vpop.f32.mrb[4].mxu0 }
  0xf4   : > { %595 = vst [vmem:[%s1384_s10 + $0x88] sm:$0xff] %v563_v43  ;;  %v1059_v45 = vpop.f32.mrb[4].mxu1  ;;  %v444_v46 = vadd.f32 %v1043_v44, %v1374_v19  ;;  %v435_v48 = vpop.f32.mrb[5].mxu0 }
  0xf5   : > { %v508_v47 = vadd.f32 %v1059_v45, %v1374_v19  ;;  %v499_v49 = vpop.f32.mrb[5].mxu1  ;;  %v436_v50 = vadd.f32 %v1374_v19, %v435_v48  ;;  %v1044_v52 = vpop.f32.mrb[6].mxu0 }
  0xf6   : > { %v500_v51 = vadd.f32 %v1374_v19, %v499_v49  ;;  %v1060_v53 = vpop.f32.mrb[6].mxu1  ;;  %v552_v54 = vmax.f32 %v444_v46, 0.0  ;;  %v447_v56 = vadd.f32 %v1044_v52, %v1374_v19  ;;  %v438_v58 = vpop.f32.mrb[7].mxu0 }
  0xf7   : > { %v568_v55 = vmax.f32 %v508_v47, 0.0  ;;  %v511_v57 = vadd.f32 %v1060_v53, %v1374_v19  ;;  %v502_v59 = vpop.f32.mrb[7].mxu1  ;;  %v550_v60 = vmax.f32 %v436_v50, 0.0  ;;  %v439_v62 = vadd.f32 %v1374_v19, %v438_v58 }
  0xf8   : > { %v566_v61 = vmax.f32 %v500_v51, 0.0  ;;  %v503_v63 = vadd.f32 %v1374_v19, %v502_v59  ;;  %584 = vst [vmem:[%s1384_s10 + $0x30] sm:$0xff] %v552_v54  ;;  %v553_v0 = vmax.f32 %v447_v56, 0.0 }
  0xf9   : > { %600 = vst [vmem:[%s1384_s10 + $0xb0] sm:$0xff] %v568_v55  ;;  %v569_v1 = vmax.f32 %v511_v57, 0.0  ;;  %582 = vst [vmem:[%s1384_s10 + $0x20] sm:$0xff] %v550_v60  ;;  %v551_v2 = vmax.f32 %v439_v62, 0.0 }
  0xfa   : > { %598 = vst [vmem:[%s1384_s10 + $0xa0] sm:$0xff] %v566_v61  ;;  %v567_v3 = vmax.f32 %v503_v63, 0.0  ;;  %585 = vst [vmem:[%s1384_s10 + $0x38] sm:$0xff] %v553_v0 }
  0xfb   : > { %601 = vst [vmem:[%s1384_s10 + $0xb8] sm:$0xff] %v569_v1  ;;  %583 = vst [vmem:[%s1384_s10 + $0x28] sm:$0xff] %v551_v2  ;;  %v1047_v4 = vpop.f32.mrb[8].mxu0 }
  0xfc   : > { %599 = vst [vmem:[%s1384_s10 + $0xa8] sm:$0xff] %v567_v3  ;;  %v1063_v5 = vpop.f32.mrb[8].mxu1  ;;  %v460_v6 = vadd.f32 %v1047_v4, %v1374_v19  ;;  %v451_v8 = vpop.f32.mrb[9].mxu0 }
  0xfd   : > { %v524_v7 = vadd.f32 %v1063_v5, %v1374_v19  ;;  %v515_v9 = vpop.f32.mrb[9].mxu1  ;;  %v452_v10 = vadd.f32 %v1374_v19, %v451_v8  ;;  %v1048_v12 = vpop.f32.mrb[10].mxu0 }
  0xfe   : > { %v516_v11 = vadd.f32 %v1374_v19, %v515_v9  ;;  %v1064_v13 = vpop.f32.mrb[10].mxu1  ;;  %v556_v14 = vmax.f32 %v460_v6, 0.0  ;;  %v463_v16 = vadd.f32 %v1048_v12, %v1374_v19  ;;  %v454_v18 = vpop.f32.mrb[11].mxu0 }
  0xff   : > { %v572_v15 = vmax.f32 %v524_v7, 0.0  ;;  %v527_v17 = vadd.f32 %v1064_v13, %v1374_v19  ;;  %v518_v20 = vpop.f32.mrb[11].mxu1  ;;  %v554_v21 = vmax.f32 %v452_v10, 0.0  ;;  %v455_v23 = vadd.f32 %v1374_v19, %v454_v18 }
 0x100   : > { %v570_v22 = vmax.f32 %v516_v11, 0.0  ;;  %v519_v24 = vadd.f32 %v1374_v19, %v518_v20  ;;  %588 = vst [vmem:[%s1384_s10 + $0x50] sm:$0xff] %v556_v14  ;;  %v557_v25 = vmax.f32 %v463_v16, 0.0 }
 0x101   : > { %604 = vst [vmem:[%s1384_s10 + $0xd0] sm:$0xff] %v572_v15  ;;  %v573_v26 = vmax.f32 %v527_v17, 0.0  ;;  %586 = vst [vmem:[%s1384_s10 + $0x40] sm:$0xff] %v554_v21  ;;  %v555_v27 = vmax.f32 %v455_v23, 0.0 }
 0x102   : > { %602 = vst [vmem:[%s1384_s10 + $0xc0] sm:$0xff] %v570_v22  ;;  %v571_v28 = vmax.f32 %v519_v24, 0.0  ;;  %589 = vst [vmem:[%s1384_s10 + $0x58] sm:$0xff] %v557_v25 }
 0x103   : > { %605 = vst [vmem:[%s1384_s10 + $0xd8] sm:$0xff] %v573_v26  ;;  %587 = vst [vmem:[%s1384_s10 + $0x48] sm:$0xff] %v555_v27  ;;  %v1051_v29 = vpop.f32.mrb[12].mxu0 }
 0x104   : > { %603 = vst [vmem:[%s1384_s10 + $0xc8] sm:$0xff] %v571_v28  ;;  %v1067_v30 = vpop.f32.mrb[12].mxu1  ;;  %v476_v31 = vadd.f32 %v1051_v29, %v1374_v19  ;;  %v467_v33 = vpop.f32.mrb[13].mxu0 }
 0x105   : > { %v540_v32 = vadd.f32 %v1067_v30, %v1374_v19  ;;  %v531_v34 = vpop.f32.mrb[13].mxu1  ;;  %v468_v35 = vadd.f32 %v1374_v19, %v467_v33  ;;  %v1052_v37 = vpop.f32.mrb[14].mxu0 }
 0x106   : > { %v532_v36 = vadd.f32 %v1374_v19, %v531_v34  ;;  %v1068_v38 = vpop.f32.mrb[14].mxu1  ;;  %v560_v39 = vmax.f32 %v476_v31, 0.0  ;;  %v479_v41 = vadd.f32 %v1052_v37, %v1374_v19  ;;  %v470_v43 = vpop.f32.mrb[15].mxu0  ;;  %616 = sbr.rel (!%p1315_p4) target bundleno = 325 (0x145), region = 36 }
 0x107   : > { %v576_v40 = vmax.f32 %v540_v32, 0.0  ;;  %v543_v42 = vadd.f32 %v1068_v38, %v1374_v19  ;;  %v534_v44 = vpop.f32.mrb[15].mxu1  ;;  %v558_v45 = vmax.f32 %v468_v35, 0.0  ;;  %v471_v47 = vadd.f32 %v1374_v19, %v470_v43 }
 0x108   : > { %v574_v46 = vmax.f32 %v532_v36, 0.0  ;;  %v535_v48 = vadd.f32 %v1374_v19, %v534_v44  ;;  %592 = vst [vmem:[%s1384_s10 + $0x70] sm:$0xff] %v560_v39  ;;  %v561_v49 = vmax.f32 %v479_v41, 0.0 }
 0x109   : > { %608 = vst [vmem:[%s1384_s10 + $0xf0] sm:$0xff] %v576_v40  ;;  %v577_v50 = vmax.f32 %v543_v42, 0.0  ;;  %590 = vst [vmem:[%s1384_s10 + $0x60] sm:$0xff] %v558_v45  ;;  %v559_v51 = vmax.f32 %v471_v47, 0.0 }
 0x10a   : > { %606 = vst [vmem:[%s1384_s10 + $0xe0] sm:$0xff] %v574_v46  ;;  %v575_v52 = vmax.f32 %v535_v48, 0.0  ;;  %593 = vst [vmem:[%s1384_s10 + $0x78] sm:$0xff] %v561_v49 }
 0x10b   : > { %609 = vst [vmem:[%s1384_s10 + $0xf8] sm:$0xff] %v577_v50  ;;  %591 = vst [vmem:[%s1384_s10 + $0x68] sm:$0xff] %v559_v51 }
 0x10c   : > { %607 = vst [vmem:[%s1384_s10 + $0xe8] sm:$0xff] %v575_v52 }
 0x10d   : > { %s1595_s11 = smov (!%p619_p8, %s618_s11), 32 }
 0x10e   : > { %s994_s21 = sshll.u32 %s1595_s11, 7 }
 0x10f   : > { %p997_p9 = scmp.eq.s32.totalorder %s994_s21, 0 }
 0x110   : > { %s1455_s22 = sshrl.u32 (!%p997_p9), %s1595_s11, 5 }
 0x111   : > { %627 = sbr.rel (%p997_p9) target bundleno = 325 (0x145), region = 40  ;;  %p998_p10 = scmp.le.s32.totalorder (!%p997_p9), %s1455_s22, 0 }
 0x118   : > { %905 = sbr.rel (%p998_p10) target bundleno = 304 (0x130), region = 116  ;;  %s1586_s15 = smov (!%p998_p10), %s1449_s18 }
 0x119   : > { %s1587_s20 = smov (!%p998_p10), %s1384_s10  ;;  %s1464_s23 = smov (!%p998_p10), 0  }
 0x11a   : > { %s1466_s24 = smov (!%p998_p10), 0  }
 0x11f LB: >> { %v751_v19 = vld [vmem:[%s1244_s20] sm:$0xff]  ;;  %v753_v53 = vld [vmem:[%s1244_s20 + $0x8] sm:$0xff]  ;;  %v755_v54 = vld [vmem:[%s1244_s20 + $0x10] sm:$0xff]  ;;  %s815_s25 = sadd.s32 1, %s1248_s23  ;;  %s745_s24 = sadd.s32 1, %s1252_s24   ;;  %s1252_s24 = sphi %s1466_s24, %s745_s24   ;;  %s1248_s23 = sphi %s1464_s23, %s1590_s23   ;;  %s1244_s20 = sphi %s1587_s20, %s1589_s20   ;;  %s1240_s15 = sphi %s1586_s15, %s1588_s15  }
 0x120   : >> { %752 = vst [vmem:[%s1240_s15] sm:$0xff] %v751_v19  ;;  %754 = vst [vmem:[%s1240_s15 + $0x8] sm:$0xff] %v753_v53  ;;  %v757_v55 = vld [vmem:[%s1244_s20 + $0x18] sm:$0xff]  ;;  %v759_v56 = vld [vmem:[%s1244_s20 + $0x20] sm:$0xff]  ;;  %p816_p11 = scmp.ge.s32.totalorder %s815_s25, %s1455_s22  ;;  %p744_p12 = scmp.ge.s32.totalorder %s745_s24, %s1455_s22 }
 0x121   : >> { %756 = vst [vmem:[%s1240_s15 + $0x10] sm:$0xff] %v755_v54  ;;  %v761_v57 = vld [vmem:[%s1244_s20 + $0x28] sm:$0xff]  ;;  %758 = vst [vmem:[%s1240_s15 + $0x18] sm:$0xff] %v757_v55  ;;  %v763_v58 = vld [vmem:[%s1244_s20 + $0x30] sm:$0xff] }
 0x122   : >> { %760 = vst [vmem:[%s1240_s15 + $0x20] sm:$0xff] %v759_v56  ;;  %762 = vst [vmem:[%s1240_s15 + $0x28] sm:$0xff] %v761_v57  ;;  %v765_v59 = vld [vmem:[%s1244_s20 + $0x38] sm:$0xff]  ;;  %v767_v60 = vld [vmem:[%s1244_s20 + $0x40] sm:$0xff]  ;;  %s1597_s25 = smov (%p816_p11, %s815_s25), 0 }
 0x123   : >> { %764 = vst [vmem:[%s1240_s15 + $0x30] sm:$0xff] %v763_v58  ;;  %766 = vst [vmem:[%s1240_s15 + $0x38] sm:$0xff] %v765_v59  ;;  %v769_v61 = vld [vmem:[%s1244_s20 + $0x48] sm:$0xff]  ;;  %v771_v62 = vld [vmem:[%s1244_s20 + $0x50] sm:$0xff]  ;;  %s999_s26 = sshll.u32 %s1597_s25, 8  ;;  %s1590_s23 = smov %s1597_s25 }
 0x124   : >> { %768 = vst [vmem:[%s1240_s15 + $0x40] sm:$0xff] %v767_v60  ;;  %v773_v63 = vld [vmem:[%s1244_s20 + $0x58] sm:$0xff]  ;;  %770 = vst [vmem:[%s1240_s15 + $0x48] sm:$0xff] %v769_v61  ;;  %v775_v0 = vld [vmem:[%s1244_s20 + $0x60] sm:$0xff]  ;;  %s1522_s27 = scalar_lea.vmem %s1384_s10, %s999_s26 [#allocation2]   ;;  %s821_s28 = scalar_lea.vmem %s1449_s18, %s999_s26  }
 0x125   : >> { %772 = vst [vmem:[%s1240_s15 + $0x50] sm:$0xff] %v771_v62  ;;  %774 = vst [vmem:[%s1240_s15 + $0x58] sm:$0xff] %v773_v63  ;;  %v777_v1 = vld [vmem:[%s1244_s20 + $0x68] sm:$0xff]  ;;  %v779_v2 = vld [vmem:[%s1244_s20 + $0x70] sm:$0xff] }
 0x126   : >> { %776 = vst [vmem:[%s1240_s15 + $0x60] sm:$0xff] %v775_v0  ;;  %778 = vst [vmem:[%s1240_s15 + $0x68] sm:$0xff] %v777_v1  ;;  %v781_v3 = vld [vmem:[%s1244_s20 + $0x78] sm:$0xff]  ;;  %v783_v4 = vld [vmem:[%s1244_s20 + $0x80] sm:$0xff] }
 0x127   : >> { %780 = vst [vmem:[%s1240_s15 + $0x70] sm:$0xff] %v779_v2  ;;  %v785_v5 = vld [vmem:[%s1244_s20 + $0x88] sm:$0xff]  ;;  %782 = vst [vmem:[%s1240_s15 + $0x78] sm:$0xff] %v781_v3  ;;  %v787_v6 = vld [vmem:[%s1244_s20 + $0x90] sm:$0xff] }
 0x128   : >> { %784 = vst [vmem:[%s1240_s15 + $0x80] sm:$0xff] %v783_v4  ;;  %786 = vst [vmem:[%s1240_s15 + $0x88] sm:$0xff] %v785_v5  ;;  %v789_v7 = vld [vmem:[%s1244_s20 + $0x98] sm:$0xff]  ;;  %v791_v8 = vld [vmem:[%s1244_s20 + $0xa0] sm:$0xff] }
 0x129   : >> { %788 = vst [vmem:[%s1240_s15 + $0x90] sm:$0xff] %v787_v6  ;;  %790 = vst [vmem:[%s1240_s15 + $0x98] sm:$0xff] %v789_v7  ;;  %v793_v9 = vld [vmem:[%s1244_s20 + $0xa8] sm:$0xff]  ;;  %v795_v10 = vld [vmem:[%s1244_s20 + $0xb0] sm:$0xff]  ;;  %747 = sbr.rel (!%p744_p12) target bundleno = 287 (0x11f), region = 122 }
 0x12a   : >> { %792 = vst [vmem:[%s1240_s15 + $0xa0] sm:$0xff] %v791_v8  ;;  %v797_v11 = vld [vmem:[%s1244_s20 + $0xb8] sm:$0xff]  ;;  %794 = vst [vmem:[%s1240_s15 + $0xa8] sm:$0xff] %v793_v9  ;;  %v799_v12 = vld [vmem:[%s1244_s20 + $0xc0] sm:$0xff] }
 0x12b   : >> { %796 = vst [vmem:[%s1240_s15 + $0xb0] sm:$0xff] %v795_v10  ;;  %798 = vst [vmem:[%s1240_s15 + $0xb8] sm:$0xff] %v797_v11  ;;  %v801_v13 = vld [vmem:[%s1244_s20 + $0xc8] sm:$0xff]  ;;  %v803_v14 = vld [vmem:[%s1244_s20 + $0xd0] sm:$0xff] }
 0x12c   : >> { %800 = vst [vmem:[%s1240_s15 + $0xc0] sm:$0xff] %v799_v12  ;;  %802 = vst [vmem:[%s1240_s15 + $0xc8] sm:$0xff] %v801_v13  ;;  %v805_v15 = vld [vmem:[%s1244_s20 + $0xd8] sm:$0xff]  ;;  %v807_v16 = vld [vmem:[%s1244_s20 + $0xe0] sm:$0xff] }
 0x12d   : >> { %804 = vst [vmem:[%s1240_s15 + $0xd0] sm:$0xff] %v803_v14  ;;  %v809_v17 = vld [vmem:[%s1244_s20 + $0xe8] sm:$0xff]  ;;  %806 = vst [vmem:[%s1240_s15 + $0xd8] sm:$0xff] %v805_v15  ;;  %v811_v18 = vld [vmem:[%s1244_s20 + $0xf0] sm:$0xff] }
 0x12e   : >> { %808 = vst [vmem:[%s1240_s15 + $0xe0] sm:$0xff] %v807_v16  ;;  %810 = vst [vmem:[%s1240_s15 + $0xe8] sm:$0xff] %v809_v17  ;;  %v813_v20 = vld [vmem:[%s1244_s20 + $0xf8] sm:$0xff]  ;;  %s1589_s20 = smov %s1522_s27 }
 0x12f   : >> { %812 = vst [vmem:[%s1240_s15 + $0xf0] sm:$0xff] %v811_v18  ;;  %814 = vst [vmem:[%s1240_s15 + $0xf8] sm:$0xff] %v813_v20  ;;  %s1588_s15 = smov %s821_s28 }
 0x130 PF: > { %s1563_s29 = sand.u32 31, %s1595_s11   ;;  %s1010_s30 = sshll.u32 %s1455_s22, 8 }
 0x131   : > { %s826_s4 = scalar_lea.vmem %s1384_s10, %s1010_s30 [#allocation2]   ;;  %s828_s5 = scalar_lea.vmem %s1449_s18, %s1010_s30  }
 0x132   : > { %p1004_p13 = scmp.le.s32.totalorder %s1563_s29, 0 }
 0x133   : > { %s1254_s6 = smov (!%p1004_p13), %s828_s5   ;;  %s1258_s7 = smov (!%p1004_p13), %s826_s4  }
 0x134   : > { %919 = sbr.rel (%p1004_p13) target bundleno = 325 (0x145), region = 127  ;;  %s1262_s8 = smov (!%p1004_p13), 0  }
 0x135   : > { %s1266_s9 = smov (!%p1004_p13), 0  }
 0x13b LB: >> { %v838_v21 = vld [vmem:[%s1260_s7] sm:$0xff]  ;;  %s840_s11 = sadd.s32 1, %s1264_s8  ;;  %s832_s9 = sadd.s32 1, %s1268_s9   ;;  %s1268_s9 = sphi %s1266_s9, %s832_s9   ;;  %s1264_s8 = sphi %s1262_s8, %s1263_s8   ;;  %s1260_s7 = sphi %s1258_s7, %s845_s7   ;;  %s1256_s6 = sphi %s1254_s6, %s846_s6  }
 0x13c   : >> { %839 = vst [vmem:[%s1256_s6] sm:$0xff] %v838_v21  ;;  %p841_p0 = scmp.ge.s32.totalorder %s840_s11, %s1563_s29  ;;  %p831_p1 = scmp.ge.s32.totalorder %s832_s9, %s1563_s29 }
 0x13e   : >> { %s1599_s11 = smov (%p841_p0, %s840_s11), 0  ;;  %834 = sbr.rel (!%p831_p1) target bundleno = 315 (0x13b), region = 133 }
 0x13f   : >> { %s1005_s10 = sshll.u32 %s1599_s11, 3  ;;  %s1263_s8 = smov %s1599_s11  }
 0x140   : >> { %s845_s7 = scalar_lea.vmem %s826_s4, %s1005_s10 [#allocation2]   ;;  %s846_s6 = scalar_lea.vmem %s828_s5, %s1005_s10  }
 0x145 PF: > { %p10_p2 = scmp.ge.s32.totalorder %s1305_s16, 5   ;;  %s1591_s12 = smov %s1232_s13 }
 0x146   : > { %s1592_s13 = smov %s1313_s19  ;;  %s1593_s14 = smov %s1305_s16 }
 0x147   :  { %12 = sbr.rel (!%p10_p2) target bundleno = 2 (0x2), region = 144 }

// kernel: pdn_s_forward.7
= control target key start
LH: loop header
LB: loop body
LE: loop exit
PB: predicated region body
PF: predicated region fallthrough
CT: control target
= control target key end

     0   :  { %s506_s6 = smov 0   ;;  %s508_s7 = smov 0   ;;  %s647_s0 = inlined_call_operand.vmem [shape: f32[2,10,2,10,256], index: 0, kind: input, shape index: {}]   ;;  %s648_s1 = inlined_call_operand.vmem [shape: f32[2,10,10,128], index: 1, kind: output, shape index: {}]  }
   0x1   :  { %s510_s8 = smov 0  }
   0x2 LB: > { %s23_s9 = sadd.s32 1, %s490_s7  ;;  %p441_p0 = scmp.ge.s32.totalorder %s494_s8, 1  ;;  %s494_s8 = sphi %s510_s8, %s11_s8   ;;  %s490_s7 = sphi %s508_s7, %s650_s7   ;;  %s486_s6 = sphi %s506_s6, %s649_s6  }
   0x3   : > { %p25_p1 = scmp.ge.s32.totalorder %s23_s9, 2  ;;  %p109_p2 = scmp.lt.s32.totalorder %s494_s8, 3 }
   0x5   : > { %s652_s9 = smov (%p25_p1, %s23_s9), 0  ;;  %p110_p3 = pnand %p441_p0, %p109_p2 }
   0x6   : > { %p140_p4 = scmp.lt.s32.totalorder (!%p110_p3), %s486_s6, 1 }
   0x7   : > { %113 = sbr.rel (%p110_p3) target bundleno = 55 (0x37), region = 24 }
   0xe   : > { %s654_s6 = smov (!%p140_p4, %s486_s6), 1 }
   0xf   : > { %s446_s10 = smul.u32 640, %s654_s6 }
  0x10   : > { %s447_s14 = smul.u32 160, %s654_s6 }
  0x11   : > { %s530_s13 = scalar_lea.vmem %s647_s0, %s446_s10 }
  0x12   : > { %v161_v0 = vld [vmem:[%s530_s13] sm:$0xff]  ;;  %v162_v1 = vld [vmem:[%s530_s13 + $0x8] sm:$0xff]  ;;  %v163_v5 = vld [vmem:[%s530_s13 + $0x10] sm:$0x3]  ;;  %s554_s17 = scalar_lea.vmem %s648_s1, %s447_s14 }
  0x13   : > { %v165_v2 = vld [vmem:[%s530_s13 + $0x20] sm:$0xff]  ;;  %v166_v3 = vld [vmem:[%s530_s13 + $0x28] sm:$0xff]  ;;  %v241_v4 = vadd.f32 %v162_v1, %v161_v0  ;;  %v164_v6 = vld [vmem:[%s530_s13 + $0x18] sm:$0x3] }
  0x14   : > { %v167_v7 = vld [vmem:[%s530_s13 + $0x30] sm:$0x3]  ;;  %v168_v8 = vld [vmem:[%s530_s13 + $0x38] sm:$0x3]  ;;  %v242_v9 = vadd.f32 %v164_v6, %v163_v5  ;;  %v169_v10 = vld [vmem:[%s530_s13 + $0x40] sm:$0xff] }
  0x15   : > { %v261_v11 = vadd.f32 %v241_v4, %v165_v2  ;;  %v170_v12 = vld [vmem:[%s530_s13 + $0x48] sm:$0xff]  ;;  %v173_v13 = vld [vmem:[%s530_s13 + $0x60] sm:$0xff]  ;;  %v171_v17 = vld [vmem:[%s530_s13 + $0x50] sm:$0x3] }
  0x16   : > { %v174_v14 = vld [vmem:[%s530_s13 + $0x68] sm:$0xff]  ;;  %v262_v15 = vadd.f32 %v242_v9, %v167_v7  ;;  %v243_v16 = vadd.f32 %v170_v12, %v169_v10  ;;  %v172_v18 = vld [vmem:[%s530_s13 + $0x58] sm:$0x3]  ;;  %v175_v19 = vld [vmem:[%s530_s13 + $0x70] sm:$0x3] }
  0x17   : > { %v281_v20 = vadd.f32 %v261_v11, %v166_v3  ;;  %v176_v21 = vld [vmem:[%s530_s13 + $0x78] sm:$0x3]  ;;  %v244_v22 = vadd.f32 %v172_v18, %v171_v17  ;;  %v177_v23 = vld [vmem:[%s530_s13 + $0x80] sm:$0xff]  ;;  %v178_v24 = vld [vmem:[%s530_s13 + $0x88] sm:$0xff] }
  0x18   : > { %v282_v25 = vadd.f32 %v262_v15, %v168_v8  ;;  %v263_v26 = vadd.f32 %v243_v16, %v173_v13  ;;  %v181_v27 = vld [vmem:[%s530_s13 + $0xa0] sm:$0xff]  ;;  %v182_v28 = vld [vmem:[%s530_s13 + $0xa8] sm:$0xff]  ;;  %v245_v29 = vadd.f32 %v178_v24, %v177_v23  ;;  %v179_v30 = vld [vmem:[%s530_s13 + $0x90] sm:$0x3] }
  0x19   : > { %v301_v31 = vmul.f32 0.25, %v281_v20  ;;  %v264_v32 = vadd.f32 %v244_v22, %v175_v19  ;;  %v180_v33 = vld [vmem:[%s530_s13 + $0x98] sm:$0x3]  ;;  %v183_v34 = vld [vmem:[%s530_s13 + $0xb0] sm:$0x3]  ;;  %v185_v35 = vld [vmem:[%s530_s13 + $0xc0] sm:$0xff] }
  0x1a   : > { %v302_v36 = vmul.f32 0.25, %v282_v25  ;;  %v283_v37 = vadd.f32 %v263_v26, %v174_v14  ;;  %v265_v38 = vadd.f32 %v245_v29, %v181_v27  ;;  %v184_v39 = vld [vmem:[%s530_s13 + $0xb8] sm:$0x3]  ;;  %v246_v40 = vadd.f32 %v180_v33, %v179_v30  ;;  %v186_v41 = vld [vmem:[%s530_s13 + $0xc8] sm:$0xff]  ;;  %v189_v42 = vld [vmem:[%s530_s13 + $0xe0] sm:$0xff] }
  0x1b   : > { %321 = vst [vmem:[%s554_s17] sm:$0xff] %v301_v31  ;;  %v284_v43 = vadd.f32 %v264_v32, %v176_v21  ;;  %v190_v44 = vld [vmem:[%s530_s13 + $0xe8] sm:$0xff]  ;;  %v247_v45 = vadd.f32 %v186_v41, %v185_v35  ;;  %v187_v46 = vld [vmem:[%s530_s13 + $0xd0] sm:$0x3]  ;;  %v188_v47 = vld [vmem:[%s530_s13 + $0xd8] sm:$0x3] }
  0x1c   : > { %322 = vst [vmem:[%s554_s17 + $0x8] sm:$0x3] %v302_v36  ;;  %v303_v48 = vmul.f32 0.25, %v283_v37  ;;  %v285_v49 = vadd.f32 %v265_v38, %v182_v28  ;;  %v266_v50 = vadd.f32 %v246_v40, %v183_v34  ;;  %v191_v51 = vld [vmem:[%s530_s13 + $0xf0] sm:$0x3]  ;;  %v248_v53 = vadd.f32 %v188_v47, %v187_v46  ;;  %v193_v54 = vld [vmem:[%s530_s13 + $0x100] sm:$0xff] }
  0x1d   : > { %v192_v52 = vld [vmem:[%s530_s13 + $0xf8] sm:$0x3]  ;;  %v304_v55 = vmul.f32 0.25, %v284_v43  ;;  %v267_v56 = vadd.f32 %v247_v45, %v189_v42  ;;  %v194_v57 = vld [vmem:[%s530_s13 + $0x108] sm:$0xff]  ;;  %v197_v58 = vld [vmem:[%s530_s13 + $0x120] sm:$0xff] }
  0x1e   : > { %v198_v59 = vld [vmem:[%s530_s13 + $0x128] sm:$0xff]  ;;  %323 = vst [vmem:[%s554_s17 + $0x10] sm:$0xff] %v303_v48  ;;  %v305_v60 = vmul.f32 0.25, %v285_v49  ;;  %v286_v61 = vadd.f32 %v266_v50, %v184_v39  ;;  %v268_v62 = vadd.f32 %v248_v53, %v191_v51  ;;  %v249_v63 = vadd.f32 %v194_v57, %v193_v54  ;;  %v195_v0 = vld [vmem:[%s530_s13 + $0x110] sm:$0x3]  ;;  %v201_v2 = vld [vmem:[%s530_s13 + $0x140] sm:$0xff] }
  0x1f   : > { %v196_v1 = vld [vmem:[%s530_s13 + $0x118] sm:$0x3]  ;;  %324 = vst [vmem:[%s554_s17 + $0x18] sm:$0x3] %v304_v55  ;;  %v287_v3 = vadd.f32 %v267_v56, %v190_v44  ;;  %v199_v4 = vld [vmem:[%s530_s13 + $0x130] sm:$0x3] }
  0x20   : > { %v200_v5 = vld [vmem:[%s530_s13 + $0x138] sm:$0x3]  ;;  %v250_v6 = vadd.f32 %v196_v1, %v195_v0  ;;  %v202_v7 = vld [vmem:[%s530_s13 + $0x148] sm:$0xff]  ;;  %325 = vst [vmem:[%s554_s17 + $0x20] sm:$0xff] %v305_v60  ;;  %v306_v8 = vmul.f32 0.25, %v286_v61  ;;  %v288_v9 = vadd.f32 %v268_v62, %v192_v52  ;;  %v269_v10 = vadd.f32 %v249_v63, %v197_v58  ;;  %v205_v11 = vld [vmem:[%s530_s13 + $0x160] sm:$0xff] }
  0x21   : > { %v206_v12 = vld [vmem:[%s530_s13 + $0x168] sm:$0xff]  ;;  %v251_v13 = vadd.f32 %v202_v7, %v201_v2  ;;  %v203_v14 = vld [vmem:[%s530_s13 + $0x150] sm:$0x3]  ;;  %v307_v15 = vmul.f32 0.25, %v287_v3  ;;  %v204_v17 = vld [vmem:[%s530_s13 + $0x158] sm:$0x3] }
  0x22   : > { %v270_v16 = vadd.f32 %v250_v6, %v199_v4  ;;  %v207_v18 = vld [vmem:[%s530_s13 + $0x170] sm:$0x3]  ;;  %v209_v19 = vld [vmem:[%s530_s13 + $0x180] sm:$0xff]  ;;  %326 = vst [vmem:[%s554_s17 + $0x28] sm:$0x3] %v306_v8  ;;  %v308_v20 = vmul.f32 0.25, %v288_v9  ;;  %v289_v21 = vadd.f32 %v269_v10, %v198_v59  ;;  %v252_v24 = vadd.f32 %v204_v17, %v203_v14 }
  0x23   : > { %v271_v22 = vadd.f32 %v251_v13, %v205_v11  ;;  %v208_v23 = vld [vmem:[%s530_s13 + $0x178] sm:$0x3]  ;;  %v210_v25 = vld [vmem:[%s530_s13 + $0x188] sm:$0xff]  ;;  %v213_v26 = vld [vmem:[%s530_s13 + $0x1a0] sm:$0xff]  ;;  %327 = vst [vmem:[%s554_s17 + $0x30] sm:$0xff] %v307_v15 }
  0x24   : > { %v290_v27 = vadd.f32 %v270_v16, %v200_v5  ;;  %v214_v28 = vld [vmem:[%s530_s13 + $0x1a8] sm:$0xff]  ;;  %v253_v29 = vadd.f32 %v210_v25, %v209_v19  ;;  %v211_v30 = vld [vmem:[%s530_s13 + $0x190] sm:$0x3]  ;;  %v212_v31 = vld [vmem:[%s530_s13 + $0x198] sm:$0x3]  ;;  %v309_v32 = vmul.f32 0.25, %v289_v21  ;;  %v272_v34 = vadd.f32 %v252_v24, %v207_v18 }
  0x25   : > { %328 = vst [vmem:[%s554_s17 + $0x38] sm:$0x3] %v308_v20  ;;  %v291_v33 = vadd.f32 %v271_v22, %v206_v12  ;;  %v215_v35 = vld [vmem:[%s530_s13 + $0x1b0] sm:$0x3]  ;;  %v216_v36 = vld [vmem:[%s530_s13 + $0x1b8] sm:$0x3]  ;;  %v254_v37 = vadd.f32 %v212_v31, %v211_v30 }
  0x26   : > { %v217_v38 = vld [vmem:[%s530_s13 + $0x1c0] sm:$0xff]  ;;  %v310_v39 = vmul.f32 0.25, %v290_v27  ;;  %v273_v40 = vadd.f32 %v253_v29, %v213_v26  ;;  %v218_v41 = vld [vmem:[%s530_s13 + $0x1c8] sm:$0xff]  ;;  %329 = vst [vmem:[%s554_s17 + $0x40] sm:$0xff] %v309_v32  ;;  %v292_v45 = vadd.f32 %v272_v34, %v208_v23  ;;  %v219_v48 = vld [vmem:[%s530_s13 + $0x1d0] sm:$0x3] }
  0x27   : > { %v221_v42 = vld [vmem:[%s530_s13 + $0x1e0] sm:$0xff]  ;;  %v222_v43 = vld [vmem:[%s530_s13 + $0x1e8] sm:$0xff]  ;;  %v311_v44 = vmul.f32 0.25, %v291_v33  ;;  %v274_v46 = vadd.f32 %v254_v37, %v215_v35  ;;  %v255_v47 = vadd.f32 %v218_v41, %v217_v38  ;;  %v220_v49 = vld [vmem:[%s530_s13 + $0x1d8] sm:$0x3] }
  0x28   : > { %v225_v50 = vld [vmem:[%s530_s13 + $0x200] sm:$0xff]  ;;  %330 = vst [vmem:[%s554_s17 + $0x48] sm:$0x3] %v310_v39  ;;  %v293_v51 = vadd.f32 %v273_v40, %v214_v28  ;;  %v223_v52 = vld [vmem:[%s530_s13 + $0x1f0] sm:$0x3]  ;;  %v256_v54 = vadd.f32 %v220_v49, %v219_v48  ;;  %v226_v55 = vld [vmem:[%s530_s13 + $0x208] sm:$0xff] }
  0x29   : > { %v224_v53 = vld [vmem:[%s530_s13 + $0x1f8] sm:$0x3]  ;;  %331 = vst [vmem:[%s554_s17 + $0x50] sm:$0xff] %v311_v44  ;;  %v312_v56 = vmul.f32 0.25, %v292_v45  ;;  %v294_v57 = vadd.f32 %v274_v46, %v216_v36  ;;  %v275_v58 = vadd.f32 %v255_v47, %v221_v42  ;;  %v229_v59 = vld [vmem:[%s530_s13 + $0x220] sm:$0xff]  ;;  %v230_v60 = vld [vmem:[%s530_s13 + $0x228] sm:$0xff]  ;;  %v257_v61 = vadd.f32 %v226_v55, %v225_v50 }
  0x2a   : > { %v227_v62 = vld [vmem:[%s530_s13 + $0x210] sm:$0x3]  ;;  %v313_v63 = vmul.f32 0.25, %v293_v51  ;;  %v276_v0 = vadd.f32 %v256_v54, %v223_v52  ;;  %v228_v1 = vld [vmem:[%s530_s13 + $0x218] sm:$0x3]  ;;  %v233_v3 = vld [vmem:[%s530_s13 + $0x240] sm:$0xff] }
  0x2b   : > { %v231_v2 = vld [vmem:[%s530_s13 + $0x230] sm:$0x3]  ;;  %332 = vst [vmem:[%s554_s17 + $0x58] sm:$0x3] %v312_v56  ;;  %v314_v4 = vmul.f32 0.25, %v294_v57  ;;  %v295_v5 = vadd.f32 %v275_v58, %v222_v43  ;;  %v277_v6 = vadd.f32 %v257_v61, %v229_v59  ;;  %v258_v7 = vadd.f32 %v228_v1, %v227_v62  ;;  %v234_v8 = vld [vmem:[%s530_s13 + $0x248] sm:$0xff] }
  0x2c   : > { %v237_v9 = vld [vmem:[%s530_s13 + $0x260] sm:$0xff]  ;;  %333 = vst [vmem:[%s554_s17 + $0x60] sm:$0xff] %v313_v63  ;;  %v296_v10 = vadd.f32 %v276_v0, %v224_v53  ;;  %v232_v11 = vld [vmem:[%s530_s13 + $0x238] sm:$0x3]  ;;  %v259_v12 = vadd.f32 %v234_v8, %v233_v3  ;;  %v235_v13 = vld [vmem:[%s530_s13 + $0x250] sm:$0x3] }
  0x2d   : > { %v236_v14 = vld [vmem:[%s530_s13 + $0x258] sm:$0x3]  ;;  %334 = vst [vmem:[%s554_s17 + $0x68] sm:$0x3] %v314_v4  ;;  %v315_v15 = vmul.f32 0.25, %v295_v5  ;;  %v297_v16 = vadd.f32 %v277_v6, %v230_v60  ;;  %v278_v17 = vadd.f32 %v258_v7, %v231_v2  ;;  %v238_v18 = vld [vmem:[%s530_s13 + $0x268] sm:$0xff] }
  0x2e   : > { %v239_v19 = vld [vmem:[%s530_s13 + $0x270] sm:$0x3]  ;;  %v260_v20 = vadd.f32 %v236_v14, %v235_v13  ;;  %v316_v21 = vmul.f32 0.25, %v296_v10  ;;  %v279_v22 = vadd.f32 %v259_v12, %v237_v9  ;;  %v240_v23 = vld [vmem:[%s530_s13 + $0x278] sm:$0x3] }
  0x2f   : > { %335 = vst [vmem:[%s554_s17 + $0x70] sm:$0xff] %v315_v15  ;;  %v317_v24 = vmul.f32 0.25, %v297_v16  ;;  %v298_v25 = vadd.f32 %v278_v17, %v232_v11 }
  0x30   : > { %v280_v26 = vadd.f32 %v260_v20, %v239_v19  ;;  %336 = vst [vmem:[%s554_s17 + $0x78] sm:$0x3] %v316_v21  ;;  %v299_v27 = vadd.f32 %v279_v22, %v238_v18 }
  0x31   : > { %337 = vst [vmem:[%s554_s17 + $0x80] sm:$0xff] %v317_v24  ;;  %v318_v28 = vmul.f32 0.25, %v298_v25 }
  0x32   : > { %v300_v29 = vadd.f32 %v280_v26, %v240_v23  ;;  %v319_v30 = vmul.f32 0.25, %v299_v27 }
  0x33   : > { %338 = vst [vmem:[%s554_s17 + $0x88] sm:$0x3] %v318_v28 }
  0x34   : > { %v320_v31 = vmul.f32 0.25, %v300_v29  ;;  %339 = vst [vmem:[%s554_s17 + $0x90] sm:$0xff] %v319_v30 }
  0x36   : > { %340 = vst [vmem:[%s554_s17 + $0x98] sm:$0x3] %v320_v31 }
  0x37 PF: > { %s11_s8 = sadd.s32 1, %s494_s8   ;;  %s649_s6 = smov %s490_s7 }
  0x38   : > { %p8_p5 = scmp.ge.s32.totalorder %s11_s8, 4   ;;  %s650_s7 = smov %s652_s9 }
  0x3a   :  { %10 = sbr.rel (!%p8_p5) target bundleno = 2 (0x2), region = 54 }

// kernel: pdn_s_forward.9
= control target key start
LH: loop header
LB: loop body
LE: loop exit
PB: predicated region body
PF: predicated region fallthrough
CT: control target
= control target key end

     0   :  { %s452_s6 = smov 0   ;;  %s454_s7 = smov 0   ;;  %s563_s0 = inlined_call_operand.vmem [shape: f32[2,7,2,7,512], index: 0, kind: input, shape index: {}]   ;;  %s564_s1 = inlined_call_operand.vmem [shape: f32[2,7,7,256], index: 1, kind: output, shape index: {}]  }
   0x1   :  { %s456_s8 = smov 0  }
   0x2 LB: > { %s23_s9 = sadd.s32 1, %s436_s7  ;;  %p387_p0 = scmp.ge.s32.totalorder %s440_s8, 1  ;;  %s440_s8 = sphi %s456_s8, %s11_s8   ;;  %s436_s7 = sphi %s454_s7, %s566_s7   ;;  %s432_s6 = sphi %s452_s6, %s565_s6  }
   0x3   : > { %p25_p1 = scmp.ge.s32.totalorder %s23_s9, 2  ;;  %p109_p2 = scmp.lt.s32.totalorder %s440_s8, 3 }
   0x5   : > { %s568_s9 = smov (%p25_p1, %s23_s9), 0  ;;  %p110_p3 = pnand %p387_p0, %p109_p2 }
   0x6   : > { %p140_p4 = scmp.lt.s32.totalorder (!%p110_p3), %s432_s6, 1 }
   0x7   : > { %113 = sbr.rel (%p110_p3) target bundleno = 50 (0x32), region = 24 }
   0xe   : > { %s570_s6 = smov (!%p140_p4, %s432_s6), 1 }
   0xf   : > { %s392_s10 = smul.u32 448, %s570_s6 }
  0x10   : > { %s393_s14 = smul.u32 112, %s570_s6 }
  0x11   : > { %s476_s13 = scalar_lea.vmem %s563_s0, %s392_s10 }
  0x12   : > { %v161_v0 = vld [vmem:[%s476_s13] sm:$0x7f]  ;;  %v163_v1 = vld [vmem:[%s476_s13 + $0x10] sm:$0x7f]  ;;  %v162_v5 = vld [vmem:[%s476_s13 + $0x8] sm:$0x7f]  ;;  %s500_s17 = scalar_lea.vmem %s564_s1, %s393_s14 }
  0x13   : > { %v165_v2 = vld [vmem:[%s476_s13 + $0x20] sm:$0x7f]  ;;  %v167_v3 = vld [vmem:[%s476_s13 + $0x30] sm:$0x7f]  ;;  %v217_v4 = vadd.f32 %v163_v1, %v161_v0  ;;  %v164_v6 = vld [vmem:[%s476_s13 + $0x18] sm:$0x7f] }
  0x14   : > { %v166_v7 = vld [vmem:[%s476_s13 + $0x28] sm:$0x7f]  ;;  %v168_v8 = vld [vmem:[%s476_s13 + $0x38] sm:$0x7f]  ;;  %v218_v9 = vadd.f32 %v164_v6, %v162_v5  ;;  %v169_v10 = vld [vmem:[%s476_s13 + $0x40] sm:$0x7f] }
  0x15   : > { %v231_v11 = vadd.f32 %v217_v4, %v165_v2  ;;  %v171_v12 = vld [vmem:[%s476_s13 + $0x50] sm:$0x7f]  ;;  %v173_v13 = vld [vmem:[%s476_s13 + $0x60] sm:$0x7f]  ;;  %v170_v17 = vld [vmem:[%s476_s13 + $0x48] sm:$0x7f] }
  0x16   : > { %v175_v14 = vld [vmem:[%s476_s13 + $0x70] sm:$0x7f]  ;;  %v232_v15 = vadd.f32 %v218_v9, %v166_v7  ;;  %v219_v16 = vadd.f32 %v171_v12, %v169_v10  ;;  %v172_v18 = vld [vmem:[%s476_s13 + $0x58] sm:$0x7f]  ;;  %v174_v19 = vld [vmem:[%s476_s13 + $0x68] sm:$0x7f] }
  0x17   : > { %v245_v20 = vadd.f32 %v231_v11, %v167_v3  ;;  %v176_v21 = vld [vmem:[%s476_s13 + $0x78] sm:$0x7f]  ;;  %v220_v22 = vadd.f32 %v172_v18, %v170_v17  ;;  %v177_v23 = vld [vmem:[%s476_s13 + $0x80] sm:$0x7f]  ;;  %v179_v24 = vld [vmem:[%s476_s13 + $0x90] sm:$0x7f] }
  0x18   : > { %v246_v25 = vadd.f32 %v232_v15, %v168_v8  ;;  %v233_v26 = vadd.f32 %v219_v16, %v173_v13  ;;  %v181_v27 = vld [vmem:[%s476_s13 + $0xa0] sm:$0x7f]  ;;  %v183_v28 = vld [vmem:[%s476_s13 + $0xb0] sm:$0x7f]  ;;  %v221_v29 = vadd.f32 %v179_v24, %v177_v23  ;;  %v178_v30 = vld [vmem:[%s476_s13 + $0x88] sm:$0x7f] }
  0x19   : > { %v259_v31 = vmul.f32 0.25, %v245_v20  ;;  %v234_v32 = vadd.f32 %v220_v22, %v174_v19  ;;  %v180_v33 = vld [vmem:[%s476_s13 + $0x98] sm:$0x7f]  ;;  %v182_v34 = vld [vmem:[%s476_s13 + $0xa8] sm:$0x7f] }
  0x1a   : > { %v260_v35 = vmul.f32 0.25, %v246_v25  ;;  %v247_v36 = vadd.f32 %v233_v26, %v175_v14  ;;  %v235_v37 = vadd.f32 %v221_v29, %v181_v27  ;;  %v184_v38 = vld [vmem:[%s476_s13 + $0xb8] sm:$0x7f]  ;;  %v222_v39 = vadd.f32 %v180_v33, %v178_v30  ;;  %v185_v40 = vld [vmem:[%s476_s13 + $0xc0] sm:$0x7f] }
  0x1b   : > { %273 = vst [vmem:[%s500_s17] sm:$0x7f] %v259_v31  ;;  %v248_v41 = vadd.f32 %v234_v32, %v176_v21  ;;  %v187_v42 = vld [vmem:[%s476_s13 + $0xd0] sm:$0x7f]  ;;  %v189_v43 = vld [vmem:[%s476_s13 + $0xe0] sm:$0x7f] }
  0x1c   : > { %v191_v44 = vld [vmem:[%s476_s13 + $0xf0] sm:$0x7f]  ;;  %274 = vst [vmem:[%s500_s17 + $0x8] sm:$0x7f] %v260_v35  ;;  %v261_v45 = vmul.f32 0.25, %v247_v36  ;;  %v249_v46 = vadd.f32 %v235_v37, %v183_v28  ;;  %v236_v47 = vadd.f32 %v222_v39, %v182_v34  ;;  %v223_v48 = vadd.f32 %v187_v42, %v185_v40 }
  0x1d   : > { %v186_v49 = vld [vmem:[%s476_s13 + $0xc8] sm:$0x7f]  ;;  %v188_v50 = vld [vmem:[%s476_s13 + $0xd8] sm:$0x7f]  ;;  %v262_v51 = vmul.f32 0.25, %v248_v41 }
  0x1e   : > { %v190_v52 = vld [vmem:[%s476_s13 + $0xe8] sm:$0x7f]  ;;  %v192_v53 = vld [vmem:[%s476_s13 + $0xf8] sm:$0x7f]  ;;  %v224_v54 = vadd.f32 %v188_v50, %v186_v49  ;;  %275 = vst [vmem:[%s500_s17 + $0x10] sm:$0x7f] %v261_v45  ;;  %v250_v56 = vadd.f32 %v236_v47, %v184_v38  ;;  %v237_v57 = vadd.f32 %v223_v48, %v189_v43 }
  0x1f   : > { %v263_v55 = vmul.f32 0.25, %v249_v46  ;;  %v193_v58 = vld [vmem:[%s476_s13 + $0x100] sm:$0x7f]  ;;  %v195_v59 = vld [vmem:[%s476_s13 + $0x110] sm:$0x7f] }
  0x20   : > { %276 = vst [vmem:[%s500_s17 + $0x18] sm:$0x7f] %v262_v51  ;;  %v238_v60 = vadd.f32 %v224_v54, %v190_v52  ;;  %v197_v61 = vld [vmem:[%s476_s13 + $0x120] sm:$0x7f]  ;;  %v199_v62 = vld [vmem:[%s476_s13 + $0x130] sm:$0x7f]  ;;  %v225_v63 = vadd.f32 %v195_v59, %v193_v58  ;;  %v251_v2 = vadd.f32 %v237_v57, %v191_v44 }
  0x21   : > { %v194_v0 = vld [vmem:[%s476_s13 + $0x108] sm:$0x7f]  ;;  %277 = vst [vmem:[%s500_s17 + $0x20] sm:$0x7f] %v263_v55  ;;  %v264_v1 = vmul.f32 0.25, %v250_v56 }
  0x22   : > { %v196_v3 = vld [vmem:[%s476_s13 + $0x118] sm:$0x7f]  ;;  %v198_v4 = vld [vmem:[%s476_s13 + $0x128] sm:$0x7f]  ;;  %v252_v5 = vadd.f32 %v238_v60, %v192_v53  ;;  %v239_v6 = vadd.f32 %v225_v63, %v197_v61  ;;  %v201_v9 = vld [vmem:[%s476_s13 + $0x140] sm:$0x7f] }
  0x23   : > { %v200_v7 = vld [vmem:[%s476_s13 + $0x138] sm:$0x7f]  ;;  %v226_v8 = vadd.f32 %v196_v3, %v194_v0  ;;  %v203_v10 = vld [vmem:[%s476_s13 + $0x150] sm:$0x7f]  ;;  %278 = vst [vmem:[%s500_s17 + $0x28] sm:$0x7f] %v264_v1 }
  0x24   : > { %v265_v11 = vmul.f32 0.25, %v251_v2  ;;  %v205_v12 = vld [vmem:[%s476_s13 + $0x160] sm:$0x7f]  ;;  %v207_v13 = vld [vmem:[%s476_s13 + $0x170] sm:$0x7f]  ;;  %v227_v14 = vadd.f32 %v203_v10, %v201_v9  ;;  %v266_v15 = vmul.f32 0.25, %v252_v5  ;;  %v253_v16 = vadd.f32 %v239_v6, %v199_v62 }
  0x25   : > { %v240_v17 = vadd.f32 %v226_v8, %v198_v4  ;;  %v202_v18 = vld [vmem:[%s476_s13 + $0x148] sm:$0x7f]  ;;  %v204_v19 = vld [vmem:[%s476_s13 + $0x158] sm:$0x7f]  ;;  %v209_v24 = vld [vmem:[%s476_s13 + $0x180] sm:$0x7f] }
  0x26   : > { %279 = vst [vmem:[%s500_s17 + $0x30] sm:$0x7f] %v265_v11  ;;  %v241_v20 = vadd.f32 %v227_v14, %v205_v12  ;;  %v206_v21 = vld [vmem:[%s476_s13 + $0x168] sm:$0x7f]  ;;  %v208_v22 = vld [vmem:[%s476_s13 + $0x178] sm:$0x7f]  ;;  %v228_v23 = vadd.f32 %v204_v19, %v202_v18 }
  0x27   : > { %280 = vst [vmem:[%s500_s17 + $0x38] sm:$0x7f] %v266_v15  ;;  %v267_v25 = vmul.f32 0.25, %v253_v16  ;;  %v254_v26 = vadd.f32 %v240_v17, %v200_v7  ;;  %v211_v27 = vld [vmem:[%s476_s13 + $0x190] sm:$0x7f] }
  0x28   : > { %v213_v28 = vld [vmem:[%s476_s13 + $0x1a0] sm:$0x7f]  ;;  %v255_v29 = vadd.f32 %v241_v20, %v207_v13  ;;  %v242_v30 = vadd.f32 %v228_v23, %v206_v21  ;;  %v229_v31 = vadd.f32 %v211_v27, %v209_v24  ;;  %v210_v32 = vld [vmem:[%s476_s13 + $0x188] sm:$0x7f]  ;;  %v212_v33 = vld [vmem:[%s476_s13 + $0x198] sm:$0x7f] }
  0x29   : > { %281 = vst [vmem:[%s500_s17 + $0x40] sm:$0x7f] %v267_v25  ;;  %v268_v34 = vmul.f32 0.25, %v254_v26  ;;  %v215_v35 = vld [vmem:[%s476_s13 + $0x1b0] sm:$0x7f]  ;;  %v230_v37 = vadd.f32 %v212_v33, %v210_v32 }
  0x2a   : > { %v214_v36 = vld [vmem:[%s476_s13 + $0x1a8] sm:$0x7f]  ;;  %v269_v38 = vmul.f32 0.25, %v255_v29  ;;  %v256_v39 = vadd.f32 %v242_v30, %v208_v22  ;;  %v243_v40 = vadd.f32 %v229_v31, %v213_v28  ;;  %v216_v41 = vld [vmem:[%s476_s13 + $0x1b8] sm:$0x7f] }
  0x2b   : > { %282 = vst [vmem:[%s500_s17 + $0x48] sm:$0x7f] %v268_v34  ;;  %v244_v42 = vadd.f32 %v230_v37, %v214_v36 }
  0x2c   : > { %283 = vst [vmem:[%s500_s17 + $0x50] sm:$0x7f] %v269_v38  ;;  %v270_v43 = vmul.f32 0.25, %v256_v39  ;;  %v257_v44 = vadd.f32 %v243_v40, %v215_v35 }
  0x2d   : > { %v258_v45 = vadd.f32 %v244_v42, %v216_v41 }
  0x2e   : > { %284 = vst [vmem:[%s500_s17 + $0x58] sm:$0x7f] %v270_v43  ;;  %v271_v46 = vmul.f32 0.25, %v257_v44 }
  0x2f   : > { %v272_v47 = vmul.f32 0.25, %v258_v45 }
  0x30   : > { %285 = vst [vmem:[%s500_s17 + $0x60] sm:$0x7f] %v271_v46 }
  0x31   : > { %286 = vst [vmem:[%s500_s17 + $0x68] sm:$0x7f] %v272_v47 }
  0x32 PF: > { %s11_s8 = sadd.s32 1, %s440_s8   ;;  %s565_s6 = smov %s436_s7 }
  0x33   : > { %p8_p5 = scmp.ge.s32.totalorder %s11_s8, 4   ;;  %s566_s7 = smov %s568_s9 }
  0x35   :  { %10 = sbr.rel (!%p8_p5) target bundleno = 2 (0x2), region = 54 }

// kernel: pdn_s_forward.8
= control target key start
LH: loop header
LB: loop body
LE: loop exit
PB: predicated region body
PF: predicated region fallthrough
CT: control target
= control target key end

     0   :  { %s6878_s12 = smov 0   ;;  %s6880_s13 = smov 0   ;;  %s8301_s0 = inlined_call_operand.vmem [shape: bf16[338,2048], index: 0, kind: input, shape index: {}]   ;;  %s8302_s1 = inlined_call_operand.vmem [shape: bf16[2048,256], index: 1, kind: input, shape index: {}]   ;;  %s8303_s2 = inlined_call_operand.vmem [shape: f32[1,256], index: 2, kind: input, shape index: {}]   ;;  %s8304_s3 = inlined_call_operand.vmem [shape: f32[338,256], index: 3, kind: output, shape index: {}]  }
   0x1   :  { %s6882_s14 = smov 0  }
   0x2 LB: > { %s6891_s15 = sadd.s32 4294967295, %s6824_s14   ;;  %s6893_s16 = sadd.s32 1, %s6824_s14   ;;  %s6824_s14 = sphi %s6882_s14, %s8313_s14   ;;  %s6820_s13 = sphi %s6880_s13, %s8312_s13   ;;  %s6816_s12 = sphi %s6878_s12, %s8311_s12  }
   0x3   : > { %s85_s17 = ssub.s32 %s6824_s14, %s6893_s16  ;;  %s88_s18 = sadd.s32 1, %s6820_s13 }
   0x4   : > { %p86_p0 = scmp.eq.s32.totalorder %s85_s17, 0  ;;  %p98_p1 = scmp.ne.s32.totalorder %s6820_s13, %s6816_s12 }
   0x5   : > { %p99_p2 = scmp.eq.s32.totalorder %s6891_s15, 1  ;;  %p5244_p3 = scmp.ge.s32.totalorder %s6824_s14, 1 }
   0x6   : > { %s6901_s19 = scalar_select %p86_p0, %s6820_s13, %s88_s18  }
   0x7   : > { %p6903_p4 = por %p99_p2, %p98_p1  ;;  %p149_p5 = scmp.lt.s32.totalorder %s6824_s14, 3 }
   0x9   : > { %p150_p6 = pnand %p5244_p3, %p149_p5 }
   0xa   : > { %v6386_v0 = vld [vmem:[%s8302_s1 + $0x4] ss:$8 sps:$4 sm:$0xff] (!%p150_p6)   ;;  %v6390_v2 = vld [vmem:[%s8302_s1] ss:$8 sps:$4 sm:$0xff] (!%p150_p6)   ;;  %v6392_v4 = vld [vmem:[%s8302_s1 + $0x14] ss:$8 sps:$4 sm:$0xff] (!%p150_p6)  }
   0xb   : > { %153 = sbr.rel (%p150_p6) target bundleno = 873 (0x369), region = 32  ;;  %v6388_v1 = vld [vmem:[%s8302_s1 + $0x404] ss:$8 sps:$4 sm:$0xff] (!%p150_p6)   ;;  %3285 = vmatprep.subr.bf16.mxu1 (!%p150_p6), %v6386_v0  ;;  %v6391_v3 = vld [vmem:[%s8302_s1 + $0x400] ss:$8 sps:$4 sm:$0xff] (!%p150_p6)   ;;  %s6998_s14 = sshll.u32 (!%p150_p6), %s6891_s15, 5 }
   0xc   : > { %4057 = vmatprep.subr.bf16.mxu0 (!%p150_p6), %v6388_v1  ;;  %3286 = vmatpush1.bf16.msra.mxu1 (!%p150_p6), %v6390_v2  ;;  %v6394_v5 = vld [vmem:[%s8302_s1 + $0x414] ss:$8 sps:$4 sm:$0xff] (!%p150_p6)   ;;  %v6396_v6 = vld [vmem:[%s8302_s1 + $0x10] ss:$8 sps:$4 sm:$0xff] (!%p150_p6)   ;;  %v6398_v8 = vld [vmem:[%s8302_s1 + $0x24] ss:$8 sps:$4 sm:$0xff] (!%p150_p6)  }
   0xd   : > { %4058 = vmatpush1.bf16.msra.mxu0 (!%p150_p6), %v6391_v3  ;;  %3287 = vmatprep.subr.bf16.mxu1 (!%p150_p6), %v6392_v4  ;;  %v6397_v7 = vld [vmem:[%s8302_s1 + $0x410] ss:$8 sps:$4 sm:$0xff] (!%p150_p6)   ;;  %v6400_v9 = vld [vmem:[%s8302_s1 + $0x424] ss:$8 sps:$4 sm:$0xff] (!%p150_p6)   ;;  %v6402_v10 = vld [vmem:[%s8302_s1 + $0x20] ss:$8 sps:$4 sm:$0xff] (!%p150_p6)  }
   0xe   : > { %4059 = vmatprep.subr.bf16.mxu0 (!%p150_p6), %v6394_v5  ;;  %v6403_v11 = vld [vmem:[%s8302_s1 + $0x420] ss:$8 sps:$4 sm:$0xff] (!%p150_p6)   ;;  %v6404_v12 = vld [vmem:[%s8302_s1 + $0x34] ss:$8 sps:$4 sm:$0xff] (!%p150_p6)   ;;  %v6408_v14 = vld [vmem:[%s8302_s1 + $0x30] ss:$8 sps:$4 sm:$0xff] (!%p150_p6)  }
   0xf   : > { %v6406_v13 = vld [vmem:[%s8302_s1 + $0x434] ss:$8 sps:$4 sm:$0xff] (!%p150_p6)   ;;  %v6409_v15 = vld [vmem:[%s8302_s1 + $0x430] ss:$8 sps:$4 sm:$0xff] (!%p150_p6)   ;;  %v6410_v16 = vld [vmem:[%s8302_s1 + $0x44] ss:$8 sps:$4 sm:$0xff] (!%p150_p6)  }
  0x10   : > { %3288 = vmatpush1.bf16.msra.mxu1 (!%p150_p6), %v6396_v6  ;;  %v6412_v17 = vld [vmem:[%s8302_s1 + $0x444] ss:$8 sps:$4 sm:$0xff] (!%p150_p6)   ;;  %v6414_v18 = vld [vmem:[%s8302_s1 + $0x40] ss:$8 sps:$4 sm:$0xff] (!%p150_p6)   ;;  %v6416_v20 = vld [vmem:[%s8302_s1 + $0x54] ss:$8 sps:$4 sm:$0xff] (!%p150_p6)  }
  0x11   : > { %4060 = vmatpush1.bf16.msra.mxu0 (!%p150_p6), %v6397_v7  ;;  %3289 = vmatprep.subr.bf16.mxu1 (!%p150_p6), %v6398_v8  ;;  %v6415_v19 = vld [vmem:[%s8302_s1 + $0x440] ss:$8 sps:$4 sm:$0xff] (!%p150_p6)   ;;  %v6418_v21 = vld [vmem:[%s8302_s1 + $0x454] ss:$8 sps:$4 sm:$0xff] (!%p150_p6)   ;;  %v6420_v22 = vld [vmem:[%s8302_s1 + $0x50] ss:$8 sps:$4 sm:$0xff] (!%p150_p6)  }
  0x12   : > { %4061 = vmatprep.subr.bf16.mxu0 %v6400_v9  ;;  %v6421_v23 = vld [vmem:[%s8302_s1 + $0x450] ss:$8 sps:$4 sm:$0xff]   ;;  %v6422_v24 = vld [vmem:[%s8302_s1 + $0x64] ss:$8 sps:$4 sm:$0xff]   ;;  %v6426_v26 = vld [vmem:[%s8302_s1 + $0x60] ss:$8 sps:$4 sm:$0xff]  }
  0x13   : > { %v6424_v25 = vld [vmem:[%s8302_s1 + $0x464] ss:$8 sps:$4 sm:$0xff]   ;;  %v6427_v27 = vld [vmem:[%s8302_s1 + $0x460] ss:$8 sps:$4 sm:$0xff]   ;;  %v6428_v28 = vld [vmem:[%s8302_s1 + $0x74] ss:$8 sps:$4 sm:$0xff]  }
  0x14   : > { %3290 = vmatpush1.bf16.msra.mxu1 %v6402_v10  ;;  %v6430_v29 = vld [vmem:[%s8302_s1 + $0x474] ss:$8 sps:$4 sm:$0xff]   ;;  %v6432_v30 = vld [vmem:[%s8302_s1 + $0x70] ss:$8 sps:$4 sm:$0xff]   ;;  %v6434_v32 = vld [vmem:[%s8302_s1 + $0x84] ss:$8 sps:$4 sm:$0xff]  }
  0x15   : > { %4062 = vmatpush1.bf16.msra.mxu0 %v6403_v11  ;;  %3291 = vmatprep.subr.bf16.mxu1 %v6404_v12  ;;  %v6433_v31 = vld [vmem:[%s8302_s1 + $0x470] ss:$8 sps:$4 sm:$0xff]   ;;  %p184_p7 = scmp.lt.s32.totalorder %s6998_s14, 42  ;;  %v6436_v33 = vld [vmem:[%s8302_s1 + $0x484] ss:$8 sps:$4 sm:$0xff]   ;;  %s4965_s21 = ssub.s32 (%p6903_p4), 43, %s6998_s14 }
  0x16   : > { %4063 = vmatprep.subr.bf16.mxu0 %v6406_v13  ;;  %v6438_v34 = vld [vmem:[%s8302_s1 + $0x80] ss:$8 sps:$4 sm:$0xff]   ;;  %v6440_v36 = vld [vmem:[%s8302_s1 + $0x94] ss:$8 sps:$4 sm:$0xff]   ;;  %v6444_v38 = vld [vmem:[%s8302_s1 + $0x90] ss:$8 sps:$4 sm:$0xff]  }
  0x17   : > { %v6439_v35 = vld [vmem:[%s8302_s1 + $0x480] ss:$8 sps:$4 sm:$0xff]   ;;  %s185_s6 = scalar_select %p184_p7, %s6998_s14, 42  ;;  %v6442_v37 = vld [vmem:[%s8302_s1 + $0x494] ss:$8 sps:$4 sm:$0xff]  }
  0x18   : > { %3292 = vmatpush1.bf16.msra.mxu1 %v6408_v14  ;;  %v6445_v39 = vld [vmem:[%s8302_s1 + $0x490] ss:$8 sps:$4 sm:$0xff]   ;;  %v6446_v40 = vld [vmem:[%s8302_s1 + $0xa4] ss:$8 sps:$4 sm:$0xff]   ;;  %v6450_v42 = vld [vmem:[%s8302_s1 + $0xa0] ss:$8 sps:$4 sm:$0xff]  }
  0x19   : > { %4064 = vmatpush1.bf16.msra.mxu0 %v6409_v15  ;;  %3293 = vmatprep.subr.bf16.mxu1 %v6410_v16  ;;  %s5780_s22 = sshll.u32 %s185_s6, 6  ;;  %v6448_v41 = vld [vmem:[%s8302_s1 + $0x4a4] ss:$8 sps:$4 sm:$0xff]   ;;  %v6451_v43 = vld [vmem:[%s8302_s1 + $0x4a0] ss:$8 sps:$4 sm:$0xff]   ;;  %p4966_p8 = scmp.lt.s32.totalorder (%p6903_p4), %s4965_s21, 32 }
  0x1a   : > { %4065 = vmatprep.subr.bf16.mxu0 %v6412_v17  ;;  %s7047_s4 = scalar_lea.vmem %s8301_s0, %s5780_s22  ;;  %v6452_v44 = vld [vmem:[%s8302_s1 + $0xb4] ss:$8 sps:$4 sm:$0xff]   ;;  %v6456_v46 = vld [vmem:[%s8302_s1 + $0xb0] ss:$8 sps:$4 sm:$0xff]   ;;  %v6458_v52 = vld [vmem:[%s8302_s1 + $0xc4] ss:$8 sps:$4 sm:$0xff]  }
  0x1b   : > { %v6454_v45 = vld [vmem:[%s8302_s1 + $0x4b4] ss:$8 sps:$4 sm:$0xff]   ;;  %v6457_v47 = vld [vmem:[%s8302_s1 + $0x4b0] ss:$8 sps:$4 sm:$0xff]   ;;  %v7062_v48 = vld [vmem:[%s7047_s4] sm:$0xff]  ;;  %s5783_s22 = sshll.u32 (%p6903_p4), %s6891_s15, 9 }
  0x1c   : > { %3294 = vmatpush1.bf16.msra.mxu1 %v6414_v18  ;;  %v7065_v49 = vld [vmem:[%s7047_s4 + $0x40] sm:$0xff]  ;;  %v6464_v58 = vld [vmem:[%s8302_s1 + $0xd4] ss:$8 sps:$4 sm:$0xff]   ;;  %v6468_v60 = vld [vmem:[%s8302_s1 + $0xd0] ss:$8 sps:$4 sm:$0xff]   ;;  %s8098_s25 = scalar_lea.vmem (%p6903_p4), %s8304_s3, %s5783_s22  }
  0x1d   : > { %4066 = vmatpush1.bf16.msra.mxu0 %v6415_v19  ;;  %3295 = vmatprep.subr.bf16.mxu1 %v6416_v20  ;;  %v7068_v50 = vld [vmem:[%s7047_s4 + $0x20] sm:$0xff]  ;;  %v5250_v53 = vcombine.high %v7062_v48, %v7065_v49  ;;  %v6466_v59 = vld [vmem:[%s8302_s1 + $0x4d4] ss:$8 sps:$4 sm:$0xff]   ;;  %v6469_v61 = vld [vmem:[%s8302_s1 + $0x4d0] ss:$8 sps:$4 sm:$0xff]   ;;  %v5249_v12 = vcombine.low %v7062_v48, %v7065_v49 }
  0x1e   : > { %4067 = vmatprep.subr.bf16.mxu0 %v6418_v21  ;;  %v213_v51 = vld [vmem:[%s7047_s4 + $0x60] sm:$0xff]  ;;  %v6476_v2 = vld [vmem:[%s8302_s1 + $0xf4] ss:$8 sps:$4 sm:$0xff]   ;;  %v6480_v4 = vld [vmem:[%s8302_s1 + $0xf0] ss:$8 sps:$4 sm:$0xff]  }
  0x1f   : > { %v6460_v54 = vld [vmem:[%s8302_s1 + $0x4c4] ss:$8 sps:$4 sm:$0xff]   ;;  %v5258_v55 = vcombine.high %v7068_v50, %v213_v51  ;;  %3317 = vmatprep.mubr.bf16.mxu1 %v5250_v53  ;;  %v6462_v56 = vld [vmem:[%s8302_s1 + $0xc0] ss:$8 sps:$4 sm:$0xff]   ;;  %v6478_v3 = vld [vmem:[%s8302_s1 + $0x4f4] ss:$8 sps:$4 sm:$0xff]   ;;  %v5257_v13 = vcombine.low %v7068_v50, %v213_v51 }
  0x20   : > { %3296 = vmatpush1.bf16.msra.mxu1 %v6420_v22  ;;  %v6463_v57 = vld [vmem:[%s8302_s1 + $0x4c0] ss:$8 sps:$4 sm:$0xff]   ;;  %v6470_v62 = vld [vmem:[%s8302_s1 + $0xe4] ss:$8 sps:$4 sm:$0xff]   ;;  %v6481_v5 = vld [vmem:[%s8302_s1 + $0x4f0] ss:$8 sps:$4 sm:$0xff]  }
  0x21   : > { %4068 = vmatpush1.bf16.msra.mxu0 %v6421_v23  ;;  %3297 = vmatprep.subr.bf16.mxu1 %v6422_v24  ;;  %v6472_v63 = vld [vmem:[%s8302_s1 + $0x4e4] ss:$8 sps:$4 sm:$0xff]   ;;  %v6474_v0 = vld [vmem:[%s8302_s1 + $0xe0] ss:$8 sps:$4 sm:$0xff]   ;;  %v6488_v18 = vld [vmem:[%s8302_s1 + $0x110] ss:$8 sps:$4 sm:$0xff]  }
  0x22   : > { %4069 = vmatprep.subr.bf16.mxu0 %v6424_v25  ;;  %4089 = vmatprep.mubr.bf16.mxu0 %v5258_v55  ;;  %v6475_v1 = vld [vmem:[%s8302_s1 + $0x4e0] ss:$8 sps:$4 sm:$0xff]   ;;  %v6484_v6 = vld [vmem:[%s8302_s1 + $0x104] ss:$8 sps:$4 sm:$0xff]   ;;  %v6490_v19 = vld [vmem:[%s8302_s1 + $0x114] ss:$8 sps:$4 sm:$0xff]  }
  0x23   : > { %v6487_v7 = vld [vmem:[%s8302_s1 + $0x504] ss:$8 sps:$4 sm:$0xff]   ;;  %v6482_v14 = vld [vmem:[%s8302_s1 + $0x100] ss:$8 sps:$4 sm:$0xff]   ;;  %v6491_v20 = vld [vmem:[%s8302_s1 + $0x510] ss:$8 sps:$4 sm:$0xff]  }
  0x24   : > { %3298 = vmatpush1.bf16.msra.mxu1 %v6426_v26  ;;  %v217_v8 = vld [vmem:[%s7047_s4 + $0x80] sm:$0xff]  ;;  %v6493_v21 = vld [vmem:[%s8302_s1 + $0x514] ss:$8 sps:$4 sm:$0xff]  }
  0x25   : > { %4070 = vmatpush1.bf16.msra.mxu0 %v6427_v27  ;;  %3299 = vmatprep.subr.bf16.mxu1 %v6428_v28  ;;  %v225_v9 = vld [vmem:[%s7047_s4 + $0xc0] sm:$0xff]  ;;  %v6514_v50 = vld [vmem:[%s8302_s1 + $0x154] ss:$8 sps:$4 sm:$0xff]  }
  0x26   : > { %4071 = vmatprep.subr.bf16.mxu0 %v6430_v29  ;;  %v221_v10 = vld [vmem:[%s7047_s4 + $0xa0] sm:$0xff]  ;;  %v5266_v16 = vcombine.high %v217_v8, %v225_v9  ;;  %v5265_v28 = vcombine.low %v217_v8, %v225_v9  ;;  %v6517_v51 = vld [vmem:[%s8302_s1 + $0x554] ss:$8 sps:$4 sm:$0xff]   ;;  %v6524_v8 = vld [vmem:[%s8302_s1 + $0x170] ss:$8 sps:$4 sm:$0xff]  }
  0x27   : > { %v229_v11 = vld [vmem:[%s7047_s4 + $0xe0] sm:$0xff]  ;;  %v6527_v9 = vld [vmem:[%s8302_s1 + $0x570] ss:$8 sps:$4 sm:$0xff]  }
  0x28   : > { %3300 = vmatpush1.bf16.msra.mxu1 %v6432_v30  ;;  %v6485_v15 = vld [vmem:[%s8302_s1 + $0x500] ss:$8 sps:$4 sm:$0xff]   ;;  %v5274_v17 = vcombine.high %v221_v10, %v229_v11  ;;  %v6496_v26 = vld [vmem:[%s8302_s1 + $0x124] ss:$8 sps:$4 sm:$0xff]   ;;  %v5273_v29 = vcombine.low %v221_v10, %v229_v11 }
  0x29   : > { %4072 = vmatpush1.bf16.msra.mxu0 %v6433_v31  ;;  %3301 = vmatprep.subr.bf16.mxu1 %v6434_v32  ;;  %v233_v22 = vld [vmem:[%s7047_s4 + $0x100] sm:$0xff] }
  0x2a   : > { %4073 = vmatprep.subr.bf16.mxu0 %v6436_v33  ;;  %v241_v23 = vld [vmem:[%s7047_s4 + $0x140] sm:$0xff] }
  0x2b   : > { %v237_v24 = vld [vmem:[%s7047_s4 + $0x120] sm:$0xff]  ;;  %v5282_v30 = vcombine.high %v233_v22, %v241_v23 }
  0x2c   : > { %3302 = vmatpush1.bf16.msra.mxu1 %v6438_v34  ;;  %v245_v25 = vld [vmem:[%s7047_s4 + $0x160] sm:$0xff]  ;;  %v6502_v34 = vld [vmem:[%s8302_s1 + $0x134] ss:$8 sps:$4 sm:$0xff]  }
  0x2d   : > { %4074 = vmatpush1.bf16.msra.mxu0 %v6439_v35  ;;  %3303 = vmatprep.subr.bf16.mxu1 %v6440_v36  ;;  %v6499_v27 = vld [vmem:[%s8302_s1 + $0x524] ss:$8 sps:$4 sm:$0xff]   ;;  %v5290_v31 = vcombine.high %v237_v24, %v245_v25  ;;  %v6494_v32 = vld [vmem:[%s8302_s1 + $0x120] ss:$8 sps:$4 sm:$0xff]   ;;  %v6505_v35 = vld [vmem:[%s8302_s1 + $0x534] ss:$8 sps:$4 sm:$0xff]  }
  0x2e   : > { %4075 = vmatprep.subr.bf16.mxu0 %v6442_v37  ;;  %v6497_v33 = vld [vmem:[%s8302_s1 + $0x520] ss:$8 sps:$4 sm:$0xff]   ;;  %v6532_v10 = vld [vmem:[%s8302_s1 + $0x184] ss:$8 sps:$4 sm:$0xff]  }
  0x2f   : > { %v249_v36 = vld [vmem:[%s7047_s4 + $0x180] sm:$0xff] }
  0x30   : > { %3304 = vmatpush1.bf16.msra.mxu1 %v6444_v38  ;;  %v257_v37 = vld [vmem:[%s7047_s4 + $0x1c0] sm:$0xff] }
  0x31   : > { %4076 = vmatpush1.bf16.msra.mxu0 %v6445_v39  ;;  %3305 = vmatprep.subr.bf16.mxu1 %v6446_v40  ;;  %v253_v38 = vld [vmem:[%s7047_s4 + $0x1a0] sm:$0xff]  ;;  %v6500_v40 = vld [vmem:[%s8302_s1 + $0x130] ss:$8 sps:$4 sm:$0xff]  }
  0x32   : > { %4077 = vmatprep.subr.bf16.mxu0 %v6448_v41  ;;  %v261_v39 = vld [vmem:[%s7047_s4 + $0x1e0] sm:$0xff]  ;;  %v6503_v41 = vld [vmem:[%s8302_s1 + $0x530] ss:$8 sps:$4 sm:$0xff]  }
  0x33   : > { %v6506_v48 = vld [vmem:[%s8302_s1 + $0x140] ss:$8 sps:$4 sm:$0xff]   ;;  %v6535_v11 = vld [vmem:[%s8302_s1 + $0x584] ss:$8 sps:$4 sm:$0xff]  }
  0x34   : > { %3306 = vmatpush1.bf16.msra.mxu1 %v6450_v42  ;;  %v6508_v42 = vld [vmem:[%s8302_s1 + $0x144] ss:$8 sps:$4 sm:$0xff]   ;;  %v6509_v49 = vld [vmem:[%s8302_s1 + $0x540] ss:$8 sps:$4 sm:$0xff]  }
  0x35   : > { %4078 = vmatpush1.bf16.msra.mxu0 %v6451_v43  ;;  %3307 = vmatprep.subr.bf16.mxu1 %v6452_v44  ;;  %v6511_v43 = vld [vmem:[%s8302_s1 + $0x544] ss:$8 sps:$4 sm:$0xff]   ;;  %v5281_v44 = vcombine.low %v233_v22, %v241_v23 }
  0x36   : > { %4079 = vmatprep.subr.bf16.mxu0 %v6454_v45  ;;  %v5289_v45 = vcombine.low %v237_v24, %v245_v25  ;;  %v273_v53 = vld [vmem:[%s7047_s4 + $0x240] sm:$0xff]  ;;  %v6536_v24 = vld [vmem:[%s8302_s1 + $0x190] ss:$8 sps:$4 sm:$0xff]  }
  0x37   : > { %v277_v55 = vld [vmem:[%s7047_s4 + $0x260] sm:$0xff]  ;;  %v6539_v25 = vld [vmem:[%s8302_s1 + $0x590] ss:$8 sps:$4 sm:$0xff]  }
  0x38   : > { %3308 = vmatpush1.bf16.msra.mxu1 %v6456_v46  ;;  %v5298_v46 = vcombine.high %v249_v36, %v257_v37  ;;  %v301_v22 = vld [vmem:[%s7047_s4 + $0x320] sm:$0xff] }
  0x39   : > { %4080 = vmatpush1.bf16.msra.mxu0 %v6457_v47  ;;  %3309 = vmatprep.subr.bf16.mxu1 %v6458_v52  ;;  %v5306_v47 = vcombine.high %v253_v38, %v261_v39  ;;  %v265_v52 = vld [vmem:[%s7047_s4 + $0x200] sm:$0xff] }
  0x3a   : > { %4081 = vmatprep.subr.bf16.mxu0 %v6460_v54  ;;  %v269_v54 = vld [vmem:[%s7047_s4 + $0x220] sm:$0xff] }
  0x3b   : > { %v309_v23 = vld [vmem:[%s7047_s4 + $0x360] sm:$0xff] }
  0x3c   : > { %3310 = vmatpush1.bf16.msra.mxu1 %v6462_v56  ;;  %v6512_v56 = vld [vmem:[%s8302_s1 + $0x150] ss:$8 sps:$4 sm:$0xff]  }
  0x3d   : > { %4082 = vmatpush1.bf16.msra.mxu0 %v6463_v57  ;;  %3311 = vmatprep.subr.bf16.mxu1 %v6464_v58  ;;  %v6515_v57 = vld [vmem:[%s8302_s1 + $0x550] ss:$8 sps:$4 sm:$0xff]   ;;  %v6520_v58 = vld [vmem:[%s8302_s1 + $0x164] ss:$8 sps:$4 sm:$0xff]  }
  0x3e   : > { %4083 = vmatprep.subr.bf16.mxu0 %v6466_v59  ;;  %v6523_v59 = vld [vmem:[%s8302_s1 + $0x564] ss:$8 sps:$4 sm:$0xff]  }
  0x40   : > { %3312 = vmatpush1.bf16.msra.mxu1 %v6468_v60  ;;  %v5297_v60 = vcombine.low %v249_v36, %v257_v37  ;;  %v313_v36 = vld [vmem:[%s7047_s4 + $0x380] sm:$0xff] }
  0x41   : > { %4084 = vmatpush1.bf16.msra.mxu0 %v6469_v61  ;;  %3313 = vmatprep.subr.bf16.mxu1 %v6470_v62  ;;  %v5305_v61 = vcombine.low %v253_v38, %v261_v39  ;;  %v5314_v62 = vcombine.high %v265_v52, %v273_v53  ;;  %v321_v37 = vld [vmem:[%s7047_s4 + $0x3c0] sm:$0xff] }
  0x42   : > { %4085 = vmatprep.subr.bf16.mxu0 %v6472_v63  ;;  %v5322_v63 = vcombine.high %v269_v54, %v277_v55  ;;  %v317_v38 = vld [vmem:[%s7047_s4 + $0x3a0] sm:$0xff] }
  0x43   : > { %v325_v39 = vld [vmem:[%s7047_s4 + $0x3e0] sm:$0xff] }
  0x44   : > { %3314 = vmatpush1.bf16.msra.mxu1 %v6474_v0  ;;  %v6518_v0 = vld [vmem:[%s8302_s1 + $0x160] ss:$8 sps:$4 sm:$0xff]  }
  0x45   : > { %4086 = vmatpush1.bf16.msra.mxu0 %v6475_v1  ;;  %3315 = vmatprep.subr.bf16.mxu1 %v6476_v2  ;;  %v6521_v1 = vld [vmem:[%s8302_s1 + $0x560] ss:$8 sps:$4 sm:$0xff]   ;;  %v6526_v2 = vld [vmem:[%s8302_s1 + $0x174] ss:$8 sps:$4 sm:$0xff]  }
  0x46   : > { %4087 = vmatprep.subr.bf16.mxu0 %v6478_v3  ;;  %v6529_v3 = vld [vmem:[%s8302_s1 + $0x574] ss:$8 sps:$4 sm:$0xff]  }
  0x48   : > { %3316 = vmatpush1.bf16.msra.mxu1 %v6480_v4  ;;  %v281_v4 = vld [vmem:[%s7047_s4 + $0x280] sm:$0xff] }
  0x49   : > { %4088 = vmatpush1.bf16.msra.mxu0 %v6481_v5  ;;  %3478 = vmatprep.subr.bf16.mxu1 %v6484_v6  ;;  %v289_v5 = vld [vmem:[%s7047_s4 + $0x2c0] sm:$0xff] }
  0x4a   : > { %4250 = vmatprep.subr.bf16.mxu0 %v6487_v7  ;;  %v285_v6 = vld [vmem:[%s7047_s4 + $0x2a0] sm:$0xff] }
  0x4b   : > { %3318 = vmatmul.mubr.bf16.vlgmr.msra.gmra.mrb[0].mxu1 %v5249_v12  ;;  %v293_v7 = vld [vmem:[%s7047_s4 + $0x2e0] sm:$0xff]  ;;  %v5313_v12 = vcombine.low %v265_v52, %v273_v53 }
  0x4c   : > { %4090 = vmatmul.mubr.bf16.vlgmr.msra.gmra.mrb[0].mxu0 %v5257_v13  ;;  %3479 = vmatpush1.bf16.msra.mxu1 %v6482_v14  ;;  %v5321_v13 = vcombine.low %v269_v54, %v277_v55  ;;  %v5330_v14 = vcombine.high %v281_v4, %v289_v5  ;;  %v329_v52 = vld [vmem:[%s7047_s4 + $0x400] sm:$0xff] }
  0x4d   : > { %4251 = vmatpush1.bf16.msra.mxu0 %v6485_v15  ;;  %3327 = vmatprep.mubr.bf16.mxu1 %v5266_v16  ;;  %v5338_v15 = vcombine.high %v285_v6, %v293_v7  ;;  %v6530_v16 = vld [vmem:[%s8302_s1 + $0x180] ss:$8 sps:$4 sm:$0xff]  }
  0x4e   : > { %4099 = vmatprep.mubr.bf16.mxu0 %v5274_v17  ;;  %3480 = vmatprep.subr.bf16.mxu1 %v6490_v19  ;;  %v6533_v17 = vld [vmem:[%s8302_s1 + $0x580] ss:$8 sps:$4 sm:$0xff]   ;;  %v6541_v19 = vld [vmem:[%s8302_s1 + $0x594] ss:$8 sps:$4 sm:$0xff]  }
  0x4f   : > { %4252 = vmatprep.subr.bf16.mxu0 %v6493_v21  ;;  %v305_v21 = vld [vmem:[%s7047_s4 + $0x340] sm:$0xff] }
  0x50   : > { %3481 = vmatpush1.bf16.msra.mxu1 %v6488_v18  ;;  %v6538_v18 = vld [vmem:[%s8302_s1 + $0x194] ss:$8 sps:$4 sm:$0xff]   ;;  %v337_v53 = vld [vmem:[%s7047_s4 + $0x440] sm:$0xff] }
  0x51   : > { %4253 = vmatpush1.bf16.msra.mxu0 %v6491_v20  ;;  %3482 = vmatprep.subr.bf16.mxu1 %v6496_v26  ;;  %v297_v20 = vld [vmem:[%s7047_s4 + $0x300] sm:$0xff] }
  0x52   : > { %4254 = vmatprep.subr.bf16.mxu0 %v6499_v27  ;;  %v6544_v26 = vld [vmem:[%s8302_s1 + $0x1a4] ss:$8 sps:$4 sm:$0xff]  }
  0x53   : > { %3328 = vmatmul.mubr.bf16.gmra.mrb[4].mxu1 %v5265_v28  ;;  %v6547_v27 = vld [vmem:[%s8302_s1 + $0x5a4] ss:$8 sps:$4 sm:$0xff]   ;;  %v5329_v28 = vcombine.low %v281_v4, %v289_v5 }
  0x54   : > { %4100 = vmatmul.mubr.bf16.gmra.mrb[4].mxu0 %v5273_v29  ;;  %3337 = vmatprep.mubr.bf16.mxu1 %v5282_v30  ;;  %v5337_v29 = vcombine.low %v285_v6, %v293_v7  ;;  %v5346_v30 = vcombine.high %v297_v20, %v305_v21  ;;  %v333_v54 = vld [vmem:[%s7047_s4 + $0x420] sm:$0xff] }
  0x55   : > { %4109 = vmatprep.mubr.bf16.mxu0 %v5290_v31  ;;  %3483 = vmatpush1.bf16.msra.mxu1 %v6494_v32  ;;  %v5354_v31 = vcombine.high %v301_v22, %v309_v23  ;;  %v6542_v32 = vld [vmem:[%s8302_s1 + $0x1a0] ss:$8 sps:$4 sm:$0xff]  }
  0x56   : > { %4255 = vmatpush1.bf16.msra.mxu0 %v6497_v33  ;;  %3484 = vmatprep.subr.bf16.mxu1 %v6502_v34  ;;  %v6545_v33 = vld [vmem:[%s8302_s1 + $0x5a0] ss:$8 sps:$4 sm:$0xff]   ;;  %v6550_v34 = vld [vmem:[%s8302_s1 + $0x1b4] ss:$8 sps:$4 sm:$0xff]  }
  0x57   : > { %4256 = vmatprep.subr.bf16.mxu0 %v6505_v35  ;;  %v6553_v35 = vld [vmem:[%s8302_s1 + $0x5b4] ss:$8 sps:$4 sm:$0xff]   ;;  %v341_v55 = vld [vmem:[%s7047_s4 + $0x460] sm:$0xff] }
  0x58   : > { %v345_v4 = vld [vmem:[%s7047_s4 + $0x480] sm:$0xff] }
  0x59   : > { %3485 = vmatpush1.bf16.msra.mxu1 %v6500_v40  ;;  %v6548_v40 = vld [vmem:[%s8302_s1 + $0x1b0] ss:$8 sps:$4 sm:$0xff]   ;;  %v353_v5 = vld [vmem:[%s7047_s4 + $0x4c0] sm:$0xff] }
  0x5a   : > { %4257 = vmatpush1.bf16.msra.mxu0 %v6503_v41  ;;  %3486 = vmatprep.subr.bf16.mxu1 %v6508_v42  ;;  %v6551_v41 = vld [vmem:[%s8302_s1 + $0x5b0] ss:$8 sps:$4 sm:$0xff]   ;;  %v6556_v42 = vld [vmem:[%s8302_s1 + $0x1c4] ss:$8 sps:$4 sm:$0xff]  }
  0x5b   : > { %4258 = vmatprep.subr.bf16.mxu0 %v6511_v43  ;;  %3338 = vmatmul.mubr.bf16.gmra.mrb[8].mxu1 %v5281_v44  ;;  %v6559_v43 = vld [vmem:[%s8302_s1 + $0x5c4] ss:$8 sps:$4 sm:$0xff]   ;;  %v5345_v44 = vcombine.low %v297_v20, %v305_v21  ;;  %v5393_v20 = vcombine.low %v345_v4, %v353_v5 }
  0x5c   : > { %4110 = vmatmul.mubr.bf16.gmra.mrb[8].mxu0 %v5289_v45  ;;  %3347 = vmatprep.mubr.bf16.mxu1 %v5298_v46  ;;  %v5353_v45 = vcombine.low %v301_v22, %v309_v23  ;;  %v5362_v46 = vcombine.high %v313_v36, %v321_v37  ;;  %v349_v6 = vld [vmem:[%s7047_s4 + $0x4a0] sm:$0xff] }
  0x5d   : > { %4119 = vmatprep.mubr.bf16.mxu0 %v5306_v47  ;;  %3487 = vmatpush1.bf16.msra.mxu1 %v6506_v48  ;;  %v5370_v47 = vcombine.high %v317_v38, %v325_v39  ;;  %v6554_v48 = vld [vmem:[%s8302_s1 + $0x1c0] ss:$8 sps:$4 sm:$0xff]  }
  0x5e   : > { %4259 = vmatpush1.bf16.msra.mxu0 %v6509_v49  ;;  %3488 = vmatprep.subr.bf16.mxu1 %v6514_v50  ;;  %v6557_v49 = vld [vmem:[%s8302_s1 + $0x5c0] ss:$8 sps:$4 sm:$0xff]   ;;  %v6562_v50 = vld [vmem:[%s8302_s1 + $0x1d4] ss:$8 sps:$4 sm:$0xff]  }
  0x5f   : > { %4260 = vmatprep.subr.bf16.mxu0 %v6517_v51  ;;  %v6565_v51 = vld [vmem:[%s8302_s1 + $0x5d4] ss:$8 sps:$4 sm:$0xff]   ;;  %v357_v7 = vld [vmem:[%s7047_s4 + $0x4e0] sm:$0xff] }
  0x60   : > { %v5401_v21 = vcombine.low %v349_v6, %v357_v7 }
  0x61   : > { %3489 = vmatpush1.bf16.msra.mxu1 %v6512_v56  ;;  %v6560_v56 = vld [vmem:[%s8302_s1 + $0x1d0] ss:$8 sps:$4 sm:$0xff]  }
  0x62   : > { %4261 = vmatpush1.bf16.msra.mxu0 %v6515_v57  ;;  %3490 = vmatprep.subr.bf16.mxu1 %v6520_v58  ;;  %v6563_v57 = vld [vmem:[%s8302_s1 + $0x5d0] ss:$8 sps:$4 sm:$0xff]   ;;  %v6568_v58 = vld [vmem:[%s8302_s1 + $0x1e4] ss:$8 sps:$4 sm:$0xff]  }
  0x63   : > { %4262 = vmatprep.subr.bf16.mxu0 %v6523_v59  ;;  %3348 = vmatmul.mubr.bf16.gmra.mrb[12].mxu1 %v5297_v60  ;;  %v6571_v59 = vld [vmem:[%s8302_s1 + $0x5e4] ss:$8 sps:$4 sm:$0xff]   ;;  %v5361_v60 = vcombine.low %v313_v36, %v321_v37 }
  0x64   : > { %4120 = vmatmul.mubr.bf16.gmra.mrb[12].mxu0 %v5305_v61  ;;  %3357 = vmatprep.mubr.bf16.mxu1 %v5314_v62  ;;  %v5369_v61 = vcombine.low %v317_v38, %v325_v39  ;;  %v5378_v62 = vcombine.high %v329_v52, %v337_v53 }
  0x65   : > { %4129 = vmatprep.mubr.bf16.mxu0 %v5322_v63  ;;  %3491 = vmatpush1.bf16.msra.mxu1 %v6518_v0  ;;  %v5386_v63 = vcombine.high %v333_v54, %v341_v55  ;;  %v6566_v0 = vld [vmem:[%s8302_s1 + $0x1e0] ss:$8 sps:$4 sm:$0xff]  }
  0x66   : > { %4263 = vmatpush1.bf16.msra.mxu0 %v6521_v1  ;;  %3492 = vmatprep.subr.bf16.mxu1 %v6526_v2  ;;  %v6569_v1 = vld [vmem:[%s8302_s1 + $0x5e0] ss:$8 sps:$4 sm:$0xff]   ;;  %v6574_v2 = vld [vmem:[%s8302_s1 + $0x1f4] ss:$8 sps:$4 sm:$0xff]  }
  0x67   : > { %4264 = vmatprep.subr.bf16.mxu0 %v6529_v3  ;;  %v6577_v3 = vld [vmem:[%s8302_s1 + $0x5f4] ss:$8 sps:$4 sm:$0xff]  }
  0x69   : > { %3493 = vmatpush1.bf16.msra.mxu1 %v6524_v8  ;;  %v6572_v8 = vld [vmem:[%s8302_s1 + $0x1f0] ss:$8 sps:$4 sm:$0xff]  }
  0x6a   : > { %4265 = vmatpush1.bf16.msra.mxu0 %v6527_v9  ;;  %3494 = vmatprep.subr.bf16.mxu1 %v6532_v10  ;;  %v6575_v9 = vld [vmem:[%s8302_s1 + $0x5f0] ss:$8 sps:$4 sm:$0xff]   ;;  %v6580_v10 = vld [vmem:[%s8302_s1 + $0x204] ss:$8 sps:$4 sm:$0xff]  }
  0x6b   : > { %4266 = vmatprep.subr.bf16.mxu0 %v6535_v11  ;;  %3358 = vmatmul.mubr.bf16.gmra.mrb[16].mxu1 %v5313_v12  ;;  %v6583_v11 = vld [vmem:[%s8302_s1 + $0x604] ss:$8 sps:$4 sm:$0xff]   ;;  %v5377_v12 = vcombine.low %v329_v52, %v337_v53 }
  0x6c   : > { %4130 = vmatmul.mubr.bf16.gmra.mrb[16].mxu0 %v5321_v13  ;;  %3367 = vmatprep.mubr.bf16.mxu1 %v5330_v14  ;;  %v5385_v13 = vcombine.low %v333_v54, %v341_v55  ;;  %v5394_v14 = vcombine.high %v345_v4, %v353_v5 }
  0x6d   : > { %4139 = vmatprep.mubr.bf16.mxu0 %v5338_v15  ;;  %3495 = vmatpush1.bf16.msra.mxu1 %v6530_v16  ;;  %v5402_v15 = vcombine.high %v349_v6, %v357_v7  ;;  %v361_v16 = vld [vmem:[%s7047_s4 + $0x500] sm:$0xff] }
  0x6e   : > { %4267 = vmatpush1.bf16.msra.mxu0 %v6533_v17  ;;  %3496 = vmatprep.subr.bf16.mxu1 %v6538_v18  ;;  %v369_v17 = vld [vmem:[%s7047_s4 + $0x540] sm:$0xff] }
  0x6f   : > { %4268 = vmatprep.subr.bf16.mxu0 %v6541_v19  ;;  %v365_v18 = vld [vmem:[%s7047_s4 + $0x520] sm:$0xff]  ;;  %v5410_v22 = vcombine.high %v361_v16, %v369_v17 }
  0x70   : > { %v373_v19 = vld [vmem:[%s7047_s4 + $0x560] sm:$0xff] }
  0x71   : > { %3497 = vmatpush1.bf16.msra.mxu1 %v6536_v24  ;;  %v5418_v23 = vcombine.high %v365_v18, %v373_v19  ;;  %v377_v24 = vld [vmem:[%s7047_s4 + $0x580] sm:$0xff] }
  0x72   : > { %4269 = vmatpush1.bf16.msra.mxu0 %v6539_v25  ;;  %3498 = vmatprep.subr.bf16.mxu1 %v6544_v26  ;;  %v385_v25 = vld [vmem:[%s7047_s4 + $0x5c0] sm:$0xff] }
  0x73   : > { %4270 = vmatprep.subr.bf16.mxu0 %v6547_v27  ;;  %3368 = vmatmul.mubr.bf16.gmra.mrb[20].mxu1 %v5329_v28  ;;  %v381_v26 = vld [vmem:[%s7047_s4 + $0x5a0] sm:$0xff]  ;;  %v5409_v28 = vcombine.low %v361_v16, %v369_v17  ;;  %v5425_v36 = vcombine.low %v377_v24, %v385_v25 }
  0x74   : > { %4140 = vmatmul.mubr.bf16.gmra.mrb[20].mxu0 %v5337_v29  ;;  %3377 = vmatprep.mubr.bf16.mxu1 %v5346_v30  ;;  %v389_v27 = vld [vmem:[%s7047_s4 + $0x5e0] sm:$0xff]  ;;  %v5417_v29 = vcombine.low %v365_v18, %v373_v19  ;;  %v5426_v30 = vcombine.high %v377_v24, %v385_v25  ;;  %v6586_v18 = vld [vmem:[%s8302_s1 + $0x214] ss:$8 sps:$4 sm:$0xff]   ;;  %v238_v24 = vld [vmem:[%s7047_s4 + $0x128] sm:$0xff] }
  0x75   : > { %4149 = vmatprep.mubr.bf16.mxu0 %v5354_v31  ;;  %3499 = vmatpush1.bf16.msra.mxu1 %v6542_v32  ;;  %v5434_v31 = vcombine.high %v381_v26, %v389_v27  ;;  %v393_v32 = vld [vmem:[%s7047_s4 + $0x600] sm:$0xff]  ;;  %v5433_v37 = vcombine.low %v381_v26, %v389_v27  ;;  %v6589_v19 = vld [vmem:[%s8302_s1 + $0x614] ss:$8 sps:$4 sm:$0xff]   ;;  %v246_v25 = vld [vmem:[%s7047_s4 + $0x168] sm:$0xff] }
  0x76   : > { %4271 = vmatpush1.bf16.msra.mxu0 %v6545_v33  ;;  %3500 = vmatprep.subr.bf16.mxu1 %v6550_v34  ;;  %v401_v33 = vld [vmem:[%s7047_s4 + $0x640] sm:$0xff] }
  0x77   : > { %4272 = vmatprep.subr.bf16.mxu0 %v6553_v35  ;;  %v397_v34 = vld [vmem:[%s7047_s4 + $0x620] sm:$0xff]  ;;  %v5442_v38 = vcombine.high %v393_v32, %v401_v33 }
  0x78   : > { %v405_v35 = vld [vmem:[%s7047_s4 + $0x660] sm:$0xff] }
  0x79   : > { %3501 = vmatpush1.bf16.msra.mxu1 %v6548_v40  ;;  %v5450_v39 = vcombine.high %v397_v34, %v405_v35  ;;  %v409_v40 = vld [vmem:[%s7047_s4 + $0x680] sm:$0xff] }
  0x7a   : > { %4273 = vmatpush1.bf16.msra.mxu0 %v6551_v41  ;;  %3502 = vmatprep.subr.bf16.mxu1 %v6556_v42  ;;  %v417_v41 = vld [vmem:[%s7047_s4 + $0x6c0] sm:$0xff] }
  0x7b   : > { %4274 = vmatprep.subr.bf16.mxu0 %v6559_v43  ;;  %3378 = vmatmul.mubr.bf16.gmra.mrb[24].mxu1 %v5345_v44  ;;  %v413_v42 = vld [vmem:[%s7047_s4 + $0x6a0] sm:$0xff]  ;;  %v5441_v44 = vcombine.low %v393_v32, %v401_v33  ;;  %v5457_v52 = vcombine.low %v409_v40, %v417_v41 }
  0x7c   : > { %4150 = vmatmul.mubr.bf16.gmra.mrb[24].mxu0 %v5353_v45  ;;  %3387 = vmatprep.mubr.bf16.mxu1 %v5362_v46  ;;  %v421_v43 = vld [vmem:[%s7047_s4 + $0x6e0] sm:$0xff]  ;;  %v5449_v45 = vcombine.low %v397_v34, %v405_v35  ;;  %v5458_v46 = vcombine.high %v409_v40, %v417_v41  ;;  %v6598_v34 = vld [vmem:[%s8302_s1 + $0x234] ss:$8 sps:$4 sm:$0xff]   ;;  %v6596_v40 = vld [vmem:[%s8302_s1 + $0x230] ss:$8 sps:$4 sm:$0xff]  }
  0x7d   : > { %4159 = vmatprep.mubr.bf16.mxu0 %v5370_v47  ;;  %3503 = vmatpush1.bf16.msra.mxu1 %v6554_v48  ;;  %v5466_v47 = vcombine.high %v413_v42, %v421_v43  ;;  %v425_v48 = vld [vmem:[%s7047_s4 + $0x700] sm:$0xff]  ;;  %v5465_v53 = vcombine.low %v413_v42, %v421_v43  ;;  %v6601_v35 = vld [vmem:[%s8302_s1 + $0x634] ss:$8 sps:$4 sm:$0xff]   ;;  %v6599_v41 = vld [vmem:[%s8302_s1 + $0x630] ss:$8 sps:$4 sm:$0xff]  }
  0x7e   : > { %4275 = vmatpush1.bf16.msra.mxu0 %v6557_v49  ;;  %3504 = vmatprep.subr.bf16.mxu1 %v6562_v50  ;;  %v433_v49 = vld [vmem:[%s7047_s4 + $0x740] sm:$0xff] }
  0x7f   : > { %4276 = vmatprep.subr.bf16.mxu0 %v6565_v51  ;;  %v429_v50 = vld [vmem:[%s7047_s4 + $0x720] sm:$0xff]  ;;  %v5474_v54 = vcombine.high %v425_v48, %v433_v49 }
  0x80   : > { %v437_v51 = vld [vmem:[%s7047_s4 + $0x760] sm:$0xff] }
  0x81   : > { %3505 = vmatpush1.bf16.msra.mxu1 %v6560_v56  ;;  %v5482_v55 = vcombine.high %v429_v50, %v437_v51  ;;  %v441_v56 = vld [vmem:[%s7047_s4 + $0x780] sm:$0xff] }
  0x82   : > { %4277 = vmatpush1.bf16.msra.mxu0 %v6563_v57  ;;  %3506 = vmatprep.subr.bf16.mxu1 %v6568_v58  ;;  %v449_v57 = vld [vmem:[%s7047_s4 + $0x7c0] sm:$0xff] }
  0x83   : > { %4278 = vmatprep.subr.bf16.mxu0 %v6571_v59  ;;  %3388 = vmatmul.mubr.bf16.gmra.mrb[28].mxu1 %v5361_v60  ;;  %v445_v58 = vld [vmem:[%s7047_s4 + $0x7a0] sm:$0xff]  ;;  %v5473_v60 = vcombine.low %v425_v48, %v433_v49  ;;  %v5489_v4 = vcombine.low %v441_v56, %v449_v57 }
  0x84   : > { %4160 = vmatmul.mubr.bf16.gmra.mrb[28].mxu0 %v5369_v61  ;;  %3397 = vmatprep.mubr.bf16.mxu1 %v5378_v62  ;;  %v453_v59 = vld [vmem:[%s7047_s4 + $0x7e0] sm:$0xff]  ;;  %v5481_v61 = vcombine.low %v429_v50, %v437_v51  ;;  %v5490_v62 = vcombine.high %v441_v56, %v449_v57  ;;  %v6610_v50 = vld [vmem:[%s8302_s1 + $0x254] ss:$8 sps:$4 sm:$0xff]   ;;  %v6608_v56 = vld [vmem:[%s8302_s1 + $0x250] ss:$8 sps:$4 sm:$0xff]  }
  0x85   : > { %4169 = vmatprep.mubr.bf16.mxu0 %v5386_v63  ;;  %3507 = vmatpush1.bf16.msra.mxu1 %v6566_v0  ;;  %v5498_v63 = vcombine.high %v445_v58, %v453_v59  ;;  %v202_v0 = vld [vmem:[%s7047_s4 + $0x8] sm:$0xff]  ;;  %v5497_v5 = vcombine.low %v445_v58, %v453_v59  ;;  %v6613_v51 = vld [vmem:[%s8302_s1 + $0x654] ss:$8 sps:$4 sm:$0xff]   ;;  %v6611_v57 = vld [vmem:[%s8302_s1 + $0x650] ss:$8 sps:$4 sm:$0xff]  }
  0x86   : > { %4279 = vmatpush1.bf16.msra.mxu0 %v6569_v1  ;;  %3508 = vmatprep.subr.bf16.mxu1 %v6574_v2  ;;  %v210_v1 = vld [vmem:[%s7047_s4 + $0x48] sm:$0xff] }
  0x87   : > { %4280 = vmatprep.subr.bf16.mxu0 %v6577_v3  ;;  %v206_v2 = vld [vmem:[%s7047_s4 + $0x28] sm:$0xff]  ;;  %v5252_v6 = vcombine.high %v202_v0, %v210_v1 }
  0x88   : > { %v214_v3 = vld [vmem:[%s7047_s4 + $0x68] sm:$0xff] }
  0x89   : > { %3509 = vmatpush1.bf16.msra.mxu1 %v6572_v8  ;;  %v5260_v7 = vcombine.high %v206_v2, %v214_v3  ;;  %v218_v8 = vld [vmem:[%s7047_s4 + $0x88] sm:$0xff] }
  0x8a   : > { %4281 = vmatpush1.bf16.msra.mxu0 %v6575_v9  ;;  %3671 = vmatprep.subr.bf16.mxu1 %v6580_v10  ;;  %v226_v9 = vld [vmem:[%s7047_s4 + $0xc8] sm:$0xff] }
  0x8b   : > { %4443 = vmatprep.subr.bf16.mxu0 %v6583_v11  ;;  %3398 = vmatmul.mubr.bf16.gmra.mrb[32].mxu1 %v5377_v12  ;;  %v222_v10 = vld [vmem:[%s7047_s4 + $0xa8] sm:$0xff]  ;;  %v5268_v16 = vcombine.high %v218_v8, %v226_v9 }
  0x8c   : > { %4170 = vmatmul.mubr.bf16.gmra.mrb[32].mxu0 %v5385_v13  ;;  %3407 = vmatprep.mubr.bf16.mxu1 %v5394_v14  ;;  %v230_v11 = vld [vmem:[%s7047_s4 + $0xe8] sm:$0xff]  ;;  %v5251_v14 = vcombine.low %v202_v0, %v210_v1 }
  0x8d   : > { %4179 = vmatprep.mubr.bf16.mxu0 %v5402_v15  ;;  %v6578_v12 = vld [vmem:[%s8302_s1 + $0x200] ss:$8 sps:$4 sm:$0xff]   ;;  %v5259_v15 = vcombine.low %v206_v2, %v214_v3  ;;  %v5276_v17 = vcombine.high %v222_v10, %v230_v11  ;;  %v6592_v26 = vld [vmem:[%s8302_s1 + $0x224] ss:$8 sps:$4 sm:$0xff]   ;;  %v6622_v2 = vld [vmem:[%s8302_s1 + $0x274] ss:$8 sps:$4 sm:$0xff]  }
  0x8e   : > { %v6581_v13 = vld [vmem:[%s8302_s1 + $0x600] ss:$8 sps:$4 sm:$0xff]   ;;  %v6595_v27 = vld [vmem:[%s8302_s1 + $0x624] ss:$8 sps:$4 sm:$0xff]   ;;  %v6625_v3 = vld [vmem:[%s8302_s1 + $0x674] ss:$8 sps:$4 sm:$0xff]  }
  0x8f   : > { %v6590_v32 = vld [vmem:[%s8302_s1 + $0x220] ss:$8 sps:$4 sm:$0xff]   ;;  %v6604_v42 = vld [vmem:[%s8302_s1 + $0x244] ss:$8 sps:$4 sm:$0xff]  }
  0x90   : > { %v6593_v33 = vld [vmem:[%s8302_s1 + $0x620] ss:$8 sps:$4 sm:$0xff]   ;;  %v6607_v43 = vld [vmem:[%s8302_s1 + $0x644] ss:$8 sps:$4 sm:$0xff]  }
  0x91   : > { %v6602_v48 = vld [vmem:[%s8302_s1 + $0x240] ss:$8 sps:$4 sm:$0xff]   ;;  %v6616_v58 = vld [vmem:[%s8302_s1 + $0x264] ss:$8 sps:$4 sm:$0xff]  }
  0x92   : > { %v6605_v49 = vld [vmem:[%s8302_s1 + $0x640] ss:$8 sps:$4 sm:$0xff]   ;;  %v6619_v59 = vld [vmem:[%s8302_s1 + $0x664] ss:$8 sps:$4 sm:$0xff]  }
  0x93   : > { %3408 = vmatmul.mubr.bf16.gmra.mrb[36].mxu1 %v5393_v20  ;;  %v6584_v20 = vld [vmem:[%s8302_s1 + $0x210] ss:$8 sps:$4 sm:$0xff]   ;;  %v6614_v0 = vld [vmem:[%s8302_s1 + $0x260] ss:$8 sps:$4 sm:$0xff]  }
  0x94   : > { %4180 = vmatmul.mubr.bf16.gmra.mrb[36].mxu0 %v5401_v21  ;;  %3417 = vmatprep.mubr.bf16.mxu1 %v5410_v22  ;;  %v6587_v21 = vld [vmem:[%s8302_s1 + $0x610] ss:$8 sps:$4 sm:$0xff]   ;;  %v234_v22 = vld [vmem:[%s7047_s4 + $0x108] sm:$0xff] }
  0x95   : > { %4189 = vmatprep.mubr.bf16.mxu0 %v5418_v23  ;;  %v242_v23 = vld [vmem:[%s7047_s4 + $0x148] sm:$0xff] }
  0x96   : > { %v6617_v1 = vld [vmem:[%s8302_s1 + $0x660] ss:$8 sps:$4 sm:$0xff]  }
  0x9b   : > { %3418 = vmatmul.mubr.bf16.gmra.mrb[40].mxu1 %v5409_v28  ;;  %v5267_v28 = vcombine.low %v218_v8, %v226_v9  ;;  %v6620_v8 = vld [vmem:[%s8302_s1 + $0x270] ss:$8 sps:$4 sm:$0xff]  }
  0x9c   : > { %4190 = vmatmul.mubr.bf16.gmra.mrb[40].mxu0 %v5417_v29  ;;  %3427 = vmatprep.mubr.bf16.mxu1 %v5426_v30  ;;  %v5275_v29 = vcombine.low %v222_v10, %v230_v11  ;;  %v5284_v30 = vcombine.high %v234_v22, %v242_v23  ;;  %v6623_v9 = vld [vmem:[%s8302_s1 + $0x670] ss:$8 sps:$4 sm:$0xff]   ;;  %v6628_v10 = vld [vmem:[%s8302_s1 + $0x284] ss:$8 sps:$4 sm:$0xff]  }
  0x9d   : > { %4199 = vmatprep.mubr.bf16.mxu0 %v5434_v31  ;;  %v5292_v31 = vcombine.high %v238_v24, %v246_v25  ;;  %v6631_v11 = vld [vmem:[%s8302_s1 + $0x684] ss:$8 sps:$4 sm:$0xff]  }
  0xa3   : > { %3428 = vmatmul.mubr.bf16.gmra.mrb[44].mxu1 %v5425_v36  ;;  %v250_v36 = vld [vmem:[%s7047_s4 + $0x188] sm:$0xff] }
  0xa4   : > { %4200 = vmatmul.mubr.bf16.gmra.mrb[44].mxu0 %v5433_v37  ;;  %3437 = vmatprep.mubr.bf16.mxu1 %v5442_v38  ;;  %v258_v37 = vld [vmem:[%s7047_s4 + $0x1c8] sm:$0xff] }
  0xa5   : > { %4209 = vmatprep.mubr.bf16.mxu0 %v5450_v39  ;;  %v254_v38 = vld [vmem:[%s7047_s4 + $0x1a8] sm:$0xff] }
  0xa6   : > { %v262_v39 = vld [vmem:[%s7047_s4 + $0x1e8] sm:$0xff] }
  0xab   : > { %3438 = vmatmul.mubr.bf16.gmra.mrb[48].mxu1 %v5441_v44  ;;  %v5283_v44 = vcombine.low %v234_v22, %v242_v23  ;;  %v302_v22 = vld [vmem:[%s7047_s4 + $0x328] sm:$0xff] }
  0xac   : > { %4210 = vmatmul.mubr.bf16.gmra.mrb[48].mxu0 %v5449_v45  ;;  %3447 = vmatprep.mubr.bf16.mxu1 %v5458_v46  ;;  %v5291_v45 = vcombine.low %v238_v24, %v246_v25  ;;  %v5300_v46 = vcombine.high %v250_v36, %v258_v37  ;;  %v310_v23 = vld [vmem:[%s7047_s4 + $0x368] sm:$0xff]  ;;  %v6632_v24 = vld [vmem:[%s8302_s1 + $0x290] ss:$8 sps:$4 sm:$0xff]  }
  0xad   : > { %4219 = vmatprep.mubr.bf16.mxu0 %v5466_v47  ;;  %v5308_v47 = vcombine.high %v254_v38, %v262_v39  ;;  %v6635_v25 = vld [vmem:[%s8302_s1 + $0x690] ss:$8 sps:$4 sm:$0xff]  }
  0xb3   : > { %3448 = vmatmul.mubr.bf16.gmra.mrb[52].mxu1 %v5457_v52  ;;  %v266_v52 = vld [vmem:[%s7047_s4 + $0x208] sm:$0xff] }
  0xb4   : > { %4220 = vmatmul.mubr.bf16.gmra.mrb[52].mxu0 %v5465_v53  ;;  %3457 = vmatprep.mubr.bf16.mxu1 %v5474_v54  ;;  %v274_v53 = vld [vmem:[%s7047_s4 + $0x248] sm:$0xff] }
  0xb5   : > { %4229 = vmatprep.mubr.bf16.mxu0 %v5482_v55  ;;  %v270_v54 = vld [vmem:[%s7047_s4 + $0x228] sm:$0xff] }
  0xb6   : > { %v278_v55 = vld [vmem:[%s7047_s4 + $0x268] sm:$0xff] }
  0xbb   : > { %3458 = vmatmul.mubr.bf16.gmra.mrb[56].mxu1 %v5473_v60  ;;  %v5299_v60 = vcombine.low %v250_v36, %v258_v37  ;;  %v314_v36 = vld [vmem:[%s7047_s4 + $0x388] sm:$0xff] }
  0xbc   : > { %4230 = vmatmul.mubr.bf16.gmra.mrb[56].mxu0 %v5481_v61  ;;  %3467 = vmatprep.mubr.bf16.mxu1 %v5490_v62  ;;  %v5307_v61 = vcombine.low %v254_v38, %v262_v39  ;;  %v5316_v62 = vcombine.high %v266_v52, %v274_v53  ;;  %v322_v37 = vld [vmem:[%s7047_s4 + $0x3c8] sm:$0xff] }
  0xbd   : > { %4239 = vmatprep.mubr.bf16.mxu0 %v5498_v63  ;;  %v5324_v63 = vcombine.high %v270_v54, %v278_v55  ;;  %v318_v38 = vld [vmem:[%s7047_s4 + $0x3a8] sm:$0xff] }
  0xbe   : > { %v326_v39 = vld [vmem:[%s7047_s4 + $0x3e8] sm:$0xff] }
  0xc3   : > { %3468 = vmatmul.mubr.bf16.gmra.mrb[60].mxu1 %v5489_v4  ;;  %v282_v4 = vld [vmem:[%s7047_s4 + $0x288] sm:$0xff] }
  0xc4   : > { %4240 = vmatmul.mubr.bf16.gmra.mrb[60].mxu0 %v5497_v5  ;;  %3510 = vmatprep.mubr.bf16.mxu1 %v5252_v6  ;;  %v290_v5 = vld [vmem:[%s7047_s4 + $0x2c8] sm:$0xff] }
  0xc5   : > { %4282 = vmatprep.mubr.bf16.mxu0 %v5260_v7  ;;  %v286_v6 = vld [vmem:[%s7047_s4 + $0x2a8] sm:$0xff] }
  0xc6   : > { %v294_v7 = vld [vmem:[%s7047_s4 + $0x2e8] sm:$0xff] }
  0xcb   : > { %3511 = vmatmul.mubr.bf16.vlgmr.msra.gmra.mrb[0].mxu1 %v5251_v14  ;;  %v5332_v14 = vcombine.high %v282_v4, %v290_v5 }
  0xcc   : > { %4283 = vmatmul.mubr.bf16.vlgmr.msra.gmra.mrb[0].mxu0 %v5259_v15  ;;  %3672 = vmatpush1.bf16.msra.mxu1 %v6578_v12  ;;  %v5315_v12 = vcombine.low %v266_v52, %v274_v53  ;;  %v5340_v15 = vcombine.high %v286_v6, %v294_v7  ;;  %v330_v52 = vld [vmem:[%s7047_s4 + $0x408] sm:$0xff] }
  0xcd   : > { %4444 = vmatpush1.bf16.msra.mxu0 %v6581_v13  ;;  %3520 = vmatprep.mubr.bf16.mxu1 %v5268_v16  ;;  %v5323_v13 = vcombine.low %v270_v54, %v278_v55  ;;  %v6626_v16 = vld [vmem:[%s8302_s1 + $0x280] ss:$8 sps:$4 sm:$0xff]  }
  0xce   : > { %4292 = vmatprep.mubr.bf16.mxu0 %v5276_v17  ;;  %3673 = vmatprep.subr.bf16.mxu1 %v6586_v18  ;;  %v6629_v17 = vld [vmem:[%s8302_s1 + $0x680] ss:$8 sps:$4 sm:$0xff]   ;;  %v6634_v18 = vld [vmem:[%s8302_s1 + $0x294] ss:$8 sps:$4 sm:$0xff]  }
  0xcf   : > { %4445 = vmatprep.subr.bf16.mxu0 %v6589_v19  ;;  %v6637_v19 = vld [vmem:[%s8302_s1 + $0x694] ss:$8 sps:$4 sm:$0xff]   ;;  %v338_v53 = vld [vmem:[%s7047_s4 + $0x448] sm:$0xff] }
  0xd0   : > { %3674 = vmatpush1.bf16.msra.mxu1 %v6584_v20  ;;  %v298_v20 = vld [vmem:[%s7047_s4 + $0x308] sm:$0xff] }
  0xd1   : > { %4446 = vmatpush1.bf16.msra.mxu0 %v6587_v21  ;;  %3675 = vmatprep.subr.bf16.mxu1 %v6592_v26  ;;  %v306_v21 = vld [vmem:[%s7047_s4 + $0x348] sm:$0xff] }
  0xd2   : > { %4447 = vmatprep.subr.bf16.mxu0 %v6595_v27  ;;  %v6640_v26 = vld [vmem:[%s8302_s1 + $0x2a4] ss:$8 sps:$4 sm:$0xff]  }
  0xd3   : > { %3521 = vmatmul.mubr.bf16.gmra.mrb[4].mxu1 %v5267_v28  ;;  %v6643_v27 = vld [vmem:[%s8302_s1 + $0x6a4] ss:$8 sps:$4 sm:$0xff]   ;;  %v5331_v28 = vcombine.low %v282_v4, %v290_v5 }
  0xd4   : > { %4293 = vmatmul.mubr.bf16.gmra.mrb[4].mxu0 %v5275_v29  ;;  %3530 = vmatprep.mubr.bf16.mxu1 %v5284_v30  ;;  %v5339_v29 = vcombine.low %v286_v6, %v294_v7  ;;  %v5348_v30 = vcombine.high %v298_v20, %v306_v21  ;;  %v334_v54 = vld [vmem:[%s7047_s4 + $0x428] sm:$0xff] }
  0xd5   : > { %4302 = vmatprep.mubr.bf16.mxu0 %v5292_v31  ;;  %3676 = vmatpush1.bf16.msra.mxu1 %v6590_v32  ;;  %v5356_v31 = vcombine.high %v302_v22, %v310_v23  ;;  %v6638_v32 = vld [vmem:[%s8302_s1 + $0x2a0] ss:$8 sps:$4 sm:$0xff]  }
  0xd6   : > { %4448 = vmatpush1.bf16.msra.mxu0 %v6593_v33  ;;  %3677 = vmatprep.subr.bf16.mxu1 %v6598_v34  ;;  %v6641_v33 = vld [vmem:[%s8302_s1 + $0x6a0] ss:$8 sps:$4 sm:$0xff]   ;;  %v6646_v34 = vld [vmem:[%s8302_s1 + $0x2b4] ss:$8 sps:$4 sm:$0xff]  }
  0xd7   : > { %4449 = vmatprep.subr.bf16.mxu0 %v6601_v35  ;;  %v6649_v35 = vld [vmem:[%s8302_s1 + $0x6b4] ss:$8 sps:$4 sm:$0xff]   ;;  %v342_v55 = vld [vmem:[%s7047_s4 + $0x468] sm:$0xff] }
  0xd8   : > { %v346_v4 = vld [vmem:[%s7047_s4 + $0x488] sm:$0xff] }
  0xd9   : > { %3678 = vmatpush1.bf16.msra.mxu1 %v6596_v40  ;;  %v6644_v40 = vld [vmem:[%s8302_s1 + $0x2b0] ss:$8 sps:$4 sm:$0xff]   ;;  %v354_v5 = vld [vmem:[%s7047_s4 + $0x4c8] sm:$0xff] }
  0xda   : > { %4450 = vmatpush1.bf16.msra.mxu0 %v6599_v41  ;;  %3679 = vmatprep.subr.bf16.mxu1 %v6604_v42  ;;  %v6647_v41 = vld [vmem:[%s8302_s1 + $0x6b0] ss:$8 sps:$4 sm:$0xff]   ;;  %v6652_v42 = vld [vmem:[%s8302_s1 + $0x2c4] ss:$8 sps:$4 sm:$0xff]  }
  0xdb   : > { %4451 = vmatprep.subr.bf16.mxu0 %v6607_v43  ;;  %3531 = vmatmul.mubr.bf16.gmra.mrb[8].mxu1 %v5283_v44  ;;  %v6655_v43 = vld [vmem:[%s8302_s1 + $0x6c4] ss:$8 sps:$4 sm:$0xff]   ;;  %v5347_v44 = vcombine.low %v298_v20, %v306_v21  ;;  %v5395_v20 = vcombine.low %v346_v4, %v354_v5 }
  0xdc   : > { %4303 = vmatmul.mubr.bf16.gmra.mrb[8].mxu0 %v5291_v45  ;;  %3540 = vmatprep.mubr.bf16.mxu1 %v5300_v46  ;;  %v5355_v45 = vcombine.low %v302_v22, %v310_v23  ;;  %v5364_v46 = vcombine.high %v314_v36, %v322_v37  ;;  %v350_v6 = vld [vmem:[%s7047_s4 + $0x4a8] sm:$0xff] }
  0xdd   : > { %4312 = vmatprep.mubr.bf16.mxu0 %v5308_v47  ;;  %3680 = vmatpush1.bf16.msra.mxu1 %v6602_v48  ;;  %v5372_v47 = vcombine.high %v318_v38, %v326_v39  ;;  %v6650_v48 = vld [vmem:[%s8302_s1 + $0x2c0] ss:$8 sps:$4 sm:$0xff]  }
  0xde   : > { %4452 = vmatpush1.bf16.msra.mxu0 %v6605_v49  ;;  %3681 = vmatprep.subr.bf16.mxu1 %v6610_v50  ;;  %v6653_v49 = vld [vmem:[%s8302_s1 + $0x6c0] ss:$8 sps:$4 sm:$0xff]   ;;  %v6658_v50 = vld [vmem:[%s8302_s1 + $0x2d4] ss:$8 sps:$4 sm:$0xff]  }
  0xdf   : > { %4453 = vmatprep.subr.bf16.mxu0 %v6613_v51  ;;  %v6661_v51 = vld [vmem:[%s8302_s1 + $0x6d4] ss:$8 sps:$4 sm:$0xff]   ;;  %v358_v7 = vld [vmem:[%s7047_s4 + $0x4e8] sm:$0xff] }
  0xe0   : > { %v5403_v21 = vcombine.low %v350_v6, %v358_v7 }
  0xe1   : > { %3682 = vmatpush1.bf16.msra.mxu1 %v6608_v56  ;;  %v6656_v56 = vld [vmem:[%s8302_s1 + $0x2d0] ss:$8 sps:$4 sm:$0xff]  }
  0xe2   : > { %4454 = vmatpush1.bf16.msra.mxu0 %v6611_v57  ;;  %3683 = vmatprep.subr.bf16.mxu1 %v6616_v58  ;;  %v6659_v57 = vld [vmem:[%s8302_s1 + $0x6d0] ss:$8 sps:$4 sm:$0xff]   ;;  %v6664_v58 = vld [vmem:[%s8302_s1 + $0x2e4] ss:$8 sps:$4 sm:$0xff]  }
  0xe3   : > { %4455 = vmatprep.subr.bf16.mxu0 %v6619_v59  ;;  %3541 = vmatmul.mubr.bf16.gmra.mrb[12].mxu1 %v5299_v60  ;;  %v6667_v59 = vld [vmem:[%s8302_s1 + $0x6e4] ss:$8 sps:$4 sm:$0xff]   ;;  %v5363_v60 = vcombine.low %v314_v36, %v322_v37 }
  0xe4   : > { %4313 = vmatmul.mubr.bf16.gmra.mrb[12].mxu0 %v5307_v61  ;;  %3550 = vmatprep.mubr.bf16.mxu1 %v5316_v62  ;;  %v5371_v61 = vcombine.low %v318_v38, %v326_v39  ;;  %v5380_v62 = vcombine.high %v330_v52, %v338_v53 }
  0xe5   : > { %4322 = vmatprep.mubr.bf16.mxu0 %v5324_v63  ;;  %3684 = vmatpush1.bf16.msra.mxu1 %v6614_v0  ;;  %v5388_v63 = vcombine.high %v334_v54, %v342_v55  ;;  %v6662_v0 = vld [vmem:[%s8302_s1 + $0x2e0] ss:$8 sps:$4 sm:$0xff]  }
  0xe6   : > { %4456 = vmatpush1.bf16.msra.mxu0 %v6617_v1  ;;  %3685 = vmatprep.subr.bf16.mxu1 %v6622_v2  ;;  %v6665_v1 = vld [vmem:[%s8302_s1 + $0x6e0] ss:$8 sps:$4 sm:$0xff]   ;;  %v6670_v2 = vld [vmem:[%s8302_s1 + $0x2f4] ss:$8 sps:$4 sm:$0xff]  }
  0xe7   : > { %4457 = vmatprep.subr.bf16.mxu0 %v6625_v3  ;;  %v6673_v3 = vld [vmem:[%s8302_s1 + $0x6f4] ss:$8 sps:$4 sm:$0xff]  }
  0xe9   : > { %3686 = vmatpush1.bf16.msra.mxu1 %v6620_v8  ;;  %v6668_v8 = vld [vmem:[%s8302_s1 + $0x2f0] ss:$8 sps:$4 sm:$0xff]  }
  0xea   : > { %4458 = vmatpush1.bf16.msra.mxu0 %v6623_v9  ;;  %3687 = vmatprep.subr.bf16.mxu1 %v6628_v10  ;;  %v6671_v9 = vld [vmem:[%s8302_s1 + $0x6f0] ss:$8 sps:$4 sm:$0xff]   ;;  %v6676_v10 = vld [vmem:[%s8302_s1 + $0x304] ss:$8 sps:$4 sm:$0xff]  }
  0xeb   : > { %4459 = vmatprep.subr.bf16.mxu0 %v6631_v11  ;;  %3551 = vmatmul.mubr.bf16.gmra.mrb[16].mxu1 %v5315_v12  ;;  %v6679_v11 = vld [vmem:[%s8302_s1 + $0x704] ss:$8 sps:$4 sm:$0xff]   ;;  %v5379_v12 = vcombine.low %v330_v52, %v338_v53 }
  0xec   : > { %4323 = vmatmul.mubr.bf16.gmra.mrb[16].mxu0 %v5323_v13  ;;  %3560 = vmatprep.mubr.bf16.mxu1 %v5332_v14  ;;  %v5387_v13 = vcombine.low %v334_v54, %v342_v55  ;;  %v5396_v14 = vcombine.high %v346_v4, %v354_v5 }
  0xed   : > { %4332 = vmatprep.mubr.bf16.mxu0 %v5340_v15  ;;  %3688 = vmatpush1.bf16.msra.mxu1 %v6626_v16  ;;  %v5404_v15 = vcombine.high %v350_v6, %v358_v7  ;;  %v362_v16 = vld [vmem:[%s7047_s4 + $0x508] sm:$0xff] }
  0xee   : > { %4460 = vmatpush1.bf16.msra.mxu0 %v6629_v17  ;;  %3689 = vmatprep.subr.bf16.mxu1 %v6634_v18  ;;  %v370_v17 = vld [vmem:[%s7047_s4 + $0x548] sm:$0xff] }
  0xef   : > { %4461 = vmatprep.subr.bf16.mxu0 %v6637_v19  ;;  %v366_v18 = vld [vmem:[%s7047_s4 + $0x528] sm:$0xff]  ;;  %v5412_v22 = vcombine.high %v362_v16, %v370_v17 }
  0xf0   : > { %v374_v19 = vld [vmem:[%s7047_s4 + $0x568] sm:$0xff] }
  0xf1   : > { %3690 = vmatpush1.bf16.msra.mxu1 %v6632_v24  ;;  %v5420_v23 = vcombine.high %v366_v18, %v374_v19  ;;  %v378_v24 = vld [vmem:[%s7047_s4 + $0x588] sm:$0xff] }
  0xf2   : > { %4462 = vmatpush1.bf16.msra.mxu0 %v6635_v25  ;;  %3691 = vmatprep.subr.bf16.mxu1 %v6640_v26  ;;  %v386_v25 = vld [vmem:[%s7047_s4 + $0x5c8] sm:$0xff] }
  0xf3   : > { %4463 = vmatprep.subr.bf16.mxu0 %v6643_v27  ;;  %3561 = vmatmul.mubr.bf16.gmra.mrb[20].mxu1 %v5331_v28  ;;  %v382_v26 = vld [vmem:[%s7047_s4 + $0x5a8] sm:$0xff]  ;;  %v5411_v28 = vcombine.low %v362_v16, %v370_v17  ;;  %v5427_v36 = vcombine.low %v378_v24, %v386_v25 }
  0xf4   : > { %4333 = vmatmul.mubr.bf16.gmra.mrb[20].mxu0 %v5339_v29  ;;  %3570 = vmatprep.mubr.bf16.mxu1 %v5348_v30  ;;  %v390_v27 = vld [vmem:[%s7047_s4 + $0x5e8] sm:$0xff]  ;;  %v5419_v29 = vcombine.low %v366_v18, %v374_v19  ;;  %v5428_v30 = vcombine.high %v378_v24, %v386_v25  ;;  %v6682_v18 = vld [vmem:[%s8302_s1 + $0x314] ss:$8 sps:$4 sm:$0xff]  }
  0xf5   : > { %4342 = vmatprep.mubr.bf16.mxu0 %v5356_v31  ;;  %3692 = vmatpush1.bf16.msra.mxu1 %v6638_v32  ;;  %v5436_v31 = vcombine.high %v382_v26, %v390_v27  ;;  %v394_v32 = vld [vmem:[%s7047_s4 + $0x608] sm:$0xff]  ;;  %v5435_v37 = vcombine.low %v382_v26, %v390_v27  ;;  %v6685_v19 = vld [vmem:[%s8302_s1 + $0x714] ss:$8 sps:$4 sm:$0xff]  }
  0xf6   : > { %4464 = vmatpush1.bf16.msra.mxu0 %v6641_v33  ;;  %3693 = vmatprep.subr.bf16.mxu1 %v6646_v34  ;;  %v402_v33 = vld [vmem:[%s7047_s4 + $0x648] sm:$0xff]  ;;  %v239_v24 = vld [vmem:[%s7047_s4 + $0x130] sm:$0xff] }
  0xf7   : > { %4465 = vmatprep.subr.bf16.mxu0 %v6649_v35  ;;  %v398_v34 = vld [vmem:[%s7047_s4 + $0x628] sm:$0xff]  ;;  %v5444_v38 = vcombine.high %v394_v32, %v402_v33  ;;  %v247_v25 = vld [vmem:[%s7047_s4 + $0x170] sm:$0xff] }
  0xf8   : > { %v406_v35 = vld [vmem:[%s7047_s4 + $0x668] sm:$0xff] }
  0xf9   : > { %3694 = vmatpush1.bf16.msra.mxu1 %v6644_v40  ;;  %v5452_v39 = vcombine.high %v398_v34, %v406_v35  ;;  %v410_v40 = vld [vmem:[%s7047_s4 + $0x688] sm:$0xff] }
  0xfa   : > { %4466 = vmatpush1.bf16.msra.mxu0 %v6647_v41  ;;  %3695 = vmatprep.subr.bf16.mxu1 %v6652_v42  ;;  %v418_v41 = vld [vmem:[%s7047_s4 + $0x6c8] sm:$0xff] }
  0xfb   : > { %4467 = vmatprep.subr.bf16.mxu0 %v6655_v43  ;;  %3571 = vmatmul.mubr.bf16.gmra.mrb[24].mxu1 %v5347_v44  ;;  %v414_v42 = vld [vmem:[%s7047_s4 + $0x6a8] sm:$0xff]  ;;  %v5443_v44 = vcombine.low %v394_v32, %v402_v33  ;;  %v5459_v52 = vcombine.low %v410_v40, %v418_v41 }
  0xfc   : > { %4343 = vmatmul.mubr.bf16.gmra.mrb[24].mxu0 %v5355_v45  ;;  %3580 = vmatprep.mubr.bf16.mxu1 %v5364_v46  ;;  %v422_v43 = vld [vmem:[%s7047_s4 + $0x6e8] sm:$0xff]  ;;  %v5451_v45 = vcombine.low %v398_v34, %v406_v35  ;;  %v5460_v46 = vcombine.high %v410_v40, %v418_v41  ;;  %v6694_v34 = vld [vmem:[%s8302_s1 + $0x334] ss:$8 sps:$4 sm:$0xff]   ;;  %v6692_v40 = vld [vmem:[%s8302_s1 + $0x330] ss:$8 sps:$4 sm:$0xff]  }
  0xfd   : > { %4352 = vmatprep.mubr.bf16.mxu0 %v5372_v47  ;;  %3696 = vmatpush1.bf16.msra.mxu1 %v6650_v48  ;;  %v5468_v47 = vcombine.high %v414_v42, %v422_v43  ;;  %v426_v48 = vld [vmem:[%s7047_s4 + $0x708] sm:$0xff]  ;;  %v5467_v53 = vcombine.low %v414_v42, %v422_v43  ;;  %v6697_v35 = vld [vmem:[%s8302_s1 + $0x734] ss:$8 sps:$4 sm:$0xff]   ;;  %v6695_v41 = vld [vmem:[%s8302_s1 + $0x730] ss:$8 sps:$4 sm:$0xff]  }
  0xfe   : > { %4468 = vmatpush1.bf16.msra.mxu0 %v6653_v49  ;;  %3697 = vmatprep.subr.bf16.mxu1 %v6658_v50  ;;  %v434_v49 = vld [vmem:[%s7047_s4 + $0x748] sm:$0xff] }
  0xff   : > { %4469 = vmatprep.subr.bf16.mxu0 %v6661_v51  ;;  %v430_v50 = vld [vmem:[%s7047_s4 + $0x728] sm:$0xff]  ;;  %v5476_v54 = vcombine.high %v426_v48, %v434_v49 }
 0x100   : > { %v438_v51 = vld [vmem:[%s7047_s4 + $0x768] sm:$0xff] }
 0x101   : > { %3698 = vmatpush1.bf16.msra.mxu1 %v6656_v56  ;;  %v5484_v55 = vcombine.high %v430_v50, %v438_v51  ;;  %v442_v56 = vld [vmem:[%s7047_s4 + $0x788] sm:$0xff] }
 0x102   : > { %4470 = vmatpush1.bf16.msra.mxu0 %v6659_v57  ;;  %3699 = vmatprep.subr.bf16.mxu1 %v6664_v58  ;;  %v450_v57 = vld [vmem:[%s7047_s4 + $0x7c8] sm:$0xff] }
 0x103   : > { %4471 = vmatprep.subr.bf16.mxu0 %v6667_v59  ;;  %3581 = vmatmul.mubr.bf16.gmra.mrb[28].mxu1 %v5363_v60  ;;  %v446_v58 = vld [vmem:[%s7047_s4 + $0x7a8] sm:$0xff]  ;;  %v5475_v60 = vcombine.low %v426_v48, %v434_v49  ;;  %v5491_v4 = vcombine.low %v442_v56, %v450_v57 }
 0x104   : > { %4353 = vmatmul.mubr.bf16.gmra.mrb[28].mxu0 %v5371_v61  ;;  %3590 = vmatprep.mubr.bf16.mxu1 %v5380_v62  ;;  %v454_v59 = vld [vmem:[%s7047_s4 + $0x7e8] sm:$0xff]  ;;  %v5483_v61 = vcombine.low %v430_v50, %v438_v51  ;;  %v5492_v62 = vcombine.high %v442_v56, %v450_v57  ;;  %v6706_v50 = vld [vmem:[%s8302_s1 + $0x354] ss:$8 sps:$4 sm:$0xff]   ;;  %v6704_v56 = vld [vmem:[%s8302_s1 + $0x350] ss:$8 sps:$4 sm:$0xff]  }
 0x105   : > { %4362 = vmatprep.mubr.bf16.mxu0 %v5388_v63  ;;  %3700 = vmatpush1.bf16.msra.mxu1 %v6662_v0  ;;  %v5500_v63 = vcombine.high %v446_v58, %v454_v59  ;;  %v203_v0 = vld [vmem:[%s7047_s4 + $0x10] sm:$0xff]  ;;  %v5499_v5 = vcombine.low %v446_v58, %v454_v59  ;;  %v6688_v26 = vld [vmem:[%s8302_s1 + $0x324] ss:$8 sps:$4 sm:$0xff]   ;;  %v6686_v32 = vld [vmem:[%s8302_s1 + $0x320] ss:$8 sps:$4 sm:$0xff]  }
 0x106   : > { %4472 = vmatpush1.bf16.msra.mxu0 %v6665_v1  ;;  %3701 = vmatprep.subr.bf16.mxu1 %v6670_v2  ;;  %v211_v1 = vld [vmem:[%s7047_s4 + $0x50] sm:$0xff]  ;;  %v6691_v27 = vld [vmem:[%s8302_s1 + $0x724] ss:$8 sps:$4 sm:$0xff]   ;;  %v6689_v33 = vld [vmem:[%s8302_s1 + $0x720] ss:$8 sps:$4 sm:$0xff]  }
 0x107   : > { %4473 = vmatprep.subr.bf16.mxu0 %v6673_v3  ;;  %v207_v2 = vld [vmem:[%s7047_s4 + $0x30] sm:$0xff]  ;;  %v5254_v6 = vcombine.high %v203_v0, %v211_v1  ;;  %v6700_v42 = vld [vmem:[%s8302_s1 + $0x344] ss:$8 sps:$4 sm:$0xff]   ;;  %v6698_v48 = vld [vmem:[%s8302_s1 + $0x340] ss:$8 sps:$4 sm:$0xff]  }
 0x108   : > { %v215_v3 = vld [vmem:[%s7047_s4 + $0x70] sm:$0xff]  ;;  %v6703_v43 = vld [vmem:[%s8302_s1 + $0x744] ss:$8 sps:$4 sm:$0xff]   ;;  %v6701_v49 = vld [vmem:[%s8302_s1 + $0x740] ss:$8 sps:$4 sm:$0xff]  }
 0x109   : > { %3702 = vmatpush1.bf16.msra.mxu1 %v6668_v8  ;;  %v5262_v7 = vcombine.high %v207_v2, %v215_v3  ;;  %v219_v8 = vld [vmem:[%s7047_s4 + $0x90] sm:$0xff]  ;;  %v6712_v58 = vld [vmem:[%s8302_s1 + $0x364] ss:$8 sps:$4 sm:$0xff]  }
 0x10a   : > { %4474 = vmatpush1.bf16.msra.mxu0 %v6671_v9  ;;  %3864 = vmatprep.subr.bf16.mxu1 %v6676_v10  ;;  %v227_v9 = vld [vmem:[%s7047_s4 + $0xd0] sm:$0xff]  ;;  %v6715_v59 = vld [vmem:[%s8302_s1 + $0x764] ss:$8 sps:$4 sm:$0xff]  }
 0x10b   : > { %4636 = vmatprep.subr.bf16.mxu0 %v6679_v11  ;;  %3591 = vmatmul.mubr.bf16.gmra.mrb[32].mxu1 %v5379_v12  ;;  %v223_v10 = vld [vmem:[%s7047_s4 + $0xb0] sm:$0xff]  ;;  %v5253_v12 = vcombine.low %v203_v0, %v211_v1  ;;  %v5270_v16 = vcombine.high %v219_v8, %v227_v9  ;;  %v6710_v0 = vld [vmem:[%s8302_s1 + $0x360] ss:$8 sps:$4 sm:$0xff]  }
 0x10c   : > { %4363 = vmatmul.mubr.bf16.gmra.mrb[32].mxu0 %v5387_v13  ;;  %3600 = vmatprep.mubr.bf16.mxu1 %v5396_v14  ;;  %v231_v11 = vld [vmem:[%s7047_s4 + $0xf0] sm:$0xff]  ;;  %v5261_v13 = vcombine.low %v207_v2, %v215_v3  ;;  %v6674_v14 = vld [vmem:[%s8302_s1 + $0x300] ss:$8 sps:$4 sm:$0xff]  }
 0x10d   : > { %4372 = vmatprep.mubr.bf16.mxu0 %v5404_v15  ;;  %v6677_v15 = vld [vmem:[%s8302_s1 + $0x700] ss:$8 sps:$4 sm:$0xff]   ;;  %v5278_v17 = vcombine.high %v223_v10, %v231_v11  ;;  %v6709_v51 = vld [vmem:[%s8302_s1 + $0x754] ss:$8 sps:$4 sm:$0xff]   ;;  %v6707_v57 = vld [vmem:[%s8302_s1 + $0x750] ss:$8 sps:$4 sm:$0xff]  }
 0x10e   : > { %v6713_v1 = vld [vmem:[%s8302_s1 + $0x760] ss:$8 sps:$4 sm:$0xff]   ;;  %v6718_v2 = vld [vmem:[%s8302_s1 + $0x374] ss:$8 sps:$4 sm:$0xff]  }
 0x10f   : > { %v6721_v3 = vld [vmem:[%s8302_s1 + $0x774] ss:$8 sps:$4 sm:$0xff]  }
 0x113   : > { %3601 = vmatmul.mubr.bf16.gmra.mrb[36].mxu1 %v5395_v20  ;;  %v6680_v20 = vld [vmem:[%s8302_s1 + $0x310] ss:$8 sps:$4 sm:$0xff]  }
 0x114   : > { %4373 = vmatmul.mubr.bf16.gmra.mrb[36].mxu0 %v5403_v21  ;;  %3610 = vmatprep.mubr.bf16.mxu1 %v5412_v22  ;;  %v6683_v21 = vld [vmem:[%s8302_s1 + $0x710] ss:$8 sps:$4 sm:$0xff]  }
 0x115   : > { %4382 = vmatprep.mubr.bf16.mxu0 %v5420_v23  ;;  %v235_v22 = vld [vmem:[%s7047_s4 + $0x110] sm:$0xff] }
 0x116   : > { %v243_v23 = vld [vmem:[%s7047_s4 + $0x150] sm:$0xff] }
 0x11b   : > { %3611 = vmatmul.mubr.bf16.gmra.mrb[40].mxu1 %v5411_v28  ;;  %v5269_v28 = vcombine.low %v219_v8, %v227_v9  ;;  %v6716_v8 = vld [vmem:[%s8302_s1 + $0x370] ss:$8 sps:$4 sm:$0xff]  }
 0x11c   : > { %4383 = vmatmul.mubr.bf16.gmra.mrb[40].mxu0 %v5419_v29  ;;  %3620 = vmatprep.mubr.bf16.mxu1 %v5428_v30  ;;  %v5277_v29 = vcombine.low %v223_v10, %v231_v11  ;;  %v5286_v30 = vcombine.high %v235_v22, %v243_v23  ;;  %v6719_v9 = vld [vmem:[%s8302_s1 + $0x770] ss:$8 sps:$4 sm:$0xff]   ;;  %v6724_v10 = vld [vmem:[%s8302_s1 + $0x384] ss:$8 sps:$4 sm:$0xff]  }
 0x11d   : > { %4392 = vmatprep.mubr.bf16.mxu0 %v5436_v31  ;;  %v5294_v31 = vcombine.high %v239_v24, %v247_v25  ;;  %v6727_v11 = vld [vmem:[%s8302_s1 + $0x784] ss:$8 sps:$4 sm:$0xff]  }
 0x123   : > { %3621 = vmatmul.mubr.bf16.gmra.mrb[44].mxu1 %v5427_v36  ;;  %v251_v36 = vld [vmem:[%s7047_s4 + $0x190] sm:$0xff] }
 0x124   : > { %4393 = vmatmul.mubr.bf16.gmra.mrb[44].mxu0 %v5435_v37  ;;  %3630 = vmatprep.mubr.bf16.mxu1 %v5444_v38  ;;  %v259_v37 = vld [vmem:[%s7047_s4 + $0x1d0] sm:$0xff] }
 0x125   : > { %4402 = vmatprep.mubr.bf16.mxu0 %v5452_v39  ;;  %v255_v38 = vld [vmem:[%s7047_s4 + $0x1b0] sm:$0xff] }
 0x126   : > { %v263_v39 = vld [vmem:[%s7047_s4 + $0x1f0] sm:$0xff] }
 0x12b   : > { %3631 = vmatmul.mubr.bf16.gmra.mrb[48].mxu1 %v5443_v44  ;;  %v5285_v44 = vcombine.low %v235_v22, %v243_v23  ;;  %v303_v22 = vld [vmem:[%s7047_s4 + $0x330] sm:$0xff] }
 0x12c   : > { %4403 = vmatmul.mubr.bf16.gmra.mrb[48].mxu0 %v5451_v45  ;;  %3640 = vmatprep.mubr.bf16.mxu1 %v5460_v46  ;;  %v5293_v45 = vcombine.low %v239_v24, %v247_v25  ;;  %v5302_v46 = vcombine.high %v251_v36, %v259_v37  ;;  %v311_v23 = vld [vmem:[%s7047_s4 + $0x370] sm:$0xff] }
 0x12d   : > { %4412 = vmatprep.mubr.bf16.mxu0 %v5468_v47  ;;  %v5310_v47 = vcombine.high %v255_v38, %v263_v39  ;;  %v6728_v24 = vld [vmem:[%s8302_s1 + $0x390] ss:$8 sps:$4 sm:$0xff]  }
 0x12e   : > { %v6731_v25 = vld [vmem:[%s8302_s1 + $0x790] ss:$8 sps:$4 sm:$0xff]  }
 0x133   : > { %3641 = vmatmul.mubr.bf16.gmra.mrb[52].mxu1 %v5459_v52  ;;  %v267_v52 = vld [vmem:[%s7047_s4 + $0x210] sm:$0xff] }
 0x134   : > { %4413 = vmatmul.mubr.bf16.gmra.mrb[52].mxu0 %v5467_v53  ;;  %3650 = vmatprep.mubr.bf16.mxu1 %v5476_v54  ;;  %v275_v53 = vld [vmem:[%s7047_s4 + $0x250] sm:$0xff] }
 0x135   : > { %4422 = vmatprep.mubr.bf16.mxu0 %v5484_v55  ;;  %v271_v54 = vld [vmem:[%s7047_s4 + $0x230] sm:$0xff] }
 0x136   : > { %v279_v55 = vld [vmem:[%s7047_s4 + $0x270] sm:$0xff] }
 0x13b   : > { %3651 = vmatmul.mubr.bf16.gmra.mrb[56].mxu1 %v5475_v60  ;;  %v5301_v60 = vcombine.low %v251_v36, %v259_v37  ;;  %v315_v36 = vld [vmem:[%s7047_s4 + $0x390] sm:$0xff] }
 0x13c   : > { %4423 = vmatmul.mubr.bf16.gmra.mrb[56].mxu0 %v5483_v61  ;;  %3660 = vmatprep.mubr.bf16.mxu1 %v5492_v62  ;;  %v5309_v61 = vcombine.low %v255_v38, %v263_v39  ;;  %v5318_v62 = vcombine.high %v267_v52, %v275_v53  ;;  %v323_v37 = vld [vmem:[%s7047_s4 + $0x3d0] sm:$0xff] }
 0x13d   : > { %4432 = vmatprep.mubr.bf16.mxu0 %v5500_v63  ;;  %v5326_v63 = vcombine.high %v271_v54, %v279_v55  ;;  %v319_v38 = vld [vmem:[%s7047_s4 + $0x3b0] sm:$0xff] }
 0x13e   : > { %v327_v39 = vld [vmem:[%s7047_s4 + $0x3f0] sm:$0xff] }
 0x143   : > { %3661 = vmatmul.mubr.bf16.gmra.mrb[60].mxu1 %v5491_v4  ;;  %v283_v4 = vld [vmem:[%s7047_s4 + $0x290] sm:$0xff] }
 0x144   : > { %4433 = vmatmul.mubr.bf16.gmra.mrb[60].mxu0 %v5499_v5  ;;  %3703 = vmatprep.mubr.bf16.mxu1 %v5254_v6  ;;  %v291_v5 = vld [vmem:[%s7047_s4 + $0x2d0] sm:$0xff] }
 0x145   : > { %4475 = vmatprep.mubr.bf16.mxu0 %v5262_v7  ;;  %v287_v6 = vld [vmem:[%s7047_s4 + $0x2b0] sm:$0xff] }
 0x146   : > { %v295_v7 = vld [vmem:[%s7047_s4 + $0x2f0] sm:$0xff] }
 0x14b   : > { %3704 = vmatmul.mubr.bf16.vlgmr.msra.gmra.mrb[0].mxu1 %v5253_v12  ;;  %v5317_v12 = vcombine.low %v267_v52, %v275_v53  ;;  %v331_v52 = vld [vmem:[%s7047_s4 + $0x410] sm:$0xff] }
 0x14c   : > { %4476 = vmatmul.mubr.bf16.vlgmr.msra.gmra.mrb[0].mxu0 %v5261_v13  ;;  %3865 = vmatpush1.bf16.msra.mxu1 %v6674_v14  ;;  %v5325_v13 = vcombine.low %v271_v54, %v279_v55  ;;  %v5334_v14 = vcombine.high %v283_v4, %v291_v5  ;;  %v339_v53 = vld [vmem:[%s7047_s4 + $0x450] sm:$0xff] }
 0x14d   : > { %4637 = vmatpush1.bf16.msra.mxu0 %v6677_v15  ;;  %3713 = vmatprep.mubr.bf16.mxu1 %v5270_v16  ;;  %v5342_v15 = vcombine.high %v287_v6, %v295_v7  ;;  %v6722_v16 = vld [vmem:[%s8302_s1 + $0x380] ss:$8 sps:$4 sm:$0xff]   ;;  %v335_v54 = vld [vmem:[%s7047_s4 + $0x430] sm:$0xff] }
 0x14e   : > { %4485 = vmatprep.mubr.bf16.mxu0 %v5278_v17  ;;  %3866 = vmatprep.subr.bf16.mxu1 %v6682_v18  ;;  %v6725_v17 = vld [vmem:[%s8302_s1 + $0x780] ss:$8 sps:$4 sm:$0xff]   ;;  %v6730_v18 = vld [vmem:[%s8302_s1 + $0x394] ss:$8 sps:$4 sm:$0xff]  }
 0x14f   : > { %4638 = vmatprep.subr.bf16.mxu0 %v6685_v19  ;;  %v6733_v19 = vld [vmem:[%s8302_s1 + $0x794] ss:$8 sps:$4 sm:$0xff]  }
 0x150   : > { %3867 = vmatpush1.bf16.msra.mxu1 %v6680_v20  ;;  %v299_v20 = vld [vmem:[%s7047_s4 + $0x310] sm:$0xff] }
 0x151   : > { %4639 = vmatpush1.bf16.msra.mxu0 %v6683_v21  ;;  %3868 = vmatprep.subr.bf16.mxu1 %v6688_v26  ;;  %v307_v21 = vld [vmem:[%s7047_s4 + $0x350] sm:$0xff]  ;;  %v6736_v26 = vld [vmem:[%s8302_s1 + $0x3a4] ss:$8 sps:$4 sm:$0xff]  }
 0x152   : > { %4640 = vmatprep.subr.bf16.mxu0 %v6691_v27  ;;  %v6739_v27 = vld [vmem:[%s8302_s1 + $0x7a4] ss:$8 sps:$4 sm:$0xff]   ;;  %v343_v55 = vld [vmem:[%s7047_s4 + $0x470] sm:$0xff] }
 0x153   : > { %3714 = vmatmul.mubr.bf16.gmra.mrb[4].mxu1 %v5269_v28  ;;  %v5333_v28 = vcombine.low %v283_v4, %v291_v5  ;;  %v347_v4 = vld [vmem:[%s7047_s4 + $0x490] sm:$0xff] }
 0x154   : > { %4486 = vmatmul.mubr.bf16.gmra.mrb[4].mxu0 %v5277_v29  ;;  %3723 = vmatprep.mubr.bf16.mxu1 %v5286_v30  ;;  %v5341_v29 = vcombine.low %v287_v6, %v295_v7  ;;  %v5350_v30 = vcombine.high %v299_v20, %v307_v21  ;;  %v355_v5 = vld [vmem:[%s7047_s4 + $0x4d0] sm:$0xff] }
 0x155   : > { %4495 = vmatprep.mubr.bf16.mxu0 %v5294_v31  ;;  %3869 = vmatpush1.bf16.msra.mxu1 %v6686_v32  ;;  %v5358_v31 = vcombine.high %v303_v22, %v311_v23  ;;  %v6734_v32 = vld [vmem:[%s8302_s1 + $0x3a0] ss:$8 sps:$4 sm:$0xff]   ;;  %v351_v6 = vld [vmem:[%s7047_s4 + $0x4b0] sm:$0xff] }
 0x156   : > { %4641 = vmatpush1.bf16.msra.mxu0 %v6689_v33  ;;  %3870 = vmatprep.subr.bf16.mxu1 %v6694_v34  ;;  %v6737_v33 = vld [vmem:[%s8302_s1 + $0x7a0] ss:$8 sps:$4 sm:$0xff]   ;;  %v6742_v34 = vld [vmem:[%s8302_s1 + $0x3b4] ss:$8 sps:$4 sm:$0xff]  }
 0x157   : > { %4642 = vmatprep.subr.bf16.mxu0 %v6697_v35  ;;  %v6745_v35 = vld [vmem:[%s8302_s1 + $0x7b4] ss:$8 sps:$4 sm:$0xff]  }
 0x158   : > { %v359_v7 = vld [vmem:[%s7047_s4 + $0x4f0] sm:$0xff] }
 0x159   : > { %3871 = vmatpush1.bf16.msra.mxu1 %v6692_v40  ;;  %v6740_v40 = vld [vmem:[%s8302_s1 + $0x3b0] ss:$8 sps:$4 sm:$0xff]  }
 0x15a   : > { %4643 = vmatpush1.bf16.msra.mxu0 %v6695_v41  ;;  %3872 = vmatprep.subr.bf16.mxu1 %v6700_v42  ;;  %v6743_v41 = vld [vmem:[%s8302_s1 + $0x7b0] ss:$8 sps:$4 sm:$0xff]   ;;  %v6748_v42 = vld [vmem:[%s8302_s1 + $0x3c4] ss:$8 sps:$4 sm:$0xff]  }
 0x15b   : > { %4644 = vmatprep.subr.bf16.mxu0 %v6703_v43  ;;  %3724 = vmatmul.mubr.bf16.gmra.mrb[8].mxu1 %v5285_v44  ;;  %v6751_v43 = vld [vmem:[%s8302_s1 + $0x7c4] ss:$8 sps:$4 sm:$0xff]   ;;  %v5349_v44 = vcombine.low %v299_v20, %v307_v21 }
 0x15c   : > { %4496 = vmatmul.mubr.bf16.gmra.mrb[8].mxu0 %v5293_v45  ;;  %3733 = vmatprep.mubr.bf16.mxu1 %v5302_v46  ;;  %v5357_v45 = vcombine.low %v303_v22, %v311_v23  ;;  %v5366_v46 = vcombine.high %v315_v36, %v323_v37  ;;  %v379_v22 = vld [vmem:[%s7047_s4 + $0x590] sm:$0xff] }
 0x15d   : > { %4505 = vmatprep.mubr.bf16.mxu0 %v5310_v47  ;;  %3873 = vmatpush1.bf16.msra.mxu1 %v6698_v48  ;;  %v5374_v47 = vcombine.high %v319_v38, %v327_v39  ;;  %v6746_v48 = vld [vmem:[%s8302_s1 + $0x3c0] ss:$8 sps:$4 sm:$0xff]   ;;  %v387_v23 = vld [vmem:[%s7047_s4 + $0x5d0] sm:$0xff] }
 0x15e   : > { %4645 = vmatpush1.bf16.msra.mxu0 %v6701_v49  ;;  %3874 = vmatprep.subr.bf16.mxu1 %v6706_v50  ;;  %v6749_v49 = vld [vmem:[%s8302_s1 + $0x7c0] ss:$8 sps:$4 sm:$0xff]   ;;  %v6754_v50 = vld [vmem:[%s8302_s1 + $0x3d4] ss:$8 sps:$4 sm:$0xff]  }
 0x15f   : > { %4646 = vmatprep.subr.bf16.mxu0 %v6709_v51  ;;  %v6757_v51 = vld [vmem:[%s8302_s1 + $0x7d4] ss:$8 sps:$4 sm:$0xff]  }
 0x161   : > { %3875 = vmatpush1.bf16.msra.mxu1 %v6704_v56  ;;  %v6752_v56 = vld [vmem:[%s8302_s1 + $0x3d0] ss:$8 sps:$4 sm:$0xff]  }
 0x162   : > { %4647 = vmatpush1.bf16.msra.mxu0 %v6707_v57  ;;  %3876 = vmatprep.subr.bf16.mxu1 %v6712_v58  ;;  %v6755_v57 = vld [vmem:[%s8302_s1 + $0x7d0] ss:$8 sps:$4 sm:$0xff]   ;;  %v6760_v58 = vld [vmem:[%s8302_s1 + $0x3e4] ss:$8 sps:$4 sm:$0xff]  }
 0x163   : > { %4648 = vmatprep.subr.bf16.mxu0 %v6715_v59  ;;  %3734 = vmatmul.mubr.bf16.gmra.mrb[12].mxu1 %v5301_v60  ;;  %v6763_v59 = vld [vmem:[%s8302_s1 + $0x7e4] ss:$8 sps:$4 sm:$0xff]   ;;  %v5365_v60 = vcombine.low %v315_v36, %v323_v37 }
 0x164   : > { %4506 = vmatmul.mubr.bf16.gmra.mrb[12].mxu0 %v5309_v61  ;;  %3743 = vmatprep.mubr.bf16.mxu1 %v5318_v62  ;;  %v5373_v61 = vcombine.low %v319_v38, %v327_v39  ;;  %v5382_v62 = vcombine.high %v331_v52, %v339_v53  ;;  %v411_v38 = vld [vmem:[%s7047_s4 + $0x690] sm:$0xff] }
 0x165   : > { %4515 = vmatprep.mubr.bf16.mxu0 %v5326_v63  ;;  %3877 = vmatpush1.bf16.msra.mxu1 %v6710_v0  ;;  %v5390_v63 = vcombine.high %v335_v54, %v343_v55  ;;  %v6758_v0 = vld [vmem:[%s8302_s1 + $0x3e0] ss:$8 sps:$4 sm:$0xff]   ;;  %v419_v39 = vld [vmem:[%s7047_s4 + $0x6d0] sm:$0xff] }
 0x166   : > { %4649 = vmatpush1.bf16.msra.mxu0 %v6713_v1  ;;  %3878 = vmatprep.subr.bf16.mxu1 %v6718_v2  ;;  %v6761_v1 = vld [vmem:[%s8302_s1 + $0x7e0] ss:$8 sps:$4 sm:$0xff]   ;;  %v6766_v2 = vld [vmem:[%s8302_s1 + $0x3f4] ss:$8 sps:$4 sm:$0xff]  }
 0x167   : > { %4650 = vmatprep.subr.bf16.mxu0 %v6721_v3  ;;  %v6769_v3 = vld [vmem:[%s8302_s1 + $0x7f4] ss:$8 sps:$4 sm:$0xff]  }
 0x169   : > { %3879 = vmatpush1.bf16.msra.mxu1 %v6716_v8  ;;  %v6764_v8 = vld [vmem:[%s8302_s1 + $0x3f0] ss:$8 sps:$4 sm:$0xff]  }
 0x16a   : > { %4651 = vmatpush1.bf16.msra.mxu0 %v6719_v9  ;;  %3880 = vmatprep.subr.bf16.mxu1 %v6724_v10  ;;  %v6767_v9 = vld [vmem:[%s8302_s1 + $0x7f0] ss:$8 sps:$4 sm:$0xff]   ;;  %v5381_v10 = vcombine.low %v331_v52, %v339_v53 }
 0x16b   : > { %4652 = vmatprep.subr.bf16.mxu0 %v6727_v11  ;;  %3744 = vmatmul.mubr.bf16.gmra.mrb[16].mxu1 %v5317_v12  ;;  %v5389_v11 = vcombine.low %v335_v54, %v343_v55  ;;  %v5398_v12 = vcombine.high %v347_v4, %v355_v5  ;;  %v443_v54 = vld [vmem:[%s7047_s4 + $0x790] sm:$0xff] }
 0x16c   : > { %4516 = vmatmul.mubr.bf16.gmra.mrb[16].mxu0 %v5325_v13  ;;  %3753 = vmatprep.mubr.bf16.mxu1 %v5334_v14  ;;  %v5406_v13 = vcombine.high %v351_v6, %v359_v7  ;;  %v363_v14 = vld [vmem:[%s7047_s4 + $0x510] sm:$0xff] }
 0x16d   : > { %4525 = vmatprep.mubr.bf16.mxu0 %v5342_v15  ;;  %3881 = vmatpush1.bf16.msra.mxu1 %v6722_v16  ;;  %v371_v15 = vld [vmem:[%s7047_s4 + $0x550] sm:$0xff] }
 0x16e   : > { %4653 = vmatpush1.bf16.msra.mxu0 %v6725_v17  ;;  %3882 = vmatprep.subr.bf16.mxu1 %v6730_v18  ;;  %v367_v16 = vld [vmem:[%s7047_s4 + $0x530] sm:$0xff]  ;;  %v5397_v18 = vcombine.low %v347_v4, %v355_v5  ;;  %v5414_v20 = vcombine.high %v363_v14, %v371_v15 }
 0x16f   : > { %4654 = vmatprep.subr.bf16.mxu0 %v6733_v19  ;;  %v375_v17 = vld [vmem:[%s7047_s4 + $0x570] sm:$0xff]  ;;  %v5405_v19 = vcombine.low %v351_v6, %v359_v7  ;;  %v220_v6 = vld [vmem:[%s7047_s4 + $0x98] sm:$0xff] }
 0x170   : > { %v5422_v21 = vcombine.high %v367_v16, %v375_v17  ;;  %v451_v55 = vld [vmem:[%s7047_s4 + $0x7d0] sm:$0xff]  ;;  %v228_v7 = vld [vmem:[%s7047_s4 + $0xd8] sm:$0xff] }
 0x171   : > { %3883 = vmatpush1.bf16.msra.mxu1 %v6728_v24  ;;  %v383_v24 = vld [vmem:[%s7047_s4 + $0x5b0] sm:$0xff] }
 0x172   : > { %4655 = vmatpush1.bf16.msra.mxu0 %v6731_v25  ;;  %3884 = vmatprep.subr.bf16.mxu1 %v6736_v26  ;;  %v391_v25 = vld [vmem:[%s7047_s4 + $0x5f0] sm:$0xff]  ;;  %v5413_v26 = vcombine.low %v363_v14, %v371_v15  ;;  %v236_v14 = vld [vmem:[%s7047_s4 + $0x118] sm:$0xff] }
 0x173   : > { %4656 = vmatprep.subr.bf16.mxu0 %v6739_v27  ;;  %3754 = vmatmul.mubr.bf16.gmra.mrb[20].mxu1 %v5333_v28  ;;  %v5421_v27 = vcombine.low %v367_v16, %v375_v17  ;;  %v5430_v28 = vcombine.high %v379_v22, %v387_v23  ;;  %v244_v15 = vld [vmem:[%s7047_s4 + $0x158] sm:$0xff] }
 0x174   : > { %4526 = vmatmul.mubr.bf16.gmra.mrb[20].mxu0 %v5341_v29  ;;  %3763 = vmatprep.mubr.bf16.mxu1 %v5350_v30  ;;  %v5438_v29 = vcombine.high %v383_v24, %v391_v25  ;;  %v395_v30 = vld [vmem:[%s7047_s4 + $0x610] sm:$0xff]  ;;  %v240_v16 = vld [vmem:[%s7047_s4 + $0x138] sm:$0xff] }
 0x175   : > { %4535 = vmatprep.mubr.bf16.mxu0 %v5358_v31  ;;  %3885 = vmatpush1.bf16.msra.mxu1 %v6734_v32  ;;  %v403_v31 = vld [vmem:[%s7047_s4 + $0x650] sm:$0xff]  ;;  %v248_v17 = vld [vmem:[%s7047_s4 + $0x178] sm:$0xff] }
 0x176   : > { %4657 = vmatpush1.bf16.msra.mxu0 %v6737_v33  ;;  %3886 = vmatprep.subr.bf16.mxu1 %v6742_v34  ;;  %v399_v32 = vld [vmem:[%s7047_s4 + $0x630] sm:$0xff]  ;;  %v5429_v34 = vcombine.low %v379_v22, %v387_v23  ;;  %v5446_v36 = vcombine.high %v395_v30, %v403_v31  ;;  %v252_v22 = vld [vmem:[%s7047_s4 + $0x198] sm:$0xff] }
 0x177   : > { %4658 = vmatprep.subr.bf16.mxu0 %v6745_v35  ;;  %v407_v33 = vld [vmem:[%s7047_s4 + $0x670] sm:$0xff]  ;;  %v5437_v35 = vcombine.low %v383_v24, %v391_v25  ;;  %v260_v23 = vld [vmem:[%s7047_s4 + $0x1d8] sm:$0xff] }
 0x178   : > { %v5454_v37 = vcombine.high %v399_v32, %v407_v33  ;;  %v256_v24 = vld [vmem:[%s7047_s4 + $0x1b8] sm:$0xff] }
 0x179   : > { %3887 = vmatpush1.bf16.msra.mxu1 %v6740_v40  ;;  %v415_v40 = vld [vmem:[%s7047_s4 + $0x6b0] sm:$0xff]  ;;  %v264_v25 = vld [vmem:[%s7047_s4 + $0x1f8] sm:$0xff] }
 0x17a   : > { %4659 = vmatpush1.bf16.msra.mxu0 %v6743_v41  ;;  %3888 = vmatprep.subr.bf16.mxu1 %v6748_v42  ;;  %v423_v41 = vld [vmem:[%s7047_s4 + $0x6f0] sm:$0xff]  ;;  %v5445_v42 = vcombine.low %v395_v30, %v403_v31  ;;  %v268_v30 = vld [vmem:[%s7047_s4 + $0x218] sm:$0xff] }
 0x17b   : > { %4660 = vmatprep.subr.bf16.mxu0 %v6751_v43  ;;  %3764 = vmatmul.mubr.bf16.gmra.mrb[24].mxu1 %v5349_v44  ;;  %v5453_v43 = vcombine.low %v399_v32, %v407_v33  ;;  %v5462_v44 = vcombine.high %v411_v38, %v419_v39  ;;  %v276_v31 = vld [vmem:[%s7047_s4 + $0x258] sm:$0xff] }
 0x17c   : > { %4536 = vmatmul.mubr.bf16.gmra.mrb[24].mxu0 %v5357_v45  ;;  %3773 = vmatprep.mubr.bf16.mxu1 %v5366_v46  ;;  %v5470_v45 = vcombine.high %v415_v40, %v423_v41  ;;  %v427_v46 = vld [vmem:[%s7047_s4 + $0x710] sm:$0xff]  ;;  %v272_v32 = vld [vmem:[%s7047_s4 + $0x238] sm:$0xff] }
 0x17d   : > { %4545 = vmatprep.mubr.bf16.mxu0 %v5374_v47  ;;  %3889 = vmatpush1.bf16.msra.mxu1 %v6746_v48  ;;  %v435_v47 = vld [vmem:[%s7047_s4 + $0x750] sm:$0xff]  ;;  %v280_v33 = vld [vmem:[%s7047_s4 + $0x278] sm:$0xff] }
 0x17e   : > { %4661 = vmatpush1.bf16.msra.mxu0 %v6749_v49  ;;  %3890 = vmatprep.subr.bf16.mxu1 %v6754_v50  ;;  %v431_v48 = vld [vmem:[%s7047_s4 + $0x730] sm:$0xff]  ;;  %v5461_v50 = vcombine.low %v411_v38, %v419_v39  ;;  %v5478_v52 = vcombine.high %v427_v46, %v435_v47  ;;  %v284_v38 = vld [vmem:[%s7047_s4 + $0x298] sm:$0xff] }
 0x17f   : > { %4662 = vmatprep.subr.bf16.mxu0 %v6757_v51  ;;  %v439_v49 = vld [vmem:[%s7047_s4 + $0x770] sm:$0xff]  ;;  %v5469_v51 = vcombine.low %v415_v40, %v423_v41  ;;  %v292_v39 = vld [vmem:[%s7047_s4 + $0x2d8] sm:$0xff] }
 0x180   : > { %v5486_v53 = vcombine.high %v431_v48, %v439_v49  ;;  %v288_v40 = vld [vmem:[%s7047_s4 + $0x2b8] sm:$0xff] }
 0x181   : > { %3891 = vmatpush1.bf16.msra.mxu1 %v6752_v56  ;;  %v447_v56 = vld [vmem:[%s7047_s4 + $0x7b0] sm:$0xff]  ;;  %v296_v41 = vld [vmem:[%s7047_s4 + $0x2f8] sm:$0xff] }
 0x182   : > { %4663 = vmatpush1.bf16.msra.mxu0 %v6755_v57  ;;  %3892 = vmatprep.subr.bf16.mxu1 %v6760_v58  ;;  %v455_v57 = vld [vmem:[%s7047_s4 + $0x7f0] sm:$0xff]  ;;  %v5477_v58 = vcombine.low %v427_v46, %v435_v47  ;;  %v300_v46 = vld [vmem:[%s7047_s4 + $0x318] sm:$0xff] }
 0x183   : > { %4664 = vmatprep.subr.bf16.mxu0 %v6763_v59  ;;  %3774 = vmatmul.mubr.bf16.gmra.mrb[28].mxu1 %v5365_v60  ;;  %v5485_v59 = vcombine.low %v431_v48, %v439_v49  ;;  %v5494_v60 = vcombine.high %v443_v54, %v451_v55  ;;  %v308_v47 = vld [vmem:[%s7047_s4 + $0x358] sm:$0xff] }
 0x184   : > { %4546 = vmatmul.mubr.bf16.gmra.mrb[28].mxu0 %v5373_v61  ;;  %3783 = vmatprep.mubr.bf16.mxu1 %v5382_v62  ;;  %v5502_v61 = vcombine.high %v447_v56, %v455_v57  ;;  %v204_v62 = vld [vmem:[%s7047_s4 + $0x18] sm:$0xff] }
 0x185   : > { %4555 = vmatprep.mubr.bf16.mxu0 %v5390_v63  ;;  %3893 = vmatpush1.bf16.msra.mxu1 %v6758_v0  ;;  %v212_v63 = vld [vmem:[%s7047_s4 + $0x58] sm:$0xff] }
 0x186   : > { %4665 = vmatpush1.bf16.msra.mxu0 %v6761_v1  ;;  %3894 = vmatprep.subr.bf16.mxu1 %v6766_v2  ;;  %v208_v0 = vld [vmem:[%s7047_s4 + $0x38] sm:$0xff]  ;;  %v5493_v2 = vcombine.low %v443_v54, %v451_v55  ;;  %v5256_v4 = vcombine.high %v204_v62, %v212_v63 }
 0x187   : > { %4666 = vmatprep.subr.bf16.mxu0 %v6769_v3  ;;  %v216_v1 = vld [vmem:[%s7047_s4 + $0x78] sm:$0xff]  ;;  %v5501_v3 = vcombine.low %v447_v56, %v455_v57 }
 0x188   : > { %v5264_v5 = vcombine.high %v208_v0, %v216_v1  ;;  %v304_v48 = vld [vmem:[%s7047_s4 + $0x338] sm:$0xff] }
 0x189   : > { %3895 = vmatpush1.bf16.msra.mxu1 %v6764_v8  ;;  %v224_v8 = vld [vmem:[%s7047_s4 + $0xb8] sm:$0xff] }
 0x18a   : > { %4667 = vmatpush1.bf16.msra.mxu0 %v6767_v9  ;;  %v232_v9 = vld [vmem:[%s7047_s4 + $0xf8] sm:$0xff] }
 0x18b   : > { %3784 = vmatmul.mubr.bf16.gmra.mrb[32].mxu1 %v5381_v10  ;;  %v5255_v10 = vcombine.low %v204_v62, %v212_v63  ;;  %v312_v49 = vld [vmem:[%s7047_s4 + $0x378] sm:$0xff] }
 0x18c   : > { %4556 = vmatmul.mubr.bf16.gmra.mrb[32].mxu0 %v5389_v11  ;;  %3793 = vmatprep.mubr.bf16.mxu1 %v5398_v12  ;;  %v5263_v11 = vcombine.low %v208_v0, %v216_v1  ;;  %v5272_v12 = vcombine.high %v220_v6, %v228_v7  ;;  %v316_v54 = vld [vmem:[%s7047_s4 + $0x398] sm:$0xff] }
 0x18d   : > { %4565 = vmatprep.mubr.bf16.mxu0 %v5406_v13  ;;  %v5280_v13 = vcombine.high %v224_v8, %v232_v9  ;;  %v324_v55 = vld [vmem:[%s7047_s4 + $0x3d8] sm:$0xff] }
 0x18e   : > { %v320_v56 = vld [vmem:[%s7047_s4 + $0x3b8] sm:$0xff] }
 0x18f   : > { %v328_v57 = vld [vmem:[%s7047_s4 + $0x3f8] sm:$0xff] }
 0x190   : > { %v332_v62 = vld [vmem:[%s7047_s4 + $0x418] sm:$0xff] }
 0x191   : > { %v340_v63 = vld [vmem:[%s7047_s4 + $0x458] sm:$0xff] }
 0x192   : > { %v336_v0 = vld [vmem:[%s7047_s4 + $0x438] sm:$0xff] }
 0x193   : > { %3794 = vmatmul.mubr.bf16.gmra.mrb[36].mxu1 %v5397_v18  ;;  %v5271_v18 = vcombine.low %v220_v6, %v228_v7  ;;  %v344_v1 = vld [vmem:[%s7047_s4 + $0x478] sm:$0xff] }
 0x194   : > { %4566 = vmatmul.mubr.bf16.gmra.mrb[36].mxu0 %v5405_v19  ;;  %3803 = vmatprep.mubr.bf16.mxu1 %v5414_v20  ;;  %v5279_v19 = vcombine.low %v224_v8, %v232_v9  ;;  %v5288_v20 = vcombine.high %v236_v14, %v244_v15  ;;  %v348_v6 = vld [vmem:[%s7047_s4 + $0x498] sm:$0xff] }
 0x195   : > { %4575 = vmatprep.mubr.bf16.mxu0 %v5422_v21  ;;  %v5296_v21 = vcombine.high %v240_v16, %v248_v17  ;;  %v356_v7 = vld [vmem:[%s7047_s4 + $0x4d8] sm:$0xff] }
 0x196   : > { %v352_v8 = vld [vmem:[%s7047_s4 + $0x4b8] sm:$0xff] }
 0x197   : > { %v360_v9 = vld [vmem:[%s7047_s4 + $0x4f8] sm:$0xff] }
 0x19b   : > { %3804 = vmatmul.mubr.bf16.gmra.mrb[40].mxu1 %v5413_v26  ;;  %v5287_v26 = vcombine.low %v236_v14, %v244_v15  ;;  %v364_v14 = vld [vmem:[%s7047_s4 + $0x518] sm:$0xff] }
 0x19c   : > { %4576 = vmatmul.mubr.bf16.gmra.mrb[40].mxu0 %v5421_v27  ;;  %3813 = vmatprep.mubr.bf16.mxu1 %v5430_v28  ;;  %v5295_v27 = vcombine.low %v240_v16, %v248_v17  ;;  %v5304_v28 = vcombine.high %v252_v22, %v260_v23  ;;  %v372_v15 = vld [vmem:[%s7047_s4 + $0x558] sm:$0xff] }
 0x19d   : > { %4585 = vmatprep.mubr.bf16.mxu0 %v5438_v29  ;;  %v5312_v29 = vcombine.high %v256_v24, %v264_v25  ;;  %v368_v16 = vld [vmem:[%s7047_s4 + $0x538] sm:$0xff] }
 0x19e   : > { %v376_v17 = vld [vmem:[%s7047_s4 + $0x578] sm:$0xff] }
 0x1a3   : > { %3814 = vmatmul.mubr.bf16.gmra.mrb[44].mxu1 %v5429_v34  ;;  %v5303_v34 = vcombine.low %v252_v22, %v260_v23  ;;  %v380_v22 = vld [vmem:[%s7047_s4 + $0x598] sm:$0xff] }
 0x1a4   : > { %4586 = vmatmul.mubr.bf16.gmra.mrb[44].mxu0 %v5437_v35  ;;  %3823 = vmatprep.mubr.bf16.mxu1 %v5446_v36  ;;  %v5311_v35 = vcombine.low %v256_v24, %v264_v25  ;;  %v5320_v36 = vcombine.high %v268_v30, %v276_v31  ;;  %v388_v23 = vld [vmem:[%s7047_s4 + $0x5d8] sm:$0xff] }
 0x1a5   : > { %4595 = vmatprep.mubr.bf16.mxu0 %v5454_v37  ;;  %v5328_v37 = vcombine.high %v272_v32, %v280_v33  ;;  %v384_v24 = vld [vmem:[%s7047_s4 + $0x5b8] sm:$0xff] }
 0x1a6   : > { %v392_v25 = vld [vmem:[%s7047_s4 + $0x5f8] sm:$0xff] }
 0x1ab   : > { %3824 = vmatmul.mubr.bf16.gmra.mrb[48].mxu1 %v5445_v42  ;;  %v5319_v42 = vcombine.low %v268_v30, %v276_v31  ;;  %v396_v30 = vld [vmem:[%s7047_s4 + $0x618] sm:$0xff] }
 0x1ac   : > { %4596 = vmatmul.mubr.bf16.gmra.mrb[48].mxu0 %v5453_v43  ;;  %3833 = vmatprep.mubr.bf16.mxu1 %v5462_v44  ;;  %v5327_v43 = vcombine.low %v272_v32, %v280_v33  ;;  %v5336_v44 = vcombine.high %v284_v38, %v292_v39  ;;  %v404_v31 = vld [vmem:[%s7047_s4 + $0x658] sm:$0xff] }
 0x1ad   : > { %4605 = vmatprep.mubr.bf16.mxu0 %v5470_v45  ;;  %v5344_v45 = vcombine.high %v288_v40, %v296_v41  ;;  %v400_v32 = vld [vmem:[%s7047_s4 + $0x638] sm:$0xff] }
 0x1ae   : > { %v408_v33 = vld [vmem:[%s7047_s4 + $0x678] sm:$0xff] }
 0x1b3   : > { %3834 = vmatmul.mubr.bf16.gmra.mrb[52].mxu1 %v5461_v50  ;;  %v5335_v50 = vcombine.low %v284_v38, %v292_v39  ;;  %v412_v38 = vld [vmem:[%s7047_s4 + $0x698] sm:$0xff] }
 0x1b4   : > { %4606 = vmatmul.mubr.bf16.gmra.mrb[52].mxu0 %v5469_v51  ;;  %3843 = vmatprep.mubr.bf16.mxu1 %v5478_v52  ;;  %v5343_v51 = vcombine.low %v288_v40, %v296_v41  ;;  %v5352_v52 = vcombine.high %v300_v46, %v308_v47  ;;  %v420_v39 = vld [vmem:[%s7047_s4 + $0x6d8] sm:$0xff] }
 0x1b5   : > { %4615 = vmatprep.mubr.bf16.mxu0 %v5486_v53  ;;  %v5360_v53 = vcombine.high %v304_v48, %v312_v49  ;;  %v416_v40 = vld [vmem:[%s7047_s4 + $0x6b8] sm:$0xff] }
 0x1b6   : > { %v424_v41 = vld [vmem:[%s7047_s4 + $0x6f8] sm:$0xff] }
 0x1bb   : > { %3844 = vmatmul.mubr.bf16.gmra.mrb[56].mxu1 %v5477_v58  ;;  %v5351_v58 = vcombine.low %v300_v46, %v308_v47  ;;  %v428_v46 = vld [vmem:[%s7047_s4 + $0x718] sm:$0xff] }
 0x1bc   : > { %4616 = vmatmul.mubr.bf16.gmra.mrb[56].mxu0 %v5485_v59  ;;  %3853 = vmatprep.mubr.bf16.mxu1 %v5494_v60  ;;  %v5359_v59 = vcombine.low %v304_v48, %v312_v49  ;;  %v5368_v60 = vcombine.high %v316_v54, %v324_v55  ;;  %v436_v47 = vld [vmem:[%s7047_s4 + $0x758] sm:$0xff] }
 0x1bd   : > { %4625 = vmatprep.mubr.bf16.mxu0 %v5502_v61  ;;  %v5376_v61 = vcombine.high %v320_v56, %v328_v57  ;;  %v432_v48 = vld [vmem:[%s7047_s4 + $0x738] sm:$0xff] }
 0x1be   : > { %v440_v49 = vld [vmem:[%s7047_s4 + $0x778] sm:$0xff] }
 0x1c3   : > { %3854 = vmatmul.mubr.bf16.gmra.mrb[60].mxu1 %v5493_v2  ;;  %v5367_v2 = vcombine.low %v316_v54, %v324_v55  ;;  %v444_v54 = vld [vmem:[%s7047_s4 + $0x798] sm:$0xff] }
 0x1c4   : > { %4626 = vmatmul.mubr.bf16.gmra.mrb[60].mxu0 %v5501_v3  ;;  %3896 = vmatprep.mubr.bf16.mxu1 %v5256_v4  ;;  %v5375_v3 = vcombine.low %v320_v56, %v328_v57  ;;  %v5384_v4 = vcombine.high %v332_v62, %v340_v63  ;;  %v452_v55 = vld [vmem:[%s7047_s4 + $0x7d8] sm:$0xff] }
 0x1c5   : > { %4668 = vmatprep.mubr.bf16.mxu0 %v5264_v5  ;;  %v5392_v5 = vcombine.high %v336_v0, %v344_v1  ;;  %v448_v56 = vld [vmem:[%s7047_s4 + $0x7b8] sm:$0xff] }
 0x1c6   : > { %v456_v57 = vld [vmem:[%s7047_s4 + $0x7f8] sm:$0xff]  ;;  %s175_s4 = sand.u32 1, %s6816_s12  }
 0x1c7   : > { %s5245_s18 = sshll.u32 %s175_s4, 9 }
 0x1c8   : > { %s7965_s12 = scalar_lea.vmem [#allocation2], %s5245_s18  }
 0x1cb   : > { %3897 = vmatmul.mubr.bf16.vlgmr.msra.gmra.mrb[0].mxu1 %v5255_v10  ;;  %v5383_v10 = vcombine.low %v332_v62, %v340_v63  ;;  %v5495_v62 = vcombine.low %v444_v54, %v452_v55  ;;  %v5503_v63 = vcombine.low %v448_v56, %v456_v57 }
 0x1cc   : > { %4669 = vmatmul.mubr.bf16.vlgmr.msra.gmra.mrb[0].mxu0 %v5263_v11  ;;  %3906 = vmatprep.mubr.bf16.mxu1 %v5272_v12  ;;  %v5391_v11 = vcombine.low %v336_v0, %v344_v1  ;;  %v5400_v12 = vcombine.high %v348_v6, %v356_v7  ;;  %v715_v0 = vlaneseq }
 0x1cd   : > { %4678 = vmatprep.mubr.bf16.mxu0 %v5280_v13  ;;  %v5408_v13 = vcombine.high %v352_v8, %v360_v9 }
 0x1ce   : > { %v716_v1 = vshrl.u32 %v715_v0, 7 }
 0x1d3   : > { %3907 = vmatmul.mubr.bf16.gmra.mrb[4].mxu1 %v5271_v18  ;;  %v5399_v18 = vcombine.low %v348_v6, %v356_v7 }
 0x1d4   : > { %4679 = vmatmul.mubr.bf16.gmra.mrb[4].mxu0 %v5279_v19  ;;  %3916 = vmatprep.mubr.bf16.mxu1 %v5288_v20  ;;  %v5407_v19 = vcombine.low %v352_v8, %v360_v9  ;;  %v5416_v20 = vcombine.high %v364_v14, %v372_v15 }
 0x1d5   : > { %4688 = vmatprep.mubr.bf16.mxu0 %v5296_v21  ;;  %v5424_v21 = vcombine.high %v368_v16, %v376_v17 }
 0x1db   : > { %3917 = vmatmul.mubr.bf16.gmra.mrb[8].mxu1 %v5287_v26  ;;  %v5415_v26 = vcombine.low %v364_v14, %v372_v15 }
 0x1dc   : > { %4689 = vmatmul.mubr.bf16.gmra.mrb[8].mxu0 %v5295_v27  ;;  %3926 = vmatprep.mubr.bf16.mxu1 %v5304_v28  ;;  %v5423_v27 = vcombine.low %v368_v16, %v376_v17  ;;  %v5432_v28 = vcombine.high %v380_v22, %v388_v23 }
 0x1dd   : > { %4698 = vmatprep.mubr.bf16.mxu0 %v5312_v29  ;;  %v5440_v29 = vcombine.high %v384_v24, %v392_v25 }
 0x1e3   : > { %3927 = vmatmul.mubr.bf16.gmra.mrb[12].mxu1 %v5303_v34  ;;  %v5431_v34 = vcombine.low %v380_v22, %v388_v23 }
 0x1e4   : > { %4699 = vmatmul.mubr.bf16.gmra.mrb[12].mxu0 %v5311_v35  ;;  %3936 = vmatprep.mubr.bf16.mxu1 %v5320_v36  ;;  %v5439_v35 = vcombine.low %v384_v24, %v392_v25  ;;  %v5448_v36 = vcombine.high %v396_v30, %v404_v31 }
 0x1e5   : > { %4708 = vmatprep.mubr.bf16.mxu0 %v5328_v37  ;;  %v5456_v37 = vcombine.high %v400_v32, %v408_v33 }
 0x1eb   : > { %3937 = vmatmul.mubr.bf16.gmra.mrb[16].mxu1 %v5319_v42  ;;  %v5447_v42 = vcombine.low %v396_v30, %v404_v31 }
 0x1ec   : > { %4709 = vmatmul.mubr.bf16.gmra.mrb[16].mxu0 %v5327_v43  ;;  %3946 = vmatprep.mubr.bf16.mxu1 %v5336_v44  ;;  %v5455_v43 = vcombine.low %v400_v32, %v408_v33  ;;  %v5464_v44 = vcombine.high %v412_v38, %v420_v39 }
 0x1ed   : > { %4718 = vmatprep.mubr.bf16.mxu0 %v5344_v45  ;;  %v5472_v45 = vcombine.high %v416_v40, %v424_v41 }
 0x1f3   : > { %3947 = vmatmul.mubr.bf16.gmra.mrb[20].mxu1 %v5335_v50  ;;  %v5463_v50 = vcombine.low %v412_v38, %v420_v39 }
 0x1f4   : > { %4719 = vmatmul.mubr.bf16.gmra.mrb[20].mxu0 %v5343_v51  ;;  %3956 = vmatprep.mubr.bf16.mxu1 %v5352_v52  ;;  %v5471_v51 = vcombine.low %v416_v40, %v424_v41  ;;  %v5480_v52 = vcombine.high %v428_v46, %v436_v47 }
 0x1f5   : > { %4728 = vmatprep.mubr.bf16.mxu0 %v5360_v53  ;;  %v5488_v53 = vcombine.high %v432_v48, %v440_v49 }
 0x1fb   : > { %3957 = vmatmul.mubr.bf16.gmra.mrb[24].mxu1 %v5351_v58  ;;  %v5479_v58 = vcombine.low %v428_v46, %v436_v47 }
 0x1fc   : > { %4729 = vmatmul.mubr.bf16.gmra.mrb[24].mxu0 %v5359_v59  ;;  %3966 = vmatprep.mubr.bf16.mxu1 %v5368_v60  ;;  %v5487_v59 = vcombine.low %v432_v48, %v440_v49  ;;  %v5496_v60 = vcombine.high %v444_v54, %v452_v55 }
 0x1fd   : > { %4738 = vmatprep.mubr.bf16.mxu0 %v5376_v61  ;;  %v5504_v61 = vcombine.high %v448_v56, %v456_v57 }
 0x203   : > { %3967 = vmatmul.mubr.bf16.gmra.mrb[28].mxu1 %v5367_v2  ;;  %v717_v2 = vsub.s32 0, %v716_v1 }
 0x204   : > { %4739 = vmatmul.mubr.bf16.gmra.mrb[28].mxu0 %v5375_v3  ;;  %3976 = vmatprep.mubr.bf16.mxu1 %v5384_v4  ;;  %v713_v3 = vld [vmem:[%s8303_s2] sm:$0x3]  ;;  %v721_v4 = vsub.s32 1, %v716_v1 }
 0x205   : > { %4748 = vmatprep.mubr.bf16.mxu0 %v5392_v5  ;;  %v7956_v5 = vrot.slane %v713_v3, %v717_v2 }
 0x206   : > { %v7959_v6 = vrot.slane %v713_v3, %v721_v4 }
 0x20b   : > { %3977 = vmatmul.mubr.bf16.gmra.mrb[32].mxu1 %v5383_v10 }
 0x20c   : > { %4749 = vmatmul.mubr.bf16.gmra.mrb[32].mxu0 %v5391_v11  ;;  %3986 = vmatprep.mubr.bf16.mxu1 %v5400_v12 }
 0x20d   : > { %4758 = vmatprep.mubr.bf16.mxu0 %v5408_v13 }
 0x213   : > { %3987 = vmatmul.mubr.bf16.gmra.mrb[36].mxu1 %v5399_v18 }
 0x214   : > { %4759 = vmatmul.mubr.bf16.gmra.mrb[36].mxu0 %v5407_v19  ;;  %3996 = vmatprep.mubr.bf16.mxu1 %v5416_v20 }
 0x215   : > { %4768 = vmatprep.mubr.bf16.mxu0 %v5424_v21 }
 0x21b   : > { %3997 = vmatmul.mubr.bf16.gmra.mrb[40].mxu1 %v5415_v26 }
 0x21c   : > { %4769 = vmatmul.mubr.bf16.gmra.mrb[40].mxu0 %v5423_v27  ;;  %4006 = vmatprep.mubr.bf16.mxu1 %v5432_v28 }
 0x21d   : > { %4778 = vmatprep.mubr.bf16.mxu0 %v5440_v29 }
 0x223   : > { %4007 = vmatmul.mubr.bf16.gmra.mrb[44].mxu1 %v5431_v34 }
 0x224   : > { %4779 = vmatmul.mubr.bf16.gmra.mrb[44].mxu0 %v5439_v35  ;;  %4016 = vmatprep.mubr.bf16.mxu1 %v5448_v36 }
 0x225   : > { %4788 = vmatprep.mubr.bf16.mxu0 %v5456_v37 }
 0x22b   : > { %4017 = vmatmul.mubr.bf16.gmra.mrb[48].mxu1 %v5447_v42 }
 0x22c   : > { %4789 = vmatmul.mubr.bf16.gmra.mrb[48].mxu0 %v5455_v43  ;;  %4026 = vmatprep.mubr.bf16.mxu1 %v5464_v44 }
 0x22d   : > { %4798 = vmatprep.mubr.bf16.mxu0 %v5472_v45 }
 0x233   : > { %4027 = vmatmul.mubr.bf16.gmra.mrb[52].mxu1 %v5463_v50 }
 0x234   : > { %4799 = vmatmul.mubr.bf16.gmra.mrb[52].mxu0 %v5471_v51  ;;  %4036 = vmatprep.mubr.bf16.mxu1 %v5480_v52 }
 0x235   : > { %4808 = vmatprep.mubr.bf16.mxu0 %v5488_v53 }
 0x23b   : > { %4037 = vmatmul.mubr.bf16.gmra.mrb[56].mxu1 %v5479_v58 }
 0x23c   : > { %4809 = vmatmul.mubr.bf16.gmra.mrb[56].mxu0 %v5487_v59  ;;  %4046 = vmatprep.mubr.bf16.mxu1 %v5496_v60 }
 0x23d   : > { %4818 = vmatprep.mubr.bf16.mxu0 %v5504_v61 }
 0x243   : > { %4047 = vmatmul.mubr.bf16.gmra.mrb[60].mxu1 %v5495_v62 }
 0x244   : > { %4819 = vmatmul.mubr.bf16.gmra.mrb[60].mxu0 %v5503_v63 }
 0x29e   : > { %v3898_v7 = vpop.f32.mrb[0].mxu1 }
 0x29f   : > { %v4670_v8 = vpop.f32.mrb[0].mxu0  ;;  %v5786_v9 = vadd.f32 %v3898_v7, %v7956_v5  ;;  %v3900_v10 = vpop.f32.mrb[1].mxu1 }
 0x2a0   : > { %v4672_v11 = vpop.f32.mrb[1].mxu0  ;;  %v5788_v12 = vadd.f32 %v3900_v10, %v7959_v6  ;;  %v3902_v13 = vpop.f32.mrb[2].mxu1 }
 0x2a1   : > { %v4674_v14 = vpop.f32.mrb[2].mxu0  ;;  %v5787_v15 = vadd.f32 %v5786_v9, %v4670_v8  ;;  %v5790_v16 = vadd.f32 %v3902_v13, %v7956_v5  ;;  %v3904_v17 = vpop.f32.mrb[3].mxu1 }
 0x2a2   : > { %v4676_v18 = vpop.f32.mrb[3].mxu0  ;;  %v5789_v19 = vadd.f32 %v5788_v12, %v4672_v11  ;;  %v5792_v20 = vadd.f32 %v3904_v17, %v7959_v6 }
 0x2a3   : > { %v4829_v21 = vmax.f32 %v5787_v15, 0.0  ;;  %v5791_v22 = vadd.f32 %v5790_v16, %v4674_v14 }
 0x2a4   : > { %v4830_v23 = vmax.f32 %v5789_v19, 0.0  ;;  %v5793_v24 = vadd.f32 %v5792_v20, %v4676_v18 }
 0x2a5   : > { %4893 = vst [vmem:[%s7965_s12] sm:$0xff] %v4829_v21  ;;  %v4831_v25 = vmax.f32 %v5791_v22, 0.0 }
 0x2a6   : > { %4894 = vst [vmem:[%s7965_s12 + $0x8] sm:$0xff] %v4830_v23  ;;  %v4832_v26 = vmax.f32 %v5793_v24, 0.0  ;;  %v3908_v27 = vpop.f32.mrb[4].mxu1 }
 0x2a7   : > { %v4680_v28 = vpop.f32.mrb[4].mxu0  ;;  %4895 = vst [vmem:[%s7965_s12 + $0x10] sm:$0xff] %v4831_v25  ;;  %v5794_v29 = vadd.f32 %v3908_v27, %v7956_v5  ;;  %v3910_v30 = vpop.f32.mrb[5].mxu1 }
 0x2a8   : > { %v4682_v31 = vpop.f32.mrb[5].mxu0  ;;  %4896 = vst [vmem:[%s7965_s12 + $0x18] sm:$0xff] %v4832_v26  ;;  %v5796_v32 = vadd.f32 %v3910_v30, %v7959_v6  ;;  %v3912_v33 = vpop.f32.mrb[6].mxu1 }
 0x2a9   : > { %v4684_v34 = vpop.f32.mrb[6].mxu0  ;;  %v5795_v35 = vadd.f32 %v5794_v29, %v4680_v28  ;;  %v5798_v36 = vadd.f32 %v3912_v33, %v7956_v5  ;;  %v3914_v37 = vpop.f32.mrb[7].mxu1 }
 0x2aa   : > { %v4686_v38 = vpop.f32.mrb[7].mxu0  ;;  %v5797_v39 = vadd.f32 %v5796_v32, %v4682_v31  ;;  %v5800_v40 = vadd.f32 %v3914_v37, %v7959_v6 }
 0x2ab   : > { %v4833_v41 = vmax.f32 %v5795_v35, 0.0  ;;  %v5799_v42 = vadd.f32 %v5798_v36, %v4684_v34 }
 0x2ac   : > { %v4834_v43 = vmax.f32 %v5797_v39, 0.0  ;;  %v5801_v44 = vadd.f32 %v5800_v40, %v4686_v38 }
 0x2ad   : > { %4897 = vst [vmem:[%s7965_s12 + $0x20] sm:$0xff] %v4833_v41  ;;  %v4835_v45 = vmax.f32 %v5799_v42, 0.0 }
 0x2ae   : > { %4898 = vst [vmem:[%s7965_s12 + $0x28] sm:$0xff] %v4834_v43  ;;  %v4836_v46 = vmax.f32 %v5801_v44, 0.0  ;;  %v3918_v47 = vpop.f32.mrb[8].mxu1 }
 0x2af   : > { %v4690_v48 = vpop.f32.mrb[8].mxu0  ;;  %4899 = vst [vmem:[%s7965_s12 + $0x30] sm:$0xff] %v4835_v45  ;;  %v5802_v49 = vadd.f32 %v3918_v47, %v7956_v5  ;;  %v3920_v50 = vpop.f32.mrb[9].mxu1 }
 0x2b0   : > { %v4692_v51 = vpop.f32.mrb[9].mxu0  ;;  %4900 = vst [vmem:[%s7965_s12 + $0x38] sm:$0xff] %v4836_v46  ;;  %v5804_v52 = vadd.f32 %v3920_v50, %v7959_v6  ;;  %v3922_v53 = vpop.f32.mrb[10].mxu1 }
 0x2b1   : > { %v4694_v54 = vpop.f32.mrb[10].mxu0  ;;  %v5803_v55 = vadd.f32 %v5802_v49, %v4690_v48  ;;  %v5806_v56 = vadd.f32 %v3922_v53, %v7956_v5  ;;  %v3924_v57 = vpop.f32.mrb[11].mxu1 }
 0x2b2   : > { %v4696_v58 = vpop.f32.mrb[11].mxu0  ;;  %v5805_v59 = vadd.f32 %v5804_v52, %v4692_v51  ;;  %v5808_v60 = vadd.f32 %v3924_v57, %v7959_v6 }
 0x2b3   : > { %v4837_v61 = vmax.f32 %v5803_v55, 0.0  ;;  %v5807_v62 = vadd.f32 %v5806_v56, %v4694_v54 }
 0x2b4   : > { %v4838_v63 = vmax.f32 %v5805_v59, 0.0  ;;  %v5809_v0 = vadd.f32 %v5808_v60, %v4696_v58 }
 0x2b5   : > { %4901 = vst [vmem:[%s7965_s12 + $0x40] sm:$0xff] %v4837_v61  ;;  %v4839_v1 = vmax.f32 %v5807_v62, 0.0 }
 0x2b6   : > { %4902 = vst [vmem:[%s7965_s12 + $0x48] sm:$0xff] %v4838_v63  ;;  %v4840_v2 = vmax.f32 %v5809_v0, 0.0  ;;  %v3928_v3 = vpop.f32.mrb[12].mxu1 }
 0x2b7   : > { %v4700_v4 = vpop.f32.mrb[12].mxu0  ;;  %4903 = vst [vmem:[%s7965_s12 + $0x50] sm:$0xff] %v4839_v1  ;;  %v5810_v7 = vadd.f32 %v3928_v3, %v7956_v5  ;;  %v3930_v8 = vpop.f32.mrb[13].mxu1 }
 0x2b8   : > { %v4702_v9 = vpop.f32.mrb[13].mxu0  ;;  %4904 = vst [vmem:[%s7965_s12 + $0x58] sm:$0xff] %v4840_v2  ;;  %v5812_v10 = vadd.f32 %v3930_v8, %v7959_v6  ;;  %v3932_v11 = vpop.f32.mrb[14].mxu1 }
 0x2b9   : > { %v4704_v12 = vpop.f32.mrb[14].mxu0  ;;  %v5811_v13 = vadd.f32 %v5810_v7, %v4700_v4  ;;  %v5814_v14 = vadd.f32 %v3932_v11, %v7956_v5  ;;  %v3934_v15 = vpop.f32.mrb[15].mxu1 }
 0x2ba   : > { %v4706_v16 = vpop.f32.mrb[15].mxu0  ;;  %v5813_v17 = vadd.f32 %v5812_v10, %v4702_v9  ;;  %v5816_v18 = vadd.f32 %v3934_v15, %v7959_v6 }
 0x2bb   : > { %v4841_v19 = vmax.f32 %v5811_v13, 0.0  ;;  %v5815_v20 = vadd.f32 %v5814_v14, %v4704_v12 }
 0x2bc   : > { %v4842_v21 = vmax.f32 %v5813_v17, 0.0  ;;  %v5817_v22 = vadd.f32 %v5816_v18, %v4706_v16 }
 0x2bd   : > { %4905 = vst [vmem:[%s7965_s12 + $0x60] sm:$0xff] %v4841_v19  ;;  %v4843_v23 = vmax.f32 %v5815_v20, 0.0 }
 0x2be   : > { %4906 = vst [vmem:[%s7965_s12 + $0x68] sm:$0xff] %v4842_v21  ;;  %v4844_v24 = vmax.f32 %v5817_v22, 0.0  ;;  %v3938_v25 = vpop.f32.mrb[16].mxu1 }
 0x2bf   : > { %v4710_v26 = vpop.f32.mrb[16].mxu0  ;;  %4907 = vst [vmem:[%s7965_s12 + $0x70] sm:$0xff] %v4843_v23  ;;  %v5818_v27 = vadd.f32 %v3938_v25, %v7956_v5  ;;  %v3940_v28 = vpop.f32.mrb[17].mxu1 }
 0x2c0   : > { %v4712_v29 = vpop.f32.mrb[17].mxu0  ;;  %4908 = vst [vmem:[%s7965_s12 + $0x78] sm:$0xff] %v4844_v24  ;;  %v5820_v30 = vadd.f32 %v3940_v28, %v7959_v6  ;;  %v3942_v31 = vpop.f32.mrb[18].mxu1 }
 0x2c1   : > { %v4714_v32 = vpop.f32.mrb[18].mxu0  ;;  %v5819_v33 = vadd.f32 %v5818_v27, %v4710_v26  ;;  %v5822_v34 = vadd.f32 %v3942_v31, %v7956_v5  ;;  %v3944_v35 = vpop.f32.mrb[19].mxu1 }
 0x2c2   : > { %v4716_v36 = vpop.f32.mrb[19].mxu0  ;;  %v5821_v37 = vadd.f32 %v5820_v30, %v4712_v29  ;;  %v5824_v38 = vadd.f32 %v3944_v35, %v7959_v6 }
 0x2c3   : > { %v4845_v39 = vmax.f32 %v5819_v33, 0.0  ;;  %v5823_v40 = vadd.f32 %v5822_v34, %v4714_v32 }
 0x2c4   : > { %v4846_v41 = vmax.f32 %v5821_v37, 0.0  ;;  %v5825_v42 = vadd.f32 %v5824_v38, %v4716_v36 }
 0x2c5   : > { %4909 = vst [vmem:[%s7965_s12 + $0x80] sm:$0xff] %v4845_v39  ;;  %v4847_v43 = vmax.f32 %v5823_v40, 0.0 }
 0x2c6   : > { %4910 = vst [vmem:[%s7965_s12 + $0x88] sm:$0xff] %v4846_v41  ;;  %v4848_v44 = vmax.f32 %v5825_v42, 0.0  ;;  %v3948_v45 = vpop.f32.mrb[20].mxu1 }
 0x2c7   : > { %v4720_v46 = vpop.f32.mrb[20].mxu0  ;;  %4911 = vst [vmem:[%s7965_s12 + $0x90] sm:$0xff] %v4847_v43  ;;  %v5826_v47 = vadd.f32 %v3948_v45, %v7956_v5  ;;  %v3950_v48 = vpop.f32.mrb[21].mxu1 }
 0x2c8   : > { %v4722_v49 = vpop.f32.mrb[21].mxu0  ;;  %4912 = vst [vmem:[%s7965_s12 + $0x98] sm:$0xff] %v4848_v44  ;;  %v5828_v50 = vadd.f32 %v3950_v48, %v7959_v6  ;;  %v3952_v51 = vpop.f32.mrb[22].mxu1 }
 0x2c9   : > { %v4724_v52 = vpop.f32.mrb[22].mxu0  ;;  %v5827_v53 = vadd.f32 %v5826_v47, %v4720_v46  ;;  %v5830_v54 = vadd.f32 %v3952_v51, %v7956_v5  ;;  %v3954_v55 = vpop.f32.mrb[23].mxu1 }
 0x2ca   : > { %v4726_v56 = vpop.f32.mrb[23].mxu0  ;;  %v5829_v57 = vadd.f32 %v5828_v50, %v4722_v49  ;;  %v5832_v58 = vadd.f32 %v3954_v55, %v7959_v6 }
 0x2cb   : > { %v4849_v59 = vmax.f32 %v5827_v53, 0.0  ;;  %v5831_v60 = vadd.f32 %v5830_v54, %v4724_v52 }
 0x2cc   : > { %v4850_v61 = vmax.f32 %v5829_v57, 0.0  ;;  %v5833_v62 = vadd.f32 %v5832_v58, %v4726_v56 }
 0x2cd   : > { %4913 = vst [vmem:[%s7965_s12 + $0xa0] sm:$0xff] %v4849_v59  ;;  %v4851_v63 = vmax.f32 %v5831_v60, 0.0 }
 0x2ce   : > { %4914 = vst [vmem:[%s7965_s12 + $0xa8] sm:$0xff] %v4850_v61  ;;  %v4852_v0 = vmax.f32 %v5833_v62, 0.0  ;;  %v3958_v1 = vpop.f32.mrb[24].mxu1 }
 0x2cf   : > { %v4730_v2 = vpop.f32.mrb[24].mxu0  ;;  %4915 = vst [vmem:[%s7965_s12 + $0xb0] sm:$0xff] %v4851_v63  ;;  %v5834_v3 = vadd.f32 %v3958_v1, %v7956_v5  ;;  %v3960_v4 = vpop.f32.mrb[25].mxu1 }
 0x2d0   : > { %v4732_v7 = vpop.f32.mrb[25].mxu0  ;;  %4916 = vst [vmem:[%s7965_s12 + $0xb8] sm:$0xff] %v4852_v0  ;;  %v5836_v8 = vadd.f32 %v3960_v4, %v7959_v6  ;;  %v3962_v9 = vpop.f32.mrb[26].mxu1 }
 0x2d1   : > { %v4734_v10 = vpop.f32.mrb[26].mxu0  ;;  %v5835_v11 = vadd.f32 %v5834_v3, %v4730_v2  ;;  %v5838_v12 = vadd.f32 %v3962_v9, %v7956_v5  ;;  %v3964_v13 = vpop.f32.mrb[27].mxu1 }
 0x2d2   : > { %v4736_v14 = vpop.f32.mrb[27].mxu0  ;;  %v5837_v15 = vadd.f32 %v5836_v8, %v4732_v7  ;;  %v5840_v16 = vadd.f32 %v3964_v13, %v7959_v6 }
 0x2d3   : > { %v4853_v17 = vmax.f32 %v5835_v11, 0.0  ;;  %v5839_v18 = vadd.f32 %v5838_v12, %v4734_v10 }
 0x2d4   : > { %v4854_v19 = vmax.f32 %v5837_v15, 0.0  ;;  %v5841_v20 = vadd.f32 %v5840_v16, %v4736_v14 }
 0x2d5   : > { %4917 = vst [vmem:[%s7965_s12 + $0xc0] sm:$0xff] %v4853_v17  ;;  %v4855_v21 = vmax.f32 %v5839_v18, 0.0 }
 0x2d6   : > { %4918 = vst [vmem:[%s7965_s12 + $0xc8] sm:$0xff] %v4854_v19  ;;  %v4856_v22 = vmax.f32 %v5841_v20, 0.0  ;;  %v3968_v23 = vpop.f32.mrb[28].mxu1 }
 0x2d7   : > { %v4740_v24 = vpop.f32.mrb[28].mxu0  ;;  %4919 = vst [vmem:[%s7965_s12 + $0xd0] sm:$0xff] %v4855_v21  ;;  %v5842_v25 = vadd.f32 %v3968_v23, %v7956_v5  ;;  %v3970_v26 = vpop.f32.mrb[29].mxu1 }
 0x2d8   : > { %v4742_v27 = vpop.f32.mrb[29].mxu0  ;;  %4920 = vst [vmem:[%s7965_s12 + $0xd8] sm:$0xff] %v4856_v22  ;;  %v5844_v28 = vadd.f32 %v3970_v26, %v7959_v6  ;;  %v3972_v29 = vpop.f32.mrb[30].mxu1 }
 0x2d9   : > { %v4744_v30 = vpop.f32.mrb[30].mxu0  ;;  %v5843_v31 = vadd.f32 %v5842_v25, %v4740_v24  ;;  %v5846_v32 = vadd.f32 %v3972_v29, %v7956_v5  ;;  %v3974_v33 = vpop.f32.mrb[31].mxu1 }
 0x2da   : > { %v4746_v34 = vpop.f32.mrb[31].mxu0  ;;  %v5845_v35 = vadd.f32 %v5844_v28, %v4742_v27  ;;  %v5848_v36 = vadd.f32 %v3974_v33, %v7959_v6 }
 0x2db   : > { %v4857_v37 = vmax.f32 %v5843_v31, 0.0  ;;  %v5847_v38 = vadd.f32 %v5846_v32, %v4744_v30 }
 0x2dc   : > { %v4858_v39 = vmax.f32 %v5845_v35, 0.0  ;;  %v5849_v40 = vadd.f32 %v5848_v36, %v4746_v34 }
 0x2dd   : > { %4921 = vst [vmem:[%s7965_s12 + $0xe0] sm:$0xff] %v4857_v37  ;;  %v4859_v41 = vmax.f32 %v5847_v38, 0.0 }
 0x2de   : > { %4922 = vst [vmem:[%s7965_s12 + $0xe8] sm:$0xff] %v4858_v39  ;;  %v4860_v42 = vmax.f32 %v5849_v40, 0.0  ;;  %v3978_v43 = vpop.f32.mrb[32].mxu1 }
 0x2df   : > { %v4750_v44 = vpop.f32.mrb[32].mxu0  ;;  %4923 = vst [vmem:[%s7965_s12 + $0xf0] sm:$0xff] %v4859_v41  ;;  %v5850_v45 = vadd.f32 %v3978_v43, %v7956_v5  ;;  %v3980_v46 = vpop.f32.mrb[33].mxu1 }
 0x2e0   : > { %v4752_v47 = vpop.f32.mrb[33].mxu0  ;;  %4924 = vst [vmem:[%s7965_s12 + $0xf8] sm:$0xff] %v4860_v42  ;;  %v5852_v48 = vadd.f32 %v3980_v46, %v7959_v6  ;;  %v3982_v49 = vpop.f32.mrb[34].mxu1 }
 0x2e1   : > { %v4754_v50 = vpop.f32.mrb[34].mxu0  ;;  %v5851_v51 = vadd.f32 %v5850_v45, %v4750_v44  ;;  %v5854_v52 = vadd.f32 %v3982_v49, %v7956_v5  ;;  %v3984_v53 = vpop.f32.mrb[35].mxu1 }
 0x2e2   : > { %v4756_v54 = vpop.f32.mrb[35].mxu0  ;;  %v5853_v55 = vadd.f32 %v5852_v48, %v4752_v47  ;;  %v5856_v56 = vadd.f32 %v3984_v53, %v7959_v6 }
 0x2e3   : > { %v4861_v57 = vmax.f32 %v5851_v51, 0.0  ;;  %v5855_v58 = vadd.f32 %v5854_v52, %v4754_v50 }
 0x2e4   : > { %v4862_v59 = vmax.f32 %v5853_v55, 0.0  ;;  %v5857_v60 = vadd.f32 %v5856_v56, %v4756_v54 }
 0x2e5   : > { %4925 = vst [vmem:[%s7965_s12 + $0x100] sm:$0xff] %v4861_v57  ;;  %v4863_v61 = vmax.f32 %v5855_v58, 0.0 }
 0x2e6   : > { %4926 = vst [vmem:[%s7965_s12 + $0x108] sm:$0xff] %v4862_v59  ;;  %v4864_v62 = vmax.f32 %v5857_v60, 0.0  ;;  %v3988_v63 = vpop.f32.mrb[36].mxu1 }
 0x2e7   : > { %v4760_v0 = vpop.f32.mrb[36].mxu0  ;;  %4927 = vst [vmem:[%s7965_s12 + $0x110] sm:$0xff] %v4863_v61  ;;  %v5858_v1 = vadd.f32 %v3988_v63, %v7956_v5  ;;  %v3990_v2 = vpop.f32.mrb[37].mxu1 }
 0x2e8   : > { %v4762_v3 = vpop.f32.mrb[37].mxu0  ;;  %4928 = vst [vmem:[%s7965_s12 + $0x118] sm:$0xff] %v4864_v62  ;;  %v5860_v4 = vadd.f32 %v3990_v2, %v7959_v6  ;;  %v3992_v7 = vpop.f32.mrb[38].mxu1 }
 0x2e9   : > { %v4764_v8 = vpop.f32.mrb[38].mxu0  ;;  %v5859_v9 = vadd.f32 %v5858_v1, %v4760_v0  ;;  %v5862_v10 = vadd.f32 %v3992_v7, %v7956_v5  ;;  %v3994_v11 = vpop.f32.mrb[39].mxu1 }
 0x2ea   : > { %v4766_v12 = vpop.f32.mrb[39].mxu0  ;;  %v5861_v13 = vadd.f32 %v5860_v4, %v4762_v3  ;;  %v5864_v14 = vadd.f32 %v3994_v11, %v7959_v6 }
 0x2eb   : > { %v4865_v15 = vmax.f32 %v5859_v9, 0.0  ;;  %v5863_v16 = vadd.f32 %v5862_v10, %v4764_v8 }
 0x2ec   : > { %v4866_v17 = vmax.f32 %v5861_v13, 0.0  ;;  %v5865_v18 = vadd.f32 %v5864_v14, %v4766_v12 }
 0x2ed   : > { %4929 = vst [vmem:[%s7965_s12 + $0x120] sm:$0xff] %v4865_v15  ;;  %v4867_v19 = vmax.f32 %v5863_v16, 0.0 }
 0x2ee   : > { %4930 = vst [vmem:[%s7965_s12 + $0x128] sm:$0xff] %v4866_v17  ;;  %v4868_v20 = vmax.f32 %v5865_v18, 0.0  ;;  %v3998_v21 = vpop.f32.mrb[40].mxu1 }
 0x2ef   : > { %v4770_v22 = vpop.f32.mrb[40].mxu0  ;;  %4931 = vst [vmem:[%s7965_s12 + $0x130] sm:$0xff] %v4867_v19  ;;  %v5866_v23 = vadd.f32 %v3998_v21, %v7956_v5  ;;  %v4000_v24 = vpop.f32.mrb[41].mxu1 }
 0x2f0   : > { %v4772_v25 = vpop.f32.mrb[41].mxu0  ;;  %4932 = vst [vmem:[%s7965_s12 + $0x138] sm:$0xff] %v4868_v20  ;;  %v5868_v26 = vadd.f32 %v4000_v24, %v7959_v6  ;;  %v4002_v27 = vpop.f32.mrb[42].mxu1 }
 0x2f1   : > { %v4774_v28 = vpop.f32.mrb[42].mxu0  ;;  %v5867_v29 = vadd.f32 %v5866_v23, %v4770_v22  ;;  %v5870_v30 = vadd.f32 %v4002_v27, %v7956_v5  ;;  %v4004_v31 = vpop.f32.mrb[43].mxu1 }
 0x2f2   : > { %v4776_v32 = vpop.f32.mrb[43].mxu0  ;;  %v5869_v33 = vadd.f32 %v5868_v26, %v4772_v25  ;;  %v5872_v34 = vadd.f32 %v4004_v31, %v7959_v6 }
 0x2f3   : > { %v4869_v35 = vmax.f32 %v5867_v29, 0.0  ;;  %v5871_v36 = vadd.f32 %v5870_v30, %v4774_v28 }
 0x2f4   : > { %v4870_v37 = vmax.f32 %v5869_v33, 0.0  ;;  %v5873_v38 = vadd.f32 %v5872_v34, %v4776_v32 }
 0x2f5   : > { %4933 = vst [vmem:[%s7965_s12 + $0x140] sm:$0xff] %v4869_v35  ;;  %v4871_v39 = vmax.f32 %v5871_v36, 0.0 }
 0x2f6   : > { %4934 = vst [vmem:[%s7965_s12 + $0x148] sm:$0xff] %v4870_v37  ;;  %v4872_v40 = vmax.f32 %v5873_v38, 0.0  ;;  %v4008_v41 = vpop.f32.mrb[44].mxu1 }
 0x2f7   : > { %v4780_v42 = vpop.f32.mrb[44].mxu0  ;;  %4935 = vst [vmem:[%s7965_s12 + $0x150] sm:$0xff] %v4871_v39  ;;  %v5874_v43 = vadd.f32 %v4008_v41, %v7956_v5  ;;  %v4010_v44 = vpop.f32.mrb[45].mxu1 }
 0x2f8   : > { %v4782_v45 = vpop.f32.mrb[45].mxu0  ;;  %4936 = vst [vmem:[%s7965_s12 + $0x158] sm:$0xff] %v4872_v40  ;;  %v5876_v46 = vadd.f32 %v4010_v44, %v7959_v6  ;;  %v4012_v47 = vpop.f32.mrb[46].mxu1 }
 0x2f9   : > { %v4784_v48 = vpop.f32.mrb[46].mxu0  ;;  %v5875_v49 = vadd.f32 %v5874_v43, %v4780_v42  ;;  %v5878_v50 = vadd.f32 %v4012_v47, %v7956_v5  ;;  %v4014_v51 = vpop.f32.mrb[47].mxu1 }
 0x2fa   : > { %v4786_v52 = vpop.f32.mrb[47].mxu0  ;;  %v5877_v53 = vadd.f32 %v5876_v46, %v4782_v45  ;;  %v5880_v54 = vadd.f32 %v4014_v51, %v7959_v6 }
 0x2fb   : > { %v4873_v55 = vmax.f32 %v5875_v49, 0.0  ;;  %v5879_v56 = vadd.f32 %v5878_v50, %v4784_v48 }
 0x2fc   : > { %v4874_v57 = vmax.f32 %v5877_v53, 0.0  ;;  %v5881_v58 = vadd.f32 %v5880_v54, %v4786_v52 }
 0x2fd   : > { %4937 = vst [vmem:[%s7965_s12 + $0x160] sm:$0xff] %v4873_v55  ;;  %v4875_v59 = vmax.f32 %v5879_v56, 0.0 }
 0x2fe   : > { %4938 = vst [vmem:[%s7965_s12 + $0x168] sm:$0xff] %v4874_v57  ;;  %v4876_v60 = vmax.f32 %v5881_v58, 0.0  ;;  %v4018_v61 = vpop.f32.mrb[48].mxu1 }
 0x2ff   : > { %v4790_v62 = vpop.f32.mrb[48].mxu0  ;;  %4939 = vst [vmem:[%s7965_s12 + $0x170] sm:$0xff] %v4875_v59  ;;  %v5882_v63 = vadd.f32 %v4018_v61, %v7956_v5  ;;  %v4020_v0 = vpop.f32.mrb[49].mxu1 }
 0x300   : > { %v4792_v1 = vpop.f32.mrb[49].mxu0  ;;  %4940 = vst [vmem:[%s7965_s12 + $0x178] sm:$0xff] %v4876_v60  ;;  %v5884_v2 = vadd.f32 %v4020_v0, %v7959_v6  ;;  %v4022_v3 = vpop.f32.mrb[50].mxu1 }
 0x301   : > { %v4794_v4 = vpop.f32.mrb[50].mxu0  ;;  %v5883_v7 = vadd.f32 %v5882_v63, %v4790_v62  ;;  %v5886_v8 = vadd.f32 %v4022_v3, %v7956_v5  ;;  %v4024_v9 = vpop.f32.mrb[51].mxu1 }
 0x302   : > { %v4796_v10 = vpop.f32.mrb[51].mxu0  ;;  %v5885_v11 = vadd.f32 %v5884_v2, %v4792_v1  ;;  %v5888_v12 = vadd.f32 %v4024_v9, %v7959_v6 }
 0x303   : > { %v4877_v13 = vmax.f32 %v5883_v7, 0.0  ;;  %v5887_v14 = vadd.f32 %v5886_v8, %v4794_v4 }
 0x304   : > { %v4878_v15 = vmax.f32 %v5885_v11, 0.0  ;;  %v5889_v16 = vadd.f32 %v5888_v12, %v4796_v10 }
 0x305   : > { %4941 = vst [vmem:[%s7965_s12 + $0x180] sm:$0xff] %v4877_v13  ;;  %v4879_v17 = vmax.f32 %v5887_v14, 0.0 }
 0x306   : > { %4942 = vst [vmem:[%s7965_s12 + $0x188] sm:$0xff] %v4878_v15  ;;  %v4880_v18 = vmax.f32 %v5889_v16, 0.0  ;;  %v4028_v19 = vpop.f32.mrb[52].mxu1 }
 0x307   : > { %v4800_v20 = vpop.f32.mrb[52].mxu0  ;;  %4943 = vst [vmem:[%s7965_s12 + $0x190] sm:$0xff] %v4879_v17  ;;  %v5890_v21 = vadd.f32 %v4028_v19, %v7956_v5  ;;  %v4030_v22 = vpop.f32.mrb[53].mxu1 }
 0x308   : > { %v4802_v23 = vpop.f32.mrb[53].mxu0  ;;  %4944 = vst [vmem:[%s7965_s12 + $0x198] sm:$0xff] %v4880_v18  ;;  %v5892_v24 = vadd.f32 %v4030_v22, %v7959_v6  ;;  %v4032_v25 = vpop.f32.mrb[54].mxu1 }
 0x309   : > { %v4804_v26 = vpop.f32.mrb[54].mxu0  ;;  %v5891_v27 = vadd.f32 %v5890_v21, %v4800_v20  ;;  %v5894_v28 = vadd.f32 %v4032_v25, %v7956_v5  ;;  %v4034_v29 = vpop.f32.mrb[55].mxu1 }
 0x30a   : > { %v4806_v30 = vpop.f32.mrb[55].mxu0  ;;  %v5893_v31 = vadd.f32 %v5892_v24, %v4802_v23  ;;  %v5896_v32 = vadd.f32 %v4034_v29, %v7959_v6 }
 0x30b   : > { %v4881_v33 = vmax.f32 %v5891_v27, 0.0  ;;  %v5895_v34 = vadd.f32 %v5894_v28, %v4804_v26 }
 0x30c   : > { %v4882_v35 = vmax.f32 %v5893_v31, 0.0  ;;  %v5897_v36 = vadd.f32 %v5896_v32, %v4806_v30 }
 0x30d   : > { %4945 = vst [vmem:[%s7965_s12 + $0x1a0] sm:$0xff] %v4881_v33  ;;  %v4883_v37 = vmax.f32 %v5895_v34, 0.0 }
 0x30e   : > { %4946 = vst [vmem:[%s7965_s12 + $0x1a8] sm:$0xff] %v4882_v35  ;;  %v4884_v38 = vmax.f32 %v5897_v36, 0.0  ;;  %v4038_v39 = vpop.f32.mrb[56].mxu1 }
 0x30f   : > { %v4810_v40 = vpop.f32.mrb[56].mxu0  ;;  %4947 = vst [vmem:[%s7965_s12 + $0x1b0] sm:$0xff] %v4883_v37  ;;  %v5898_v41 = vadd.f32 %v4038_v39, %v7956_v5  ;;  %v4040_v42 = vpop.f32.mrb[57].mxu1 }
 0x310   : > { %v4812_v43 = vpop.f32.mrb[57].mxu0  ;;  %4948 = vst [vmem:[%s7965_s12 + $0x1b8] sm:$0xff] %v4884_v38  ;;  %v5900_v44 = vadd.f32 %v4040_v42, %v7959_v6  ;;  %v4042_v45 = vpop.f32.mrb[58].mxu1 }
 0x311   : > { %v4814_v46 = vpop.f32.mrb[58].mxu0  ;;  %v5899_v47 = vadd.f32 %v5898_v41, %v4810_v40  ;;  %v5902_v48 = vadd.f32 %v4042_v45, %v7956_v5  ;;  %v4044_v49 = vpop.f32.mrb[59].mxu1 }
 0x312   : > { %v4816_v50 = vpop.f32.mrb[59].mxu0  ;;  %v5901_v51 = vadd.f32 %v5900_v44, %v4812_v43  ;;  %v5904_v52 = vadd.f32 %v4044_v49, %v7959_v6 }
 0x313   : > { %v4885_v53 = vmax.f32 %v5899_v47, 0.0  ;;  %v5903_v54 = vadd.f32 %v5902_v48, %v4814_v46 }
 0x314   : > { %v4886_v55 = vmax.f32 %v5901_v51, 0.0  ;;  %v5905_v56 = vadd.f32 %v5904_v52, %v4816_v50 }
 0x315   : > { %4949 = vst [vmem:[%s7965_s12 + $0x1c0] sm:$0xff] %v4885_v53  ;;  %v4887_v57 = vmax.f32 %v5903_v54, 0.0 }
 0x316   : > { %4950 = vst [vmem:[%s7965_s12 + $0x1c8] sm:$0xff] %v4886_v55  ;;  %v4888_v58 = vmax.f32 %v5905_v56, 0.0  ;;  %v4048_v59 = vpop.f32.mrb[60].mxu1 }
 0x317   : > { %v4820_v60 = vpop.f32.mrb[60].mxu0  ;;  %4951 = vst [vmem:[%s7965_s12 + $0x1d0] sm:$0xff] %v4887_v57  ;;  %v5906_v61 = vadd.f32 %v4048_v59, %v7956_v5  ;;  %v4050_v62 = vpop.f32.mrb[61].mxu1 }
 0x318   : > { %v4822_v63 = vpop.f32.mrb[61].mxu0  ;;  %4952 = vst [vmem:[%s7965_s12 + $0x1d8] sm:$0xff] %v4888_v58  ;;  %v5908_v0 = vadd.f32 %v4050_v62, %v7959_v6  ;;  %v4052_v1 = vpop.f32.mrb[62].mxu1 }
 0x319   : > { %v4824_v2 = vpop.f32.mrb[62].mxu0  ;;  %v5907_v3 = vadd.f32 %v5906_v61, %v4820_v60  ;;  %v5910_v4 = vadd.f32 %v4052_v1, %v7956_v5  ;;  %v4054_v7 = vpop.f32.mrb[63].mxu1 }
 0x31a   : > { %v4826_v8 = vpop.f32.mrb[63].mxu0  ;;  %v5909_v9 = vadd.f32 %v5908_v0, %v4822_v63  ;;  %v5912_v10 = vadd.f32 %v4054_v7, %v7959_v6  ;;  %4963 = sbr.rel (!%p6903_p4) target bundleno = 873 (0x369), region = 36 }
 0x31b   : > { %v4889_v11 = vmax.f32 %v5907_v3, 0.0  ;;  %v5911_v12 = vadd.f32 %v5910_v4, %v4824_v2 }
 0x31c   : > { %v4890_v13 = vmax.f32 %v5909_v9, 0.0  ;;  %v5913_v14 = vadd.f32 %v5912_v10, %v4826_v8 }
 0x31d   : > { %4953 = vst [vmem:[%s7965_s12 + $0x1e0] sm:$0xff] %v4889_v11  ;;  %v4891_v15 = vmax.f32 %v5911_v12, 0.0 }
 0x31e   : > { %4954 = vst [vmem:[%s7965_s12 + $0x1e8] sm:$0xff] %v4890_v13  ;;  %v4892_v16 = vmax.f32 %v5913_v14, 0.0 }
 0x31f   : > { %4955 = vst [vmem:[%s7965_s12 + $0x1f0] sm:$0xff] %v4891_v15 }
 0x320   : > { %4956 = vst [vmem:[%s7965_s12 + $0x1f8] sm:$0xff] %v4892_v16 }
 0x321   : > { %s8315_s21 = smov (!%p4966_p8, %s4965_s21), 32 }
 0x322   : > { %s5781_s26 = sshll.u32 %s8315_s21, 8 }
 0x323   : > { %p5768_p9 = scmp.eq.s32.totalorder %s5781_s26, 0 }
 0x324   : > { %s8104_s27 = sshrl.u32 (!%p5768_p9), %s8315_s21, 5 }
 0x325   : > { %4976 = sbr.rel (%p5768_p9) target bundleno = 873 (0x369), region = 40  ;;  %p5769_p10 = scmp.le.s32.totalorder (!%p5768_p9), %s8104_s27, 0 }
 0x32c   : > { %5197 = sbr.rel (%p5769_p10) target bundleno = 852 (0x354), region = 88  ;;  %s8306_s15 = smov (!%p5769_p10), %s8098_s25 }
 0x32d   : > { %s8307_s20 = smov (!%p5769_p10), %s7965_s12  ;;  %s8113_s14 = smov (!%p5769_p10), 0  }
 0x32e   : > { %s8115_s28 = smov (!%p5769_p10), 0  }
 0x333 LB: >> { %v4989_v5 = vld [vmem:[%s6832_s20] sm:$0xff]  ;;  %v4991_v6 = vld [vmem:[%s6832_s20 + $0x10] sm:$0xff]  ;;  %s5117_s29 = sadd.s32 1, %s6836_s14  ;;  %v5053_v47 = vld [vmem:[%s6832_s20 + $0x8] sm:$0xff]  ;;  %s4983_s28 = sadd.s32 1, %s6840_s28   ;;  %s6840_s28 = sphi %s8115_s28, %s4983_s28   ;;  %s6836_s14 = sphi %s8113_s14, %s8310_s14   ;;  %s6832_s20 = sphi %s8307_s20, %s8309_s20   ;;  %s6828_s15 = sphi %s8306_s15, %s8308_s15  }
 0x334   : >> { %v4993_v17 = vld [vmem:[%s6832_s20 + $0x20] sm:$0xff]  ;;  %4990 = vst [vmem:[%s6828_s15] sm:$0xff] %v4989_v5  ;;  %4992 = vst [vmem:[%s6828_s15 + $0x10] sm:$0xff] %v4991_v6  ;;  %v4995_v18 = vld [vmem:[%s6832_s20 + $0x30] sm:$0xff]  ;;  %p5118_p11 = scmp.ge.s32.totalorder %s5117_s29, %s8104_s27  ;;  %p4982_p12 = scmp.ge.s32.totalorder %s4983_s28, %s8104_s27 }
 0x335   : >> { %4994 = vst [vmem:[%s6828_s15 + $0x20] sm:$0xff] %v4993_v17  ;;  %v4997_v19 = vld [vmem:[%s6832_s20 + $0x40] sm:$0xff]  ;;  %v4999_v20 = vld [vmem:[%s6832_s20 + $0x50] sm:$0xff]  ;;  %4996 = vst [vmem:[%s6828_s15 + $0x30] sm:$0xff] %v4995_v18 }
 0x336   : >> { %4998 = vst [vmem:[%s6828_s15 + $0x40] sm:$0xff] %v4997_v19  ;;  %5000 = vst [vmem:[%s6828_s15 + $0x50] sm:$0xff] %v4999_v20  ;;  %v5001_v21 = vld [vmem:[%s6832_s20 + $0x60] sm:$0xff]  ;;  %v5003_v22 = vld [vmem:[%s6832_s20 + $0x70] sm:$0xff]  ;;  %s8317_s29 = smov (%p5118_p11, %s5117_s29), 0 }
 0x337   : >> { %v5005_v23 = vld [vmem:[%s6832_s20 + $0x80] sm:$0xff]  ;;  %5002 = vst [vmem:[%s6828_s15 + $0x60] sm:$0xff] %v5001_v21  ;;  %5004 = vst [vmem:[%s6828_s15 + $0x70] sm:$0xff] %v5003_v22  ;;  %v5007_v24 = vld [vmem:[%s6832_s20 + $0x90] sm:$0xff]  ;;  %s5770_s30 = sshll.u32 %s8317_s29, 9  ;;  %s8310_s14 = smov %s8317_s29 }
 0x338   : >> { %5006 = vst [vmem:[%s6828_s15 + $0x80] sm:$0xff] %v5005_v23  ;;  %v5009_v25 = vld [vmem:[%s6832_s20 + $0xa0] sm:$0xff]  ;;  %v5011_v26 = vld [vmem:[%s6832_s20 + $0xb0] sm:$0xff]  ;;  %5008 = vst [vmem:[%s6828_s15 + $0x90] sm:$0xff] %v5007_v24  ;;  %s8171_s5 = scalar_lea.vmem %s7965_s12, %s5770_s30 [#allocation2]   ;;  %s8174_s6 = scalar_lea.vmem %s8098_s25, %s5770_s30  }
 0x339   : >> { %5010 = vst [vmem:[%s6828_s15 + $0xa0] sm:$0xff] %v5009_v25  ;;  %5012 = vst [vmem:[%s6828_s15 + $0xb0] sm:$0xff] %v5011_v26  ;;  %v5013_v27 = vld [vmem:[%s6832_s20 + $0xc0] sm:$0xff]  ;;  %v5015_v28 = vld [vmem:[%s6832_s20 + $0xd0] sm:$0xff] }
 0x33a   : >> { %v5017_v29 = vld [vmem:[%s6832_s20 + $0xe0] sm:$0xff]  ;;  %5014 = vst [vmem:[%s6828_s15 + $0xc0] sm:$0xff] %v5013_v27  ;;  %5016 = vst [vmem:[%s6828_s15 + $0xd0] sm:$0xff] %v5015_v28  ;;  %v5019_v30 = vld [vmem:[%s6832_s20 + $0xf0] sm:$0xff] }
 0x33b   : >> { %5018 = vst [vmem:[%s6828_s15 + $0xe0] sm:$0xff] %v5017_v29  ;;  %v5021_v31 = vld [vmem:[%s6832_s20 + $0x100] sm:$0xff]  ;;  %v5023_v32 = vld [vmem:[%s6832_s20 + $0x110] sm:$0xff]  ;;  %5020 = vst [vmem:[%s6828_s15 + $0xf0] sm:$0xff] %v5019_v30 }
 0x33c   : >> { %5022 = vst [vmem:[%s6828_s15 + $0x100] sm:$0xff] %v5021_v31  ;;  %5024 = vst [vmem:[%s6828_s15 + $0x110] sm:$0xff] %v5023_v32  ;;  %v5025_v33 = vld [vmem:[%s6832_s20 + $0x120] sm:$0xff]  ;;  %v5027_v34 = vld [vmem:[%s6832_s20 + $0x130] sm:$0xff] }
 0x33d   : >> { %v5029_v35 = vld [vmem:[%s6832_s20 + $0x140] sm:$0xff]  ;;  %5026 = vst [vmem:[%s6828_s15 + $0x120] sm:$0xff] %v5025_v33  ;;  %5028 = vst [vmem:[%s6828_s15 + $0x130] sm:$0xff] %v5027_v34  ;;  %v5031_v36 = vld [vmem:[%s6832_s20 + $0x150] sm:$0xff] }
 0x33e   : >> { %5030 = vst [vmem:[%s6828_s15 + $0x140] sm:$0xff] %v5029_v35  ;;  %v5033_v37 = vld [vmem:[%s6832_s20 + $0x160] sm:$0xff]  ;;  %v5035_v38 = vld [vmem:[%s6832_s20 + $0x170] sm:$0xff]  ;;  %5032 = vst [vmem:[%s6828_s15 + $0x150] sm:$0xff] %v5031_v36 }
 0x33f   : >> { %5034 = vst [vmem:[%s6828_s15 + $0x160] sm:$0xff] %v5033_v37  ;;  %5036 = vst [vmem:[%s6828_s15 + $0x170] sm:$0xff] %v5035_v38  ;;  %v5037_v39 = vld [vmem:[%s6832_s20 + $0x180] sm:$0xff]  ;;  %v5039_v40 = vld [vmem:[%s6832_s20 + $0x190] sm:$0xff] }
 0x340   : >> { %v5041_v41 = vld [vmem:[%s6832_s20 + $0x1a0] sm:$0xff]  ;;  %5038 = vst [vmem:[%s6828_s15 + $0x180] sm:$0xff] %v5037_v39  ;;  %5040 = vst [vmem:[%s6828_s15 + $0x190] sm:$0xff] %v5039_v40  ;;  %v5043_v42 = vld [vmem:[%s6832_s20 + $0x1b0] sm:$0xff] }
 0x341   : >> { %5042 = vst [vmem:[%s6828_s15 + $0x1a0] sm:$0xff] %v5041_v41  ;;  %v5045_v43 = vld [vmem:[%s6832_s20 + $0x1c0] sm:$0xff]  ;;  %v5047_v44 = vld [vmem:[%s6832_s20 + $0x1d0] sm:$0xff]  ;;  %5044 = vst [vmem:[%s6828_s15 + $0x1b0] sm:$0xff] %v5043_v42 }
 0x342   : >> { %5046 = vst [vmem:[%s6828_s15 + $0x1c0] sm:$0xff] %v5045_v43  ;;  %5048 = vst [vmem:[%s6828_s15 + $0x1d0] sm:$0xff] %v5047_v44  ;;  %v5049_v45 = vld [vmem:[%s6832_s20 + $0x1e0] sm:$0xff]  ;;  %v5051_v46 = vld [vmem:[%s6832_s20 + $0x1f0] sm:$0xff] }
 0x343   : >> { %5050 = vst [vmem:[%s6828_s15 + $0x1e0] sm:$0xff] %v5049_v45  ;;  %5052 = vst [vmem:[%s6828_s15 + $0x1f0] sm:$0xff] %v5051_v46  ;;  %v5055_v48 = vld [vmem:[%s6832_s20 + $0x18] sm:$0xff]  ;;  %v5057_v49 = vld [vmem:[%s6832_s20 + $0x28] sm:$0xff] }
 0x344   : >> { %5054 = vst [vmem:[%s6828_s15 + $0x8] sm:$0xff] %v5053_v47  ;;  %v5059_v50 = vld [vmem:[%s6832_s20 + $0x38] sm:$0xff]  ;;  %5056 = vst [vmem:[%s6828_s15 + $0x18] sm:$0xff] %v5055_v48  ;;  %v5061_v51 = vld [vmem:[%s6832_s20 + $0x48] sm:$0xff] }
 0x345   : >> { %5058 = vst [vmem:[%s6828_s15 + $0x28] sm:$0xff] %v5057_v49  ;;  %5060 = vst [vmem:[%s6828_s15 + $0x38] sm:$0xff] %v5059_v50  ;;  %v5063_v52 = vld [vmem:[%s6832_s20 + $0x58] sm:$0xff]  ;;  %v5065_v53 = vld [vmem:[%s6832_s20 + $0x68] sm:$0xff] }
 0x346   : >> { %5062 = vst [vmem:[%s6828_s15 + $0x48] sm:$0xff] %v5061_v51  ;;  %5064 = vst [vmem:[%s6828_s15 + $0x58] sm:$0xff] %v5063_v52  ;;  %v5067_v54 = vld [vmem:[%s6832_s20 + $0x78] sm:$0xff]  ;;  %v5069_v55 = vld [vmem:[%s6832_s20 + $0x88] sm:$0xff] }
 0x347   : >> { %5066 = vst [vmem:[%s6828_s15 + $0x68] sm:$0xff] %v5065_v53  ;;  %v5071_v56 = vld [vmem:[%s6832_s20 + $0x98] sm:$0xff]  ;;  %5068 = vst [vmem:[%s6828_s15 + $0x78] sm:$0xff] %v5067_v54  ;;  %v5073_v57 = vld [vmem:[%s6832_s20 + $0xa8] sm:$0xff] }
 0x348   : >> { %5070 = vst [vmem:[%s6828_s15 + $0x88] sm:$0xff] %v5069_v55  ;;  %5072 = vst [vmem:[%s6828_s15 + $0x98] sm:$0xff] %v5071_v56  ;;  %v5075_v58 = vld [vmem:[%s6832_s20 + $0xb8] sm:$0xff]  ;;  %v5077_v59 = vld [vmem:[%s6832_s20 + $0xc8] sm:$0xff] }
 0x349   : >> { %5074 = vst [vmem:[%s6828_s15 + $0xa8] sm:$0xff] %v5073_v57  ;;  %5076 = vst [vmem:[%s6828_s15 + $0xb8] sm:$0xff] %v5075_v58  ;;  %v5079_v60 = vld [vmem:[%s6832_s20 + $0xd8] sm:$0xff]  ;;  %v5081_v61 = vld [vmem:[%s6832_s20 + $0xe8] sm:$0xff] }
 0x34a   : >> { %5078 = vst [vmem:[%s6828_s15 + $0xc8] sm:$0xff] %v5077_v59  ;;  %v5083_v62 = vld [vmem:[%s6832_s20 + $0xf8] sm:$0xff]  ;;  %5080 = vst [vmem:[%s6828_s15 + $0xd8] sm:$0xff] %v5079_v60  ;;  %v5085_v63 = vld [vmem:[%s6832_s20 + $0x108] sm:$0xff] }
 0x34b   : >> { %5082 = vst [vmem:[%s6828_s15 + $0xe8] sm:$0xff] %v5081_v61  ;;  %5084 = vst [vmem:[%s6828_s15 + $0xf8] sm:$0xff] %v5083_v62  ;;  %v5087_v0 = vld [vmem:[%s6832_s20 + $0x118] sm:$0xff]  ;;  %v5089_v1 = vld [vmem:[%s6832_s20 + $0x128] sm:$0xff] }
 0x34c   : >> { %5086 = vst [vmem:[%s6828_s15 + $0x108] sm:$0xff] %v5085_v63  ;;  %5088 = vst [vmem:[%s6828_s15 + $0x118] sm:$0xff] %v5087_v0  ;;  %v5091_v2 = vld [vmem:[%s6832_s20 + $0x138] sm:$0xff]  ;;  %v5093_v3 = vld [vmem:[%s6832_s20 + $0x148] sm:$0xff] }
 0x34d   : >> { %5090 = vst [vmem:[%s6828_s15 + $0x128] sm:$0xff] %v5089_v1  ;;  %v5095_v4 = vld [vmem:[%s6832_s20 + $0x158] sm:$0xff]  ;;  %5092 = vst [vmem:[%s6828_s15 + $0x138] sm:$0xff] %v5091_v2  ;;  %v5097_v7 = vld [vmem:[%s6832_s20 + $0x168] sm:$0xff]  ;;  %4985 = sbr.rel (!%p4982_p12) target bundleno = 819 (0x333), region = 94 }
 0x34e   : >> { %5094 = vst [vmem:[%s6828_s15 + $0x148] sm:$0xff] %v5093_v3  ;;  %5096 = vst [vmem:[%s6828_s15 + $0x158] sm:$0xff] %v5095_v4  ;;  %v5099_v8 = vld [vmem:[%s6832_s20 + $0x178] sm:$0xff]  ;;  %v5101_v9 = vld [vmem:[%s6832_s20 + $0x188] sm:$0xff] }
 0x34f   : >> { %5098 = vst [vmem:[%s6828_s15 + $0x168] sm:$0xff] %v5097_v7  ;;  %5100 = vst [vmem:[%s6828_s15 + $0x178] sm:$0xff] %v5099_v8  ;;  %v5103_v10 = vld [vmem:[%s6832_s20 + $0x198] sm:$0xff]  ;;  %v5105_v11 = vld [vmem:[%s6832_s20 + $0x1a8] sm:$0xff] }
 0x350   : >> { %5102 = vst [vmem:[%s6828_s15 + $0x188] sm:$0xff] %v5101_v9  ;;  %v5107_v12 = vld [vmem:[%s6832_s20 + $0x1b8] sm:$0xff]  ;;  %5104 = vst [vmem:[%s6828_s15 + $0x198] sm:$0xff] %v5103_v10  ;;  %v5109_v13 = vld [vmem:[%s6832_s20 + $0x1c8] sm:$0xff] }
 0x351   : >> { %5106 = vst [vmem:[%s6828_s15 + $0x1a8] sm:$0xff] %v5105_v11  ;;  %5108 = vst [vmem:[%s6828_s15 + $0x1b8] sm:$0xff] %v5107_v12  ;;  %v5111_v14 = vld [vmem:[%s6832_s20 + $0x1d8] sm:$0xff]  ;;  %v5113_v15 = vld [vmem:[%s6832_s20 + $0x1e8] sm:$0xff] }
 0x352   : >> { %5110 = vst [vmem:[%s6828_s15 + $0x1c8] sm:$0xff] %v5109_v13  ;;  %5112 = vst [vmem:[%s6828_s15 + $0x1d8] sm:$0xff] %v5111_v14  ;;  %v5115_v16 = vld [vmem:[%s6832_s20 + $0x1f8] sm:$0xff]  ;;  %s8309_s20 = smov %s8171_s5 }
 0x353   : >> { %5114 = vst [vmem:[%s6828_s15 + $0x1e8] sm:$0xff] %v5113_v15  ;;  %5116 = vst [vmem:[%s6828_s15 + $0x1f8] sm:$0xff] %v5115_v16  ;;  %s8308_s15 = smov %s8174_s6 }
 0x354 PF: > { %s8279_s7 = sand.u32 31, %s8315_s21   ;;  %s5784_s8 = sshll.u32 %s8104_s27, 9 }
 0x355   : > { %s8283_s9 = scalar_lea.vmem %s7965_s12, %s5784_s8 [#allocation2]   ;;  %s5130_s10 = scalar_lea.vmem %s8098_s25, %s5784_s8  }
 0x356   : > { %p5775_p13 = scmp.le.s32.totalorder %s8279_s7, 0 }
 0x357   : > { %s6842_s11 = smov (!%p5775_p13), %s5130_s10   ;;  %s6846_s17 = smov (!%p5775_p13), %s8283_s9  }
 0x358   : > { %5211 = sbr.rel (%p5775_p13) target bundleno = 873 (0x369), region = 99  ;;  %s6850_s4 = smov (!%p5775_p13), 0  }
 0x359   : > { %s6854_s18 = smov (!%p5775_p13), 0  }
 0x35f LB: >> { %v5140_v5 = vld [vmem:[%s6848_s17] sm:$0xff]  ;;  %v5142_v6 = vld [vmem:[%s6848_s17 + $0x8] sm:$0xff]  ;;  %s5144_s12 = sadd.s32 1, %s6852_s4  ;;  %s5134_s18 = sadd.s32 1, %s6856_s18   ;;  %s6856_s18 = sphi %s6854_s18, %s5134_s18   ;;  %s6852_s4 = sphi %s6850_s4, %s6851_s4   ;;  %s6848_s17 = sphi %s6846_s17, %s5149_s17   ;;  %s6844_s11 = sphi %s6842_s11, %s5150_s11  }
 0x360   : >> { %5141 = vst [vmem:[%s6844_s11] sm:$0xff] %v5140_v5  ;;  %5143 = vst [vmem:[%s6844_s11 + $0x8] sm:$0xff] %v5142_v6  ;;  %p5145_p0 = scmp.ge.s32.totalorder %s5144_s12, %s8279_s7  ;;  %p5133_p1 = scmp.ge.s32.totalorder %s5134_s18, %s8279_s7 }
 0x362   : >> { %s8319_s12 = smov (%p5145_p0, %s5144_s12), 0  ;;  %5136 = sbr.rel (!%p5133_p1) target bundleno = 863 (0x35f), region = 105 }
 0x363   : >> { %s5776_s21 = sshll.u32 %s8319_s12, 4  ;;  %s6851_s4 = smov %s8319_s12  }
 0x364   : >> { %s5149_s17 = scalar_lea.vmem %s8283_s9, %s5776_s21 [#allocation2]   ;;  %s5150_s11 = scalar_lea.vmem %s5130_s10, %s5776_s21  }
 0x369 PF: > { %p10_p2 = scmp.ge.s32.totalorder %s6893_s16, 4   ;;  %s8311_s12 = smov %s6820_s13 }
 0x36a   : > { %s8312_s13 = smov %s6901_s19  ;;  %s8313_s14 = smov %s6893_s16 }
 0x36b   :  { %12 = sbr.rel (!%p10_p2) target bundleno = 2 (0x2), region = 116 }

// kernel: pdn_s_forward.10
= control target key start
LH: loop header
LB: loop body
LE: loop exit
PB: predicated region body
PF: predicated region fallthrough
CT: control target
= control target key end

     0   :  { %s4554_s12 = smov 0   ;;  %s4556_s13 = smov 0   ;;  %s5690_s0 = inlined_call_operand.vmem [shape: bf16[98,2304], index: 0, kind: input, shape index: {}]   ;;  %s5691_s1 = inlined_call_operand.vmem [shape: bf16[2304,256], index: 1, kind: input, shape index: {}]   ;;  %s5692_s2 = inlined_call_operand.vmem [shape: f32[1,256], index: 2, kind: input, shape index: {}]   ;;  %s5693_s3 = inlined_call_operand.vmem [shape: f32[98,256], index: 3, kind: output, shape index: {}]  }
   0x1   :  { %s4558_s14 = smov 0  }
   0x2 LB: > { %s4567_s15 = sadd.s32 4294967295, %s4500_s14   ;;  %s4569_s16 = sadd.s32 1, %s4500_s14   ;;  %s4500_s14 = sphi %s4558_s14, %s5700_s14   ;;  %s4496_s13 = sphi %s4556_s13, %s5699_s13   ;;  %s4492_s12 = sphi %s4554_s12, %s5698_s12  }
   0x3   : > { %s85_s17 = ssub.s32 %s4500_s14, %s4569_s16  ;;  %s88_s18 = sadd.s32 1, %s4496_s13 }
   0x4   : > { %p86_p0 = scmp.eq.s32.totalorder %s85_s17, 0  ;;  %p98_p1 = scmp.ne.s32.totalorder %s4496_s13, %s4492_s12 }
   0x5   : > { %p99_p2 = scmp.eq.s32.totalorder %s4567_s15, 1  ;;  %p3253_p3 = scmp.ge.s32.totalorder %s4500_s14, 1 }
   0x6   : > { %s4577_s19 = scalar_select %p86_p0, %s4496_s13, %s88_s18  }
   0x7   : > { %p4579_p4 = por %p99_p2, %p98_p1  ;;  %p149_p5 = scmp.lt.s32.totalorder %s4500_s14, 3 }
   0x9   : > { %p150_p6 = pnand %p3253_p3, %p149_p5 }
   0xa   : > { %v3906_v0 = vld [vmem:[%s5691_s1 + $0x4] ss:$8 sps:$4 sm:$0xff] (!%p150_p6)   ;;  %v3910_v2 = vld [vmem:[%s5691_s1] ss:$8 sps:$4 sm:$0xff] (!%p150_p6)   ;;  %v3912_v4 = vld [vmem:[%s5691_s1 + $0x14] ss:$8 sps:$4 sm:$0xff] (!%p150_p6)  }
   0xb   : > { %153 = sbr.rel (%p150_p6) target bundleno = 609 (0x261), region = 32  ;;  %v3908_v1 = vld [vmem:[%s5691_s1 + $0x404] ss:$8 sps:$4 sm:$0xff] (!%p150_p6)   ;;  %2373 = vmatprep.subr.bf16.mxu1 (!%p150_p6), %v3906_v0  ;;  %v3911_v3 = vld [vmem:[%s5691_s1 + $0x400] ss:$8 sps:$4 sm:$0xff] (!%p150_p6)   ;;  %s4674_s14 = sshll.u32 (!%p150_p6), %s4567_s15, 3 }
   0xc   : > { %2665 = vmatprep.subr.bf16.mxu0 (!%p150_p6), %v3908_v1  ;;  %2374 = vmatpush1.bf16.msra.mxu1 (!%p150_p6), %v3910_v2  ;;  %v3914_v5 = vld [vmem:[%s5691_s1 + $0x414] ss:$8 sps:$4 sm:$0xff] (!%p150_p6)   ;;  %v3916_v6 = vld [vmem:[%s5691_s1 + $0x10] ss:$8 sps:$4 sm:$0xff] (!%p150_p6)   ;;  %v3918_v8 = vld [vmem:[%s5691_s1 + $0x24] ss:$8 sps:$4 sm:$0xff] (!%p150_p6)  }
   0xd   : > { %2666 = vmatpush1.bf16.msra.mxu0 (!%p150_p6), %v3911_v3  ;;  %2375 = vmatprep.subr.bf16.mxu1 (!%p150_p6), %v3912_v4  ;;  %v3917_v7 = vld [vmem:[%s5691_s1 + $0x410] ss:$8 sps:$4 sm:$0xff] (!%p150_p6)   ;;  %v3920_v9 = vld [vmem:[%s5691_s1 + $0x424] ss:$8 sps:$4 sm:$0xff] (!%p150_p6)   ;;  %v3922_v10 = vld [vmem:[%s5691_s1 + $0x20] ss:$8 sps:$4 sm:$0xff] (!%p150_p6)  }
   0xe   : > { %2667 = vmatprep.subr.bf16.mxu0 (!%p150_p6), %v3914_v5  ;;  %v3923_v11 = vld [vmem:[%s5691_s1 + $0x420] ss:$8 sps:$4 sm:$0xff] (!%p150_p6)   ;;  %v3924_v12 = vld [vmem:[%s5691_s1 + $0x34] ss:$8 sps:$4 sm:$0xff] (!%p150_p6)   ;;  %v3928_v14 = vld [vmem:[%s5691_s1 + $0x30] ss:$8 sps:$4 sm:$0xff] (!%p150_p6)  }
   0xf   : > { %v3926_v13 = vld [vmem:[%s5691_s1 + $0x434] ss:$8 sps:$4 sm:$0xff] (!%p150_p6)   ;;  %v3929_v15 = vld [vmem:[%s5691_s1 + $0x430] ss:$8 sps:$4 sm:$0xff] (!%p150_p6)   ;;  %v3930_v16 = vld [vmem:[%s5691_s1 + $0x44] ss:$8 sps:$4 sm:$0xff] (!%p150_p6)  }
  0x10   : > { %2376 = vmatpush1.bf16.msra.mxu1 (!%p150_p6), %v3916_v6  ;;  %v3932_v17 = vld [vmem:[%s5691_s1 + $0x444] ss:$8 sps:$4 sm:$0xff] (!%p150_p6)   ;;  %v3934_v18 = vld [vmem:[%s5691_s1 + $0x40] ss:$8 sps:$4 sm:$0xff] (!%p150_p6)   ;;  %v3936_v20 = vld [vmem:[%s5691_s1 + $0x54] ss:$8 sps:$4 sm:$0xff] (!%p150_p6)  }
  0x11   : > { %2668 = vmatpush1.bf16.msra.mxu0 (!%p150_p6), %v3917_v7  ;;  %2377 = vmatprep.subr.bf16.mxu1 (!%p150_p6), %v3918_v8  ;;  %v3935_v19 = vld [vmem:[%s5691_s1 + $0x440] ss:$8 sps:$4 sm:$0xff] (!%p150_p6)   ;;  %v3938_v21 = vld [vmem:[%s5691_s1 + $0x454] ss:$8 sps:$4 sm:$0xff] (!%p150_p6)   ;;  %v3940_v22 = vld [vmem:[%s5691_s1 + $0x50] ss:$8 sps:$4 sm:$0xff] (!%p150_p6)  }
  0x12   : > { %2669 = vmatprep.subr.bf16.mxu0 %v3920_v9  ;;  %v3941_v23 = vld [vmem:[%s5691_s1 + $0x450] ss:$8 sps:$4 sm:$0xff]   ;;  %v3942_v24 = vld [vmem:[%s5691_s1 + $0x64] ss:$8 sps:$4 sm:$0xff]   ;;  %v3946_v26 = vld [vmem:[%s5691_s1 + $0x60] ss:$8 sps:$4 sm:$0xff]  }
  0x13   : > { %v3944_v25 = vld [vmem:[%s5691_s1 + $0x464] ss:$8 sps:$4 sm:$0xff]   ;;  %v3947_v27 = vld [vmem:[%s5691_s1 + $0x460] ss:$8 sps:$4 sm:$0xff]   ;;  %v3948_v28 = vld [vmem:[%s5691_s1 + $0x74] ss:$8 sps:$4 sm:$0xff]  }
  0x14   : > { %2378 = vmatpush1.bf16.msra.mxu1 %v3922_v10  ;;  %v3950_v29 = vld [vmem:[%s5691_s1 + $0x474] ss:$8 sps:$4 sm:$0xff]   ;;  %v3952_v30 = vld [vmem:[%s5691_s1 + $0x70] ss:$8 sps:$4 sm:$0xff]   ;;  %v3954_v32 = vld [vmem:[%s5691_s1 + $0x84] ss:$8 sps:$4 sm:$0xff]  }
  0x15   : > { %2670 = vmatpush1.bf16.msra.mxu0 %v3923_v11  ;;  %2379 = vmatprep.subr.bf16.mxu1 %v3924_v12  ;;  %v3953_v31 = vld [vmem:[%s5691_s1 + $0x470] ss:$8 sps:$4 sm:$0xff]   ;;  %p184_p7 = scmp.lt.s32.totalorder %s4674_s14, 12  ;;  %v3956_v33 = vld [vmem:[%s5691_s1 + $0x484] ss:$8 sps:$4 sm:$0xff]   ;;  %s3070_s28 = ssub.s32 (%p4579_p4), 13, %s4674_s14 }
  0x16   : > { %2671 = vmatprep.subr.bf16.mxu0 %v3926_v13  ;;  %v3958_v34 = vld [vmem:[%s5691_s1 + $0x80] ss:$8 sps:$4 sm:$0xff]   ;;  %v3960_v36 = vld [vmem:[%s5691_s1 + $0x94] ss:$8 sps:$4 sm:$0xff]   ;;  %v3964_v38 = vld [vmem:[%s5691_s1 + $0x90] ss:$8 sps:$4 sm:$0xff]  }
  0x17   : > { %v3959_v35 = vld [vmem:[%s5691_s1 + $0x480] ss:$8 sps:$4 sm:$0xff]   ;;  %s185_s6 = scalar_select %p184_p7, %s4674_s14, 12  ;;  %v3962_v37 = vld [vmem:[%s5691_s1 + $0x494] ss:$8 sps:$4 sm:$0xff]  }
  0x18   : > { %2380 = vmatpush1.bf16.msra.mxu1 %v3928_v14  ;;  %v3965_v39 = vld [vmem:[%s5691_s1 + $0x490] ss:$8 sps:$4 sm:$0xff]   ;;  %v3966_v40 = vld [vmem:[%s5691_s1 + $0xa4] ss:$8 sps:$4 sm:$0xff]   ;;  %v3970_v42 = vld [vmem:[%s5691_s1 + $0xa0] ss:$8 sps:$4 sm:$0xff]  }
  0x19   : > { %2672 = vmatpush1.bf16.msra.mxu0 %v3929_v15  ;;  %2381 = vmatprep.subr.bf16.mxu1 %v3930_v16  ;;  %s3817_s22 = smul.u32 72, %s185_s6  ;;  %v3968_v41 = vld [vmem:[%s5691_s1 + $0x4a4] ss:$8 sps:$4 sm:$0xff]   ;;  %v3971_v43 = vld [vmem:[%s5691_s1 + $0x4a0] ss:$8 sps:$4 sm:$0xff]   ;;  %s3638_s29 = sshll.u32 (%p4579_p4), %s4567_s15, 7 }
  0x1a   : > { %2673 = vmatprep.subr.bf16.mxu0 %v3932_v17  ;;  %v3972_v44 = vld [vmem:[%s5691_s1 + $0xb4] ss:$8 sps:$4 sm:$0xff]   ;;  %v3976_v46 = vld [vmem:[%s5691_s1 + $0xb0] ss:$8 sps:$4 sm:$0xff]   ;;  %v3978_v49 = vld [vmem:[%s5691_s1 + $0xc4] ss:$8 sps:$4 sm:$0xff]   ;;  %s5593_s5 = scalar_lea.vmem (%p4579_p4), %s5693_s3, %s3638_s29  }
  0x1b   : > { %s4726_s6 = scalar_lea.vmem %s5690_s0, %s3817_s22  ;;  %v3974_v45 = vld [vmem:[%s5691_s1 + $0x4b4] ss:$8 sps:$4 sm:$0xff]   ;;  %v3977_v47 = vld [vmem:[%s5691_s1 + $0x4b0] ss:$8 sps:$4 sm:$0xff]   ;;  %v3980_v50 = vld [vmem:[%s5691_s1 + $0x4c4] ss:$8 sps:$4 sm:$0xff]  }
  0x1c   : > { %2382 = vmatpush1.bf16.msra.mxu1 %v3934_v18  ;;  %v4004_v48 = vld [vmem:[%s4726_s6 + $0x4] ss:$72 sps:$4 sm:$0xff]   ;;  %v3982_v52 = vld [vmem:[%s5691_s1 + $0xc0] ss:$8 sps:$4 sm:$0xff]   ;;  %v3984_v54 = vld [vmem:[%s5691_s1 + $0xd4] ss:$8 sps:$4 sm:$0xff]  }
  0x1d   : > { %2674 = vmatpush1.bf16.msra.mxu0 %v3935_v19  ;;  %2383 = vmatprep.subr.bf16.mxu1 %v3936_v20  ;;  %v4010_v51 = vld [vmem:[%s4726_s6 + $0x24] ss:$72 sps:$4 sm:$0xff]   ;;  %v3983_v53 = vld [vmem:[%s5691_s1 + $0x4c0] ss:$8 sps:$4 sm:$0xff]   ;;  %v3986_v55 = vld [vmem:[%s5691_s1 + $0x4d4] ss:$8 sps:$4 sm:$0xff]  }
  0x1e   : > { %2675 = vmatprep.subr.bf16.mxu0 %v3938_v21  ;;  %2405 = vmatprep.mubr.bf16.mxu1 %v4004_v48  ;;  %v3988_v56 = vld [vmem:[%s5691_s1 + $0xd0] ss:$8 sps:$4 sm:$0xff]   ;;  %v3990_v58 = vld [vmem:[%s5691_s1 + $0xe4] ss:$8 sps:$4 sm:$0xff]   ;;  %v3994_v60 = vld [vmem:[%s5691_s1 + $0xe0] ss:$8 sps:$4 sm:$0xff]  }
  0x1f   : > { %2697 = vmatprep.mubr.bf16.mxu0 %v4010_v51  ;;  %v3989_v57 = vld [vmem:[%s5691_s1 + $0x4d0] ss:$8 sps:$4 sm:$0xff]   ;;  %v3992_v59 = vld [vmem:[%s5691_s1 + $0x4e4] ss:$8 sps:$4 sm:$0xff]   ;;  %v3995_v61 = vld [vmem:[%s5691_s1 + $0x4e0] ss:$8 sps:$4 sm:$0xff]  }
  0x20   : > { %2384 = vmatpush1.bf16.msra.mxu1 %v3940_v22  ;;  %v3996_v62 = vld [vmem:[%s5691_s1 + $0xf4] ss:$8 sps:$4 sm:$0xff]   ;;  %v4000_v0 = vld [vmem:[%s5691_s1 + $0xf0] ss:$8 sps:$4 sm:$0xff]   ;;  %v4007_v2 = vld [vmem:[%s5691_s1 + $0x104] ss:$8 sps:$4 sm:$0xff]  }
  0x21   : > { %2676 = vmatpush1.bf16.msra.mxu0 %v3941_v23  ;;  %2385 = vmatprep.subr.bf16.mxu1 %v3942_v24  ;;  %v3998_v63 = vld [vmem:[%s5691_s1 + $0x4f4] ss:$8 sps:$4 sm:$0xff]   ;;  %v4001_v1 = vld [vmem:[%s5691_s1 + $0x4f0] ss:$8 sps:$4 sm:$0xff]   ;;  %v4013_v3 = vld [vmem:[%s5691_s1 + $0x504] ss:$8 sps:$4 sm:$0xff]  }
  0x22   : > { %2677 = vmatprep.subr.bf16.mxu0 %v3944_v25  ;;  %v4002_v4 = vld [vmem:[%s4726_s6] ss:$72 sps:$4 sm:$0xff]   ;;  %v4016_v8 = vld [vmem:[%s5691_s1 + $0x114] ss:$8 sps:$4 sm:$0xff]   ;;  %v4014_v10 = vld [vmem:[%s5691_s1 + $0x110] ss:$8 sps:$4 sm:$0xff]  }
  0x23   : > { %v4005_v5 = vld [vmem:[%s5691_s1 + $0x100] ss:$8 sps:$4 sm:$0xff]   ;;  %v4019_v9 = vld [vmem:[%s5691_s1 + $0x514] ss:$8 sps:$4 sm:$0xff]   ;;  %v4017_v11 = vld [vmem:[%s5691_s1 + $0x510] ss:$8 sps:$4 sm:$0xff]  }
  0x24   : > { %2386 = vmatpush1.bf16.msra.mxu1 %v3946_v26  ;;  %v4008_v6 = vld [vmem:[%s4726_s6 + $0x20] ss:$72 sps:$4 sm:$0xff]   ;;  %v4022_v12 = vld [vmem:[%s5691_s1 + $0x124] ss:$8 sps:$4 sm:$0xff]   ;;  %v4028_v16 = vld [vmem:[%s5691_s1 + $0x134] ss:$8 sps:$4 sm:$0xff]  }
  0x25   : > { %2678 = vmatpush1.bf16.msra.mxu0 %v3947_v27  ;;  %2387 = vmatprep.subr.bf16.mxu1 %v3948_v28  ;;  %v4011_v7 = vld [vmem:[%s5691_s1 + $0x500] ss:$8 sps:$4 sm:$0xff]   ;;  %v4025_v13 = vld [vmem:[%s5691_s1 + $0x524] ss:$8 sps:$4 sm:$0xff]   ;;  %v4068_v17 = vld [vmem:[%s4726_s6 + $0x94] ss:$72 sps:$4 sm:$0xff]  }
  0x26   : > { %2679 = vmatprep.subr.bf16.mxu0 %v3950_v29  ;;  %v4020_v14 = vld [vmem:[%s5691_s1 + $0x120] ss:$8 sps:$4 sm:$0xff]   ;;  %v4031_v18 = vld [vmem:[%s5691_s1 + $0x534] ss:$8 sps:$4 sm:$0xff]   ;;  %v4026_v19 = vld [vmem:[%s5691_s1 + $0x130] ss:$8 sps:$4 sm:$0xff]  }
  0x27   : > { %v4023_v15 = vld [vmem:[%s5691_s1 + $0x520] ss:$8 sps:$4 sm:$0xff]   ;;  %v4029_v20 = vld [vmem:[%s5691_s1 + $0x530] ss:$8 sps:$4 sm:$0xff]   ;;  %v4073_v21 = vld [vmem:[%s4726_s6 + $0xb4] ss:$72 sps:$4 sm:$0xff]  }
  0x28   : > { %2388 = vmatpush1.bf16.msra.mxu1 %v3952_v30  ;;  %v4034_v22 = vld [vmem:[%s5691_s1 + $0x144] ss:$8 sps:$4 sm:$0xff]   ;;  %v4078_v24 = vld [vmem:[%s4726_s6 + $0x90] ss:$72 sps:$4 sm:$0xff]   ;;  %v4032_v26 = vld [vmem:[%s5691_s1 + $0x140] ss:$8 sps:$4 sm:$0xff]  }
  0x29   : > { %2680 = vmatpush1.bf16.msra.mxu0 %v3953_v31  ;;  %2389 = vmatprep.subr.bf16.mxu1 %v3954_v32  ;;  %v4037_v23 = vld [vmem:[%s5691_s1 + $0x544] ss:$8 sps:$4 sm:$0xff]   ;;  %v4079_v25 = vld [vmem:[%s4726_s6 + $0xb0] ss:$72 sps:$4 sm:$0xff]   ;;  %v4035_v27 = vld [vmem:[%s5691_s1 + $0x540] ss:$8 sps:$4 sm:$0xff]  }
  0x2a   : > { %2681 = vmatprep.subr.bf16.mxu0 %v3956_v33  ;;  %v4040_v28 = vld [vmem:[%s5691_s1 + $0x154] ss:$8 sps:$4 sm:$0xff]   ;;  %v4086_v29 = vld [vmem:[%s4726_s6 + $0x124] ss:$72 sps:$4 sm:$0xff]   ;;  %v4038_v31 = vld [vmem:[%s5691_s1 + $0x150] ss:$8 sps:$4 sm:$0xff]  }
  0x2b   : > { %v4043_v30 = vld [vmem:[%s5691_s1 + $0x554] ss:$8 sps:$4 sm:$0xff]   ;;  %v4041_v32 = vld [vmem:[%s5691_s1 + $0x550] ss:$8 sps:$4 sm:$0xff]   ;;  %v4091_v33 = vld [vmem:[%s4726_s6 + $0x144] ss:$72 sps:$4 sm:$0xff]  }
  0x2c   : > { %2390 = vmatpush1.bf16.msra.mxu1 %v3958_v34  ;;  %v4046_v34 = vld [vmem:[%s5691_s1 + $0x164] ss:$8 sps:$4 sm:$0xff]   ;;  %v4114_v48 = vld [vmem:[%s4726_s6 + $0x1b0] ss:$72 sps:$4 sm:$0xff]   ;;  %v4059_v51 = vld [vmem:[%s5691_s1 + $0x580] ss:$8 sps:$4 sm:$0xff]  }
  0x2d   : > { %2682 = vmatpush1.bf16.msra.mxu0 %v3959_v35  ;;  %2391 = vmatprep.subr.bf16.mxu1 %v3960_v36  ;;  %v4049_v35 = vld [vmem:[%s5691_s1 + $0x564] ss:$8 sps:$4 sm:$0xff]   ;;  %v4096_v36 = vld [vmem:[%s4726_s6 + $0x120] ss:$72 sps:$4 sm:$0xff]   ;;  %p3071_p8 = scmp.lt.s32.totalorder (%p4579_p4), %s3070_s28, 8 }
  0x2e   : > { %2683 = vmatprep.subr.bf16.mxu0 %v3962_v37  ;;  %v4097_v37 = vld [vmem:[%s4726_s6 + $0x140] ss:$72 sps:$4 sm:$0xff]  }
  0x30   : > { %2392 = vmatpush1.bf16.msra.mxu1 %v3964_v38  ;;  %v4044_v38 = vld [vmem:[%s5691_s1 + $0x160] ss:$8 sps:$4 sm:$0xff]  }
  0x31   : > { %2684 = vmatpush1.bf16.msra.mxu0 %v3965_v39  ;;  %2393 = vmatprep.subr.bf16.mxu1 %v3966_v40  ;;  %v4047_v39 = vld [vmem:[%s5691_s1 + $0x560] ss:$8 sps:$4 sm:$0xff]   ;;  %v4052_v40 = vld [vmem:[%s5691_s1 + $0x174] ss:$8 sps:$4 sm:$0xff]  }
  0x32   : > { %2685 = vmatprep.subr.bf16.mxu0 %v3968_v41  ;;  %v4104_v41 = vld [vmem:[%s4726_s6 + $0x1b4] ss:$72 sps:$4 sm:$0xff]  }
  0x34   : > { %2394 = vmatpush1.bf16.msra.mxu1 %v3970_v42  ;;  %v4055_v42 = vld [vmem:[%s5691_s1 + $0x574] ss:$8 sps:$4 sm:$0xff]  }
  0x35   : > { %2686 = vmatpush1.bf16.msra.mxu0 %v3971_v43  ;;  %2395 = vmatprep.subr.bf16.mxu1 %v3972_v44  ;;  %v4050_v43 = vld [vmem:[%s5691_s1 + $0x170] ss:$8 sps:$4 sm:$0xff]  }
  0x36   : > { %2687 = vmatprep.subr.bf16.mxu0 %v3974_v45  ;;  %v4053_v44 = vld [vmem:[%s5691_s1 + $0x570] ss:$8 sps:$4 sm:$0xff]   ;;  %v4109_v45 = vld [vmem:[%s4726_s6 + $0x1d4] ss:$72 sps:$4 sm:$0xff]  }
  0x38   : > { %2396 = vmatpush1.bf16.msra.mxu1 %v3976_v46  ;;  %v4058_v46 = vld [vmem:[%s5691_s1 + $0x184] ss:$8 sps:$4 sm:$0xff]  }
  0x39   : > { %2688 = vmatpush1.bf16.msra.mxu0 %v3977_v47  ;;  %2397 = vmatprep.subr.bf16.mxu1 %v3978_v49  ;;  %v4061_v47 = vld [vmem:[%s5691_s1 + $0x584] ss:$8 sps:$4 sm:$0xff]   ;;  %v4115_v49 = vld [vmem:[%s4726_s6 + $0x1d0] ss:$72 sps:$4 sm:$0xff]  }
  0x3a   : > { %2689 = vmatprep.subr.bf16.mxu0 %v3980_v50  ;;  %v4056_v50 = vld [vmem:[%s5691_s1 + $0x180] ss:$8 sps:$4 sm:$0xff]  }
  0x3c   : > { %2398 = vmatpush1.bf16.msra.mxu1 %v3982_v52  ;;  %v4064_v52 = vld [vmem:[%s5691_s1 + $0x194] ss:$8 sps:$4 sm:$0xff]  }
  0x3d   : > { %2690 = vmatpush1.bf16.msra.mxu0 %v3983_v53  ;;  %2399 = vmatprep.subr.bf16.mxu1 %v3984_v54  ;;  %v4067_v53 = vld [vmem:[%s5691_s1 + $0x594] ss:$8 sps:$4 sm:$0xff]  }
  0x3e   : > { %2691 = vmatprep.subr.bf16.mxu0 %v3986_v55  ;;  %v4124_v54 = vld [vmem:[%s4726_s6 + $0xc] ss:$72 sps:$4 sm:$0xff]   ;;  %v4062_v55 = vld [vmem:[%s5691_s1 + $0x190] ss:$8 sps:$4 sm:$0xff]  }
  0x40   : > { %2400 = vmatpush1.bf16.msra.mxu1 %v3988_v56  ;;  %v4065_v56 = vld [vmem:[%s5691_s1 + $0x590] ss:$8 sps:$4 sm:$0xff]  }
  0x41   : > { %2692 = vmatpush1.bf16.msra.mxu0 %v3989_v57  ;;  %2401 = vmatprep.subr.bf16.mxu1 %v3990_v58  ;;  %v4130_v57 = vld [vmem:[%s4726_s6 + $0x2c] ss:$72 sps:$4 sm:$0xff]  }
  0x42   : > { %2693 = vmatprep.subr.bf16.mxu0 %v3992_v59  ;;  %v4072_v58 = vld [vmem:[%s5691_s1 + $0x1a4] ss:$8 sps:$4 sm:$0xff]  }
  0x43   : > { %v4077_v59 = vld [vmem:[%s5691_s1 + $0x5a4] ss:$8 sps:$4 sm:$0xff]  }
  0x44   : > { %2402 = vmatpush1.bf16.msra.mxu1 %v3994_v60  ;;  %v4070_v60 = vld [vmem:[%s5691_s1 + $0x1a0] ss:$8 sps:$4 sm:$0xff]  }
  0x45   : > { %2694 = vmatpush1.bf16.msra.mxu0 %v3995_v61  ;;  %2403 = vmatprep.subr.bf16.mxu1 %v3996_v62  ;;  %v4075_v61 = vld [vmem:[%s5691_s1 + $0x5a0] ss:$8 sps:$4 sm:$0xff]   ;;  %v4082_v62 = vld [vmem:[%s5691_s1 + $0x1b4] ss:$8 sps:$4 sm:$0xff]  }
  0x46   : > { %2695 = vmatprep.subr.bf16.mxu0 %v3998_v63  ;;  %v4085_v63 = vld [vmem:[%s5691_s1 + $0x5b4] ss:$8 sps:$4 sm:$0xff]  }
  0x48   : > { %2404 = vmatpush1.bf16.msra.mxu1 %v4000_v0  ;;  %v4080_v0 = vld [vmem:[%s5691_s1 + $0x1b0] ss:$8 sps:$4 sm:$0xff]  }
  0x49   : > { %2696 = vmatpush1.bf16.msra.mxu0 %v4001_v1  ;;  %2446 = vmatprep.subr.bf16.mxu1 %v4007_v2  ;;  %v4083_v1 = vld [vmem:[%s5691_s1 + $0x5b0] ss:$8 sps:$4 sm:$0xff]   ;;  %v4090_v2 = vld [vmem:[%s5691_s1 + $0x1c4] ss:$8 sps:$4 sm:$0xff]  }
  0x4a   : > { %2738 = vmatprep.subr.bf16.mxu0 %v4013_v3  ;;  %v4095_v3 = vld [vmem:[%s5691_s1 + $0x5c4] ss:$8 sps:$4 sm:$0xff]  }
  0x4b   : > { %2406 = vmatmul.mubr.bf16.vlgmr.msra.gmra.mrb[0].mxu1 %v4002_v4  ;;  %v4088_v4 = vld [vmem:[%s5691_s1 + $0x1c0] ss:$8 sps:$4 sm:$0xff]  }
  0x4c   : > { %2698 = vmatmul.mubr.bf16.vlgmr.msra.gmra.mrb[0].mxu0 %v4008_v6  ;;  %2447 = vmatpush1.bf16.msra.mxu1 %v4005_v5  ;;  %v4093_v5 = vld [vmem:[%s5691_s1 + $0x5c0] ss:$8 sps:$4 sm:$0xff]   ;;  %v4100_v6 = vld [vmem:[%s5691_s1 + $0x1d4] ss:$8 sps:$4 sm:$0xff]  }
  0x4d   : > { %2739 = vmatpush1.bf16.msra.mxu0 %v4011_v7  ;;  %2448 = vmatprep.subr.bf16.mxu1 %v4016_v8  ;;  %v4103_v7 = vld [vmem:[%s5691_s1 + $0x5d4] ss:$8 sps:$4 sm:$0xff]   ;;  %v4098_v8 = vld [vmem:[%s5691_s1 + $0x1d0] ss:$8 sps:$4 sm:$0xff]  }
  0x4e   : > { %2740 = vmatprep.subr.bf16.mxu0 %v4019_v9  ;;  %2415 = vmatprep.mubr.bf16.mxu1 %v4068_v17  ;;  %v4101_v9 = vld [vmem:[%s5691_s1 + $0x5d0] ss:$8 sps:$4 sm:$0xff]  }
  0x4f   : > { %2707 = vmatprep.mubr.bf16.mxu0 %v4073_v21  ;;  %v4119_v17 = vld [vmem:[%s5691_s1 + $0x5f0] ss:$8 sps:$4 sm:$0xff]   ;;  %v4125_v21 = vld [vmem:[%s5691_s1 + $0x200] ss:$8 sps:$4 sm:$0xff]  }
  0x50   : > { %2449 = vmatpush1.bf16.msra.mxu1 %v4014_v10  ;;  %v4108_v10 = vld [vmem:[%s5691_s1 + $0x1e4] ss:$8 sps:$4 sm:$0xff]  }
  0x51   : > { %2741 = vmatpush1.bf16.msra.mxu0 %v4017_v11  ;;  %2450 = vmatprep.subr.bf16.mxu1 %v4022_v12  ;;  %v4113_v11 = vld [vmem:[%s5691_s1 + $0x5e4] ss:$8 sps:$4 sm:$0xff]   ;;  %v4106_v12 = vld [vmem:[%s5691_s1 + $0x1e0] ss:$8 sps:$4 sm:$0xff]  }
  0x52   : > { %2742 = vmatprep.subr.bf16.mxu0 %v4025_v13  ;;  %v4111_v13 = vld [vmem:[%s5691_s1 + $0x5e0] ss:$8 sps:$4 sm:$0xff]  }
  0x53   : > { %2416 = vmatmul.mubr.bf16.gmra.mrb[4].mxu1 %v4078_v24  ;;  %v4136_v24 = vld [vmem:[%s5691_s1 + $0x214] ss:$8 sps:$4 sm:$0xff]  }
  0x54   : > { %2451 = vmatpush1.bf16.msra.mxu1 %v4020_v14  ;;  %2708 = vmatmul.mubr.bf16.gmra.mrb[4].mxu0 %v4079_v25  ;;  %v4118_v14 = vld [vmem:[%s5691_s1 + $0x1f4] ss:$8 sps:$4 sm:$0xff]  }
  0x55   : > { %2743 = vmatpush1.bf16.msra.mxu0 %v4023_v15  ;;  %2452 = vmatprep.subr.bf16.mxu1 %v4028_v16  ;;  %v4121_v15 = vld [vmem:[%s5691_s1 + $0x5f4] ss:$8 sps:$4 sm:$0xff]   ;;  %v4116_v16 = vld [vmem:[%s5691_s1 + $0x1f0] ss:$8 sps:$4 sm:$0xff]  }
  0x56   : > { %2744 = vmatprep.subr.bf16.mxu0 %v4031_v18  ;;  %2425 = vmatprep.mubr.bf16.mxu1 %v4086_v29  ;;  %v4127_v18 = vld [vmem:[%s5691_s1 + $0x204] ss:$8 sps:$4 sm:$0xff]   ;;  %v4139_v25 = vld [vmem:[%s5691_s1 + $0x614] ss:$8 sps:$4 sm:$0xff]   ;;  %v4137_v29 = vld [vmem:[%s5691_s1 + $0x610] ss:$8 sps:$4 sm:$0xff]  }
  0x57   : > { %2717 = vmatprep.mubr.bf16.mxu0 %v4091_v33  ;;  %v4198_v33 = vld [vmem:[%s4726_s6 + $0x98] ss:$72 sps:$4 sm:$0xff]  }
  0x58   : > { %2453 = vmatpush1.bf16.msra.mxu1 %v4026_v19  ;;  %v4133_v19 = vld [vmem:[%s5691_s1 + $0x604] ss:$8 sps:$4 sm:$0xff]  }
  0x59   : > { %2745 = vmatpush1.bf16.msra.mxu0 %v4029_v20  ;;  %2454 = vmatprep.subr.bf16.mxu1 %v4034_v22  ;;  %v4122_v20 = vld [vmem:[%s4726_s6 + $0x8] ss:$72 sps:$4 sm:$0xff]  }
  0x5a   : > { %2746 = vmatprep.subr.bf16.mxu0 %v4037_v23  ;;  %v4128_v22 = vld [vmem:[%s4726_s6 + $0x28] ss:$72 sps:$4 sm:$0xff]  }
  0x5b   : > { %2426 = vmatmul.mubr.bf16.gmra.mrb[8].mxu1 %v4096_v36  ;;  %v4131_v23 = vld [vmem:[%s5691_s1 + $0x600] ss:$8 sps:$4 sm:$0xff]   ;;  %v4148_v36 = vld [vmem:[%s5691_s1 + $0x234] ss:$8 sps:$4 sm:$0xff]  }
  0x5c   : > { %2455 = vmatpush1.bf16.msra.mxu1 %v4032_v26  ;;  %2718 = vmatmul.mubr.bf16.gmra.mrb[8].mxu0 %v4097_v37  ;;  %v4188_v26 = vld [vmem:[%s4726_s6 + $0x9c] ss:$72 sps:$4 sm:$0xff]  }
  0x5d   : > { %2747 = vmatpush1.bf16.msra.mxu0 %v4035_v27  ;;  %2456 = vmatprep.subr.bf16.mxu1 %v4040_v28  ;;  %v4193_v27 = vld [vmem:[%s4726_s6 + $0xbc] ss:$72 sps:$4 sm:$0xff]   ;;  %v4134_v28 = vld [vmem:[%s5691_s1 + $0x210] ss:$8 sps:$4 sm:$0xff]  }
  0x5e   : > { %2748 = vmatprep.subr.bf16.mxu0 %v4043_v30  ;;  %2435 = vmatprep.mubr.bf16.mxu1 %v4104_v41  ;;  %v4142_v30 = vld [vmem:[%s5691_s1 + $0x224] ss:$8 sps:$4 sm:$0xff]   ;;  %v4151_v37 = vld [vmem:[%s5691_s1 + $0x634] ss:$8 sps:$4 sm:$0xff]   ;;  %v4149_v41 = vld [vmem:[%s5691_s1 + $0x630] ss:$8 sps:$4 sm:$0xff]  }
  0x5f   : > { %2727 = vmatprep.mubr.bf16.mxu0 %v4109_v45  ;;  %v4216_v45 = vld [vmem:[%s4726_s6 + $0x128] ss:$72 sps:$4 sm:$0xff]  }
  0x60   : > { %2457 = vmatpush1.bf16.msra.mxu1 %v4038_v31  ;;  %v4145_v31 = vld [vmem:[%s5691_s1 + $0x624] ss:$8 sps:$4 sm:$0xff]  }
  0x61   : > { %2749 = vmatpush1.bf16.msra.mxu0 %v4041_v32  ;;  %2458 = vmatprep.subr.bf16.mxu1 %v4046_v34  ;;  %v4140_v32 = vld [vmem:[%s5691_s1 + $0x220] ss:$8 sps:$4 sm:$0xff]  }
  0x62   : > { %2750 = vmatprep.subr.bf16.mxu0 %v4049_v35  ;;  %v4199_v34 = vld [vmem:[%s4726_s6 + $0xb8] ss:$72 sps:$4 sm:$0xff]  }
  0x63   : > { %2436 = vmatmul.mubr.bf16.gmra.mrb[12].mxu1 %v4114_v48  ;;  %v4143_v35 = vld [vmem:[%s5691_s1 + $0x620] ss:$8 sps:$4 sm:$0xff]   ;;  %v4160_v48 = vld [vmem:[%s5691_s1 + $0x254] ss:$8 sps:$4 sm:$0xff]  }
  0x64   : > { %2459 = vmatpush1.bf16.msra.mxu1 %v4044_v38  ;;  %2728 = vmatmul.mubr.bf16.gmra.mrb[12].mxu0 %v4115_v49  ;;  %v4206_v38 = vld [vmem:[%s4726_s6 + $0x12c] ss:$72 sps:$4 sm:$0xff]  }
  0x65   : > { %2751 = vmatpush1.bf16.msra.mxu0 %v4047_v39  ;;  %2460 = vmatprep.subr.bf16.mxu1 %v4052_v40  ;;  %v4211_v39 = vld [vmem:[%s4726_s6 + $0x14c] ss:$72 sps:$4 sm:$0xff]   ;;  %v4146_v40 = vld [vmem:[%s5691_s1 + $0x230] ss:$8 sps:$4 sm:$0xff]  }
  0x66   : > { %2752 = vmatprep.subr.bf16.mxu0 %v4055_v42  ;;  %2478 = vmatprep.mubr.bf16.mxu1 %v4124_v54  ;;  %v4154_v42 = vld [vmem:[%s5691_s1 + $0x244] ss:$8 sps:$4 sm:$0xff]   ;;  %v4163_v49 = vld [vmem:[%s5691_s1 + $0x654] ss:$8 sps:$4 sm:$0xff]  }
  0x67   : > { %2770 = vmatprep.mubr.bf16.mxu0 %v4130_v57  ;;  %v4166_v54 = vld [vmem:[%s5691_s1 + $0x264] ss:$8 sps:$4 sm:$0xff]   ;;  %v4167_v57 = vld [vmem:[%s5691_s1 + $0x660] ss:$8 sps:$4 sm:$0xff]  }
  0x68   : > { %2461 = vmatpush1.bf16.msra.mxu1 %v4050_v43  ;;  %v4157_v43 = vld [vmem:[%s5691_s1 + $0x644] ss:$8 sps:$4 sm:$0xff]  }
  0x69   : > { %2753 = vmatpush1.bf16.msra.mxu0 %v4053_v44  ;;  %2462 = vmatprep.subr.bf16.mxu1 %v4058_v46  ;;  %v4152_v44 = vld [vmem:[%s5691_s1 + $0x240] ss:$8 sps:$4 sm:$0xff]  }
  0x6a   : > { %2754 = vmatprep.subr.bf16.mxu0 %v4061_v47  ;;  %v4217_v46 = vld [vmem:[%s4726_s6 + $0x148] ss:$72 sps:$4 sm:$0xff]  }
  0x6b   : > { %v4155_v47 = vld [vmem:[%s5691_s1 + $0x640] ss:$8 sps:$4 sm:$0xff]  }
  0x6c   : > { %2463 = vmatpush1.bf16.msra.mxu1 %v4056_v50  ;;  %v4224_v50 = vld [vmem:[%s4726_s6 + $0x1bc] ss:$72 sps:$4 sm:$0xff]  }
  0x6d   : > { %2755 = vmatpush1.bf16.msra.mxu0 %v4059_v51  ;;  %2464 = vmatprep.subr.bf16.mxu1 %v4064_v52  ;;  %v4229_v51 = vld [vmem:[%s4726_s6 + $0x1dc] ss:$72 sps:$4 sm:$0xff]   ;;  %v4158_v52 = vld [vmem:[%s5691_s1 + $0x250] ss:$8 sps:$4 sm:$0xff]  }
  0x6e   : > { %2756 = vmatprep.subr.bf16.mxu0 %v4067_v53  ;;  %v4161_v53 = vld [vmem:[%s5691_s1 + $0x650] ss:$8 sps:$4 sm:$0xff]  }
  0x70   : > { %2465 = vmatpush1.bf16.msra.mxu1 %v4062_v55  ;;  %v4169_v55 = vld [vmem:[%s5691_s1 + $0x664] ss:$8 sps:$4 sm:$0xff]  }
  0x71   : > { %2757 = vmatpush1.bf16.msra.mxu0 %v4065_v56  ;;  %2466 = vmatprep.subr.bf16.mxu1 %v4072_v58  ;;  %v4164_v56 = vld [vmem:[%s5691_s1 + $0x260] ss:$8 sps:$4 sm:$0xff]  }
  0x72   : > { %2758 = vmatprep.subr.bf16.mxu0 %v4077_v59  ;;  %v4234_v58 = vld [vmem:[%s4726_s6 + $0x1b8] ss:$72 sps:$4 sm:$0xff]  }
  0x73   : > { %v4235_v59 = vld [vmem:[%s4726_s6 + $0x1d8] ss:$72 sps:$4 sm:$0xff]  }
  0x74   : > { %2467 = vmatpush1.bf16.msra.mxu1 %v4070_v60  ;;  %v4172_v60 = vld [vmem:[%s5691_s1 + $0x274] ss:$8 sps:$4 sm:$0xff]  }
  0x75   : > { %2759 = vmatpush1.bf16.msra.mxu0 %v4075_v61  ;;  %2468 = vmatprep.subr.bf16.mxu1 %v4082_v62  ;;  %v4175_v61 = vld [vmem:[%s5691_s1 + $0x674] ss:$8 sps:$4 sm:$0xff]  }
  0x76   : > { %2760 = vmatprep.subr.bf16.mxu0 %v4085_v63  ;;  %v4244_v62 = vld [vmem:[%s4726_s6 + $0x14] ss:$72 sps:$4 sm:$0xff]  }
  0x77   : > { %v4250_v63 = vld [vmem:[%s4726_s6 + $0x34] ss:$72 sps:$4 sm:$0xff]  }
  0x78   : > { %2469 = vmatpush1.bf16.msra.mxu1 %v4080_v0  ;;  %v4170_v0 = vld [vmem:[%s5691_s1 + $0x270] ss:$8 sps:$4 sm:$0xff]  }
  0x79   : > { %2761 = vmatpush1.bf16.msra.mxu0 %v4083_v1  ;;  %2470 = vmatprep.subr.bf16.mxu1 %v4090_v2  ;;  %v4173_v1 = vld [vmem:[%s5691_s1 + $0x670] ss:$8 sps:$4 sm:$0xff]   ;;  %v4178_v2 = vld [vmem:[%s5691_s1 + $0x284] ss:$8 sps:$4 sm:$0xff]  }
  0x7a   : > { %2762 = vmatprep.subr.bf16.mxu0 %v4095_v3  ;;  %v4181_v3 = vld [vmem:[%s5691_s1 + $0x684] ss:$8 sps:$4 sm:$0xff]  }
  0x7c   : > { %2471 = vmatpush1.bf16.msra.mxu1 %v4088_v4  ;;  %v4176_v4 = vld [vmem:[%s5691_s1 + $0x280] ss:$8 sps:$4 sm:$0xff]  }
  0x7d   : > { %2763 = vmatpush1.bf16.msra.mxu0 %v4093_v5  ;;  %2472 = vmatprep.subr.bf16.mxu1 %v4100_v6  ;;  %v4179_v5 = vld [vmem:[%s5691_s1 + $0x680] ss:$8 sps:$4 sm:$0xff]   ;;  %v4184_v6 = vld [vmem:[%s5691_s1 + $0x294] ss:$8 sps:$4 sm:$0xff]  }
  0x7e   : > { %2764 = vmatprep.subr.bf16.mxu0 %v4103_v7  ;;  %v4187_v7 = vld [vmem:[%s5691_s1 + $0x694] ss:$8 sps:$4 sm:$0xff]  }
  0x80   : > { %2473 = vmatpush1.bf16.msra.mxu1 %v4098_v8  ;;  %v4182_v8 = vld [vmem:[%s5691_s1 + $0x290] ss:$8 sps:$4 sm:$0xff]  }
  0x81   : > { %2765 = vmatpush1.bf16.msra.mxu0 %v4101_v9  ;;  %2474 = vmatprep.subr.bf16.mxu1 %v4108_v10  ;;  %v4185_v9 = vld [vmem:[%s5691_s1 + $0x690] ss:$8 sps:$4 sm:$0xff]   ;;  %v4192_v10 = vld [vmem:[%s5691_s1 + $0x2a4] ss:$8 sps:$4 sm:$0xff]  }
  0x82   : > { %2766 = vmatprep.subr.bf16.mxu0 %v4113_v11  ;;  %v4197_v11 = vld [vmem:[%s5691_s1 + $0x6a4] ss:$8 sps:$4 sm:$0xff]  }
  0x84   : > { %2475 = vmatpush1.bf16.msra.mxu1 %v4106_v12  ;;  %v4190_v12 = vld [vmem:[%s5691_s1 + $0x2a0] ss:$8 sps:$4 sm:$0xff]  }
  0x85   : > { %2767 = vmatpush1.bf16.msra.mxu0 %v4111_v13  ;;  %2476 = vmatprep.subr.bf16.mxu1 %v4118_v14  ;;  %v4195_v13 = vld [vmem:[%s5691_s1 + $0x6a0] ss:$8 sps:$4 sm:$0xff]   ;;  %v4202_v14 = vld [vmem:[%s5691_s1 + $0x2b4] ss:$8 sps:$4 sm:$0xff]  }
  0x86   : > { %2768 = vmatprep.subr.bf16.mxu0 %v4121_v15  ;;  %v4205_v15 = vld [vmem:[%s5691_s1 + $0x6b4] ss:$8 sps:$4 sm:$0xff]  }
  0x88   : > { %2477 = vmatpush1.bf16.msra.mxu1 %v4116_v16  ;;  %v4200_v16 = vld [vmem:[%s5691_s1 + $0x2b0] ss:$8 sps:$4 sm:$0xff]  }
  0x89   : > { %2769 = vmatpush1.bf16.msra.mxu0 %v4119_v17  ;;  %2519 = vmatprep.subr.bf16.mxu1 %v4127_v18  ;;  %v4203_v17 = vld [vmem:[%s5691_s1 + $0x6b0] ss:$8 sps:$4 sm:$0xff]   ;;  %v4210_v18 = vld [vmem:[%s5691_s1 + $0x2c4] ss:$8 sps:$4 sm:$0xff]  }
  0x8a   : > { %2811 = vmatprep.subr.bf16.mxu0 %v4133_v19  ;;  %v4215_v19 = vld [vmem:[%s5691_s1 + $0x6c4] ss:$8 sps:$4 sm:$0xff]  }
  0x8b   : > { %2479 = vmatmul.mubr.bf16.vlgmr.msra.gmra.mrb[0].mxu1 %v4122_v20  ;;  %v4208_v20 = vld [vmem:[%s5691_s1 + $0x2c0] ss:$8 sps:$4 sm:$0xff]  }
  0x8c   : > { %2771 = vmatmul.mubr.bf16.vlgmr.msra.gmra.mrb[0].mxu0 %v4128_v22  ;;  %2520 = vmatpush1.bf16.msra.mxu1 %v4125_v21  ;;  %v4213_v21 = vld [vmem:[%s5691_s1 + $0x6c0] ss:$8 sps:$4 sm:$0xff]   ;;  %v4220_v22 = vld [vmem:[%s5691_s1 + $0x2d4] ss:$8 sps:$4 sm:$0xff]  }
  0x8d   : > { %2812 = vmatpush1.bf16.msra.mxu0 %v4131_v23  ;;  %2521 = vmatprep.subr.bf16.mxu1 %v4136_v24  ;;  %v4223_v23 = vld [vmem:[%s5691_s1 + $0x6d4] ss:$8 sps:$4 sm:$0xff]   ;;  %v4218_v24 = vld [vmem:[%s5691_s1 + $0x2d0] ss:$8 sps:$4 sm:$0xff]  }
  0x8e   : > { %2813 = vmatprep.subr.bf16.mxu0 %v4139_v25  ;;  %2488 = vmatprep.mubr.bf16.mxu1 %v4188_v26  ;;  %v4221_v25 = vld [vmem:[%s5691_s1 + $0x6d0] ss:$8 sps:$4 sm:$0xff]   ;;  %v4228_v26 = vld [vmem:[%s5691_s1 + $0x2e4] ss:$8 sps:$4 sm:$0xff]  }
  0x8f   : > { %2780 = vmatprep.mubr.bf16.mxu0 %v4193_v27  ;;  %v4233_v27 = vld [vmem:[%s5691_s1 + $0x6e4] ss:$8 sps:$4 sm:$0xff]  }
  0x90   : > { %2522 = vmatpush1.bf16.msra.mxu1 %v4134_v28  ;;  %v4226_v28 = vld [vmem:[%s5691_s1 + $0x2e0] ss:$8 sps:$4 sm:$0xff]  }
  0x91   : > { %2814 = vmatpush1.bf16.msra.mxu0 %v4137_v29  ;;  %2523 = vmatprep.subr.bf16.mxu1 %v4142_v30  ;;  %v4231_v29 = vld [vmem:[%s5691_s1 + $0x6e0] ss:$8 sps:$4 sm:$0xff]   ;;  %v4238_v30 = vld [vmem:[%s5691_s1 + $0x2f4] ss:$8 sps:$4 sm:$0xff]  }
  0x92   : > { %2815 = vmatprep.subr.bf16.mxu0 %v4145_v31  ;;  %v4241_v31 = vld [vmem:[%s5691_s1 + $0x6f4] ss:$8 sps:$4 sm:$0xff]  }
  0x93   : > { %2489 = vmatmul.mubr.bf16.gmra.mrb[4].mxu1 %v4198_v33  ;;  %v4239_v33 = vld [vmem:[%s5691_s1 + $0x6f0] ss:$8 sps:$4 sm:$0xff]  }
  0x94   : > { %2781 = vmatmul.mubr.bf16.gmra.mrb[4].mxu0 %v4199_v34  ;;  %2524 = vmatpush1.bf16.msra.mxu1 %v4140_v32  ;;  %v4236_v32 = vld [vmem:[%s5691_s1 + $0x2f0] ss:$8 sps:$4 sm:$0xff]   ;;  %v4247_v34 = vld [vmem:[%s5691_s1 + $0x304] ss:$8 sps:$4 sm:$0xff]  }
  0x95   : > { %2816 = vmatpush1.bf16.msra.mxu0 %v4143_v35  ;;  %2525 = vmatprep.subr.bf16.mxu1 %v4148_v36  ;;  %v4253_v35 = vld [vmem:[%s5691_s1 + $0x704] ss:$8 sps:$4 sm:$0xff]   ;;  %v4242_v36 = vld [vmem:[%s4726_s6 + $0x10] ss:$72 sps:$4 sm:$0xff]  }
  0x96   : > { %2817 = vmatprep.subr.bf16.mxu0 %v4151_v37  ;;  %2498 = vmatprep.mubr.bf16.mxu1 %v4206_v38  ;;  %v4245_v37 = vld [vmem:[%s5691_s1 + $0x300] ss:$8 sps:$4 sm:$0xff]   ;;  %v4248_v38 = vld [vmem:[%s4726_s6 + $0x30] ss:$72 sps:$4 sm:$0xff]  }
  0x97   : > { %2790 = vmatprep.mubr.bf16.mxu0 %v4211_v39  ;;  %v4251_v39 = vld [vmem:[%s5691_s1 + $0x700] ss:$8 sps:$4 sm:$0xff]  }
  0x98   : > { %2526 = vmatpush1.bf16.msra.mxu1 %v4146_v40  ;;  %v4256_v40 = vld [vmem:[%s5691_s1 + $0x314] ss:$8 sps:$4 sm:$0xff]  }
  0x99   : > { %2818 = vmatpush1.bf16.msra.mxu0 %v4149_v41  ;;  %2527 = vmatprep.subr.bf16.mxu1 %v4154_v42  ;;  %v4259_v41 = vld [vmem:[%s5691_s1 + $0x714] ss:$8 sps:$4 sm:$0xff]   ;;  %v4308_v42 = vld [vmem:[%s4726_s6 + $0xa4] ss:$72 sps:$4 sm:$0xff]  }
  0x9a   : > { %2819 = vmatprep.subr.bf16.mxu0 %v4157_v43  ;;  %v4310_v43 = vld [vmem:[%s4726_s6 + $0xc4] ss:$72 sps:$4 sm:$0xff]  }
  0x9b   : > { %2499 = vmatmul.mubr.bf16.gmra.mrb[8].mxu1 %v4216_v45  ;;  %v4257_v45 = vld [vmem:[%s5691_s1 + $0x710] ss:$8 sps:$4 sm:$0xff]  }
  0x9c   : > { %2791 = vmatmul.mubr.bf16.gmra.mrb[8].mxu0 %v4217_v46  ;;  %2528 = vmatpush1.bf16.msra.mxu1 %v4152_v44  ;;  %v4254_v44 = vld [vmem:[%s5691_s1 + $0x310] ss:$8 sps:$4 sm:$0xff]   ;;  %v4262_v46 = vld [vmem:[%s5691_s1 + $0x324] ss:$8 sps:$4 sm:$0xff]  }
  0x9d   : > { %2820 = vmatpush1.bf16.msra.mxu0 %v4155_v47  ;;  %2529 = vmatprep.subr.bf16.mxu1 %v4160_v48  ;;  %v4265_v47 = vld [vmem:[%s5691_s1 + $0x724] ss:$8 sps:$4 sm:$0xff]   ;;  %v4260_v48 = vld [vmem:[%s5691_s1 + $0x320] ss:$8 sps:$4 sm:$0xff]  }
  0x9e   : > { %2821 = vmatprep.subr.bf16.mxu0 %v4163_v49  ;;  %2508 = vmatprep.mubr.bf16.mxu1 %v4224_v50  ;;  %v4263_v49 = vld [vmem:[%s5691_s1 + $0x720] ss:$8 sps:$4 sm:$0xff]  }
  0x9f   : > { %2800 = vmatprep.mubr.bf16.mxu0 %v4229_v51  ;;  %v4312_v50 = vld [vmem:[%s4726_s6 + $0xa0] ss:$72 sps:$4 sm:$0xff]  }
  0xa0   : > { %2530 = vmatpush1.bf16.msra.mxu1 %v4158_v52  ;;  %v4316_v51 = vld [vmem:[%s4726_s6 + $0xc0] ss:$72 sps:$4 sm:$0xff]   ;;  %v4268_v52 = vld [vmem:[%s5691_s1 + $0x334] ss:$8 sps:$4 sm:$0xff]  }
  0xa1   : > { %2822 = vmatpush1.bf16.msra.mxu0 %v4161_v53  ;;  %2531 = vmatprep.subr.bf16.mxu1 %v4166_v54  ;;  %v4271_v53 = vld [vmem:[%s5691_s1 + $0x734] ss:$8 sps:$4 sm:$0xff]  }
  0xa2   : > { %2823 = vmatprep.subr.bf16.mxu0 %v4169_v55  ;;  %v4326_v54 = vld [vmem:[%s4726_s6 + $0x134] ss:$72 sps:$4 sm:$0xff]  }
  0xa3   : > { %2509 = vmatmul.mubr.bf16.gmra.mrb[12].mxu1 %v4234_v58  ;;  %v4328_v55 = vld [vmem:[%s4726_s6 + $0x154] ss:$72 sps:$4 sm:$0xff]   ;;  %v4274_v58 = vld [vmem:[%s5691_s1 + $0x344] ss:$8 sps:$4 sm:$0xff]  }
  0xa4   : > { %2801 = vmatmul.mubr.bf16.gmra.mrb[12].mxu0 %v4235_v59  ;;  %2532 = vmatpush1.bf16.msra.mxu1 %v4164_v56  ;;  %v4266_v56 = vld [vmem:[%s5691_s1 + $0x330] ss:$8 sps:$4 sm:$0xff]   ;;  %v4277_v59 = vld [vmem:[%s5691_s1 + $0x744] ss:$8 sps:$4 sm:$0xff]  }
  0xa5   : > { %2824 = vmatpush1.bf16.msra.mxu0 %v4167_v57  ;;  %2533 = vmatprep.subr.bf16.mxu1 %v4172_v60  ;;  %v4269_v57 = vld [vmem:[%s5691_s1 + $0x730] ss:$8 sps:$4 sm:$0xff]   ;;  %v4272_v60 = vld [vmem:[%s5691_s1 + $0x340] ss:$8 sps:$4 sm:$0xff]  }
  0xa6   : > { %2825 = vmatprep.subr.bf16.mxu0 %v4175_v61  ;;  %2551 = vmatprep.mubr.bf16.mxu1 %v4244_v62  ;;  %v4275_v61 = vld [vmem:[%s5691_s1 + $0x740] ss:$8 sps:$4 sm:$0xff]   ;;  %v4330_v62 = vld [vmem:[%s4726_s6 + $0x130] ss:$72 sps:$4 sm:$0xff]  }
  0xa7   : > { %2843 = vmatprep.mubr.bf16.mxu0 %v4250_v63  ;;  %v4334_v63 = vld [vmem:[%s4726_s6 + $0x150] ss:$72 sps:$4 sm:$0xff]  }
  0xa8   : > { %2534 = vmatpush1.bf16.msra.mxu1 %v4170_v0  ;;  %v4280_v0 = vld [vmem:[%s5691_s1 + $0x354] ss:$8 sps:$4 sm:$0xff]  }
  0xa9   : > { %2826 = vmatpush1.bf16.msra.mxu0 %v4173_v1  ;;  %2535 = vmatprep.subr.bf16.mxu1 %v4178_v2  ;;  %v4283_v1 = vld [vmem:[%s5691_s1 + $0x754] ss:$8 sps:$4 sm:$0xff]   ;;  %v4344_v2 = vld [vmem:[%s4726_s6 + $0x1c4] ss:$72 sps:$4 sm:$0xff]  }
  0xaa   : > { %2827 = vmatprep.subr.bf16.mxu0 %v4181_v3  ;;  %v4346_v3 = vld [vmem:[%s4726_s6 + $0x1e4] ss:$72 sps:$4 sm:$0xff]  }
  0xac   : > { %2536 = vmatpush1.bf16.msra.mxu1 %v4176_v4  ;;  %v4278_v4 = vld [vmem:[%s5691_s1 + $0x350] ss:$8 sps:$4 sm:$0xff]  }
  0xad   : > { %2828 = vmatpush1.bf16.msra.mxu0 %v4179_v5  ;;  %2537 = vmatprep.subr.bf16.mxu1 %v4184_v6  ;;  %v4281_v5 = vld [vmem:[%s5691_s1 + $0x750] ss:$8 sps:$4 sm:$0xff]   ;;  %v4286_v6 = vld [vmem:[%s5691_s1 + $0x364] ss:$8 sps:$4 sm:$0xff]  }
  0xae   : > { %2829 = vmatprep.subr.bf16.mxu0 %v4187_v7  ;;  %v4289_v7 = vld [vmem:[%s5691_s1 + $0x764] ss:$8 sps:$4 sm:$0xff]  }
  0xb0   : > { %2538 = vmatpush1.bf16.msra.mxu1 %v4182_v8  ;;  %v4284_v8 = vld [vmem:[%s5691_s1 + $0x360] ss:$8 sps:$4 sm:$0xff]  }
  0xb1   : > { %2830 = vmatpush1.bf16.msra.mxu0 %v4185_v9  ;;  %2539 = vmatprep.subr.bf16.mxu1 %v4192_v10  ;;  %v4287_v9 = vld [vmem:[%s5691_s1 + $0x760] ss:$8 sps:$4 sm:$0xff]  }
  0xb2   : > { %2831 = vmatprep.subr.bf16.mxu0 %v4197_v11  ;;  %v4348_v10 = vld [vmem:[%s4726_s6 + $0x1c0] ss:$72 sps:$4 sm:$0xff]  }
  0xb3   : > { %v4352_v11 = vld [vmem:[%s4726_s6 + $0x1e0] ss:$72 sps:$4 sm:$0xff]  }
  0xb4   : > { %2540 = vmatpush1.bf16.msra.mxu1 %v4190_v12  ;;  %v4292_v12 = vld [vmem:[%s5691_s1 + $0x374] ss:$8 sps:$4 sm:$0xff]  }
  0xb5   : > { %2832 = vmatpush1.bf16.msra.mxu0 %v4195_v13  ;;  %2541 = vmatprep.subr.bf16.mxu1 %v4202_v14  ;;  %v4295_v13 = vld [vmem:[%s5691_s1 + $0x774] ss:$8 sps:$4 sm:$0xff]  }
  0xb6   : > { %2833 = vmatprep.subr.bf16.mxu0 %v4205_v15  ;;  %v4364_v14 = vld [vmem:[%s4726_s6 + $0x1c] ss:$72 sps:$4 sm:$0xff]  }
  0xb7   : > { %v4367_v15 = vld [vmem:[%s4726_s6 + $0x3c] ss:$72 sps:$4 sm:$0xff]  }
  0xb8   : > { %2542 = vmatpush1.bf16.msra.mxu1 %v4200_v16  ;;  %v4290_v16 = vld [vmem:[%s5691_s1 + $0x370] ss:$8 sps:$4 sm:$0xff]  }
  0xb9   : > { %2834 = vmatpush1.bf16.msra.mxu0 %v4203_v17  ;;  %2543 = vmatprep.subr.bf16.mxu1 %v4210_v18  ;;  %v4293_v17 = vld [vmem:[%s5691_s1 + $0x770] ss:$8 sps:$4 sm:$0xff]   ;;  %v4298_v18 = vld [vmem:[%s5691_s1 + $0x384] ss:$8 sps:$4 sm:$0xff]  }
  0xba   : > { %2835 = vmatprep.subr.bf16.mxu0 %v4215_v19  ;;  %v4301_v19 = vld [vmem:[%s5691_s1 + $0x784] ss:$8 sps:$4 sm:$0xff]  }
  0xbc   : > { %2544 = vmatpush1.bf16.msra.mxu1 %v4208_v20  ;;  %v4296_v20 = vld [vmem:[%s5691_s1 + $0x380] ss:$8 sps:$4 sm:$0xff]  }
  0xbd   : > { %2836 = vmatpush1.bf16.msra.mxu0 %v4213_v21  ;;  %2545 = vmatprep.subr.bf16.mxu1 %v4220_v22  ;;  %v4299_v21 = vld [vmem:[%s5691_s1 + $0x780] ss:$8 sps:$4 sm:$0xff]   ;;  %v4304_v22 = vld [vmem:[%s5691_s1 + $0x394] ss:$8 sps:$4 sm:$0xff]  }
  0xbe   : > { %2837 = vmatprep.subr.bf16.mxu0 %v4223_v23  ;;  %v4307_v23 = vld [vmem:[%s5691_s1 + $0x794] ss:$8 sps:$4 sm:$0xff]  }
  0xc0   : > { %2546 = vmatpush1.bf16.msra.mxu1 %v4218_v24  ;;  %v4302_v24 = vld [vmem:[%s5691_s1 + $0x390] ss:$8 sps:$4 sm:$0xff]  }
  0xc1   : > { %2838 = vmatpush1.bf16.msra.mxu0 %v4221_v25  ;;  %2547 = vmatprep.subr.bf16.mxu1 %v4228_v26  ;;  %v4305_v25 = vld [vmem:[%s5691_s1 + $0x790] ss:$8 sps:$4 sm:$0xff]   ;;  %v4315_v26 = vld [vmem:[%s5691_s1 + $0x3a4] ss:$8 sps:$4 sm:$0xff]  }
  0xc2   : > { %2839 = vmatprep.subr.bf16.mxu0 %v4233_v27  ;;  %v4319_v27 = vld [vmem:[%s5691_s1 + $0x7a4] ss:$8 sps:$4 sm:$0xff]  }
  0xc4   : > { %2548 = vmatpush1.bf16.msra.mxu1 %v4226_v28  ;;  %v4313_v28 = vld [vmem:[%s5691_s1 + $0x3a0] ss:$8 sps:$4 sm:$0xff]  }
  0xc5   : > { %2840 = vmatpush1.bf16.msra.mxu0 %v4231_v29  ;;  %2549 = vmatprep.subr.bf16.mxu1 %v4238_v30  ;;  %v4317_v29 = vld [vmem:[%s5691_s1 + $0x7a0] ss:$8 sps:$4 sm:$0xff]   ;;  %v4322_v30 = vld [vmem:[%s5691_s1 + $0x3b4] ss:$8 sps:$4 sm:$0xff]  }
  0xc6   : > { %2841 = vmatprep.subr.bf16.mxu0 %v4241_v31  ;;  %v4325_v31 = vld [vmem:[%s5691_s1 + $0x7b4] ss:$8 sps:$4 sm:$0xff]  }
  0xc8   : > { %2550 = vmatpush1.bf16.msra.mxu1 %v4236_v32  ;;  %v4320_v32 = vld [vmem:[%s5691_s1 + $0x3b0] ss:$8 sps:$4 sm:$0xff]  }
  0xc9   : > { %2842 = vmatpush1.bf16.msra.mxu0 %v4239_v33  ;;  %2592 = vmatprep.subr.bf16.mxu1 %v4247_v34  ;;  %v4323_v33 = vld [vmem:[%s5691_s1 + $0x7b0] ss:$8 sps:$4 sm:$0xff]   ;;  %v4333_v34 = vld [vmem:[%s5691_s1 + $0x3c4] ss:$8 sps:$4 sm:$0xff]  }
  0xca   : > { %2884 = vmatprep.subr.bf16.mxu0 %v4253_v35  ;;  %v4337_v35 = vld [vmem:[%s5691_s1 + $0x7c4] ss:$8 sps:$4 sm:$0xff]  }
  0xcb   : > { %2552 = vmatmul.mubr.bf16.vlgmr.msra.gmra.mrb[0].mxu1 %v4242_v36  ;;  %v4331_v36 = vld [vmem:[%s5691_s1 + $0x3c0] ss:$8 sps:$4 sm:$0xff]  }
  0xcc   : > { %2844 = vmatmul.mubr.bf16.vlgmr.msra.gmra.mrb[0].mxu0 %v4248_v38  ;;  %2593 = vmatpush1.bf16.msra.mxu1 %v4245_v37  ;;  %v4335_v37 = vld [vmem:[%s5691_s1 + $0x7c0] ss:$8 sps:$4 sm:$0xff]   ;;  %v4340_v38 = vld [vmem:[%s5691_s1 + $0x3d4] ss:$8 sps:$4 sm:$0xff]  }
  0xcd   : > { %2885 = vmatpush1.bf16.msra.mxu0 %v4251_v39  ;;  %2594 = vmatprep.subr.bf16.mxu1 %v4256_v40  ;;  %v4343_v39 = vld [vmem:[%s5691_s1 + $0x7d4] ss:$8 sps:$4 sm:$0xff]   ;;  %v4338_v40 = vld [vmem:[%s5691_s1 + $0x3d0] ss:$8 sps:$4 sm:$0xff]  }
  0xce   : > { %2886 = vmatprep.subr.bf16.mxu0 %v4259_v41  ;;  %2561 = vmatprep.mubr.bf16.mxu1 %v4308_v42  ;;  %v4341_v41 = vld [vmem:[%s5691_s1 + $0x7d0] ss:$8 sps:$4 sm:$0xff]   ;;  %v4351_v42 = vld [vmem:[%s5691_s1 + $0x3e4] ss:$8 sps:$4 sm:$0xff]  }
  0xcf   : > { %2853 = vmatprep.mubr.bf16.mxu0 %v4310_v43  ;;  %v4355_v43 = vld [vmem:[%s5691_s1 + $0x7e4] ss:$8 sps:$4 sm:$0xff]  }
  0xd0   : > { %2595 = vmatpush1.bf16.msra.mxu1 %v4254_v44  ;;  %v4349_v44 = vld [vmem:[%s5691_s1 + $0x3e0] ss:$8 sps:$4 sm:$0xff]  }
  0xd1   : > { %2887 = vmatpush1.bf16.msra.mxu0 %v4257_v45  ;;  %2596 = vmatprep.subr.bf16.mxu1 %v4262_v46  ;;  %v4353_v45 = vld [vmem:[%s5691_s1 + $0x7e0] ss:$8 sps:$4 sm:$0xff]   ;;  %v4358_v46 = vld [vmem:[%s5691_s1 + $0x3f4] ss:$8 sps:$4 sm:$0xff]  }
  0xd2   : > { %2888 = vmatprep.subr.bf16.mxu0 %v4265_v47  ;;  %v4361_v47 = vld [vmem:[%s5691_s1 + $0x7f4] ss:$8 sps:$4 sm:$0xff]  }
  0xd3   : > { %2562 = vmatmul.mubr.bf16.gmra.mrb[4].mxu1 %v4312_v50  ;;  %v4370_v50 = vld [vmem:[%s5691_s1 + $0x804] ss:$8 sps:$4 sm:$0xff]  }
  0xd4   : > { %2854 = vmatmul.mubr.bf16.gmra.mrb[4].mxu0 %v4316_v51  ;;  %2597 = vmatpush1.bf16.msra.mxu1 %v4260_v48  ;;  %v4356_v48 = vld [vmem:[%s5691_s1 + $0x3f0] ss:$8 sps:$4 sm:$0xff]  }
  0xd5   : > { %2889 = vmatpush1.bf16.msra.mxu0 %v4263_v49  ;;  %2598 = vmatprep.subr.bf16.mxu1 %v4268_v52  ;;  %v4359_v49 = vld [vmem:[%s5691_s1 + $0x7f0] ss:$8 sps:$4 sm:$0xff]  }
  0xd6   : > { %2890 = vmatprep.subr.bf16.mxu0 %v4271_v53  ;;  %2571 = vmatprep.mubr.bf16.mxu1 %v4326_v54  ;;  %v4362_v51 = vld [vmem:[%s4726_s6 + $0x18] ss:$72 sps:$4 sm:$0xff]   ;;  %v4373_v54 = vld [vmem:[%s5691_s1 + $0x814] ss:$8 sps:$4 sm:$0xff]  }
  0xd7   : > { %2863 = vmatprep.mubr.bf16.mxu0 %v4328_v55  ;;  %v4365_v52 = vld [vmem:[%s4726_s6 + $0x38] ss:$72 sps:$4 sm:$0xff]   ;;  %v4374_v55 = vld [vmem:[%s4726_s6 + $0xac] ss:$72 sps:$4 sm:$0xff]  }
  0xd8   : > { %2599 = vmatpush1.bf16.msra.mxu1 %v4266_v56  ;;  %v4368_v53 = vld [vmem:[%s5691_s1 + $0x800] ss:$8 sps:$4 sm:$0xff]   ;;  %v4376_v56 = vld [vmem:[%s4726_s6 + $0xcc] ss:$72 sps:$4 sm:$0xff]  }
  0xd9   : > { %2891 = vmatpush1.bf16.msra.mxu0 %v4269_v57  ;;  %2600 = vmatprep.subr.bf16.mxu1 %v4274_v58  ;;  %v4371_v57 = vld [vmem:[%s5691_s1 + $0x810] ss:$8 sps:$4 sm:$0xff]   ;;  %v4382_v58 = vld [vmem:[%s5691_s1 + $0x824] ss:$8 sps:$4 sm:$0xff]  }
  0xda   : > { %2892 = vmatprep.subr.bf16.mxu0 %v4277_v59  ;;  %v4378_v59 = vld [vmem:[%s4726_s6 + $0xa8] ss:$72 sps:$4 sm:$0xff]  }
  0xdb   : > { %2572 = vmatmul.mubr.bf16.gmra.mrb[8].mxu1 %v4330_v62  ;;  %v4385_v62 = vld [vmem:[%s5691_s1 + $0x834] ss:$8 sps:$4 sm:$0xff]  }
  0xdc   : > { %2864 = vmatmul.mubr.bf16.gmra.mrb[8].mxu0 %v4334_v63  ;;  %2601 = vmatpush1.bf16.msra.mxu1 %v4272_v60  ;;  %v4379_v60 = vld [vmem:[%s4726_s6 + $0xc8] ss:$72 sps:$4 sm:$0xff]   ;;  %v4386_v63 = vld [vmem:[%s4726_s6 + $0x13c] ss:$72 sps:$4 sm:$0xff]  }
  0xdd   : > { %2893 = vmatpush1.bf16.msra.mxu0 %v4275_v61  ;;  %2602 = vmatprep.subr.bf16.mxu1 %v4280_v0  ;;  %v4380_v61 = vld [vmem:[%s5691_s1 + $0x820] ss:$8 sps:$4 sm:$0xff]   ;;  %v4388_v0 = vld [vmem:[%s4726_s6 + $0x15c] ss:$72 sps:$4 sm:$0xff]  }
  0xde   : > { %2894 = vmatprep.subr.bf16.mxu0 %v4283_v1  ;;  %2581 = vmatprep.mubr.bf16.mxu1 %v4344_v2  ;;  %v4383_v1 = vld [vmem:[%s5691_s1 + $0x830] ss:$8 sps:$4 sm:$0xff]   ;;  %v4394_v2 = vld [vmem:[%s5691_s1 + $0x844] ss:$8 sps:$4 sm:$0xff]  }
  0xdf   : > { %2873 = vmatprep.mubr.bf16.mxu0 %v4346_v3  ;;  %v4390_v3 = vld [vmem:[%s4726_s6 + $0x138] ss:$72 sps:$4 sm:$0xff]  }
  0xe0   : > { %2603 = vmatpush1.bf16.msra.mxu1 %v4278_v4  ;;  %v4391_v4 = vld [vmem:[%s4726_s6 + $0x158] ss:$72 sps:$4 sm:$0xff]  }
  0xe1   : > { %2895 = vmatpush1.bf16.msra.mxu0 %v4281_v5  ;;  %2604 = vmatprep.subr.bf16.mxu1 %v4286_v6  ;;  %v4392_v5 = vld [vmem:[%s5691_s1 + $0x840] ss:$8 sps:$4 sm:$0xff]   ;;  %v4397_v6 = vld [vmem:[%s5691_s1 + $0x854] ss:$8 sps:$4 sm:$0xff]  }
  0xe2   : > { %2896 = vmatprep.subr.bf16.mxu0 %v4289_v7  ;;  %v4398_v7 = vld [vmem:[%s4726_s6 + $0x1cc] ss:$72 sps:$4 sm:$0xff]  }
  0xe3   : > { %2582 = vmatmul.mubr.bf16.gmra.mrb[12].mxu1 %v4348_v10  ;;  %v4406_v10 = vld [vmem:[%s5691_s1 + $0x864] ss:$8 sps:$4 sm:$0xff]  }
  0xe4   : > { %2874 = vmatmul.mubr.bf16.gmra.mrb[12].mxu0 %v4352_v11  ;;  %2605 = vmatpush1.bf16.msra.mxu1 %v4284_v8  ;;  %v4400_v8 = vld [vmem:[%s4726_s6 + $0x1ec] ss:$72 sps:$4 sm:$0xff]   ;;  %v4402_v11 = vld [vmem:[%s4726_s6 + $0x1c8] ss:$72 sps:$4 sm:$0xff]  }
  0xe5   : > { %2897 = vmatpush1.bf16.msra.mxu0 %v4287_v9  ;;  %2606 = vmatprep.subr.bf16.mxu1 %v4292_v12  ;;  %v4395_v9 = vld [vmem:[%s5691_s1 + $0x850] ss:$8 sps:$4 sm:$0xff]  }
  0xe6   : > { %2898 = vmatprep.subr.bf16.mxu0 %v4295_v13  ;;  %2624 = vmatprep.mubr.bf16.mxu1 %v4364_v14  ;;  %v4403_v12 = vld [vmem:[%s4726_s6 + $0x1e8] ss:$72 sps:$4 sm:$0xff]   ;;  %v4409_v14 = vld [vmem:[%s5691_s1 + $0x874] ss:$8 sps:$4 sm:$0xff]  }
  0xe7   : > { %2916 = vmatprep.mubr.bf16.mxu0 %v4367_v15  ;;  %v4404_v13 = vld [vmem:[%s5691_s1 + $0x860] ss:$8 sps:$4 sm:$0xff]   ;;  %v4436_v15 = vld [vmem:[%s4726_s6 + $0x44] ss:$72 sps:$4 sm:$0xff]  }
  0xe8   : > { %2607 = vmatpush1.bf16.msra.mxu1 %v4290_v16  ;;  %v4439_v16 = vld [vmem:[%s4726_s6 + $0x164] ss:$72 sps:$4 sm:$0xff]  }
  0xe9   : > { %2899 = vmatpush1.bf16.msra.mxu0 %v4293_v17  ;;  %2608 = vmatprep.subr.bf16.mxu1 %v4298_v18  ;;  %v4407_v17 = vld [vmem:[%s5691_s1 + $0x870] ss:$8 sps:$4 sm:$0xff]   ;;  %v4412_v18 = vld [vmem:[%s5691_s1 + $0x884] ss:$8 sps:$4 sm:$0xff]  }
  0xea   : > { %2900 = vmatprep.subr.bf16.mxu0 %v4301_v19  ;;  %v4410_v19 = vld [vmem:[%s5691_s1 + $0x880] ss:$8 sps:$4 sm:$0xff]  }
  0xec   : > { %2609 = vmatpush1.bf16.msra.mxu1 %v4296_v20  ;;  %v4415_v20 = vld [vmem:[%s5691_s1 + $0x894] ss:$8 sps:$4 sm:$0xff]  }
  0xed   : > { %2901 = vmatpush1.bf16.msra.mxu0 %v4299_v21  ;;  %2610 = vmatprep.subr.bf16.mxu1 %v4304_v22  ;;  %v4413_v21 = vld [vmem:[%s5691_s1 + $0x890] ss:$8 sps:$4 sm:$0xff]   ;;  %v4418_v22 = vld [vmem:[%s5691_s1 + $0x8a4] ss:$8 sps:$4 sm:$0xff]  }
  0xee   : > { %2902 = vmatprep.subr.bf16.mxu0 %v4307_v23  ;;  %v4416_v23 = vld [vmem:[%s5691_s1 + $0x8a0] ss:$8 sps:$4 sm:$0xff]  }
  0xf0   : > { %2611 = vmatpush1.bf16.msra.mxu1 %v4302_v24  ;;  %v4421_v24 = vld [vmem:[%s5691_s1 + $0x8b4] ss:$8 sps:$4 sm:$0xff]  }
  0xf1   : > { %2903 = vmatpush1.bf16.msra.mxu0 %v4305_v25  ;;  %2612 = vmatprep.subr.bf16.mxu1 %v4315_v26  ;;  %v4419_v25 = vld [vmem:[%s5691_s1 + $0x8b0] ss:$8 sps:$4 sm:$0xff]   ;;  %v4424_v26 = vld [vmem:[%s5691_s1 + $0x8c4] ss:$8 sps:$4 sm:$0xff]  }
  0xf2   : > { %2904 = vmatprep.subr.bf16.mxu0 %v4319_v27  ;;  %v4422_v27 = vld [vmem:[%s5691_s1 + $0x8c0] ss:$8 sps:$4 sm:$0xff]  }
  0xf4   : > { %2613 = vmatpush1.bf16.msra.mxu1 %v4313_v28  ;;  %v4427_v28 = vld [vmem:[%s5691_s1 + $0x8d4] ss:$8 sps:$4 sm:$0xff]  }
  0xf5   : > { %2905 = vmatpush1.bf16.msra.mxu0 %v4317_v29  ;;  %2614 = vmatprep.subr.bf16.mxu1 %v4322_v30  ;;  %v4425_v29 = vld [vmem:[%s5691_s1 + $0x8d0] ss:$8 sps:$4 sm:$0xff]   ;;  %v4430_v30 = vld [vmem:[%s5691_s1 + $0x8e4] ss:$8 sps:$4 sm:$0xff]  }
  0xf6   : > { %2906 = vmatprep.subr.bf16.mxu0 %v4325_v31  ;;  %v4428_v31 = vld [vmem:[%s5691_s1 + $0x8e0] ss:$8 sps:$4 sm:$0xff]  }
  0xf8   : > { %2615 = vmatpush1.bf16.msra.mxu1 %v4320_v32  ;;  %v4433_v32 = vld [vmem:[%s5691_s1 + $0x8f4] ss:$8 sps:$4 sm:$0xff]  }
  0xf9   : > { %2907 = vmatpush1.bf16.msra.mxu0 %v4323_v33  ;;  %2616 = vmatprep.subr.bf16.mxu1 %v4333_v34  ;;  %v4431_v33 = vld [vmem:[%s5691_s1 + $0x8f0] ss:$8 sps:$4 sm:$0xff]   ;;  %v4434_v34 = vld [vmem:[%s4726_s6 + $0x40] ss:$72 sps:$4 sm:$0xff]  }
  0xfa   : > { %2908 = vmatprep.subr.bf16.mxu0 %v4337_v35  ;;  %v4437_v35 = vld [vmem:[%s4726_s6 + $0x160] ss:$72 sps:$4 sm:$0xff]  }
  0xfc   : > { %2617 = vmatpush1.bf16.msra.mxu1 %v4331_v36  ;;  %v4440_v36 = vld [vmem:[%s4726_s6 + $0xd4] ss:$72 sps:$4 sm:$0xff]  }
  0xfd   : > { %2909 = vmatpush1.bf16.msra.mxu0 %v4335_v37  ;;  %2618 = vmatprep.subr.bf16.mxu1 %v4340_v38  ;;  %v4442_v37 = vld [vmem:[%s4726_s6 + $0x1f4] ss:$72 sps:$4 sm:$0xff]   ;;  %v4444_v38 = vld [vmem:[%s4726_s6 + $0xd0] ss:$72 sps:$4 sm:$0xff]  }
  0xfe   : > { %2910 = vmatprep.subr.bf16.mxu0 %v4343_v39  ;;  %v4445_v39 = vld [vmem:[%s4726_s6 + $0x1f0] ss:$72 sps:$4 sm:$0xff]   ;;  %s175_s6 = sand.u32 1, %s4492_s12  }
  0xff   : > { %s3254_s27 = sshll.u32 %s175_s6, 7 }
 0x100   : > { %2619 = vmatpush1.bf16.msra.mxu1 %v4338_v40  ;;  %s5559_s12 = scalar_lea.vmem [#allocation2], %s3254_s27  }
 0x101   : > { %2911 = vmatpush1.bf16.msra.mxu0 %v4341_v41  ;;  %2620 = vmatprep.subr.bf16.mxu1 %v4351_v42 }
 0x102   : > { %2912 = vmatprep.subr.bf16.mxu0 %v4355_v43  ;;  %v563_v43 = vlaneseq }
 0x104   : > { %2621 = vmatpush1.bf16.msra.mxu1 %v4349_v44 }
 0x105   : > { %2913 = vmatpush1.bf16.msra.mxu0 %v4353_v45  ;;  %2622 = vmatprep.subr.bf16.mxu1 %v4358_v46  ;;  %v564_v45 = vshrl.u32 %v563_v43, 7 }
 0x106   : > { %2914 = vmatprep.subr.bf16.mxu0 %v4361_v47 }
 0x108   : > { %2623 = vmatpush1.bf16.msra.mxu1 %v4356_v48 }
 0x109   : > { %2915 = vmatpush1.bf16.msra.mxu0 %v4359_v49  ;;  %3641 = vmatprep.subr.bf16.mxu1 %v4370_v50  ;;  %v565_v49 = vsub.s32 0, %v564_v45 }
 0x10a   : > { %2957 = vmatprep.subr.bf16.mxu0 %v4370_v50 }
 0x10b   : > { %2625 = vmatmul.mubr.bf16.vlgmr.msra.gmra.mrb[0].mxu1 %v4362_v51  ;;  %v561_v51 = vld [vmem:[%s5692_s2] sm:$0x3] }
 0x10c   : > { %2917 = vmatmul.mubr.bf16.vlgmr.msra.gmra.mrb[0].mxu0 %v4365_v52  ;;  %3657 = vmatpush1.bf16.msra.mxu1 %v4368_v53  ;;  %v569_v52 = vsub.s32 1, %v564_v45 }
 0x10d   : > { %2958 = vmatpush1.bf16.msra.mxu0 %v4368_v53  ;;  %3642 = vmatprep.subr.bf16.mxu1 %v4373_v54  ;;  %v5540_v53 = vrot.slane %v561_v51, %v565_v49 }
 0x10e   : > { %2959 = vmatprep.subr.bf16.mxu0 %v4373_v54  ;;  %2634 = vmatprep.mubr.bf16.mxu1 %v4374_v55  ;;  %v5542_v54 = vrot.slane %v561_v51, %v569_v52 }
 0x10f   : > { %2926 = vmatprep.mubr.bf16.mxu0 %v4376_v56 }
 0x110   : > { %3658 = vmatpush1.bf16.msra.mxu1 %v4371_v57 }
 0x111   : > { %2960 = vmatpush1.bf16.msra.mxu0 %v4371_v57  ;;  %3643 = vmatprep.subr.bf16.mxu1 %v4382_v58 }
 0x112   : > { %2961 = vmatprep.subr.bf16.mxu0 %v4382_v58 }
 0x113   : > { %2635 = vmatmul.mubr.bf16.gmra.mrb[4].mxu1 %v4378_v59 }
 0x114   : > { %2927 = vmatmul.mubr.bf16.gmra.mrb[4].mxu0 %v4379_v60  ;;  %3659 = vmatpush1.bf16.msra.mxu1 %v4380_v61 }
 0x115   : > { %2962 = vmatpush1.bf16.msra.mxu0 %v4380_v61  ;;  %3644 = vmatprep.subr.bf16.mxu1 %v4385_v62 }
 0x116   : > { %2963 = vmatprep.subr.bf16.mxu0 %v4385_v62  ;;  %2644 = vmatprep.mubr.bf16.mxu1 %v4386_v63 }
 0x117   : > { %2936 = vmatprep.mubr.bf16.mxu0 %v4388_v0 }
 0x118   : > { %3660 = vmatpush1.bf16.msra.mxu1 %v4383_v1 }
 0x119   : > { %2964 = vmatpush1.bf16.msra.mxu0 %v4383_v1  ;;  %3645 = vmatprep.subr.bf16.mxu1 %v4394_v2 }
 0x11a   : > { %2965 = vmatprep.subr.bf16.mxu0 %v4394_v2 }
 0x11b   : > { %2645 = vmatmul.mubr.bf16.gmra.mrb[8].mxu1 %v4390_v3 }
 0x11c   : > { %2937 = vmatmul.mubr.bf16.gmra.mrb[8].mxu0 %v4391_v4  ;;  %3661 = vmatpush1.bf16.msra.mxu1 %v4392_v5 }
 0x11d   : > { %2966 = vmatpush1.bf16.msra.mxu0 %v4392_v5  ;;  %3646 = vmatprep.subr.bf16.mxu1 %v4397_v6 }
 0x11e   : > { %2967 = vmatprep.subr.bf16.mxu0 %v4397_v6  ;;  %2654 = vmatprep.mubr.bf16.mxu1 %v4398_v7 }
 0x11f   : > { %2946 = vmatprep.mubr.bf16.mxu0 %v4400_v8 }
 0x120   : > { %3662 = vmatpush1.bf16.msra.mxu1 %v4395_v9 }
 0x121   : > { %2968 = vmatpush1.bf16.msra.mxu0 %v4395_v9  ;;  %3647 = vmatprep.subr.bf16.mxu1 %v4406_v10 }
 0x122   : > { %2969 = vmatprep.subr.bf16.mxu0 %v4406_v10 }
 0x123   : > { %2655 = vmatmul.mubr.bf16.gmra.mrb[12].mxu1 %v4402_v11 }
 0x124   : > { %2947 = vmatmul.mubr.bf16.gmra.mrb[12].mxu0 %v4403_v12  ;;  %3663 = vmatpush1.bf16.msra.mxu1 %v4404_v13 }
 0x125   : > { %2970 = vmatpush1.bf16.msra.mxu0 %v4404_v13  ;;  %3648 = vmatprep.subr.bf16.mxu1 %v4409_v14 }
 0x126   : > { %2971 = vmatprep.subr.bf16.mxu0 %v4409_v14  ;;  %2989 = vmatprep.mubr.bf16.mxu0 %v4436_v15 }
 0x127   : > { %3009 = vmatprep.mubr.bf16.mxu1 %v4439_v16 }
 0x128   : > { %3664 = vmatpush1.bf16.msra.mxu1 %v4407_v17 }
 0x129   : > { %2972 = vmatpush1.bf16.msra.mxu0 %v4407_v17  ;;  %3649 = vmatprep.subr.bf16.mxu1 %v4412_v18 }
 0x12a   : > { %2973 = vmatprep.subr.bf16.mxu0 %v4412_v18 }
 0x12c   : > { %3665 = vmatpush1.bf16.msra.mxu1 %v4410_v19 }
 0x12d   : > { %2974 = vmatpush1.bf16.msra.mxu0 %v4410_v19  ;;  %3650 = vmatprep.subr.bf16.mxu1 %v4415_v20 }
 0x12e   : > { %2975 = vmatprep.subr.bf16.mxu0 %v4415_v20 }
 0x130   : > { %3666 = vmatpush1.bf16.msra.mxu1 %v4413_v21 }
 0x131   : > { %2976 = vmatpush1.bf16.msra.mxu0 %v4413_v21  ;;  %3651 = vmatprep.subr.bf16.mxu1 %v4418_v22 }
 0x132   : > { %2977 = vmatprep.subr.bf16.mxu0 %v4418_v22 }
 0x134   : > { %3667 = vmatpush1.bf16.msra.mxu1 %v4416_v23 }
 0x135   : > { %2978 = vmatpush1.bf16.msra.mxu0 %v4416_v23  ;;  %3652 = vmatprep.subr.bf16.mxu1 %v4421_v24 }
 0x136   : > { %2979 = vmatprep.subr.bf16.mxu0 %v4421_v24 }
 0x138   : > { %3668 = vmatpush1.bf16.msra.mxu1 %v4419_v25 }
 0x139   : > { %2980 = vmatpush1.bf16.msra.mxu0 %v4419_v25  ;;  %3653 = vmatprep.subr.bf16.mxu1 %v4424_v26 }
 0x13a   : > { %2981 = vmatprep.subr.bf16.mxu0 %v4424_v26 }
 0x13c   : > { %3669 = vmatpush1.bf16.msra.mxu1 %v4422_v27 }
 0x13d   : > { %2982 = vmatpush1.bf16.msra.mxu0 %v4422_v27  ;;  %3654 = vmatprep.subr.bf16.mxu1 %v4427_v28 }
 0x13e   : > { %2983 = vmatprep.subr.bf16.mxu0 %v4427_v28 }
 0x140   : > { %3670 = vmatpush1.bf16.msra.mxu1 %v4425_v29 }
 0x141   : > { %2984 = vmatpush1.bf16.msra.mxu0 %v4425_v29  ;;  %3655 = vmatprep.subr.bf16.mxu1 %v4430_v30 }
 0x142   : > { %2985 = vmatprep.subr.bf16.mxu0 %v4430_v30 }
 0x144   : > { %3671 = vmatpush1.bf16.msra.mxu1 %v4428_v31 }
 0x145   : > { %2986 = vmatpush1.bf16.msra.mxu0 %v4428_v31  ;;  %3656 = vmatprep.subr.bf16.mxu1 %v4433_v32 }
 0x146   : > { %2987 = vmatprep.subr.bf16.mxu0 %v4433_v32 }
 0x148   : > { %3672 = vmatpush1.bf16.msra.mxu1 %v4431_v33 }
 0x149   : > { %2988 = vmatpush1.bf16.msra.mxu0 %v4431_v33 }
 0x14b   : > { %3010 = vmatmul.mubr.bf16.vlgmr.msra.gmra.mrb[16].mxu1 %v4437_v35 }
 0x14c   : > { %2990 = vmatmul.mubr.bf16.vlgmr.msra.gmra.mrb[0].mxu0 %v4434_v34  ;;  %3019 = vmatprep.mubr.bf16.mxu1 %v4442_v37 }
 0x14d   : > { %2999 = vmatprep.mubr.bf16.mxu0 %v4440_v36 }
 0x153   : > { %3020 = vmatmul.mubr.bf16.gmra.mrb[20].mxu1 %v4445_v39 }
 0x154   : > { %3000 = vmatmul.mubr.bf16.gmra.mrb[4].mxu0 %v4444_v38 }
 0x1de   : > { %v2626_v40 = vpop.f32.mrb[0].mxu1 }
 0x1df   : > { %v2628_v41 = vpop.f32.mrb[1].mxu1  ;;  %v3673_v23 = vadd.f32 %v2626_v40, %v5540_v53 }
 0x1e0   : > { %v2630_v42 = vpop.f32.mrb[2].mxu1  ;;  %v3675_v24 = vadd.f32 %v2628_v41, %v5542_v54 }
 0x1e1   : > { %v2632_v44 = vpop.f32.mrb[3].mxu1  ;;  %v3677_v27 = vadd.f32 %v2630_v42, %v5540_v53 }
 0x1e2   : > { %v3679_v32 = vadd.f32 %v2632_v44, %v5542_v54 }
 0x1e6   : > { %v5529_v46 = vpop.f32.mrb[4].mxu1 }
 0x1e7   : > { %v5531_v47 = vpop.f32.mrb[5].mxu1 }
 0x1e8   : > { %v5533_v48 = vpop.f32.mrb[6].mxu1 }
 0x1e9   : > { %v5535_v50 = vpop.f32.mrb[7].mxu1 }
 0x1ee   : > { %v2646_v55 = vpop.f32.mrb[8].mxu1 }
 0x1ef   : > { %v2938_v56 = vpop.f32.mrb[8].mxu0  ;;  %v3689_v57 = vadd.f32 %v2646_v55, %v5540_v53  ;;  %v2648_v58 = vpop.f32.mrb[9].mxu1 }
 0x1f0   : > { %v2940_v59 = vpop.f32.mrb[9].mxu0  ;;  %v3692_v60 = vadd.f32 %v2648_v58, %v5542_v54  ;;  %v2650_v61 = vpop.f32.mrb[10].mxu1  ;;  %v3683_v58 = vadd.f32 %v5531_v47, %v5542_v54 }
 0x1f1   : > { %v2942_v62 = vpop.f32.mrb[10].mxu0  ;;  %v3690_v63 = vadd.f32 %v3689_v57, %v2938_v56  ;;  %v3695_v0 = vadd.f32 %v2650_v61, %v5540_v53  ;;  %v2652_v1 = vpop.f32.mrb[11].mxu1  ;;  %v3681_v57 = vadd.f32 %v5529_v46, %v5540_v53  ;;  %v3685_v61 = vadd.f32 %v5533_v48, %v5540_v53 }
 0x1f2   : > { %v2944_v2 = vpop.f32.mrb[11].mxu0  ;;  %v3693_v3 = vadd.f32 %v3692_v60, %v2940_v59  ;;  %v3698_v4 = vadd.f32 %v2652_v1, %v5542_v54  ;;  %v3687_v46 = vadd.f32 %v5535_v50, %v5542_v54 }
 0x1f3   : > { %v3696_v5 = vadd.f32 %v3695_v0, %v2942_v62 }
 0x1f4   : > { %v3699_v6 = vadd.f32 %v3698_v4, %v2944_v2 }
 0x1f6   : > { %v2656_v7 = vpop.f32.mrb[12].mxu1 }
 0x1f7   : > { %v2948_v8 = vpop.f32.mrb[12].mxu0  ;;  %v3701_v9 = vadd.f32 %v2656_v7, %v5540_v53  ;;  %v2658_v10 = vpop.f32.mrb[13].mxu1 }
 0x1f8   : > { %v2950_v11 = vpop.f32.mrb[13].mxu0  ;;  %v3704_v12 = vadd.f32 %v2658_v10, %v5542_v54  ;;  %v2660_v13 = vpop.f32.mrb[14].mxu1 }
 0x1f9   : > { %v2952_v14 = vpop.f32.mrb[14].mxu0  ;;  %v3702_v15 = vadd.f32 %v3701_v9, %v2948_v8  ;;  %v3707_v16 = vadd.f32 %v2660_v13, %v5540_v53  ;;  %v2662_v17 = vpop.f32.mrb[15].mxu1 }
 0x1fa   : > { %v2954_v18 = vpop.f32.mrb[15].mxu0  ;;  %v3705_v19 = vadd.f32 %v3704_v12, %v2950_v11  ;;  %v3710_v20 = vadd.f32 %v2662_v17, %v5542_v54 }
 0x1fb   : > { %v3708_v21 = vadd.f32 %v3707_v16, %v2952_v14 }
 0x1fc   : > { %v5552_v22 = vadd.f32 %v3710_v20, %v2954_v18 }
 0x21e   : > { %v3011_v26 = vpop.f32.mrb[16].mxu1 }
 0x21f   : > { %v2991_v25 = vpop.f32.mrb[0].mxu0  ;;  %v3691_v29 = vadd.f32 %v3690_v63, %v3011_v26  ;;  %v3013_v31 = vpop.f32.mrb[17].mxu1 }
 0x220   : > { %v3674_v28 = vadd.f32 %v3673_v23, %v2991_v25  ;;  %v2993_v30 = vpop.f32.mrb[1].mxu0  ;;  %v3694_v34 = vadd.f32 %v3693_v3, %v3013_v31  ;;  %v3015_v36 = vpop.f32.mrb[18].mxu1 }
 0x221   : > { %v3676_v33 = vadd.f32 %v3675_v24, %v2993_v30  ;;  %v2995_v35 = vpop.f32.mrb[2].mxu0  ;;  %v3038_v38 = vmax.f32 %v3691_v29, 0.0  ;;  %v3697_v40 = vadd.f32 %v3696_v5, %v3015_v36  ;;  %v3017_v41 = vpop.f32.mrb[19].mxu1 }
 0x222   : > { %v3030_v37 = vmax.f32 %v3674_v28, 0.0  ;;  %v3678_v39 = vadd.f32 %v3677_v27, %v2995_v35  ;;  %v2997_v43 = vpop.f32.mrb[3].mxu0  ;;  %v3039_v49 = vmax.f32 %v3694_v34, 0.0  ;;  %v3700_v42 = vadd.f32 %v3699_v6, %v3017_v41 }
 0x223   : > { %v3031_v45 = vmax.f32 %v3676_v33, 0.0  ;;  %v3680_v51 = vadd.f32 %v3679_v32, %v2997_v43  ;;  %3054 = vst [vmem:[%s5559_s12 + $0x40] sm:$0xff] %v3038_v38  ;;  %v3040_v52 = vmax.f32 %v3697_v40, 0.0 }
 0x224   : > { %3046 = vst [vmem:[%s5559_s12] sm:$0xff] %v3030_v37  ;;  %v3032_v44 = vmax.f32 %v3678_v39, 0.0  ;;  %3055 = vst [vmem:[%s5559_s12 + $0x48] sm:$0xff] %v3039_v49  ;;  %v3041_v56 = vmax.f32 %v3700_v42, 0.0 }
 0x225   : > { %3047 = vst [vmem:[%s5559_s12 + $0x8] sm:$0xff] %v3031_v45  ;;  %v3033_v55 = vmax.f32 %v3680_v51, 0.0  ;;  %3056 = vst [vmem:[%s5559_s12 + $0x50] sm:$0xff] %v3040_v52 }
 0x226   : > { %3048 = vst [vmem:[%s5559_s12 + $0x10] sm:$0xff] %v3032_v44  ;;  %3057 = vst [vmem:[%s5559_s12 + $0x58] sm:$0xff] %v3041_v56  ;;  %v3021_v60 = vpop.f32.mrb[20].mxu1 }
 0x227   : > { %3049 = vst [vmem:[%s5559_s12 + $0x18] sm:$0xff] %v3033_v55  ;;  %v3001_v59 = vpop.f32.mrb[4].mxu0  ;;  %v3703_v63 = vadd.f32 %v3702_v15, %v3021_v60  ;;  %v3023_v1 = vpop.f32.mrb[21].mxu1 }
 0x228   : > { %v3682_v62 = vadd.f32 %v3681_v57, %v3001_v59  ;;  %v3003_v0 = vpop.f32.mrb[5].mxu0  ;;  %v3706_v3 = vadd.f32 %v3705_v19, %v3023_v1  ;;  %v3025_v47 = vpop.f32.mrb[22].mxu1 }
 0x229   : > { %v3684_v2 = vadd.f32 %v3683_v58, %v3003_v0  ;;  %v3005_v4 = vpop.f32.mrb[6].mxu0  ;;  %v3042_v6 = vmax.f32 %v3703_v63, 0.0  ;;  %v3709_v48 = vadd.f32 %v3708_v21, %v3025_v47  ;;  %v3027_v8 = vpop.f32.mrb[23].mxu1  ;;  %3068 = sbr.rel (!%p4579_p4) target bundleno = 609 (0x261), region = 36 }
 0x22a   : > { %v3034_v5 = vmax.f32 %v3682_v62, 0.0  ;;  %v3686_v7 = vadd.f32 %v3685_v61, %v3005_v4  ;;  %v3007_v53 = vpop.f32.mrb[7].mxu0  ;;  %v3043_v10 = vmax.f32 %v3706_v3, 0.0  ;;  %v3712_v54 = vadd.f32 %v5552_v22, %v3027_v8 }
 0x22b   : > { %v3035_v9 = vmax.f32 %v3684_v2, 0.0  ;;  %v3688_v50 = vadd.f32 %v3687_v46, %v3007_v53  ;;  %3058 = vst [vmem:[%s5559_s12 + $0x60] sm:$0xff] %v3042_v6  ;;  %v3044_v12 = vmax.f32 %v3709_v48, 0.0 }
 0x22c   : > { %3050 = vst [vmem:[%s5559_s12 + $0x20] sm:$0xff] %v3034_v5  ;;  %v3036_v11 = vmax.f32 %v3686_v7, 0.0  ;;  %3059 = vst [vmem:[%s5559_s12 + $0x68] sm:$0xff] %v3043_v10  ;;  %v3045_v14 = vmax.f32 %v3712_v54, 0.0 }
 0x22d   : > { %3051 = vst [vmem:[%s5559_s12 + $0x28] sm:$0xff] %v3035_v9  ;;  %v3037_v13 = vmax.f32 %v3688_v50, 0.0  ;;  %3060 = vst [vmem:[%s5559_s12 + $0x70] sm:$0xff] %v3044_v12 }
 0x22e   : > { %3052 = vst [vmem:[%s5559_s12 + $0x30] sm:$0xff] %v3036_v11  ;;  %3061 = vst [vmem:[%s5559_s12 + $0x78] sm:$0xff] %v3045_v14 }
 0x22f   : > { %3053 = vst [vmem:[%s5559_s12 + $0x38] sm:$0xff] %v3037_v13 }
 0x230   : > { %s5702_s28 = smov (!%p3071_p8, %s3070_s28), 8 }
 0x231   : > { %s3636_s7 = sshll.u32 %s5702_s28, 8 }
 0x232   : > { %p3624_p9 = scmp.eq.s32.totalorder %s3636_s7, 0 }
 0x233   : > { %s5599_s8 = sshrl.u32 (!%p3624_p9), %s5702_s28, 3 }
 0x234   : > { %3081 = sbr.rel (%p3624_p9) target bundleno = 609 (0x261), region = 40  ;;  %p3625_p10 = scmp.le.s32.totalorder (!%p3624_p9), %s5599_s8, 0 }
 0x23b   : > { %3206 = sbr.rel (%p3625_p10) target bundleno = 588 (0x24c), region = 88  ;;  %s5695_s15 = smov (!%p3625_p10), %s5593_s5 }
 0x23c   : > { %s5696_s20 = smov (!%p3625_p10), %s5559_s12  ;;  %s5608_s14 = smov (!%p3625_p10), 0  }
 0x23d   : > { %s5610_s9 = smov (!%p3625_p10), 0  }
 0x242 LB: >> { %v3094_v15 = vld [vmem:[%s4508_s20] sm:$0xff]  ;;  %v3096_v16 = vld [vmem:[%s4508_s20 + $0x10] sm:$0xff]  ;;  %s3126_s10 = sadd.s32 1, %s4512_s14  ;;  %v3110_v23 = vld [vmem:[%s4508_s20 + $0x8] sm:$0xff]  ;;  %s3088_s9 = sadd.s32 1, %s4516_s9   ;;  %s4516_s9 = sphi %s5610_s9, %s3088_s9   ;;  %s4512_s14 = sphi %s5608_s14, %s5697_s14   ;;  %s4508_s20 = sphi %s5696_s20, %s3131_s20   ;;  %s4504_s15 = sphi %s5695_s15, %s3132_s15  }
 0x243   : >> { %v3098_v17 = vld [vmem:[%s4508_s20 + $0x20] sm:$0xff]  ;;  %3095 = vst [vmem:[%s4504_s15] sm:$0xff] %v3094_v15  ;;  %3097 = vst [vmem:[%s4504_s15 + $0x10] sm:$0xff] %v3096_v16  ;;  %v3100_v18 = vld [vmem:[%s4508_s20 + $0x30] sm:$0xff]  ;;  %p3127_p11 = scmp.ge.s32.totalorder %s3126_s10, %s5599_s8  ;;  %p3087_p12 = scmp.ge.s32.totalorder %s3088_s9, %s5599_s8 }
 0x244   : >> { %3099 = vst [vmem:[%s4504_s15 + $0x20] sm:$0xff] %v3098_v17  ;;  %v3102_v19 = vld [vmem:[%s4508_s20 + $0x40] sm:$0xff]  ;;  %v3104_v20 = vld [vmem:[%s4508_s20 + $0x50] sm:$0xff]  ;;  %3101 = vst [vmem:[%s4504_s15 + $0x30] sm:$0xff] %v3100_v18 }
 0x245   : >> { %3103 = vst [vmem:[%s4504_s15 + $0x40] sm:$0xff] %v3102_v19  ;;  %3105 = vst [vmem:[%s4504_s15 + $0x50] sm:$0xff] %v3104_v20  ;;  %v3106_v21 = vld [vmem:[%s4508_s20 + $0x60] sm:$0xff]  ;;  %v3108_v22 = vld [vmem:[%s4508_s20 + $0x70] sm:$0xff]  ;;  %s5704_s10 = smov (%p3127_p11, %s3126_s10), 0  ;;  %3090 = sbr.rel (!%p3087_p12) target bundleno = 578 (0x242), region = 94 }
 0x246   : >> { %3107 = vst [vmem:[%s4504_s15 + $0x60] sm:$0xff] %v3106_v21  ;;  %3109 = vst [vmem:[%s4504_s15 + $0x70] sm:$0xff] %v3108_v22  ;;  %v3112_v24 = vld [vmem:[%s4508_s20 + $0x18] sm:$0xff]  ;;  %v3114_v25 = vld [vmem:[%s4508_s20 + $0x28] sm:$0xff]  ;;  %s3626_s11 = sshll.u32 %s5704_s10, 7  ;;  %s5697_s14 = smov %s5704_s10 }
 0x247   : >> { %3111 = vst [vmem:[%s4504_s15 + $0x8] sm:$0xff] %v3110_v23  ;;  %v3116_v26 = vld [vmem:[%s4508_s20 + $0x38] sm:$0xff]  ;;  %3113 = vst [vmem:[%s4504_s15 + $0x18] sm:$0xff] %v3112_v24  ;;  %v3118_v27 = vld [vmem:[%s4508_s20 + $0x48] sm:$0xff] }
 0x248   : >> { %3115 = vst [vmem:[%s4504_s15 + $0x28] sm:$0xff] %v3114_v25  ;;  %3117 = vst [vmem:[%s4504_s15 + $0x38] sm:$0xff] %v3116_v26  ;;  %v3120_v28 = vld [vmem:[%s4508_s20 + $0x58] sm:$0xff]  ;;  %v3122_v29 = vld [vmem:[%s4508_s20 + $0x68] sm:$0xff] }
 0x249   : >> { %3119 = vst [vmem:[%s4504_s15 + $0x48] sm:$0xff] %v3118_v27  ;;  %3121 = vst [vmem:[%s4504_s15 + $0x58] sm:$0xff] %v3120_v28  ;;  %v3124_v30 = vld [vmem:[%s4508_s20 + $0x78] sm:$0xff]  ;;  %s3131_s20 = scalar_lea.vmem %s5559_s12, %s3626_s11 [#allocation2]  }
 0x24a   : >> { %3123 = vst [vmem:[%s4504_s15 + $0x68] sm:$0xff] %v3122_v29  ;;  %3125 = vst [vmem:[%s4504_s15 + $0x78] sm:$0xff] %v3124_v30  ;;  %s3132_s15 = scalar_lea.vmem %s5593_s5, %s3626_s11  }
 0x24c PF: > { %s5668_s17 = sand.u32 7, %s5702_s28   ;;  %s3639_s18 = sshll.u32 %s5599_s8, 7 }
 0x24d   : > { %s5672_s21 = scalar_lea.vmem %s5559_s12, %s3639_s18 [#allocation2]   ;;  %s3139_s22 = scalar_lea.vmem %s5593_s5, %s3639_s18  }
 0x24e   : > { %p3631_p13 = scmp.le.s32.totalorder %s5668_s17, 0 }
 0x24f   : > { %s4518_s23 = smov (!%p3631_p13), %s3139_s22   ;;  %s4522_s24 = smov (!%p3631_p13), %s5672_s21  }
 0x250   : > { %3220 = sbr.rel (%p3631_p13) target bundleno = 609 (0x261), region = 99  ;;  %s4526_s25 = smov (!%p3631_p13), 0  }
 0x251   : > { %s4530_s26 = smov (!%p3631_p13), 0  }
 0x257 LB: >> { %v3149_v31 = vld [vmem:[%s4524_s24] sm:$0xff]  ;;  %v3151_v32 = vld [vmem:[%s4524_s24 + $0x8] sm:$0xff]  ;;  %s3153_s6 = sadd.s32 1, %s4528_s25  ;;  %s3143_s26 = sadd.s32 1, %s4532_s26   ;;  %s4532_s26 = sphi %s4530_s26, %s3143_s26   ;;  %s4528_s25 = sphi %s4526_s25, %s4527_s25   ;;  %s4524_s24 = sphi %s4522_s24, %s3158_s24   ;;  %s4520_s23 = sphi %s4518_s23, %s3159_s23  }
 0x258   : >> { %3150 = vst [vmem:[%s4520_s23] sm:$0xff] %v3149_v31  ;;  %3152 = vst [vmem:[%s4520_s23 + $0x8] sm:$0xff] %v3151_v32  ;;  %p3154_p0 = scmp.ge.s32.totalorder %s3153_s6, %s5668_s17  ;;  %p3142_p1 = scmp.ge.s32.totalorder %s3143_s26, %s5668_s17 }
 0x25a   : >> { %s5706_s6 = smov (%p3154_p0, %s3153_s6), 0  ;;  %3145 = sbr.rel (!%p3142_p1) target bundleno = 599 (0x257), region = 105 }
 0x25b   : >> { %s3632_s27 = sshll.u32 %s5706_s6, 4  ;;  %s4527_s25 = smov %s5706_s6  }
 0x25c   : >> { %s3158_s24 = scalar_lea.vmem %s5672_s21, %s3632_s27 [#allocation2]   ;;  %s3159_s23 = scalar_lea.vmem %s3139_s22, %s3632_s27  }
 0x261 PF: > { %p10_p2 = scmp.ge.s32.totalorder %s4569_s16, 4   ;;  %s5698_s12 = smov %s4496_s13 }
 0x262   : > { %s5699_s13 = smov %s4577_s19  ;;  %s5700_s14 = smov %s4569_s16 }
 0x263   :  { %12 = sbr.rel (!%p10_p2) target bundleno = 2 (0x2), region = 116 }

// kernel: pdn_s_forward.11
= control target key start
LH: loop header
LB: loop body
LE: loop exit
PB: predicated region body
PF: predicated region fallthrough
CT: control target
= control target key end

     0   :  { %s9208_s12 = smov 0   ;;  %s11876_s0 = inlined_call_operand.vmem [shape: bf16[32,4096], index: 0, kind: input, shape index: {}]   ;;  %s11877_s1 = inlined_call_operand.vmem [shape: bf16[4096,384], index: 1, kind: input, shape index: {}]   ;;  %s11878_s2 = inlined_call_operand.vmem [shape: f32[1,384], index: 2, kind: input, shape index: {}]   ;;  %s11879_s3 = inlined_call_operand.vmem [shape: f32[32,384], index: 3, kind: output, shape index: {}]  }
   0x1 LB: > { %s6917_s13 = sadd.s32 4294967295, %s9186_s12   ;;  %p6921_p0 = scmp.ge.s32.totalorder %s9186_s12, 1  ;;  %s9186_s12 = sphi %s9208_s12, %s13_s12  }
   0x2   : > { %p139_p1 = scmp.lt.s32.totalorder %s9186_s12, 3 }
   0x4   : > { %p140_p2 = pnand %p6921_p0, %p139_p1 }
   0x5   : > { %v8155_v0 = vld [vmem:[%s11877_s1 + $0x4] ss:$12 sps:$4 sm:$0xff] (!%p140_p2)   ;;  %v8159_v2 = vld [vmem:[%s11877_s1] ss:$12 sps:$4 sm:$0xff] (!%p140_p2)   ;;  %v8161_v4 = vld [vmem:[%s11877_s1 + $0x1c] ss:$12 sps:$4 sm:$0xff] (!%p140_p2)  }
   0x6   : > { %143 = sbr.rel (%p140_p2) target bundleno = 994 (0x3e2), region = 32  ;;  %v8157_v1 = vld [vmem:[%s11877_s1 + $0x604] ss:$12 sps:$4 sm:$0xff] (!%p140_p2)   ;;  %5509 = vmatprep.subr.bf16.mxu1 (!%p140_p2), %v8155_v0  ;;  %v8160_v3 = vld [vmem:[%s11877_s1 + $0x600] ss:$12 sps:$4 sm:$0xff] (!%p140_p2)   ;;  %s6922_s24 = sshll.u32 (!%p140_p2), %s6917_s13, 1 }
   0x7   : > { %5681 = vmatprep.subr.bf16.mxu0 (!%p140_p2), %v8157_v1  ;;  %5510 = vmatpush1.bf16.msra.mxu1 (!%p140_p2), %v8159_v2  ;;  %v8163_v5 = vld [vmem:[%s11877_s1 + $0x61c] ss:$12 sps:$4 sm:$0xff] (!%p140_p2)   ;;  %v8165_v6 = vld [vmem:[%s11877_s1 + $0x18] ss:$12 sps:$4 sm:$0xff] (!%p140_p2)   ;;  %v8167_v8 = vld [vmem:[%s11877_s1 + $0x34] ss:$12 sps:$4 sm:$0xff] (!%p140_p2)  }
   0x8   : > { %5682 = vmatpush1.bf16.msra.mxu0 (!%p140_p2), %v8160_v3  ;;  %5511 = vmatprep.subr.bf16.mxu1 (!%p140_p2), %v8161_v4  ;;  %v8166_v7 = vld [vmem:[%s11877_s1 + $0x618] ss:$12 sps:$4 sm:$0xff] (!%p140_p2)   ;;  %v8169_v9 = vld [vmem:[%s11877_s1 + $0x634] ss:$12 sps:$4 sm:$0xff] (!%p140_p2)   ;;  %v8171_v10 = vld [vmem:[%s11877_s1 + $0x30] ss:$12 sps:$4 sm:$0xff] (!%p140_p2)  }
   0x9   : > { %5683 = vmatprep.subr.bf16.mxu0 (!%p140_p2), %v8163_v5  ;;  %v8172_v11 = vld [vmem:[%s11877_s1 + $0x630] ss:$12 sps:$4 sm:$0xff] (!%p140_p2)   ;;  %v8173_v12 = vld [vmem:[%s11877_s1 + $0x4c] ss:$12 sps:$4 sm:$0xff] (!%p140_p2)   ;;  %v8177_v14 = vld [vmem:[%s11877_s1 + $0x48] ss:$12 sps:$4 sm:$0xff] (!%p140_p2)  }
   0xa   : > { %v8175_v13 = vld [vmem:[%s11877_s1 + $0x64c] ss:$12 sps:$4 sm:$0xff] (!%p140_p2)   ;;  %v8178_v15 = vld [vmem:[%s11877_s1 + $0x648] ss:$12 sps:$4 sm:$0xff] (!%p140_p2)   ;;  %v8179_v16 = vld [vmem:[%s11877_s1 + $0x64] ss:$12 sps:$4 sm:$0xff] (!%p140_p2)  }
   0xb   : > { %5512 = vmatpush1.bf16.msra.mxu1 (!%p140_p2), %v8165_v6  ;;  %v8181_v17 = vld [vmem:[%s11877_s1 + $0x664] ss:$12 sps:$4 sm:$0xff] (!%p140_p2)   ;;  %v8183_v18 = vld [vmem:[%s11877_s1 + $0x60] ss:$12 sps:$4 sm:$0xff] (!%p140_p2)   ;;  %v8185_v20 = vld [vmem:[%s11877_s1 + $0x7c] ss:$12 sps:$4 sm:$0xff] (!%p140_p2)  }
   0xc   : > { %5684 = vmatpush1.bf16.msra.mxu0 (!%p140_p2), %v8166_v7  ;;  %5513 = vmatprep.subr.bf16.mxu1 (!%p140_p2), %v8167_v8  ;;  %v8184_v19 = vld [vmem:[%s11877_s1 + $0x660] ss:$12 sps:$4 sm:$0xff] (!%p140_p2)   ;;  %v8187_v21 = vld [vmem:[%s11877_s1 + $0x67c] ss:$12 sps:$4 sm:$0xff] (!%p140_p2)   ;;  %v8189_v22 = vld [vmem:[%s11877_s1 + $0x78] ss:$12 sps:$4 sm:$0xff] (!%p140_p2)  }
   0xd   : > { %5685 = vmatprep.subr.bf16.mxu0 %v8169_v9  ;;  %v8190_v23 = vld [vmem:[%s11877_s1 + $0x678] ss:$12 sps:$4 sm:$0xff]   ;;  %v8191_v24 = vld [vmem:[%s11877_s1 + $0x94] ss:$12 sps:$4 sm:$0xff]   ;;  %v8195_v26 = vld [vmem:[%s11877_s1 + $0x90] ss:$12 sps:$4 sm:$0xff]  }
   0xe   : > { %v8193_v25 = vld [vmem:[%s11877_s1 + $0x694] ss:$12 sps:$4 sm:$0xff]   ;;  %v8196_v27 = vld [vmem:[%s11877_s1 + $0x690] ss:$12 sps:$4 sm:$0xff]   ;;  %v8197_v28 = vld [vmem:[%s11877_s1 + $0xac] ss:$12 sps:$4 sm:$0xff]  }
   0xf   : > { %5514 = vmatpush1.bf16.msra.mxu1 %v8171_v10  ;;  %v8199_v29 = vld [vmem:[%s11877_s1 + $0x6ac] ss:$12 sps:$4 sm:$0xff]   ;;  %v8201_v30 = vld [vmem:[%s11877_s1 + $0xa8] ss:$12 sps:$4 sm:$0xff]   ;;  %v8203_v32 = vld [vmem:[%s11877_s1 + $0xc4] ss:$12 sps:$4 sm:$0xff]  }
  0x10   : > { %5686 = vmatpush1.bf16.msra.mxu0 %v8172_v11  ;;  %5515 = vmatprep.subr.bf16.mxu1 %v8173_v12  ;;  %v8202_v31 = vld [vmem:[%s11877_s1 + $0x6a8] ss:$12 sps:$4 sm:$0xff]   ;;  %p166_p3 = scmp.lt.s32.totalorder %s6922_s24, 3  ;;  %v8205_v33 = vld [vmem:[%s11877_s1 + $0x6c4] ss:$12 sps:$4 sm:$0xff]  }
  0x11   : > { %5687 = vmatprep.subr.bf16.mxu0 %v8175_v13  ;;  %v8207_v34 = vld [vmem:[%s11877_s1 + $0xc0] ss:$12 sps:$4 sm:$0xff]   ;;  %v8209_v36 = vld [vmem:[%s11877_s1 + $0xdc] ss:$12 sps:$4 sm:$0xff]   ;;  %v8213_v38 = vld [vmem:[%s11877_s1 + $0xd8] ss:$12 sps:$4 sm:$0xff]  }
  0x12   : > { %v8208_v35 = vld [vmem:[%s11877_s1 + $0x6c0] ss:$12 sps:$4 sm:$0xff]   ;;  %s11881_s24 = smov (!%p166_p3, %s6922_s24), 3  ;;  %v8211_v37 = vld [vmem:[%s11877_s1 + $0x6dc] ss:$12 sps:$4 sm:$0xff]  }
  0x13   : > { %5516 = vmatpush1.bf16.msra.mxu1 %v8177_v14  ;;  %v8214_v39 = vld [vmem:[%s11877_s1 + $0x6d8] ss:$12 sps:$4 sm:$0xff]   ;;  %v8215_v40 = vld [vmem:[%s11877_s1 + $0xf4] ss:$12 sps:$4 sm:$0xff]   ;;  %s7729_s21 = sshll.u32 %s11881_s24, 7  ;;  %s8146_s11 = smul.u32 24, %s11881_s24 }
  0x14   : > { %5688 = vmatpush1.bf16.msra.mxu0 %v8178_v15  ;;  %5517 = vmatprep.subr.bf16.mxu1 %v8179_v16  ;;  %v8217_v41 = vld [vmem:[%s11877_s1 + $0x6f4] ss:$12 sps:$4 sm:$0xff]   ;;  %v8219_v42 = vld [vmem:[%s11877_s1 + $0xf0] ss:$12 sps:$4 sm:$0xff]   ;;  %s9356_s4 = scalar_lea.vmem %s11876_s0, %s7729_s21  ;;  %v8221_v44 = vld [vmem:[%s11877_s1 + $0x10c] ss:$12 sps:$4 sm:$0xff]  }
  0x15   : > { %5689 = vmatprep.subr.bf16.mxu0 %v8181_v17  ;;  %v8220_v43 = vld [vmem:[%s11877_s1 + $0x6f0] ss:$12 sps:$4 sm:$0xff]   ;;  %v8223_v45 = vld [vmem:[%s11877_s1 + $0x70c] ss:$12 sps:$4 sm:$0xff]   ;;  %v8225_v46 = vld [vmem:[%s11877_s1 + $0x108] ss:$12 sps:$4 sm:$0xff]   ;;  %s177_s16 = scalar_lea.vmem %s11879_s3, %s8146_s11 }
  0x16   : > { %v8226_v47 = vld [vmem:[%s11877_s1 + $0x708] ss:$12 sps:$4 sm:$0xff]   ;;  %v180_v48 = vld [vmem:[%s9356_s4] sm:$0xff]  ;;  %v8243_v0 = vld [vmem:[%s11877_s1 + $0x150] ss:$12 sps:$4 sm:$0xff]  }
  0x17   : > { %5518 = vmatpush1.bf16.msra.mxu1 %v8183_v18  ;;  %v196_v49 = vld [vmem:[%s9356_s4 + $0x80] sm:$0xff]  ;;  %v8233_v58 = vld [vmem:[%s11877_s1 + $0x13c] ss:$12 sps:$4 sm:$0xff]   ;;  %v8245_v2 = vld [vmem:[%s11877_s1 + $0x16c] ss:$12 sps:$4 sm:$0xff]  }
  0x18   : > { %5690 = vmatpush1.bf16.msra.mxu0 %v8184_v19  ;;  %5519 = vmatprep.subr.bf16.mxu1 %v8185_v20  ;;  %v8227_v50 = vld [vmem:[%s11877_s1 + $0x124] ss:$12 sps:$4 sm:$0xff]   ;;  %v9378_v52 = vcombine.high %v180_v48, %v196_v49  ;;  %v8231_v56 = vld [vmem:[%s11877_s1 + $0x120] ss:$12 sps:$4 sm:$0xff]   ;;  %v8235_v59 = vld [vmem:[%s11877_s1 + $0x73c] ss:$12 sps:$4 sm:$0xff]   ;;  %v9434_v8 = vcombine.low %v180_v48, %v196_v49 }
  0x19   : > { %5691 = vmatprep.subr.bf16.mxu0 %v8187_v21  ;;  %v8229_v51 = vld [vmem:[%s11877_s1 + $0x724] ss:$12 sps:$4 sm:$0xff]   ;;  %v8232_v57 = vld [vmem:[%s11877_s1 + $0x720] ss:$12 sps:$4 sm:$0xff]   ;;  %v8249_v4 = vld [vmem:[%s11877_s1 + $0x168] ss:$12 sps:$4 sm:$0xff]  }
  0x1a   : > { %v184_v53 = vld [vmem:[%s9356_s4 + $0x20] sm:$0xff]  ;;  %5541 = vmatprep.mubr.bf16.mxu1 %v9378_v52  ;;  %v8244_v1 = vld [vmem:[%s11877_s1 + $0x750] ss:$12 sps:$4 sm:$0xff]   ;;  %v8247_v3 = vld [vmem:[%s11877_s1 + $0x76c] ss:$12 sps:$4 sm:$0xff]  }
  0x1b   : > { %5520 = vmatpush1.bf16.msra.mxu1 %v8189_v22  ;;  %v200_v54 = vld [vmem:[%s9356_s4 + $0xa0] sm:$0xff]  ;;  %v8250_v5 = vld [vmem:[%s11877_s1 + $0x768] ss:$12 sps:$4 sm:$0xff]   ;;  %v8263_v18 = vld [vmem:[%s11877_s1 + $0x1b0] ss:$12 sps:$4 sm:$0xff]  }
  0x1c   : > { %5692 = vmatpush1.bf16.msra.mxu0 %v8190_v23  ;;  %5521 = vmatprep.subr.bf16.mxu1 %v8191_v24  ;;  %v9383_v55 = vcombine.high %v184_v53, %v200_v54  ;;  %v8237_v60 = vld [vmem:[%s11877_s1 + $0x138] ss:$12 sps:$4 sm:$0xff]   ;;  %v8239_v62 = vld [vmem:[%s11877_s1 + $0x154] ss:$12 sps:$4 sm:$0xff]   ;;  %v9439_v10 = vcombine.low %v184_v53, %v200_v54  ;;  %v8259_v12 = vld [vmem:[%s11877_s1 + $0x19c] ss:$12 sps:$4 sm:$0xff]  }
  0x1d   : > { %5693 = vmatprep.subr.bf16.mxu0 %v8193_v25  ;;  %v8238_v61 = vld [vmem:[%s11877_s1 + $0x738] ss:$12 sps:$4 sm:$0xff]   ;;  %v8241_v63 = vld [vmem:[%s11877_s1 + $0x754] ss:$12 sps:$4 sm:$0xff]   ;;  %v8262_v13 = vld [vmem:[%s11877_s1 + $0x79c] ss:$12 sps:$4 sm:$0xff]  }
  0x1e   : > { %5713 = vmatprep.mubr.bf16.mxu0 %v9383_v55  ;;  %v8253_v6 = vld [vmem:[%s11877_s1 + $0x184] ss:$12 sps:$4 sm:$0xff]   ;;  %v8251_v9 = vld [vmem:[%s11877_s1 + $0x180] ss:$12 sps:$4 sm:$0xff]   ;;  %v8269_v22 = vld [vmem:[%s11877_s1 + $0x1c8] ss:$12 sps:$4 sm:$0xff]  }
  0x1f   : > { %5522 = vmatpush1.bf16.msra.mxu1 %v8195_v26  ;;  %v8256_v7 = vld [vmem:[%s11877_s1 + $0x784] ss:$12 sps:$4 sm:$0xff]   ;;  %v8254_v11 = vld [vmem:[%s11877_s1 + $0x780] ss:$12 sps:$4 sm:$0xff]   ;;  %v8272_v23 = vld [vmem:[%s11877_s1 + $0x7c8] ss:$12 sps:$4 sm:$0xff]  }
  0x20   : > { %5694 = vmatpush1.bf16.msra.mxu0 %v8196_v27  ;;  %5523 = vmatprep.subr.bf16.mxu1 %v8197_v28  ;;  %v8257_v14 = vld [vmem:[%s11877_s1 + $0x198] ss:$12 sps:$4 sm:$0xff]   ;;  %v8265_v16 = vld [vmem:[%s11877_s1 + $0x1b4] ss:$12 sps:$4 sm:$0xff]   ;;  %v8266_v19 = vld [vmem:[%s11877_s1 + $0x7b0] ss:$12 sps:$4 sm:$0xff]  }
  0x21   : > { %5695 = vmatprep.subr.bf16.mxu0 %v8199_v29  ;;  %v8260_v15 = vld [vmem:[%s11877_s1 + $0x798] ss:$12 sps:$4 sm:$0xff]   ;;  %v8268_v17 = vld [vmem:[%s11877_s1 + $0x7b4] ss:$12 sps:$4 sm:$0xff]   ;;  %v8283_v28 = vld [vmem:[%s11877_s1 + $0x1fc] ss:$12 sps:$4 sm:$0xff]  }
  0x22   : > { %v8271_v20 = vld [vmem:[%s11877_s1 + $0x1cc] ss:$12 sps:$4 sm:$0xff]   ;;  %v8277_v24 = vld [vmem:[%s11877_s1 + $0x1e4] ss:$12 sps:$4 sm:$0xff]   ;;  %v8286_v29 = vld [vmem:[%s11877_s1 + $0x7fc] ss:$12 sps:$4 sm:$0xff]  }
  0x23   : > { %5524 = vmatpush1.bf16.msra.mxu1 %v8201_v30  ;;  %v8274_v21 = vld [vmem:[%s11877_s1 + $0x7cc] ss:$12 sps:$4 sm:$0xff]   ;;  %v8280_v25 = vld [vmem:[%s11877_s1 + $0x7e4] ss:$12 sps:$4 sm:$0xff]  }
  0x24   : > { %5696 = vmatpush1.bf16.msra.mxu0 %v8202_v31  ;;  %5525 = vmatprep.subr.bf16.mxu1 %v8203_v32  ;;  %v8275_v26 = vld [vmem:[%s11877_s1 + $0x1e0] ss:$12 sps:$4 sm:$0xff]   ;;  %v8281_v30 = vld [vmem:[%s11877_s1 + $0x1f8] ss:$12 sps:$4 sm:$0xff]  }
  0x25   : > { %5697 = vmatprep.subr.bf16.mxu0 %v8205_v33  ;;  %v8278_v27 = vld [vmem:[%s11877_s1 + $0x7e0] ss:$12 sps:$4 sm:$0xff]   ;;  %v8284_v31 = vld [vmem:[%s11877_s1 + $0x7f8] ss:$12 sps:$4 sm:$0xff]  }
  0x26   : > { %v8289_v32 = vld [vmem:[%s11877_s1 + $0x214] ss:$12 sps:$4 sm:$0xff]   ;;  %v8305_v53 = vld [vmem:[%s11877_s1 + $0x258] ss:$12 sps:$4 sm:$0xff]  }
  0x27   : > { %5526 = vmatpush1.bf16.msra.mxu1 %v8207_v34  ;;  %v8292_v33 = vld [vmem:[%s11877_s1 + $0x814] ss:$12 sps:$4 sm:$0xff]   ;;  %v8287_v34 = vld [vmem:[%s11877_s1 + $0x210] ss:$12 sps:$4 sm:$0xff]   ;;  %v8308_v54 = vld [vmem:[%s11877_s1 + $0x858] ss:$12 sps:$4 sm:$0xff]  }
  0x28   : > { %5698 = vmatpush1.bf16.msra.mxu0 %v8208_v35  ;;  %5527 = vmatprep.subr.bf16.mxu1 %v8209_v36  ;;  %v8290_v35 = vld [vmem:[%s11877_s1 + $0x810] ss:$12 sps:$4 sm:$0xff]   ;;  %v9519_v36 = vld [vmem:[%s9356_s4 + $0x8] sm:$0xff] }
  0x29   : > { %5699 = vmatprep.subr.bf16.mxu0 %v8211_v37  ;;  %v9522_v37 = vld [vmem:[%s9356_s4 + $0x88] sm:$0xff] }
  0x2a   : > { %v8299_v48 = vld [vmem:[%s11877_s1 + $0x240] ss:$12 sps:$4 sm:$0xff]  }
  0x2b   : > { %5528 = vmatpush1.bf16.msra.mxu1 %v8213_v38  ;;  %v8295_v38 = vld [vmem:[%s11877_s1 + $0x22c] ss:$12 sps:$4 sm:$0xff]  }
  0x2c   : > { %5700 = vmatpush1.bf16.msra.mxu0 %v8214_v39  ;;  %5529 = vmatprep.subr.bf16.mxu1 %v8215_v40  ;;  %v8298_v39 = vld [vmem:[%s11877_s1 + $0x82c] ss:$12 sps:$4 sm:$0xff]   ;;  %v9532_v40 = vcombine.high %v9519_v36, %v9522_v37 }
  0x2d   : > { %5701 = vmatprep.subr.bf16.mxu0 %v8217_v41  ;;  %v9535_v41 = vld [vmem:[%s9356_s4 + $0x28] sm:$0xff] }
  0x2e   : > { %v8302_v49 = vld [vmem:[%s11877_s1 + $0x840] ss:$12 sps:$4 sm:$0xff]  }
  0x2f   : > { %5530 = vmatpush1.bf16.msra.mxu1 %v8219_v42  ;;  %v9538_v42 = vld [vmem:[%s9356_s4 + $0xa8] sm:$0xff] }
  0x30   : > { %5702 = vmatpush1.bf16.msra.mxu0 %v8220_v43  ;;  %5531 = vmatprep.subr.bf16.mxu1 %v8221_v44  ;;  %v9543_v43 = vcombine.high %v9535_v41, %v9538_v42  ;;  %v8293_v44 = vld [vmem:[%s11877_s1 + $0x228] ss:$12 sps:$4 sm:$0xff]  }
  0x31   : > { %5703 = vmatprep.subr.bf16.mxu0 %v8223_v45  ;;  %v8296_v45 = vld [vmem:[%s11877_s1 + $0x828] ss:$12 sps:$4 sm:$0xff]  }
  0x33   : > { %5532 = vmatpush1.bf16.msra.mxu1 %v8225_v46  ;;  %v8301_v46 = vld [vmem:[%s11877_s1 + $0x244] ss:$12 sps:$4 sm:$0xff]  }
  0x34   : > { %5704 = vmatpush1.bf16.msra.mxu0 %v8226_v47  ;;  %5533 = vmatprep.subr.bf16.mxu1 %v8227_v50  ;;  %v8304_v47 = vld [vmem:[%s11877_s1 + $0x844] ss:$12 sps:$4 sm:$0xff]   ;;  %v8307_v50 = vld [vmem:[%s11877_s1 + $0x25c] ss:$12 sps:$4 sm:$0xff]  }
  0x35   : > { %5705 = vmatprep.subr.bf16.mxu0 %v8229_v51  ;;  %v8310_v51 = vld [vmem:[%s11877_s1 + $0x85c] ss:$12 sps:$4 sm:$0xff]  }
  0x37   : > { %5534 = vmatpush1.bf16.msra.mxu1 %v8231_v56  ;;  %v8313_v56 = vld [vmem:[%s11877_s1 + $0x274] ss:$12 sps:$4 sm:$0xff]  }
  0x38   : > { %5706 = vmatpush1.bf16.msra.mxu0 %v8232_v57  ;;  %5535 = vmatprep.subr.bf16.mxu1 %v8233_v58  ;;  %v8316_v57 = vld [vmem:[%s11877_s1 + $0x874] ss:$12 sps:$4 sm:$0xff]   ;;  %v8311_v58 = vld [vmem:[%s11877_s1 + $0x270] ss:$12 sps:$4 sm:$0xff]  }
  0x39   : > { %5707 = vmatprep.subr.bf16.mxu0 %v8235_v59  ;;  %v8314_v59 = vld [vmem:[%s11877_s1 + $0x870] ss:$12 sps:$4 sm:$0xff]  }
  0x3b   : > { %5536 = vmatpush1.bf16.msra.mxu1 %v8237_v60  ;;  %v8319_v60 = vld [vmem:[%s11877_s1 + $0x28c] ss:$12 sps:$4 sm:$0xff]  }
  0x3c   : > { %5708 = vmatpush1.bf16.msra.mxu0 %v8238_v61  ;;  %5537 = vmatprep.subr.bf16.mxu1 %v8239_v62  ;;  %v8322_v61 = vld [vmem:[%s11877_s1 + $0x88c] ss:$12 sps:$4 sm:$0xff]   ;;  %v8317_v62 = vld [vmem:[%s11877_s1 + $0x288] ss:$12 sps:$4 sm:$0xff]  }
  0x3d   : > { %5709 = vmatprep.subr.bf16.mxu0 %v8241_v63  ;;  %v8320_v63 = vld [vmem:[%s11877_s1 + $0x888] ss:$12 sps:$4 sm:$0xff]  }
  0x3f   : > { %5538 = vmatpush1.bf16.msra.mxu1 %v8243_v0  ;;  %v8325_v0 = vld [vmem:[%s11877_s1 + $0x2a4] ss:$12 sps:$4 sm:$0xff]  }
  0x40   : > { %5710 = vmatpush1.bf16.msra.mxu0 %v8244_v1  ;;  %5539 = vmatprep.subr.bf16.mxu1 %v8245_v2  ;;  %v8328_v1 = vld [vmem:[%s11877_s1 + $0x8a4] ss:$12 sps:$4 sm:$0xff]   ;;  %v8323_v2 = vld [vmem:[%s11877_s1 + $0x2a0] ss:$12 sps:$4 sm:$0xff]  }
  0x41   : > { %5711 = vmatprep.subr.bf16.mxu0 %v8247_v3  ;;  %v8326_v3 = vld [vmem:[%s11877_s1 + $0x8a0] ss:$12 sps:$4 sm:$0xff]  }
  0x43   : > { %5540 = vmatpush1.bf16.msra.mxu1 %v8249_v4  ;;  %v8331_v4 = vld [vmem:[%s11877_s1 + $0x2bc] ss:$12 sps:$4 sm:$0xff]  }
  0x44   : > { %5712 = vmatpush1.bf16.msra.mxu0 %v8250_v5  ;;  %5552 = vmatprep.subr.bf16.mxu1 %v8253_v6  ;;  %v8334_v5 = vld [vmem:[%s11877_s1 + $0x8bc] ss:$12 sps:$4 sm:$0xff]   ;;  %v8329_v6 = vld [vmem:[%s11877_s1 + $0x2b8] ss:$12 sps:$4 sm:$0xff]  }
  0x45   : > { %5724 = vmatprep.subr.bf16.mxu0 %v8256_v7  ;;  %v8332_v7 = vld [vmem:[%s11877_s1 + $0x8b8] ss:$12 sps:$4 sm:$0xff]  }
  0x46   : > { %5542 = vmatmul.mubr.bf16.vlgmr.msra.gmra.mrb[0].mxu1 %v9434_v8 }
  0x47   : > { %5714 = vmatmul.mubr.bf16.vlgmr.msra.gmra.mrb[0].mxu0 %v9439_v10  ;;  %5553 = vmatpush1.bf16.msra.mxu1 %v8251_v9  ;;  %v8337_v9 = vld [vmem:[%s11877_s1 + $0x2d4] ss:$12 sps:$4 sm:$0xff]  }
  0x48   : > { %5725 = vmatpush1.bf16.msra.mxu0 %v8254_v11  ;;  %5554 = vmatprep.subr.bf16.mxu1 %v8259_v12  ;;  %v8340_v11 = vld [vmem:[%s11877_s1 + $0x8d4] ss:$12 sps:$4 sm:$0xff]   ;;  %v8335_v12 = vld [vmem:[%s11877_s1 + $0x2d0] ss:$12 sps:$4 sm:$0xff]  }
  0x49   : > { %5726 = vmatprep.subr.bf16.mxu0 %v8262_v13  ;;  %5584 = vmatprep.mubr.bf16.mxu1 %v9532_v40  ;;  %v8338_v13 = vld [vmem:[%s11877_s1 + $0x8d0] ss:$12 sps:$4 sm:$0xff]  }
  0x4a   : > { %5756 = vmatprep.mubr.bf16.mxu0 %v9543_v43 }
  0x4b   : > { %5555 = vmatpush1.bf16.msra.mxu1 %v8257_v14  ;;  %v8343_v14 = vld [vmem:[%s11877_s1 + $0x2ec] ss:$12 sps:$4 sm:$0xff]  }
  0x4c   : > { %5727 = vmatpush1.bf16.msra.mxu0 %v8260_v15  ;;  %5556 = vmatprep.subr.bf16.mxu1 %v8265_v16  ;;  %v8346_v15 = vld [vmem:[%s11877_s1 + $0x8ec] ss:$12 sps:$4 sm:$0xff]   ;;  %v8341_v16 = vld [vmem:[%s11877_s1 + $0x2e8] ss:$12 sps:$4 sm:$0xff]  }
  0x4d   : > { %5728 = vmatprep.subr.bf16.mxu0 %v8268_v17  ;;  %v8344_v17 = vld [vmem:[%s11877_s1 + $0x8e8] ss:$12 sps:$4 sm:$0xff]  }
  0x4f   : > { %5557 = vmatpush1.bf16.msra.mxu1 %v8263_v18  ;;  %v8349_v18 = vld [vmem:[%s11877_s1 + $0x304] ss:$12 sps:$4 sm:$0xff]  }
  0x50   : > { %5729 = vmatpush1.bf16.msra.mxu0 %v8266_v19  ;;  %5558 = vmatprep.subr.bf16.mxu1 %v8271_v20  ;;  %v8352_v19 = vld [vmem:[%s11877_s1 + $0x904] ss:$12 sps:$4 sm:$0xff]   ;;  %v9656_v20 = vcombine.low %v9519_v36, %v9522_v37 }
  0x51   : > { %5730 = vmatprep.subr.bf16.mxu0 %v8274_v21  ;;  %v8347_v21 = vld [vmem:[%s11877_s1 + $0x300] ss:$12 sps:$4 sm:$0xff]   ;;  %v8359_v36 = vld [vmem:[%s11877_s1 + $0x330] ss:$12 sps:$4 sm:$0xff]  }
  0x52   : > { %v8362_v37 = vld [vmem:[%s11877_s1 + $0x930] ss:$12 sps:$4 sm:$0xff]  }
  0x53   : > { %5559 = vmatpush1.bf16.msra.mxu1 %v8269_v22  ;;  %v9663_v22 = vcombine.low %v9535_v41, %v9538_v42  ;;  %v8365_v41 = vld [vmem:[%s11877_s1 + $0x348] ss:$12 sps:$4 sm:$0xff]  }
  0x54   : > { %5731 = vmatpush1.bf16.msra.mxu0 %v8272_v23  ;;  %5560 = vmatprep.subr.bf16.mxu1 %v8277_v24  ;;  %v8350_v23 = vld [vmem:[%s11877_s1 + $0x900] ss:$12 sps:$4 sm:$0xff]   ;;  %v8355_v24 = vld [vmem:[%s11877_s1 + $0x31c] ss:$12 sps:$4 sm:$0xff]  }
  0x55   : > { %5732 = vmatprep.subr.bf16.mxu0 %v8280_v25  ;;  %v8358_v25 = vld [vmem:[%s11877_s1 + $0x91c] ss:$12 sps:$4 sm:$0xff]  }
  0x56   : > { %v8368_v42 = vld [vmem:[%s11877_s1 + $0x948] ss:$12 sps:$4 sm:$0xff]  }
  0x57   : > { %5561 = vmatpush1.bf16.msra.mxu1 %v8275_v26  ;;  %v8353_v26 = vld [vmem:[%s11877_s1 + $0x318] ss:$12 sps:$4 sm:$0xff]  }
  0x58   : > { %5733 = vmatpush1.bf16.msra.mxu0 %v8278_v27  ;;  %5562 = vmatprep.subr.bf16.mxu1 %v8283_v28  ;;  %v8356_v27 = vld [vmem:[%s11877_s1 + $0x918] ss:$12 sps:$4 sm:$0xff]   ;;  %v9681_v28 = vld [vmem:[%s9356_s4 + $0x10] sm:$0xff] }
  0x59   : > { %5734 = vmatprep.subr.bf16.mxu0 %v8286_v29  ;;  %v9686_v29 = vld [vmem:[%s9356_s4 + $0x90] sm:$0xff] }
  0x5b   : > { %5563 = vmatpush1.bf16.msra.mxu1 %v8281_v30  ;;  %v8361_v30 = vld [vmem:[%s11877_s1 + $0x334] ss:$12 sps:$4 sm:$0xff]  }
  0x5c   : > { %5735 = vmatpush1.bf16.msra.mxu0 %v8284_v31  ;;  %5564 = vmatprep.subr.bf16.mxu1 %v8289_v32  ;;  %v8364_v31 = vld [vmem:[%s11877_s1 + $0x934] ss:$12 sps:$4 sm:$0xff]   ;;  %v9696_v32 = vcombine.high %v9681_v28, %v9686_v29 }
  0x5d   : > { %5736 = vmatprep.subr.bf16.mxu0 %v8292_v33  ;;  %v9699_v33 = vld [vmem:[%s9356_s4 + $0x30] sm:$0xff] }
  0x5f   : > { %5565 = vmatpush1.bf16.msra.mxu1 %v8287_v34  ;;  %v9702_v34 = vld [vmem:[%s9356_s4 + $0xb0] sm:$0xff] }
  0x60   : > { %5737 = vmatpush1.bf16.msra.mxu0 %v8290_v35  ;;  %5566 = vmatprep.subr.bf16.mxu1 %v8295_v38  ;;  %v9707_v35 = vcombine.high %v9699_v33, %v9702_v34  ;;  %v8367_v38 = vld [vmem:[%s11877_s1 + $0x34c] ss:$12 sps:$4 sm:$0xff]  }
  0x61   : > { %5738 = vmatprep.subr.bf16.mxu0 %v8298_v39  ;;  %v8370_v39 = vld [vmem:[%s11877_s1 + $0x94c] ss:$12 sps:$4 sm:$0xff]  }
  0x63   : > { %5567 = vmatpush1.bf16.msra.mxu1 %v8293_v44  ;;  %v8373_v44 = vld [vmem:[%s11877_s1 + $0x364] ss:$12 sps:$4 sm:$0xff]  }
  0x64   : > { %5739 = vmatpush1.bf16.msra.mxu0 %v8296_v45  ;;  %5568 = vmatprep.subr.bf16.mxu1 %v8301_v46  ;;  %v8376_v45 = vld [vmem:[%s11877_s1 + $0x964] ss:$12 sps:$4 sm:$0xff]   ;;  %v8371_v46 = vld [vmem:[%s11877_s1 + $0x360] ss:$12 sps:$4 sm:$0xff]  }
  0x65   : > { %5740 = vmatprep.subr.bf16.mxu0 %v8304_v47  ;;  %v8374_v47 = vld [vmem:[%s11877_s1 + $0x960] ss:$12 sps:$4 sm:$0xff]  }
  0x67   : > { %5569 = vmatpush1.bf16.msra.mxu1 %v8299_v48  ;;  %v8379_v48 = vld [vmem:[%s11877_s1 + $0x37c] ss:$12 sps:$4 sm:$0xff]  }
  0x68   : > { %5741 = vmatpush1.bf16.msra.mxu0 %v8302_v49  ;;  %5570 = vmatprep.subr.bf16.mxu1 %v8307_v50  ;;  %v8382_v49 = vld [vmem:[%s11877_s1 + $0x97c] ss:$12 sps:$4 sm:$0xff]   ;;  %v8377_v50 = vld [vmem:[%s11877_s1 + $0x378] ss:$12 sps:$4 sm:$0xff]  }
  0x69   : > { %5742 = vmatprep.subr.bf16.mxu0 %v8310_v51  ;;  %v8380_v51 = vld [vmem:[%s11877_s1 + $0x978] ss:$12 sps:$4 sm:$0xff]  }
  0x6b   : > { %5571 = vmatpush1.bf16.msra.mxu1 %v8305_v53  ;;  %v8385_v53 = vld [vmem:[%s11877_s1 + $0x394] ss:$12 sps:$4 sm:$0xff]  }
  0x6c   : > { %5743 = vmatpush1.bf16.msra.mxu0 %v8308_v54  ;;  %5572 = vmatprep.subr.bf16.mxu1 %v8313_v56  ;;  %v8388_v54 = vld [vmem:[%s11877_s1 + $0x994] ss:$12 sps:$4 sm:$0xff]   ;;  %v8383_v56 = vld [vmem:[%s11877_s1 + $0x390] ss:$12 sps:$4 sm:$0xff]  }
  0x6d   : > { %5744 = vmatprep.subr.bf16.mxu0 %v8316_v57  ;;  %v8386_v57 = vld [vmem:[%s11877_s1 + $0x990] ss:$12 sps:$4 sm:$0xff]  }
  0x6f   : > { %5573 = vmatpush1.bf16.msra.mxu1 %v8311_v58  ;;  %v8391_v58 = vld [vmem:[%s11877_s1 + $0x3ac] ss:$12 sps:$4 sm:$0xff]  }
  0x70   : > { %5745 = vmatpush1.bf16.msra.mxu0 %v8314_v59  ;;  %5574 = vmatprep.subr.bf16.mxu1 %v8319_v60  ;;  %v8394_v59 = vld [vmem:[%s11877_s1 + $0x9ac] ss:$12 sps:$4 sm:$0xff]   ;;  %v8389_v60 = vld [vmem:[%s11877_s1 + $0x3a8] ss:$12 sps:$4 sm:$0xff]  }
  0x71   : > { %5746 = vmatprep.subr.bf16.mxu0 %v8322_v61  ;;  %v8392_v61 = vld [vmem:[%s11877_s1 + $0x9a8] ss:$12 sps:$4 sm:$0xff]  }
  0x73   : > { %5575 = vmatpush1.bf16.msra.mxu1 %v8317_v62  ;;  %v8397_v62 = vld [vmem:[%s11877_s1 + $0x3c4] ss:$12 sps:$4 sm:$0xff]  }
  0x74   : > { %5747 = vmatpush1.bf16.msra.mxu0 %v8320_v63  ;;  %5576 = vmatprep.subr.bf16.mxu1 %v8325_v0  ;;  %v8400_v63 = vld [vmem:[%s11877_s1 + $0x9c4] ss:$12 sps:$4 sm:$0xff]   ;;  %v8395_v0 = vld [vmem:[%s11877_s1 + $0x3c0] ss:$12 sps:$4 sm:$0xff]  }
  0x75   : > { %5748 = vmatprep.subr.bf16.mxu0 %v8328_v1  ;;  %v8398_v1 = vld [vmem:[%s11877_s1 + $0x9c0] ss:$12 sps:$4 sm:$0xff]  }
  0x77   : > { %5577 = vmatpush1.bf16.msra.mxu1 %v8323_v2  ;;  %v8403_v2 = vld [vmem:[%s11877_s1 + $0x3dc] ss:$12 sps:$4 sm:$0xff]  }
  0x78   : > { %5749 = vmatpush1.bf16.msra.mxu0 %v8326_v3  ;;  %5578 = vmatprep.subr.bf16.mxu1 %v8331_v4  ;;  %v8406_v3 = vld [vmem:[%s11877_s1 + $0x9dc] ss:$12 sps:$4 sm:$0xff]   ;;  %v8401_v4 = vld [vmem:[%s11877_s1 + $0x3d8] ss:$12 sps:$4 sm:$0xff]  }
  0x79   : > { %5750 = vmatprep.subr.bf16.mxu0 %v8334_v5  ;;  %v8404_v5 = vld [vmem:[%s11877_s1 + $0x9d8] ss:$12 sps:$4 sm:$0xff]  }
  0x7b   : > { %5579 = vmatpush1.bf16.msra.mxu1 %v8329_v6  ;;  %v8409_v6 = vld [vmem:[%s11877_s1 + $0x3f4] ss:$12 sps:$4 sm:$0xff]  }
  0x7c   : > { %5751 = vmatpush1.bf16.msra.mxu0 %v8332_v7  ;;  %5580 = vmatprep.subr.bf16.mxu1 %v8337_v9  ;;  %v8412_v7 = vld [vmem:[%s11877_s1 + $0x9f4] ss:$12 sps:$4 sm:$0xff]   ;;  %v8407_v9 = vld [vmem:[%s11877_s1 + $0x3f0] ss:$12 sps:$4 sm:$0xff]  }
  0x7d   : > { %5752 = vmatprep.subr.bf16.mxu0 %v8340_v11  ;;  %v8410_v11 = vld [vmem:[%s11877_s1 + $0x9f0] ss:$12 sps:$4 sm:$0xff]  }
  0x7f   : > { %5581 = vmatpush1.bf16.msra.mxu1 %v8335_v12  ;;  %v8415_v12 = vld [vmem:[%s11877_s1 + $0x40c] ss:$12 sps:$4 sm:$0xff]  }
  0x80   : > { %5753 = vmatpush1.bf16.msra.mxu0 %v8338_v13  ;;  %5582 = vmatprep.subr.bf16.mxu1 %v8343_v14  ;;  %v8418_v13 = vld [vmem:[%s11877_s1 + $0xa0c] ss:$12 sps:$4 sm:$0xff]   ;;  %v8413_v14 = vld [vmem:[%s11877_s1 + $0x408] ss:$12 sps:$4 sm:$0xff]  }
  0x81   : > { %5754 = vmatprep.subr.bf16.mxu0 %v8346_v15  ;;  %v8416_v15 = vld [vmem:[%s11877_s1 + $0xa08] ss:$12 sps:$4 sm:$0xff]  }
  0x83   : > { %5583 = vmatpush1.bf16.msra.mxu1 %v8341_v16  ;;  %v8421_v16 = vld [vmem:[%s11877_s1 + $0x424] ss:$12 sps:$4 sm:$0xff]  }
  0x84   : > { %5755 = vmatpush1.bf16.msra.mxu0 %v8344_v17  ;;  %5595 = vmatprep.subr.bf16.mxu1 %v8349_v18  ;;  %v8424_v17 = vld [vmem:[%s11877_s1 + $0xa24] ss:$12 sps:$4 sm:$0xff]   ;;  %v8419_v18 = vld [vmem:[%s11877_s1 + $0x420] ss:$12 sps:$4 sm:$0xff]  }
  0x85   : > { %5767 = vmatprep.subr.bf16.mxu0 %v8352_v19  ;;  %v8422_v19 = vld [vmem:[%s11877_s1 + $0xa20] ss:$12 sps:$4 sm:$0xff]  }
  0x86   : > { %5585 = vmatmul.mubr.bf16.vlgmr.msra.gmra.mrb[0].mxu1 %v9656_v20 }
  0x87   : > { %5757 = vmatmul.mubr.bf16.vlgmr.msra.gmra.mrb[0].mxu0 %v9663_v22  ;;  %5596 = vmatpush1.bf16.msra.mxu1 %v8347_v21  ;;  %v8427_v21 = vld [vmem:[%s11877_s1 + $0x43c] ss:$12 sps:$4 sm:$0xff]  }
  0x88   : > { %5768 = vmatpush1.bf16.msra.mxu0 %v8350_v23  ;;  %5597 = vmatprep.subr.bf16.mxu1 %v8355_v24  ;;  %v8430_v23 = vld [vmem:[%s11877_s1 + $0xa3c] ss:$12 sps:$4 sm:$0xff]   ;;  %v8425_v24 = vld [vmem:[%s11877_s1 + $0x438] ss:$12 sps:$4 sm:$0xff]  }
  0x89   : > { %5769 = vmatprep.subr.bf16.mxu0 %v8358_v25  ;;  %5627 = vmatprep.mubr.bf16.mxu1 %v9696_v32  ;;  %v8428_v25 = vld [vmem:[%s11877_s1 + $0xa38] ss:$12 sps:$4 sm:$0xff]  }
  0x8a   : > { %5799 = vmatprep.mubr.bf16.mxu0 %v9707_v35 }
  0x8b   : > { %5598 = vmatpush1.bf16.msra.mxu1 %v8353_v26  ;;  %v8433_v26 = vld [vmem:[%s11877_s1 + $0x454] ss:$12 sps:$4 sm:$0xff]  }
  0x8c   : > { %5770 = vmatpush1.bf16.msra.mxu0 %v8356_v27  ;;  %5599 = vmatprep.subr.bf16.mxu1 %v8361_v30  ;;  %v8436_v27 = vld [vmem:[%s11877_s1 + $0xa54] ss:$12 sps:$4 sm:$0xff]   ;;  %v8431_v30 = vld [vmem:[%s11877_s1 + $0x450] ss:$12 sps:$4 sm:$0xff]  }
  0x8d   : > { %5771 = vmatprep.subr.bf16.mxu0 %v8364_v31  ;;  %v8434_v31 = vld [vmem:[%s11877_s1 + $0xa50] ss:$12 sps:$4 sm:$0xff]  }
  0x8f   : > { %5600 = vmatpush1.bf16.msra.mxu1 %v8359_v36  ;;  %v8439_v36 = vld [vmem:[%s11877_s1 + $0x46c] ss:$12 sps:$4 sm:$0xff]  }
  0x90   : > { %5772 = vmatpush1.bf16.msra.mxu0 %v8362_v37  ;;  %5601 = vmatprep.subr.bf16.mxu1 %v8367_v38  ;;  %v8442_v37 = vld [vmem:[%s11877_s1 + $0xa6c] ss:$12 sps:$4 sm:$0xff]   ;;  %v8437_v38 = vld [vmem:[%s11877_s1 + $0x468] ss:$12 sps:$4 sm:$0xff]  }
  0x91   : > { %5773 = vmatprep.subr.bf16.mxu0 %v8370_v39  ;;  %v8440_v39 = vld [vmem:[%s11877_s1 + $0xa68] ss:$12 sps:$4 sm:$0xff]  }
  0x93   : > { %5602 = vmatpush1.bf16.msra.mxu1 %v8365_v41  ;;  %v8445_v41 = vld [vmem:[%s11877_s1 + $0x484] ss:$12 sps:$4 sm:$0xff]  }
  0x94   : > { %5774 = vmatpush1.bf16.msra.mxu0 %v8368_v42  ;;  %5603 = vmatprep.subr.bf16.mxu1 %v8373_v44  ;;  %v8448_v42 = vld [vmem:[%s11877_s1 + $0xa84] ss:$12 sps:$4 sm:$0xff]   ;;  %v9879_v44 = vld [vmem:[%s9356_s4 + $0x18] sm:$0xff] }
  0x95   : > { %5775 = vmatprep.subr.bf16.mxu0 %v8376_v45  ;;  %v8443_v45 = vld [vmem:[%s11877_s1 + $0x480] ss:$12 sps:$4 sm:$0xff]  }
  0x97   : > { %5604 = vmatpush1.bf16.msra.mxu1 %v8371_v46  ;;  %v9885_v46 = vld [vmem:[%s9356_s4 + $0x98] sm:$0xff] }
  0x98   : > { %5776 = vmatpush1.bf16.msra.mxu0 %v8374_v47  ;;  %5605 = vmatprep.subr.bf16.mxu1 %v8379_v48  ;;  %v9888_v47 = vld [vmem:[%s9356_s4 + $0x38] sm:$0xff]  ;;  %v9892_v48 = vcombine.low %v9681_v28, %v9686_v29 }
  0x99   : > { %5777 = vmatprep.subr.bf16.mxu0 %v8382_v49  ;;  %v9896_v49 = vcombine.low %v9699_v33, %v9702_v34  ;;  %v8454_v28 = vld [vmem:[%s11877_s1 + $0xa9c] ss:$12 sps:$4 sm:$0xff]   ;;  %v8449_v29 = vld [vmem:[%s11877_s1 + $0x498] ss:$12 sps:$4 sm:$0xff]   ;;  %v9915_v33 = vcombine.high %v9879_v44, %v9885_v46 }
  0x9b   : > { %5606 = vmatpush1.bf16.msra.mxu1 %v8377_v50  ;;  %v9899_v50 = vld [vmem:[%s9356_s4 + $0xb8] sm:$0xff] }
  0x9c   : > { %5778 = vmatpush1.bf16.msra.mxu0 %v8380_v51  ;;  %5607 = vmatprep.subr.bf16.mxu1 %v8385_v53  ;;  %v8446_v51 = vld [vmem:[%s11877_s1 + $0xa80] ss:$12 sps:$4 sm:$0xff]   ;;  %v8451_v53 = vld [vmem:[%s11877_s1 + $0x49c] ss:$12 sps:$4 sm:$0xff]   ;;  %v9919_v34 = vcombine.high %v9888_v47, %v9899_v50 }
  0x9d   : > { %5779 = vmatprep.subr.bf16.mxu0 %v8388_v54  ;;  %v8452_v54 = vld [vmem:[%s11877_s1 + $0xa98] ss:$12 sps:$4 sm:$0xff]  }
  0x9f   : > { %5608 = vmatpush1.bf16.msra.mxu1 %v8383_v56  ;;  %v8457_v56 = vld [vmem:[%s11877_s1 + $0x4b4] ss:$12 sps:$4 sm:$0xff]  }
  0xa0   : > { %5780 = vmatpush1.bf16.msra.mxu0 %v8386_v57  ;;  %5609 = vmatprep.subr.bf16.mxu1 %v8391_v58  ;;  %v8460_v57 = vld [vmem:[%s11877_s1 + $0xab4] ss:$12 sps:$4 sm:$0xff]   ;;  %v8455_v58 = vld [vmem:[%s11877_s1 + $0x4b0] ss:$12 sps:$4 sm:$0xff]  }
  0xa1   : > { %5781 = vmatprep.subr.bf16.mxu0 %v8394_v59  ;;  %v8458_v59 = vld [vmem:[%s11877_s1 + $0xab0] ss:$12 sps:$4 sm:$0xff]  }
  0xa3   : > { %5610 = vmatpush1.bf16.msra.mxu1 %v8389_v60  ;;  %v8463_v60 = vld [vmem:[%s11877_s1 + $0x4cc] ss:$12 sps:$4 sm:$0xff]  }
  0xa4   : > { %5782 = vmatpush1.bf16.msra.mxu0 %v8392_v61  ;;  %5611 = vmatprep.subr.bf16.mxu1 %v8397_v62  ;;  %v8466_v61 = vld [vmem:[%s11877_s1 + $0xacc] ss:$12 sps:$4 sm:$0xff]   ;;  %v8461_v62 = vld [vmem:[%s11877_s1 + $0x4c8] ss:$12 sps:$4 sm:$0xff]  }
  0xa5   : > { %5783 = vmatprep.subr.bf16.mxu0 %v8400_v63  ;;  %v8464_v63 = vld [vmem:[%s11877_s1 + $0xac8] ss:$12 sps:$4 sm:$0xff]  }
  0xa7   : > { %5612 = vmatpush1.bf16.msra.mxu1 %v8395_v0  ;;  %v8469_v0 = vld [vmem:[%s11877_s1 + $0x4e4] ss:$12 sps:$4 sm:$0xff]  }
  0xa8   : > { %5784 = vmatpush1.bf16.msra.mxu0 %v8398_v1  ;;  %5613 = vmatprep.subr.bf16.mxu1 %v8403_v2  ;;  %v8472_v1 = vld [vmem:[%s11877_s1 + $0xae4] ss:$12 sps:$4 sm:$0xff]   ;;  %v8467_v2 = vld [vmem:[%s11877_s1 + $0x4e0] ss:$12 sps:$4 sm:$0xff]  }
  0xa9   : > { %5785 = vmatprep.subr.bf16.mxu0 %v8406_v3  ;;  %v8470_v3 = vld [vmem:[%s11877_s1 + $0xae0] ss:$12 sps:$4 sm:$0xff]  }
  0xab   : > { %5614 = vmatpush1.bf16.msra.mxu1 %v8401_v4  ;;  %v8475_v4 = vld [vmem:[%s11877_s1 + $0x4fc] ss:$12 sps:$4 sm:$0xff]  }
  0xac   : > { %5786 = vmatpush1.bf16.msra.mxu0 %v8404_v5  ;;  %5615 = vmatprep.subr.bf16.mxu1 %v8409_v6  ;;  %v8478_v5 = vld [vmem:[%s11877_s1 + $0xafc] ss:$12 sps:$4 sm:$0xff]   ;;  %v8473_v6 = vld [vmem:[%s11877_s1 + $0x4f8] ss:$12 sps:$4 sm:$0xff]  }
  0xad   : > { %5787 = vmatprep.subr.bf16.mxu0 %v8412_v7  ;;  %v8476_v7 = vld [vmem:[%s11877_s1 + $0xaf8] ss:$12 sps:$4 sm:$0xff]  }
  0xaf   : > { %5616 = vmatpush1.bf16.msra.mxu1 %v8407_v9  ;;  %v8481_v9 = vld [vmem:[%s11877_s1 + $0x514] ss:$12 sps:$4 sm:$0xff]  }
  0xb0   : > { %5788 = vmatpush1.bf16.msra.mxu0 %v8410_v11  ;;  %5617 = vmatprep.subr.bf16.mxu1 %v8415_v12  ;;  %v8484_v11 = vld [vmem:[%s11877_s1 + $0xb14] ss:$12 sps:$4 sm:$0xff]   ;;  %v8479_v12 = vld [vmem:[%s11877_s1 + $0x510] ss:$12 sps:$4 sm:$0xff]  }
  0xb1   : > { %5789 = vmatprep.subr.bf16.mxu0 %v8418_v13  ;;  %v8482_v13 = vld [vmem:[%s11877_s1 + $0xb10] ss:$12 sps:$4 sm:$0xff]  }
  0xb3   : > { %5618 = vmatpush1.bf16.msra.mxu1 %v8413_v14  ;;  %v8487_v14 = vld [vmem:[%s11877_s1 + $0x52c] ss:$12 sps:$4 sm:$0xff]  }
  0xb4   : > { %5790 = vmatpush1.bf16.msra.mxu0 %v8416_v15  ;;  %5619 = vmatprep.subr.bf16.mxu1 %v8421_v16  ;;  %v8490_v15 = vld [vmem:[%s11877_s1 + $0xb2c] ss:$12 sps:$4 sm:$0xff]   ;;  %v8485_v16 = vld [vmem:[%s11877_s1 + $0x528] ss:$12 sps:$4 sm:$0xff]  }
  0xb5   : > { %5791 = vmatprep.subr.bf16.mxu0 %v8424_v17  ;;  %v8488_v17 = vld [vmem:[%s11877_s1 + $0xb28] ss:$12 sps:$4 sm:$0xff]  }
  0xb7   : > { %5620 = vmatpush1.bf16.msra.mxu1 %v8419_v18  ;;  %v8493_v18 = vld [vmem:[%s11877_s1 + $0x544] ss:$12 sps:$4 sm:$0xff]  }
  0xb8   : > { %5792 = vmatpush1.bf16.msra.mxu0 %v8422_v19  ;;  %5621 = vmatprep.subr.bf16.mxu1 %v8427_v21  ;;  %v8496_v19 = vld [vmem:[%s11877_s1 + $0xb44] ss:$12 sps:$4 sm:$0xff]   ;;  %v8491_v21 = vld [vmem:[%s11877_s1 + $0x540] ss:$12 sps:$4 sm:$0xff]  }
  0xb9   : > { %5793 = vmatprep.subr.bf16.mxu0 %v8430_v23  ;;  %v8494_v23 = vld [vmem:[%s11877_s1 + $0xb40] ss:$12 sps:$4 sm:$0xff]  }
  0xbb   : > { %5622 = vmatpush1.bf16.msra.mxu1 %v8425_v24  ;;  %v8499_v24 = vld [vmem:[%s11877_s1 + $0x55c] ss:$12 sps:$4 sm:$0xff]  }
  0xbc   : > { %5794 = vmatpush1.bf16.msra.mxu0 %v8428_v25  ;;  %5623 = vmatprep.subr.bf16.mxu1 %v8433_v26  ;;  %v8502_v25 = vld [vmem:[%s11877_s1 + $0xb5c] ss:$12 sps:$4 sm:$0xff]   ;;  %v8497_v26 = vld [vmem:[%s11877_s1 + $0x558] ss:$12 sps:$4 sm:$0xff]  }
  0xbd   : > { %5795 = vmatprep.subr.bf16.mxu0 %v8436_v27  ;;  %v8500_v27 = vld [vmem:[%s11877_s1 + $0xb58] ss:$12 sps:$4 sm:$0xff]  }
  0xbf   : > { %5624 = vmatpush1.bf16.msra.mxu1 %v8431_v30  ;;  %v8505_v30 = vld [vmem:[%s11877_s1 + $0x574] ss:$12 sps:$4 sm:$0xff]  }
  0xc0   : > { %5796 = vmatpush1.bf16.msra.mxu0 %v8434_v31  ;;  %5625 = vmatprep.subr.bf16.mxu1 %v8439_v36  ;;  %v8508_v31 = vld [vmem:[%s11877_s1 + $0xb74] ss:$12 sps:$4 sm:$0xff]   ;;  %v8503_v36 = vld [vmem:[%s11877_s1 + $0x570] ss:$12 sps:$4 sm:$0xff]  }
  0xc1   : > { %5797 = vmatprep.subr.bf16.mxu0 %v8442_v37  ;;  %v8506_v37 = vld [vmem:[%s11877_s1 + $0xb70] ss:$12 sps:$4 sm:$0xff]  }
  0xc3   : > { %5626 = vmatpush1.bf16.msra.mxu1 %v8437_v38  ;;  %v8511_v38 = vld [vmem:[%s11877_s1 + $0x58c] ss:$12 sps:$4 sm:$0xff]  }
  0xc4   : > { %5798 = vmatpush1.bf16.msra.mxu0 %v8440_v39  ;;  %5638 = vmatprep.subr.bf16.mxu1 %v8445_v41  ;;  %v8514_v39 = vld [vmem:[%s11877_s1 + $0xb8c] ss:$12 sps:$4 sm:$0xff]   ;;  %v8509_v41 = vld [vmem:[%s11877_s1 + $0x588] ss:$12 sps:$4 sm:$0xff]  }
  0xc5   : > { %5810 = vmatprep.subr.bf16.mxu0 %v8448_v42  ;;  %v8512_v42 = vld [vmem:[%s11877_s1 + $0xb88] ss:$12 sps:$4 sm:$0xff]  }
  0xc6   : > { %5628 = vmatmul.mubr.bf16.vlgmr.msra.gmra.mrb[0].mxu1 %v9892_v48 }
  0xc7   : > { %5800 = vmatmul.mubr.bf16.vlgmr.msra.gmra.mrb[0].mxu0 %v9896_v49  ;;  %5639 = vmatpush1.bf16.msra.mxu1 %v8443_v45  ;;  %v8517_v45 = vld [vmem:[%s11877_s1 + $0x5a4] ss:$12 sps:$4 sm:$0xff]  }
  0xc8   : > { %5811 = vmatpush1.bf16.msra.mxu0 %v8446_v51  ;;  %5640 = vmatprep.subr.bf16.mxu1 %v8451_v53  ;;  %v8520_v51 = vld [vmem:[%s11877_s1 + $0xba4] ss:$12 sps:$4 sm:$0xff]   ;;  %v8515_v53 = vld [vmem:[%s11877_s1 + $0x5a0] ss:$12 sps:$4 sm:$0xff]  }
  0xc9   : > { %5812 = vmatprep.subr.bf16.mxu0 %v8454_v28  ;;  %5670 = vmatprep.mubr.bf16.mxu1 %v9915_v33  ;;  %v8518_v28 = vld [vmem:[%s11877_s1 + $0xba0] ss:$12 sps:$4 sm:$0xff]  }
  0xca   : > { %5842 = vmatprep.mubr.bf16.mxu0 %v9919_v34 }
  0xcb   : > { %5641 = vmatpush1.bf16.msra.mxu1 %v8449_v29  ;;  %v8523_v29 = vld [vmem:[%s11877_s1 + $0x5bc] ss:$12 sps:$4 sm:$0xff]  }
  0xcc   : > { %5813 = vmatpush1.bf16.msra.mxu0 %v8452_v54  ;;  %5642 = vmatprep.subr.bf16.mxu1 %v8457_v56  ;;  %v8526_v54 = vld [vmem:[%s11877_s1 + $0xbbc] ss:$12 sps:$4 sm:$0xff]   ;;  %v8521_v56 = vld [vmem:[%s11877_s1 + $0x5b8] ss:$12 sps:$4 sm:$0xff]  }
  0xcd   : > { %5814 = vmatprep.subr.bf16.mxu0 %v8460_v57  ;;  %v8524_v57 = vld [vmem:[%s11877_s1 + $0xbb8] ss:$12 sps:$4 sm:$0xff]  }
  0xcf   : > { %5643 = vmatpush1.bf16.msra.mxu1 %v8455_v58  ;;  %v8529_v58 = vld [vmem:[%s11877_s1 + $0x5d4] ss:$12 sps:$4 sm:$0xff]  }
  0xd0   : > { %5815 = vmatpush1.bf16.msra.mxu0 %v8458_v59  ;;  %5644 = vmatprep.subr.bf16.mxu1 %v8463_v60  ;;  %v8532_v59 = vld [vmem:[%s11877_s1 + $0xbd4] ss:$12 sps:$4 sm:$0xff]   ;;  %v8527_v60 = vld [vmem:[%s11877_s1 + $0x5d0] ss:$12 sps:$4 sm:$0xff]  }
  0xd1   : > { %5816 = vmatprep.subr.bf16.mxu0 %v8466_v61  ;;  %v8530_v61 = vld [vmem:[%s11877_s1 + $0xbd0] ss:$12 sps:$4 sm:$0xff]  }
  0xd3   : > { %5645 = vmatpush1.bf16.msra.mxu1 %v8461_v62  ;;  %v8535_v62 = vld [vmem:[%s11877_s1 + $0x5ec] ss:$12 sps:$4 sm:$0xff]  }
  0xd4   : > { %5817 = vmatpush1.bf16.msra.mxu0 %v8464_v63  ;;  %5646 = vmatprep.subr.bf16.mxu1 %v8469_v0  ;;  %v8538_v63 = vld [vmem:[%s11877_s1 + $0xbec] ss:$12 sps:$4 sm:$0xff]   ;;  %v8533_v0 = vld [vmem:[%s11877_s1 + $0x5e8] ss:$12 sps:$4 sm:$0xff]  }
  0xd5   : > { %5818 = vmatprep.subr.bf16.mxu0 %v8472_v1  ;;  %v8536_v1 = vld [vmem:[%s11877_s1 + $0xbe8] ss:$12 sps:$4 sm:$0xff]  }
  0xd7   : > { %5647 = vmatpush1.bf16.msra.mxu1 %v8467_v2  ;;  %v8541_v2 = vld [vmem:[%s11877_s1 + $0xc04] ss:$12 sps:$4 sm:$0xff]  }
  0xd8   : > { %5819 = vmatpush1.bf16.msra.mxu0 %v8470_v3  ;;  %5648 = vmatprep.subr.bf16.mxu1 %v8475_v4  ;;  %v8542_v3 = vld [vmem:[%s11877_s1 + $0xc8] ss:$12 sps:$4 sm:$0xff]   ;;  %v8539_v4 = vld [vmem:[%s11877_s1 + $0xc00] ss:$12 sps:$4 sm:$0xff]  }
  0xd9   : > { %5820 = vmatprep.subr.bf16.mxu0 %v8478_v5  ;;  %v10106_v5 = vld [vmem:[%s9356_s4 + $0x40] sm:$0xff] }
  0xdb   : > { %5649 = vmatpush1.bf16.msra.mxu1 %v8473_v6  ;;  %v10110_v6 = vcombine.low %v9879_v44, %v9885_v46  ;;  %v8547_v44 = vld [vmem:[%s11877_s1 + $0xe0] ss:$12 sps:$4 sm:$0xff]   ;;  %v8544_v46 = vld [vmem:[%s11877_s1 + $0xc18] ss:$12 sps:$4 sm:$0xff]  }
  0xdc   : > { %5821 = vmatpush1.bf16.msra.mxu0 %v8476_v7  ;;  %5650 = vmatprep.subr.bf16.mxu1 %v8481_v9  ;;  %v10114_v7 = vcombine.low %v9888_v47, %v9899_v50  ;;  %v10117_v9 = vld [vmem:[%s9356_s4 + $0xc0] sm:$0xff] }
  0xdd   : > { %5822 = vmatprep.subr.bf16.mxu0 %v8484_v11  ;;  %v8543_v11 = vld [vmem:[%s11877_s1 + $0x8] ss:$12 sps:$4 sm:$0xff]   ;;  %v10133_v47 = vcombine.high %v10106_v5, %v10117_v9  ;;  %v8548_v50 = vld [vmem:[%s11877_s1 + $0x20] ss:$12 sps:$4 sm:$0xff]  }
  0xdf   : > { %5651 = vmatpush1.bf16.msra.mxu1 %v8479_v12  ;;  %v8546_v12 = vld [vmem:[%s11877_s1 + $0xc1c] ss:$12 sps:$4 sm:$0xff]  }
  0xe0   : > { %5823 = vmatpush1.bf16.msra.mxu0 %v8482_v13  ;;  %5652 = vmatprep.subr.bf16.mxu1 %v8487_v14  ;;  %v8551_v13 = vld [vmem:[%s11877_s1 + $0xc34] ss:$12 sps:$4 sm:$0xff]   ;;  %v8552_v14 = vld [vmem:[%s11877_s1 + $0xf8] ss:$12 sps:$4 sm:$0xff]  }
  0xe1   : > { %5824 = vmatprep.subr.bf16.mxu0 %v8490_v15  ;;  %v8549_v15 = vld [vmem:[%s11877_s1 + $0xc30] ss:$12 sps:$4 sm:$0xff]  }
  0xe3   : > { %5653 = vmatpush1.bf16.msra.mxu1 %v8485_v16  ;;  %v8553_v16 = vld [vmem:[%s11877_s1 + $0x38] ss:$12 sps:$4 sm:$0xff]  }
  0xe4   : > { %5825 = vmatpush1.bf16.msra.mxu0 %v8488_v17  ;;  %5654 = vmatprep.subr.bf16.mxu1 %v8493_v18  ;;  %v8556_v17 = vld [vmem:[%s11877_s1 + $0xc4c] ss:$12 sps:$4 sm:$0xff]   ;;  %v8554_v18 = vld [vmem:[%s11877_s1 + $0xc48] ss:$12 sps:$4 sm:$0xff]  }
  0xe5   : > { %5826 = vmatprep.subr.bf16.mxu0 %v8496_v19  ;;  %v8558_v19 = vld [vmem:[%s11877_s1 + $0x50] ss:$12 sps:$4 sm:$0xff]  }
  0xe7   : > { %5655 = vmatpush1.bf16.msra.mxu1 %v8491_v21  ;;  %v8561_v21 = vld [vmem:[%s11877_s1 + $0xc64] ss:$12 sps:$4 sm:$0xff]  }
  0xe8   : > { %5827 = vmatpush1.bf16.msra.mxu0 %v8494_v23  ;;  %5656 = vmatprep.subr.bf16.mxu1 %v8499_v24  ;;  %v8562_v23 = vld [vmem:[%s11877_s1 + $0x128] ss:$12 sps:$4 sm:$0xff]   ;;  %v8559_v24 = vld [vmem:[%s11877_s1 + $0xc60] ss:$12 sps:$4 sm:$0xff]  }
  0xe9   : > { %5828 = vmatprep.subr.bf16.mxu0 %v8502_v25  ;;  %v8563_v25 = vld [vmem:[%s11877_s1 + $0x68] ss:$12 sps:$4 sm:$0xff]  }
  0xeb   : > { %5657 = vmatpush1.bf16.msra.mxu1 %v8497_v26  ;;  %v8566_v26 = vld [vmem:[%s11877_s1 + $0xc7c] ss:$12 sps:$4 sm:$0xff]  }
  0xec   : > { %5829 = vmatpush1.bf16.msra.mxu0 %v8500_v27  ;;  %5658 = vmatprep.subr.bf16.mxu1 %v8505_v30  ;;  %v8567_v27 = vld [vmem:[%s11877_s1 + $0x140] ss:$12 sps:$4 sm:$0xff]   ;;  %v8564_v30 = vld [vmem:[%s11877_s1 + $0xc78] ss:$12 sps:$4 sm:$0xff]  }
  0xed   : > { %5830 = vmatprep.subr.bf16.mxu0 %v8508_v31  ;;  %v8568_v31 = vld [vmem:[%s11877_s1 + $0x80] ss:$12 sps:$4 sm:$0xff]  }
  0xef   : > { %5659 = vmatpush1.bf16.msra.mxu1 %v8503_v36  ;;  %v8571_v36 = vld [vmem:[%s11877_s1 + $0xc94] ss:$12 sps:$4 sm:$0xff]  }
  0xf0   : > { %5831 = vmatpush1.bf16.msra.mxu0 %v8506_v37  ;;  %5660 = vmatprep.subr.bf16.mxu1 %v8511_v38  ;;  %v8572_v37 = vld [vmem:[%s11877_s1 + $0x158] ss:$12 sps:$4 sm:$0xff]   ;;  %v8569_v38 = vld [vmem:[%s11877_s1 + $0xc90] ss:$12 sps:$4 sm:$0xff]  }
  0xf1   : > { %5832 = vmatprep.subr.bf16.mxu0 %v8514_v39  ;;  %v8573_v39 = vld [vmem:[%s11877_s1 + $0x98] ss:$12 sps:$4 sm:$0xff]  }
  0xf3   : > { %5661 = vmatpush1.bf16.msra.mxu1 %v8509_v41  ;;  %v8576_v41 = vld [vmem:[%s11877_s1 + $0xcac] ss:$12 sps:$4 sm:$0xff]  }
  0xf4   : > { %5833 = vmatpush1.bf16.msra.mxu0 %v8512_v42  ;;  %5662 = vmatprep.subr.bf16.mxu1 %v8517_v45  ;;  %v8577_v42 = vld [vmem:[%s11877_s1 + $0x170] ss:$12 sps:$4 sm:$0xff]   ;;  %v8574_v45 = vld [vmem:[%s11877_s1 + $0xca8] ss:$12 sps:$4 sm:$0xff]  }
  0xf5   : > { %5834 = vmatprep.subr.bf16.mxu0 %v8520_v51  ;;  %v8578_v51 = vld [vmem:[%s11877_s1 + $0xb0] ss:$12 sps:$4 sm:$0xff]  }
  0xf7   : > { %5663 = vmatpush1.bf16.msra.mxu1 %v8515_v53  ;;  %v8581_v53 = vld [vmem:[%s11877_s1 + $0xcc4] ss:$12 sps:$4 sm:$0xff]  }
  0xf8   : > { %5835 = vmatpush1.bf16.msra.mxu0 %v8518_v28  ;;  %5664 = vmatprep.subr.bf16.mxu1 %v8523_v29  ;;  %v8582_v28 = vld [vmem:[%s11877_s1 + $0x248] ss:$12 sps:$4 sm:$0xff]   ;;  %v8579_v29 = vld [vmem:[%s11877_s1 + $0xcc0] ss:$12 sps:$4 sm:$0xff]  }
  0xf9   : > { %5836 = vmatprep.subr.bf16.mxu0 %v8526_v54  ;;  %v8583_v54 = vld [vmem:[%s11877_s1 + $0x188] ss:$12 sps:$4 sm:$0xff]  }
  0xfb   : > { %5665 = vmatpush1.bf16.msra.mxu1 %v8521_v56  ;;  %v8586_v56 = vld [vmem:[%s11877_s1 + $0xcdc] ss:$12 sps:$4 sm:$0xff]  }
  0xfc   : > { %5837 = vmatpush1.bf16.msra.mxu0 %v8524_v57  ;;  %5666 = vmatprep.subr.bf16.mxu1 %v8529_v58  ;;  %v8587_v57 = vld [vmem:[%s11877_s1 + $0x260] ss:$12 sps:$4 sm:$0xff]   ;;  %v8584_v58 = vld [vmem:[%s11877_s1 + $0xcd8] ss:$12 sps:$4 sm:$0xff]  }
  0xfd   : > { %5838 = vmatprep.subr.bf16.mxu0 %v8532_v59  ;;  %v8588_v59 = vld [vmem:[%s11877_s1 + $0x1a0] ss:$12 sps:$4 sm:$0xff]  }
  0xff   : > { %5667 = vmatpush1.bf16.msra.mxu1 %v8527_v60  ;;  %v8591_v60 = vld [vmem:[%s11877_s1 + $0xcf4] ss:$12 sps:$4 sm:$0xff]  }
 0x100   : > { %5839 = vmatpush1.bf16.msra.mxu0 %v8530_v61  ;;  %5668 = vmatprep.subr.bf16.mxu1 %v8535_v62  ;;  %v8589_v61 = vld [vmem:[%s11877_s1 + $0xcf0] ss:$12 sps:$4 sm:$0xff]   ;;  %v8593_v62 = vld [vmem:[%s11877_s1 + $0x1b8] ss:$12 sps:$4 sm:$0xff]  }
 0x101   : > { %5840 = vmatprep.subr.bf16.mxu0 %v8538_v63  ;;  %v8596_v63 = vld [vmem:[%s11877_s1 + $0xd0c] ss:$12 sps:$4 sm:$0xff]  }
 0x103   : > { %5669 = vmatpush1.bf16.msra.mxu1 %v8533_v0  ;;  %v8597_v0 = vld [vmem:[%s11877_s1 + $0x290] ss:$12 sps:$4 sm:$0xff]  }
 0x104   : > { %5841 = vmatpush1.bf16.msra.mxu0 %v8536_v1  ;;  %7730 = vmatprep.subr.bf16.mxu1 %v8542_v3  ;;  %v8598_v1 = vld [vmem:[%s11877_s1 + $0x1d0] ss:$12 sps:$4 sm:$0xff]   ;;  %v8602_v3 = vld [vmem:[%s11877_s1 + $0x2a8] ss:$12 sps:$4 sm:$0xff]  }
 0x105   : > { %5853 = vmatprep.subr.bf16.mxu0 %v8541_v2  ;;  %v8601_v2 = vld [vmem:[%s11877_s1 + $0xd24] ss:$12 sps:$4 sm:$0xff]  }
 0x106   : > { %5671 = vmatmul.mubr.bf16.vlgmr.msra.gmra.mrb[0].mxu1 %v10110_v6 }
 0x107   : > { %5843 = vmatmul.mubr.bf16.vlgmr.msra.gmra.mrb[0].mxu0 %v10114_v7  ;;  %7731 = vmatpush3.bf16.msra.mxu1 %v8543_v11  ;;  %v8603_v11 = vld [vmem:[%s11877_s1 + $0x1e8] ss:$12 sps:$4 sm:$0xff]  }
 0x108   : > { %5854 = vmatpush1.bf16.msra.mxu0 %v8539_v4  ;;  %7732 = vmatprep.subr.bf16.mxu1 %v8547_v44  ;;  %v8599_v4 = vld [vmem:[%s11877_s1 + $0xd20] ss:$12 sps:$4 sm:$0xff]  }
 0x109   : > { %5855 = vmatprep.subr.bf16.mxu0 %v8546_v12  ;;  %6229 = vmatprep.mubr.bf16.mxu1 %v9378_v52  ;;  %v8557_v52 = vld [vmem:[%s11877_s1 + $0x110] ss:$12 sps:$4 sm:$0xff]   ;;  %v8607_v44 = vld [vmem:[%s11877_s1 + $0x2c0] ss:$12 sps:$4 sm:$0xff]  }
 0x10a   : > { %5885 = vmatprep.mubr.bf16.mxu0 %v10133_v47  ;;  %v8606_v12 = vld [vmem:[%s11877_s1 + $0xd3c] ss:$12 sps:$4 sm:$0xff]  }
 0x10b   : > { %7733 = vmatpush3.bf16.msra.mxu1 %v8548_v50  ;;  %v8608_v50 = vld [vmem:[%s11877_s1 + $0x200] ss:$12 sps:$4 sm:$0xff]  }
 0x10c   : > { %5856 = vmatpush1.bf16.msra.mxu0 %v8544_v46  ;;  %7734 = vmatprep.subr.bf16.mxu1 %v8552_v14  ;;  %v8604_v46 = vld [vmem:[%s11877_s1 + $0xd38] ss:$12 sps:$4 sm:$0xff]  }
 0x10d   : > { %5857 = vmatprep.subr.bf16.mxu0 %v8551_v13  ;;  %v8611_v13 = vld [vmem:[%s11877_s1 + $0xd54] ss:$12 sps:$4 sm:$0xff]   ;;  %v8612_v14 = vld [vmem:[%s11877_s1 + $0x2d8] ss:$12 sps:$4 sm:$0xff]  }
 0x10f   : > { %7735 = vmatpush3.bf16.msra.mxu1 %v8553_v16  ;;  %v8613_v16 = vld [vmem:[%s11877_s1 + $0x218] ss:$12 sps:$4 sm:$0xff]  }
 0x110   : > { %5858 = vmatpush1.bf16.msra.mxu0 %v8549_v15  ;;  %7736 = vmatprep.subr.bf16.mxu1 %v8557_v52  ;;  %v8609_v15 = vld [vmem:[%s11877_s1 + $0xd50] ss:$12 sps:$4 sm:$0xff]  }
 0x111   : > { %5859 = vmatprep.subr.bf16.mxu0 %v8556_v17  ;;  %v8616_v17 = vld [vmem:[%s11877_s1 + $0xd6c] ss:$12 sps:$4 sm:$0xff]   ;;  %v8617_v52 = vld [vmem:[%s11877_s1 + $0x2f0] ss:$12 sps:$4 sm:$0xff]  }
 0x113   : > { %7737 = vmatpush3.bf16.msra.mxu1 %v8558_v19  ;;  %v8618_v19 = vld [vmem:[%s11877_s1 + $0x230] ss:$12 sps:$4 sm:$0xff]  }
 0x114   : > { %5860 = vmatpush1.bf16.msra.mxu0 %v8554_v18  ;;  %7738 = vmatprep.subr.bf16.mxu1 %v8562_v23  ;;  %v8614_v18 = vld [vmem:[%s11877_s1 + $0xd68] ss:$12 sps:$4 sm:$0xff]  }
 0x115   : > { %5861 = vmatprep.subr.bf16.mxu0 %v8561_v21  ;;  %v8621_v21 = vld [vmem:[%s11877_s1 + $0xd84] ss:$12 sps:$4 sm:$0xff]   ;;  %v8622_v23 = vld [vmem:[%s11877_s1 + $0x3c8] ss:$12 sps:$4 sm:$0xff]  }
 0x117   : > { %7739 = vmatpush3.bf16.msra.mxu1 %v8563_v25  ;;  %v10322_v25 = vld [vmem:[%s9356_s4 + $0x48] sm:$0xff] }
 0x118   : > { %5862 = vmatpush1.bf16.msra.mxu0 %v8559_v24  ;;  %7740 = vmatprep.subr.bf16.mxu1 %v8567_v27  ;;  %v8619_v24 = vld [vmem:[%s11877_s1 + $0xd80] ss:$12 sps:$4 sm:$0xff]  }
 0x119   : > { %5863 = vmatprep.subr.bf16.mxu0 %v8566_v26  ;;  %v10326_v26 = vcombine.low %v10106_v5, %v10117_v9  ;;  %v10329_v27 = vld [vmem:[%s9356_s4 + $0xc8] sm:$0xff]  ;;  %v8624_v5 = vld [vmem:[%s11877_s1 + $0xd98] ss:$12 sps:$4 sm:$0xff]  }
 0x11a   : > { %v10345_v9 = vcombine.high %v10322_v25, %v10329_v27 }
 0x11b   : > { %7741 = vmatpush3.bf16.msra.mxu1 %v8568_v31  ;;  %v8626_v31 = vld [vmem:[%s11877_s1 + $0xd9c] ss:$12 sps:$4 sm:$0xff]  }
 0x11c   : > { %5864 = vmatpush1.bf16.msra.mxu0 %v8564_v30  ;;  %7742 = vmatprep.subr.bf16.mxu1 %v8572_v37  ;;  %v8623_v30 = vld [vmem:[%s11877_s1 + $0x308] ss:$12 sps:$4 sm:$0xff]   ;;  %v8628_v37 = vld [vmem:[%s11877_s1 + $0x320] ss:$12 sps:$4 sm:$0xff]  }
 0x11d   : > { %5865 = vmatprep.subr.bf16.mxu0 %v8571_v36  ;;  %v8627_v36 = vld [vmem:[%s11877_s1 + $0x3e0] ss:$12 sps:$4 sm:$0xff]  }
 0x11f   : > { %7743 = vmatpush3.bf16.msra.mxu1 %v8573_v39  ;;  %v8632_v39 = vld [vmem:[%s11877_s1 + $0x3f8] ss:$12 sps:$4 sm:$0xff]  }
 0x120   : > { %5866 = vmatpush1.bf16.msra.mxu0 %v8569_v38  ;;  %7744 = vmatprep.subr.bf16.mxu1 %v8577_v42  ;;  %v8631_v38 = vld [vmem:[%s11877_s1 + $0xdb4] ss:$12 sps:$4 sm:$0xff]   ;;  %v8636_v42 = vld [vmem:[%s11877_s1 + $0xdcc] ss:$12 sps:$4 sm:$0xff]  }
 0x121   : > { %5867 = vmatprep.subr.bf16.mxu0 %v8576_v41  ;;  %v8633_v41 = vld [vmem:[%s11877_s1 + $0x338] ss:$12 sps:$4 sm:$0xff]  }
 0x123   : > { %7745 = vmatpush3.bf16.msra.mxu1 %v8578_v51  ;;  %v8638_v51 = vld [vmem:[%s11877_s1 + $0x350] ss:$12 sps:$4 sm:$0xff]  }
 0x124   : > { %5868 = vmatpush1.bf16.msra.mxu0 %v8574_v45  ;;  %7752 = vmatprep.subr.bf16.mxu1 %v8582_v28  ;;  %v8634_v45 = vld [vmem:[%s11877_s1 + $0xdc8] ss:$12 sps:$4 sm:$0xff]  }
 0x125   : > { %5869 = vmatprep.subr.bf16.mxu0 %v8581_v53  ;;  %v8641_v53 = vld [vmem:[%s11877_s1 + $0xde4] ss:$12 sps:$4 sm:$0xff]   ;;  %v8642_v28 = vld [vmem:[%s11877_s1 + $0x428] ss:$12 sps:$4 sm:$0xff]  }
 0x126   : > { %6230 = vmatmul.mubr.bf16.vlgmr.msra.gmra.mrb[4].mxu1 %v9434_v8  ;;  %v8592_v8 = vld [vmem:[%s11877_s1 + $0x278] ss:$12 sps:$4 sm:$0xff]  }
 0x127   : > { %7753 = vmatpush3.bf16.msra.mxu1 %v8583_v54  ;;  %6270 = vmatprep.mubr.bf16.mxu1 %v9532_v40  ;;  %v8594_v40 = vld [vmem:[%s11877_s1 + $0xd08] ss:$12 sps:$4 sm:$0xff]  }
 0x128   : > { %5870 = vmatpush1.bf16.msra.mxu0 %v8579_v29  ;;  %7754 = vmatprep.subr.bf16.mxu1 %v8587_v57  ;;  %v8639_v29 = vld [vmem:[%s11877_s1 + $0xde0] ss:$12 sps:$4 sm:$0xff]   ;;  %v8643_v54 = vld [vmem:[%s11877_s1 + $0x368] ss:$12 sps:$4 sm:$0xff]  }
 0x129   : > { %5871 = vmatprep.subr.bf16.mxu0 %v8586_v56  ;;  %v8646_v56 = vld [vmem:[%s11877_s1 + $0xdfc] ss:$12 sps:$4 sm:$0xff]   ;;  %v8647_v57 = vld [vmem:[%s11877_s1 + $0x440] ss:$12 sps:$4 sm:$0xff]  }
 0x12b   : > { %7755 = vmatpush3.bf16.msra.mxu1 %v8588_v59  ;;  %v8648_v59 = vld [vmem:[%s11877_s1 + $0x380] ss:$12 sps:$4 sm:$0xff]  }
 0x12c   : > { %5872 = vmatpush1.bf16.msra.mxu0 %v8584_v58  ;;  %7756 = vmatprep.subr.bf16.mxu1 %v8592_v8  ;;  %v8644_v58 = vld [vmem:[%s11877_s1 + $0xdf8] ss:$12 sps:$4 sm:$0xff]  }
 0x12d   : > { %5873 = vmatprep.subr.bf16.mxu0 %v8591_v60  ;;  %v8651_v60 = vld [vmem:[%s11877_s1 + $0xe14] ss:$12 sps:$4 sm:$0xff]   ;;  %v8652_v8 = vld [vmem:[%s11877_s1 + $0x458] ss:$12 sps:$4 sm:$0xff]  }
 0x12f   : > { %7757 = vmatpush3.bf16.msra.mxu1 %v8593_v62  ;;  %v8653_v62 = vld [vmem:[%s11877_s1 + $0x398] ss:$12 sps:$4 sm:$0xff]  }
 0x130   : > { %5874 = vmatpush1.bf16.msra.mxu0 %v8589_v61  ;;  %7758 = vmatprep.subr.bf16.mxu1 %v8597_v0  ;;  %v8649_v61 = vld [vmem:[%s11877_s1 + $0xe10] ss:$12 sps:$4 sm:$0xff]  }
 0x131   : > { %5875 = vmatprep.subr.bf16.mxu0 %v8596_v63  ;;  %v8656_v63 = vld [vmem:[%s11877_s1 + $0xe2c] ss:$12 sps:$4 sm:$0xff]   ;;  %v8657_v0 = vld [vmem:[%s11877_s1 + $0x470] ss:$12 sps:$4 sm:$0xff]  }
 0x133   : > { %7759 = vmatpush3.bf16.msra.mxu1 %v8598_v1  ;;  %v8658_v1 = vld [vmem:[%s11877_s1 + $0x3b0] ss:$12 sps:$4 sm:$0xff]  }
 0x134   : > { %5876 = vmatpush1.bf16.msra.mxu0 %v8594_v40  ;;  %7760 = vmatprep.subr.bf16.mxu1 %v8602_v3  ;;  %v8654_v40 = vld [vmem:[%s11877_s1 + $0xe28] ss:$12 sps:$4 sm:$0xff]  }
 0x135   : > { %5877 = vmatprep.subr.bf16.mxu0 %v8601_v2  ;;  %v8661_v2 = vld [vmem:[%s11877_s1 + $0xe44] ss:$12 sps:$4 sm:$0xff]   ;;  %v8662_v3 = vld [vmem:[%s11877_s1 + $0x548] ss:$12 sps:$4 sm:$0xff]  }
 0x137   : > { %7761 = vmatpush3.bf16.msra.mxu1 %v8603_v11  ;;  %v8663_v11 = vld [vmem:[%s11877_s1 + $0x488] ss:$12 sps:$4 sm:$0xff]  }
 0x138   : > { %5878 = vmatpush1.bf16.msra.mxu0 %v8599_v4  ;;  %7762 = vmatprep.subr.bf16.mxu1 %v8607_v44  ;;  %v8659_v4 = vld [vmem:[%s11877_s1 + $0xe40] ss:$12 sps:$4 sm:$0xff]  }
 0x139   : > { %5879 = vmatprep.subr.bf16.mxu0 %v8606_v12  ;;  %v8666_v12 = vld [vmem:[%s11877_s1 + $0xe5c] ss:$12 sps:$4 sm:$0xff]   ;;  %v8667_v44 = vld [vmem:[%s11877_s1 + $0x560] ss:$12 sps:$4 sm:$0xff]  }
 0x13b   : > { %7763 = vmatpush3.bf16.msra.mxu1 %v8608_v50  ;;  %v8668_v50 = vld [vmem:[%s11877_s1 + $0x4a0] ss:$12 sps:$4 sm:$0xff]  }
 0x13c   : > { %5880 = vmatpush1.bf16.msra.mxu0 %v8604_v46  ;;  %7764 = vmatprep.subr.bf16.mxu1 %v8612_v14  ;;  %v8664_v46 = vld [vmem:[%s11877_s1 + $0xe58] ss:$12 sps:$4 sm:$0xff]  }
 0x13d   : > { %5881 = vmatprep.subr.bf16.mxu0 %v8611_v13  ;;  %v8671_v13 = vld [vmem:[%s11877_s1 + $0xe74] ss:$12 sps:$4 sm:$0xff]   ;;  %v8672_v14 = vld [vmem:[%s11877_s1 + $0x578] ss:$12 sps:$4 sm:$0xff]  }
 0x13f   : > { %7765 = vmatpush3.bf16.msra.mxu1 %v8613_v16  ;;  %v8676_v16 = vld [vmem:[%s11877_s1 + $0xe8c] ss:$12 sps:$4 sm:$0xff]  }
 0x140   : > { %5882 = vmatpush1.bf16.msra.mxu0 %v8609_v15  ;;  %7766 = vmatprep.subr.bf16.mxu1 %v8617_v52  ;;  %v8673_v15 = vld [vmem:[%s11877_s1 + $0x4b8] ss:$12 sps:$4 sm:$0xff]   ;;  %v8678_v52 = vld [vmem:[%s11877_s1 + $0x4d0] ss:$12 sps:$4 sm:$0xff]  }
 0x141   : > { %5883 = vmatprep.subr.bf16.mxu0 %v8616_v17  ;;  %v8674_v17 = vld [vmem:[%s11877_s1 + $0xe88] ss:$12 sps:$4 sm:$0xff]  }
 0x143   : > { %7767 = vmatpush3.bf16.msra.mxu1 %v8618_v19  ;;  %v8682_v19 = vld [vmem:[%s11877_s1 + $0x5a8] ss:$12 sps:$4 sm:$0xff]  }
 0x144   : > { %5884 = vmatpush1.bf16.msra.mxu0 %v8614_v18  ;;  %7774 = vmatprep.subr.bf16.mxu1 %v8622_v23  ;;  %v8681_v18 = vld [vmem:[%s11877_s1 + $0xea4] ss:$12 sps:$4 sm:$0xff]   ;;  %v8683_v23 = vld [vmem:[%s11877_s1 + $0x4e8] ss:$12 sps:$4 sm:$0xff]  }
 0x145   : > { %5896 = vmatprep.subr.bf16.mxu0 %v8621_v21  ;;  %v8679_v21 = vld [vmem:[%s11877_s1 + $0xea0] ss:$12 sps:$4 sm:$0xff]  }
 0x146   : > { %6271 = vmatmul.mubr.bf16.vlgmr.msra.gmra.mrb[8].mxu1 %v9656_v20  ;;  %v8629_v20 = vld [vmem:[%s11877_s1 + $0xdb0] ss:$12 sps:$4 sm:$0xff]  }
 0x147   : > { %5886 = vmatmul.mubr.bf16.vlgmr.msra.gmra.mrb[0].mxu0 %v10326_v26  ;;  %7775 = vmatpush3.bf16.msra.mxu1 %v8623_v30  ;;  %v8687_v30 = vld [vmem:[%s11877_s1 + $0x5c0] ss:$12 sps:$4 sm:$0xff]  }
 0x148   : > { %5897 = vmatpush1.bf16.msra.mxu0 %v8619_v24  ;;  %7776 = vmatprep.subr.bf16.mxu1 %v8627_v36  ;;  %v8686_v24 = vld [vmem:[%s11877_s1 + $0xebc] ss:$12 sps:$4 sm:$0xff]   ;;  %v8688_v36 = vld [vmem:[%s11877_s1 + $0x500] ss:$12 sps:$4 sm:$0xff]  }
 0x149   : > { %5898 = vmatprep.subr.bf16.mxu0 %v8626_v31  ;;  %6311 = vmatprep.mubr.bf16.mxu1 %v9696_v32  ;;  %v8637_v32 = vld [vmem:[%s11877_s1 + $0x410] ss:$12 sps:$4 sm:$0xff]   ;;  %v8684_v31 = vld [vmem:[%s11877_s1 + $0xeb8] ss:$12 sps:$4 sm:$0xff]  }
 0x14a   : > { %5928 = vmatprep.mubr.bf16.mxu0 %v10345_v9 }
 0x14b   : > { %7777 = vmatpush3.bf16.msra.mxu1 %v8628_v37  ;;  %v8692_v37 = vld [vmem:[%s11877_s1 + $0x5d8] ss:$12 sps:$4 sm:$0xff]  }
 0x14c   : > { %5899 = vmatpush1.bf16.msra.mxu0 %v8624_v5  ;;  %7778 = vmatprep.subr.bf16.mxu1 %v8632_v39  ;;  %v8691_v5 = vld [vmem:[%s11877_s1 + $0xed4] ss:$12 sps:$4 sm:$0xff]   ;;  %v8693_v39 = vld [vmem:[%s11877_s1 + $0x518] ss:$12 sps:$4 sm:$0xff]  }
 0x14d   : > { %5900 = vmatprep.subr.bf16.mxu0 %v8631_v38  ;;  %v8689_v38 = vld [vmem:[%s11877_s1 + $0xed0] ss:$12 sps:$4 sm:$0xff]  }
 0x14f   : > { %7779 = vmatpush3.bf16.msra.mxu1 %v8633_v41  ;;  %v8697_v41 = vld [vmem:[%s11877_s1 + $0x5f0] ss:$12 sps:$4 sm:$0xff]  }
 0x150   : > { %5901 = vmatpush1.bf16.msra.mxu0 %v8629_v20  ;;  %7780 = vmatprep.subr.bf16.mxu1 %v8637_v32  ;;  %v8696_v20 = vld [vmem:[%s11877_s1 + $0xeec] ss:$12 sps:$4 sm:$0xff]   ;;  %v8698_v32 = vld [vmem:[%s11877_s1 + $0x530] ss:$12 sps:$4 sm:$0xff]  }
 0x151   : > { %5902 = vmatprep.subr.bf16.mxu0 %v8636_v42  ;;  %v8694_v42 = vld [vmem:[%s11877_s1 + $0xee8] ss:$12 sps:$4 sm:$0xff]  }
 0x153   : > { %7781 = vmatpush3.bf16.msra.mxu1 %v8638_v51  ;;  %v8702_v51 = vld [vmem:[%s11877_s1 + $0x6c8] ss:$12 sps:$4 sm:$0xff]  }
 0x154   : > { %5903 = vmatpush1.bf16.msra.mxu0 %v8634_v45  ;;  %7782 = vmatprep.subr.bf16.mxu1 %v8642_v28  ;;  %v8701_v45 = vld [vmem:[%s11877_s1 + $0xf04] ss:$12 sps:$4 sm:$0xff]   ;;  %v8703_v28 = vld [vmem:[%s11877_s1 + $0x608] ss:$12 sps:$4 sm:$0xff]  }
 0x155   : > { %5904 = vmatprep.subr.bf16.mxu0 %v8641_v53  ;;  %v8699_v53 = vld [vmem:[%s11877_s1 + $0xf00] ss:$12 sps:$4 sm:$0xff]  }
 0x157   : > { %7783 = vmatpush3.bf16.msra.mxu1 %v8643_v54  ;;  %v10541_v54 = vcombine.low %v10322_v25, %v10329_v27  ;;  %v8704_v25 = vld [vmem:[%s11877_s1 + $0xf18] ss:$12 sps:$4 sm:$0xff]   ;;  %v8708_v27 = vld [vmem:[%s11877_s1 + $0x620] ss:$12 sps:$4 sm:$0xff]  }
 0x158   : > { %5905 = vmatpush1.bf16.msra.mxu0 %v8639_v29  ;;  %7784 = vmatprep.subr.bf16.mxu1 %v8647_v57  ;;  %v10537_v29 = vld [vmem:[%s9356_s4 + $0x50] sm:$0xff]  ;;  %v8706_v57 = vld [vmem:[%s11877_s1 + $0xf1c] ss:$12 sps:$4 sm:$0xff]  }
 0x159   : > { %5906 = vmatprep.subr.bf16.mxu0 %v8646_v56  ;;  %v10544_v56 = vld [vmem:[%s9356_s4 + $0xd0] sm:$0xff] }
 0x15b   : > { %7785 = vmatpush3.bf16.msra.mxu1 %v8648_v59  ;;  %v10554_v59 = vcombine.high %v10537_v29, %v10544_v56 }
 0x15c   : > { %5907 = vmatpush1.bf16.msra.mxu0 %v8644_v58  ;;  %7786 = vmatprep.subr.bf16.mxu1 %v8652_v8  ;;  %v8707_v58 = vld [vmem:[%s11877_s1 + $0x6e0] ss:$12 sps:$4 sm:$0xff]   ;;  %v8709_v8 = vld [vmem:[%s11877_s1 + $0xf30] ss:$12 sps:$4 sm:$0xff]  }
 0x15d   : > { %5908 = vmatprep.subr.bf16.mxu0 %v8651_v60  ;;  %v8711_v60 = vld [vmem:[%s11877_s1 + $0xf34] ss:$12 sps:$4 sm:$0xff]  }
 0x15f   : > { %7787 = vmatpush3.bf16.msra.mxu1 %v8653_v62  ;;  %v8716_v62 = vld [vmem:[%s11877_s1 + $0xf4c] ss:$12 sps:$4 sm:$0xff]  }
 0x160   : > { %5909 = vmatpush1.bf16.msra.mxu0 %v8649_v61  ;;  %7788 = vmatprep.subr.bf16.mxu1 %v8657_v0  ;;  %v8713_v61 = vld [vmem:[%s11877_s1 + $0x638] ss:$12 sps:$4 sm:$0xff]   ;;  %v8718_v0 = vld [vmem:[%s11877_s1 + $0x650] ss:$12 sps:$4 sm:$0xff]  }
 0x161   : > { %5910 = vmatprep.subr.bf16.mxu0 %v8656_v63  ;;  %v8714_v63 = vld [vmem:[%s11877_s1 + $0xf48] ss:$12 sps:$4 sm:$0xff]  }
 0x163   : > { %7789 = vmatpush3.bf16.msra.mxu1 %v8658_v1  ;;  %v8722_v1 = vld [vmem:[%s11877_s1 + $0x728] ss:$12 sps:$4 sm:$0xff]  }
 0x164   : > { %5911 = vmatpush1.bf16.msra.mxu0 %v8654_v40  ;;  %7796 = vmatprep.subr.bf16.mxu1 %v8662_v3  ;;  %v8721_v40 = vld [vmem:[%s11877_s1 + $0xf64] ss:$12 sps:$4 sm:$0xff]   ;;  %v8723_v3 = vld [vmem:[%s11877_s1 + $0x668] ss:$12 sps:$4 sm:$0xff]  }
 0x165   : > { %5912 = vmatprep.subr.bf16.mxu0 %v8661_v2  ;;  %v8719_v2 = vld [vmem:[%s11877_s1 + $0xf60] ss:$12 sps:$4 sm:$0xff]  }
 0x166   : > { %6312 = vmatmul.mubr.bf16.vlgmr.msra.gmra.mrb[12].mxu1 %v9892_v48  ;;  %v8669_v48 = vld [vmem:[%s11877_s1 + $0xe70] ss:$12 sps:$4 sm:$0xff]  }
 0x167   : > { %7797 = vmatpush3.bf16.msra.mxu1 %v8663_v11  ;;  %6352 = vmatprep.mubr.bf16.mxu1 %v9915_v33  ;;  %v8677_v33 = vld [vmem:[%s11877_s1 + $0x590] ss:$12 sps:$4 sm:$0xff]   ;;  %v8727_v11 = vld [vmem:[%s11877_s1 + $0x740] ss:$12 sps:$4 sm:$0xff]  }
 0x168   : > { %5913 = vmatpush1.bf16.msra.mxu0 %v8659_v4  ;;  %7798 = vmatprep.subr.bf16.mxu1 %v8667_v44  ;;  %v8726_v4 = vld [vmem:[%s11877_s1 + $0xf7c] ss:$12 sps:$4 sm:$0xff]   ;;  %v8728_v44 = vld [vmem:[%s11877_s1 + $0x680] ss:$12 sps:$4 sm:$0xff]  }
 0x169   : > { %5914 = vmatprep.subr.bf16.mxu0 %v8666_v12  ;;  %v8724_v12 = vld [vmem:[%s11877_s1 + $0xf78] ss:$12 sps:$4 sm:$0xff]  }
 0x16b   : > { %7799 = vmatpush3.bf16.msra.mxu1 %v8668_v50  ;;  %v8732_v50 = vld [vmem:[%s11877_s1 + $0x758] ss:$12 sps:$4 sm:$0xff]  }
 0x16c   : > { %5915 = vmatpush1.bf16.msra.mxu0 %v8664_v46  ;;  %7800 = vmatprep.subr.bf16.mxu1 %v8672_v14  ;;  %v8731_v46 = vld [vmem:[%s11877_s1 + $0xf94] ss:$12 sps:$4 sm:$0xff]   ;;  %v8733_v14 = vld [vmem:[%s11877_s1 + $0x698] ss:$12 sps:$4 sm:$0xff]  }
 0x16d   : > { %5916 = vmatprep.subr.bf16.mxu0 %v8671_v13  ;;  %v8729_v13 = vld [vmem:[%s11877_s1 + $0xf90] ss:$12 sps:$4 sm:$0xff]  }
 0x16f   : > { %7801 = vmatpush3.bf16.msra.mxu1 %v8673_v15  ;;  %v8737_v15 = vld [vmem:[%s11877_s1 + $0x770] ss:$12 sps:$4 sm:$0xff]  }
 0x170   : > { %5917 = vmatpush1.bf16.msra.mxu0 %v8669_v48  ;;  %7802 = vmatprep.subr.bf16.mxu1 %v8677_v33  ;;  %v8736_v48 = vld [vmem:[%s11877_s1 + $0xfac] ss:$12 sps:$4 sm:$0xff]   ;;  %v8738_v33 = vld [vmem:[%s11877_s1 + $0x6b0] ss:$12 sps:$4 sm:$0xff]  }
 0x171   : > { %5918 = vmatprep.subr.bf16.mxu0 %v8676_v16  ;;  %v8734_v16 = vld [vmem:[%s11877_s1 + $0xfa8] ss:$12 sps:$4 sm:$0xff]  }
 0x173   : > { %7803 = vmatpush3.bf16.msra.mxu1 %v8678_v52  ;;  %v8742_v52 = vld [vmem:[%s11877_s1 + $0x848] ss:$12 sps:$4 sm:$0xff]  }
 0x174   : > { %5919 = vmatpush1.bf16.msra.mxu0 %v8674_v17  ;;  %7804 = vmatprep.subr.bf16.mxu1 %v8682_v19  ;;  %v8741_v17 = vld [vmem:[%s11877_s1 + $0xfc4] ss:$12 sps:$4 sm:$0xff]   ;;  %v8743_v19 = vld [vmem:[%s11877_s1 + $0x788] ss:$12 sps:$4 sm:$0xff]  }
 0x175   : > { %5920 = vmatprep.subr.bf16.mxu0 %v8681_v18  ;;  %v8739_v18 = vld [vmem:[%s11877_s1 + $0xfc0] ss:$12 sps:$4 sm:$0xff]  }
 0x177   : > { %7805 = vmatpush3.bf16.msra.mxu1 %v8683_v23  ;;  %v8747_v23 = vld [vmem:[%s11877_s1 + $0x860] ss:$12 sps:$4 sm:$0xff]  }
 0x178   : > { %5921 = vmatpush1.bf16.msra.mxu0 %v8679_v21  ;;  %7806 = vmatprep.subr.bf16.mxu1 %v8687_v30  ;;  %v8746_v21 = vld [vmem:[%s11877_s1 + $0xfdc] ss:$12 sps:$4 sm:$0xff]   ;;  %v8748_v30 = vld [vmem:[%s11877_s1 + $0x7a0] ss:$12 sps:$4 sm:$0xff]  }
 0x179   : > { %5922 = vmatprep.subr.bf16.mxu0 %v8686_v24  ;;  %v8744_v24 = vld [vmem:[%s11877_s1 + $0xfd8] ss:$12 sps:$4 sm:$0xff]  }
 0x17b   : > { %7807 = vmatpush3.bf16.msra.mxu1 %v8688_v36  ;;  %v8752_v36 = vld [vmem:[%s11877_s1 + $0x878] ss:$12 sps:$4 sm:$0xff]  }
 0x17c   : > { %5923 = vmatpush1.bf16.msra.mxu0 %v8684_v31  ;;  %7808 = vmatprep.subr.bf16.mxu1 %v8692_v37  ;;  %v8751_v31 = vld [vmem:[%s11877_s1 + $0xff4] ss:$12 sps:$4 sm:$0xff]   ;;  %v8756_v37 = vld [vmem:[%s11877_s1 + $0x100c] ss:$12 sps:$4 sm:$0xff]  }
 0x17d   : > { %5924 = vmatprep.subr.bf16.mxu0 %v8691_v5  ;;  %v8753_v5 = vld [vmem:[%s11877_s1 + $0x7b8] ss:$12 sps:$4 sm:$0xff]  }
 0x17f   : > { %7809 = vmatpush3.bf16.msra.mxu1 %v8693_v39  ;;  %v8758_v39 = vld [vmem:[%s11877_s1 + $0x7d0] ss:$12 sps:$4 sm:$0xff]  }
 0x180   : > { %5925 = vmatpush1.bf16.msra.mxu0 %v8689_v38  ;;  %7810 = vmatprep.subr.bf16.mxu1 %v8697_v41  ;;  %v8754_v38 = vld [vmem:[%s11877_s1 + $0x1008] ss:$12 sps:$4 sm:$0xff]  }
 0x181   : > { %5926 = vmatprep.subr.bf16.mxu0 %v8696_v20  ;;  %v8761_v20 = vld [vmem:[%s11877_s1 + $0x1024] ss:$12 sps:$4 sm:$0xff]   ;;  %v8762_v41 = vld [vmem:[%s11877_s1 + $0x8a8] ss:$12 sps:$4 sm:$0xff]  }
 0x183   : > { %7811 = vmatpush3.bf16.msra.mxu1 %v8698_v32  ;;  %v8763_v32 = vld [vmem:[%s11877_s1 + $0x7e8] ss:$12 sps:$4 sm:$0xff]  }
 0x184   : > { %5927 = vmatpush1.bf16.msra.mxu0 %v8694_v42  ;;  %7818 = vmatprep.subr.bf16.mxu1 %v8702_v51  ;;  %v8759_v42 = vld [vmem:[%s11877_s1 + $0x1020] ss:$12 sps:$4 sm:$0xff]  }
 0x185   : > { %5939 = vmatprep.subr.bf16.mxu0 %v8701_v45  ;;  %v8766_v45 = vld [vmem:[%s11877_s1 + $0x103c] ss:$12 sps:$4 sm:$0xff]   ;;  %v8767_v51 = vld [vmem:[%s11877_s1 + $0x8c0] ss:$12 sps:$4 sm:$0xff]  }
 0x186   : > { %6353 = vmatmul.mubr.bf16.vlgmr.msra.gmra.mrb[16].mxu1 %v10110_v6  ;;  %v8712_v6 = vld [vmem:[%s11877_s1 + $0x6f8] ss:$12 sps:$4 sm:$0xff]  }
 0x187   : > { %5929 = vmatmul.mubr.bf16.vlgmr.msra.gmra.mrb[0].mxu0 %v10541_v54  ;;  %7819 = vmatpush3.bf16.msra.mxu1 %v8703_v28  ;;  %v8768_v28 = vld [vmem:[%s11877_s1 + $0x800] ss:$12 sps:$4 sm:$0xff]  }
 0x188   : > { %5940 = vmatpush1.bf16.msra.mxu0 %v8699_v53  ;;  %7820 = vmatprep.subr.bf16.mxu1 %v8707_v58  ;;  %v8764_v53 = vld [vmem:[%s11877_s1 + $0x1038] ss:$12 sps:$4 sm:$0xff]  }
 0x189   : > { %5941 = vmatprep.subr.bf16.mxu0 %v8706_v57  ;;  %6393 = vmatprep.mubr.bf16.mxu1 %v9383_v55  ;;  %v8717_v55 = vld [vmem:[%s11877_s1 + $0x710] ss:$12 sps:$4 sm:$0xff]   ;;  %v8771_v57 = vld [vmem:[%s11877_s1 + $0x1054] ss:$12 sps:$4 sm:$0xff]   ;;  %v8772_v58 = vld [vmem:[%s11877_s1 + $0x8d8] ss:$12 sps:$4 sm:$0xff]  }
 0x18a   : > { %5971 = vmatprep.mubr.bf16.mxu0 %v10554_v59 }
 0x18b   : > { %7821 = vmatpush3.bf16.msra.mxu1 %v8708_v27  ;;  %v8773_v27 = vld [vmem:[%s11877_s1 + $0x818] ss:$12 sps:$4 sm:$0xff]  }
 0x18c   : > { %5942 = vmatpush1.bf16.msra.mxu0 %v8704_v25  ;;  %7822 = vmatprep.subr.bf16.mxu1 %v8712_v6  ;;  %v8769_v25 = vld [vmem:[%s11877_s1 + $0x1050] ss:$12 sps:$4 sm:$0xff]  }
 0x18d   : > { %5943 = vmatprep.subr.bf16.mxu0 %v8711_v60  ;;  %v8776_v60 = vld [vmem:[%s11877_s1 + $0x106c] ss:$12 sps:$4 sm:$0xff]   ;;  %v8777_v6 = vld [vmem:[%s11877_s1 + $0x8f0] ss:$12 sps:$4 sm:$0xff]  }
 0x18f   : > { %7823 = vmatpush3.bf16.msra.mxu1 %v8713_v61  ;;  %v8778_v61 = vld [vmem:[%s11877_s1 + $0x830] ss:$12 sps:$4 sm:$0xff]  }
 0x190   : > { %5944 = vmatpush1.bf16.msra.mxu0 %v8709_v8  ;;  %7824 = vmatprep.subr.bf16.mxu1 %v8717_v55  ;;  %v8774_v8 = vld [vmem:[%s11877_s1 + $0x1068] ss:$12 sps:$4 sm:$0xff]  }
 0x191   : > { %5945 = vmatprep.subr.bf16.mxu0 %v8716_v62  ;;  %v8781_v62 = vld [vmem:[%s11877_s1 + $0x1084] ss:$12 sps:$4 sm:$0xff]   ;;  %v8782_v55 = vld [vmem:[%s11877_s1 + $0x9c8] ss:$12 sps:$4 sm:$0xff]  }
 0x193   : > { %7825 = vmatpush3.bf16.msra.mxu1 %v8718_v0  ;;  %v10746_v0 = vld [vmem:[%s9356_s4 + $0xd8] sm:$0xff] }
 0x194   : > { %5946 = vmatpush1.bf16.msra.mxu0 %v8714_v63  ;;  %7826 = vmatprep.subr.bf16.mxu1 %v8722_v1  ;;  %v10743_v63 = vld [vmem:[%s9356_s4 + $0x58] sm:$0xff]  ;;  %v8779_v1 = vld [vmem:[%s11877_s1 + $0x1080] ss:$12 sps:$4 sm:$0xff]  }
 0x195   : > { %5947 = vmatprep.subr.bf16.mxu0 %v8721_v40  ;;  %v10750_v40 = vcombine.low %v10537_v29, %v10544_v56  ;;  %v8787_v29 = vld [vmem:[%s11877_s1 + $0x9e0] ss:$12 sps:$4 sm:$0xff]   ;;  %v8784_v56 = vld [vmem:[%s11877_s1 + $0x1098] ss:$12 sps:$4 sm:$0xff]  }
 0x197   : > { %7827 = vmatpush3.bf16.msra.mxu1 %v8723_v3  ;;  %v8786_v3 = vld [vmem:[%s11877_s1 + $0x109c] ss:$12 sps:$4 sm:$0xff]  }
 0x198   : > { %5948 = vmatpush1.bf16.msra.mxu0 %v8719_v2  ;;  %7828 = vmatprep.subr.bf16.mxu1 %v8727_v11  ;;  %v8783_v2 = vld [vmem:[%s11877_s1 + $0x908] ss:$12 sps:$4 sm:$0xff]   ;;  %v8788_v11 = vld [vmem:[%s11877_s1 + $0x920] ss:$12 sps:$4 sm:$0xff]  }
 0x199   : > { %5949 = vmatprep.subr.bf16.mxu0 %v8726_v4  ;;  %v10769_v4 = vcombine.high %v10743_v63, %v10746_v0 }
 0x19b   : > { %7829 = vmatpush3.bf16.msra.mxu1 %v8728_v44  ;;  %v8792_v44 = vld [vmem:[%s11877_s1 + $0x9f8] ss:$12 sps:$4 sm:$0xff]  }
 0x19c   : > { %5950 = vmatpush1.bf16.msra.mxu0 %v8724_v12  ;;  %7830 = vmatprep.subr.bf16.mxu1 %v8732_v50  ;;  %v8791_v12 = vld [vmem:[%s11877_s1 + $0x10b4] ss:$12 sps:$4 sm:$0xff]   ;;  %v8796_v50 = vld [vmem:[%s11877_s1 + $0x10cc] ss:$12 sps:$4 sm:$0xff]  }
 0x19d   : > { %5951 = vmatprep.subr.bf16.mxu0 %v8731_v46  ;;  %v8793_v46 = vld [vmem:[%s11877_s1 + $0x938] ss:$12 sps:$4 sm:$0xff]  }
 0x19f   : > { %7831 = vmatpush3.bf16.msra.mxu1 %v8733_v14  ;;  %v8798_v14 = vld [vmem:[%s11877_s1 + $0x950] ss:$12 sps:$4 sm:$0xff]  }
 0x1a0   : > { %5952 = vmatpush1.bf16.msra.mxu0 %v8729_v13  ;;  %7832 = vmatprep.subr.bf16.mxu1 %v8737_v15  ;;  %v8797_v13 = vld [vmem:[%s11877_s1 + $0xa10] ss:$12 sps:$4 sm:$0xff]   ;;  %v8802_v15 = vld [vmem:[%s11877_s1 + $0xa28] ss:$12 sps:$4 sm:$0xff]  }
 0x1a1   : > { %5953 = vmatprep.subr.bf16.mxu0 %v8736_v48  ;;  %v8801_v48 = vld [vmem:[%s11877_s1 + $0x10e4] ss:$12 sps:$4 sm:$0xff]  }
 0x1a3   : > { %7833 = vmatpush3.bf16.msra.mxu1 %v8738_v33  ;;  %v8803_v33 = vld [vmem:[%s11877_s1 + $0x968] ss:$12 sps:$4 sm:$0xff]  }
 0x1a4   : > { %5954 = vmatpush1.bf16.msra.mxu0 %v8734_v16  ;;  %7840 = vmatprep.subr.bf16.mxu1 %v8742_v52  ;;  %v8799_v16 = vld [vmem:[%s11877_s1 + $0x10e0] ss:$12 sps:$4 sm:$0xff]  }
 0x1a5   : > { %5955 = vmatprep.subr.bf16.mxu0 %v8741_v17  ;;  %v8806_v17 = vld [vmem:[%s11877_s1 + $0x10fc] ss:$12 sps:$4 sm:$0xff]   ;;  %v8807_v52 = vld [vmem:[%s11877_s1 + $0xa40] ss:$12 sps:$4 sm:$0xff]  }
 0x1a6   : > { %6394 = vmatmul.mubr.bf16.vlgmr.msra.gmra.mrb[20].mxu1 %v9439_v10  ;;  %v8749_v10 = vld [vmem:[%s11877_s1 + $0xff0] ss:$12 sps:$4 sm:$0xff]  }
 0x1a7   : > { %7841 = vmatpush3.bf16.msra.mxu1 %v8743_v19  ;;  %6434 = vmatprep.mubr.bf16.mxu1 %v9543_v43  ;;  %v8757_v43 = vld [vmem:[%s11877_s1 + $0x890] ss:$12 sps:$4 sm:$0xff]   ;;  %v8808_v19 = vld [vmem:[%s11877_s1 + $0x980] ss:$12 sps:$4 sm:$0xff]  }
 0x1a8   : > { %5956 = vmatpush1.bf16.msra.mxu0 %v8739_v18  ;;  %7842 = vmatprep.subr.bf16.mxu1 %v8747_v23  ;;  %v8804_v18 = vld [vmem:[%s11877_s1 + $0x10f8] ss:$12 sps:$4 sm:$0xff]  }
 0x1a9   : > { %5957 = vmatprep.subr.bf16.mxu0 %v8746_v21  ;;  %v8811_v21 = vld [vmem:[%s11877_s1 + $0x1114] ss:$12 sps:$4 sm:$0xff]   ;;  %v8812_v23 = vld [vmem:[%s11877_s1 + $0xa58] ss:$12 sps:$4 sm:$0xff]  }
 0x1ab   : > { %7843 = vmatpush3.bf16.msra.mxu1 %v8748_v30  ;;  %v8809_v30 = vld [vmem:[%s11877_s1 + $0x1110] ss:$12 sps:$4 sm:$0xff]  }
 0x1ac   : > { %5958 = vmatpush1.bf16.msra.mxu0 %v8744_v24  ;;  %7844 = vmatprep.subr.bf16.mxu1 %v8752_v36 }
 0x1ad   : > { %5959 = vmatprep.subr.bf16.mxu0 %v8751_v31  ;;  %v8813_v31 = vld [vmem:[%s11877_s1 + $0x998] ss:$12 sps:$4 sm:$0xff]  }
 0x1af   : > { %7845 = vmatpush3.bf16.msra.mxu1 %v8753_v5 }
 0x1b0   : > { %5960 = vmatpush1.bf16.msra.mxu0 %v8749_v10  ;;  %7846 = vmatprep.subr.bf16.mxu1 %v8757_v43  ;;  %v8817_v43 = vld [vmem:[%s11877_s1 + $0xa70] ss:$12 sps:$4 sm:$0xff]  }
 0x1b1   : > { %5961 = vmatprep.subr.bf16.mxu0 %v8756_v37  ;;  %v8816_v37 = vld [vmem:[%s11877_s1 + $0x112c] ss:$12 sps:$4 sm:$0xff]  }
 0x1b3   : > { %7847 = vmatpush3.bf16.msra.mxu1 %v8758_v39  ;;  %v8818_v39 = vld [vmem:[%s11877_s1 + $0x9b0] ss:$12 sps:$4 sm:$0xff]  }
 0x1b4   : > { %5962 = vmatpush1.bf16.msra.mxu0 %v8754_v38  ;;  %7848 = vmatprep.subr.bf16.mxu1 %v8762_v41  ;;  %v8814_v38 = vld [vmem:[%s11877_s1 + $0x1128] ss:$12 sps:$4 sm:$0xff]  }
 0x1b5   : > { %5963 = vmatprep.subr.bf16.mxu0 %v8761_v20  ;;  %v8821_v20 = vld [vmem:[%s11877_s1 + $0x1144] ss:$12 sps:$4 sm:$0xff]   ;;  %v8822_v41 = vld [vmem:[%s11877_s1 + $0xb48] ss:$12 sps:$4 sm:$0xff]  }
 0x1b7   : > { %7849 = vmatpush3.bf16.msra.mxu1 %v8763_v32  ;;  %v8823_v32 = vld [vmem:[%s11877_s1 + $0xa88] ss:$12 sps:$4 sm:$0xff]  }
 0x1b8   : > { %5964 = vmatpush1.bf16.msra.mxu0 %v8759_v42  ;;  %7850 = vmatprep.subr.bf16.mxu1 %v8767_v51  ;;  %v8819_v42 = vld [vmem:[%s11877_s1 + $0x1140] ss:$12 sps:$4 sm:$0xff]  }
 0x1b9   : > { %5965 = vmatprep.subr.bf16.mxu0 %v8766_v45  ;;  %v8826_v45 = vld [vmem:[%s11877_s1 + $0x115c] ss:$12 sps:$4 sm:$0xff]   ;;  %v8827_v51 = vld [vmem:[%s11877_s1 + $0xb60] ss:$12 sps:$4 sm:$0xff]  }
 0x1bb   : > { %7851 = vmatpush3.bf16.msra.mxu1 %v8768_v28  ;;  %v8828_v28 = vld [vmem:[%s11877_s1 + $0xaa0] ss:$12 sps:$4 sm:$0xff]  }
 0x1bc   : > { %5966 = vmatpush1.bf16.msra.mxu0 %v8764_v53  ;;  %7852 = vmatprep.subr.bf16.mxu1 %v8772_v58  ;;  %v8824_v53 = vld [vmem:[%s11877_s1 + $0x1158] ss:$12 sps:$4 sm:$0xff]  }
 0x1bd   : > { %5967 = vmatprep.subr.bf16.mxu0 %v8771_v57  ;;  %v8831_v57 = vld [vmem:[%s11877_s1 + $0x1174] ss:$12 sps:$4 sm:$0xff]   ;;  %v8832_v58 = vld [vmem:[%s11877_s1 + $0xb78] ss:$12 sps:$4 sm:$0xff]  }
 0x1bf   : > { %7853 = vmatpush3.bf16.msra.mxu1 %v8773_v27  ;;  %v8836_v27 = vld [vmem:[%s11877_s1 + $0x118c] ss:$12 sps:$4 sm:$0xff]  }
 0x1c0   : > { %5968 = vmatpush1.bf16.msra.mxu0 %v8769_v25  ;;  %7854 = vmatprep.subr.bf16.mxu1 %v8777_v6  ;;  %v8833_v25 = vld [vmem:[%s11877_s1 + $0xab8] ss:$12 sps:$4 sm:$0xff]   ;;  %v8838_v6 = vld [vmem:[%s11877_s1 + $0xad0] ss:$12 sps:$4 sm:$0xff]  }
 0x1c1   : > { %5969 = vmatprep.subr.bf16.mxu0 %v8776_v60  ;;  %v8837_v60 = vld [vmem:[%s11877_s1 + $0xb90] ss:$12 sps:$4 sm:$0xff]  }
 0x1c3   : > { %7855 = vmatpush3.bf16.msra.mxu1 %v8778_v61  ;;  %v8842_v61 = vld [vmem:[%s11877_s1 + $0xba8] ss:$12 sps:$4 sm:$0xff]  }
 0x1c4   : > { %5970 = vmatpush1.bf16.msra.mxu0 %v8774_v8  ;;  %7862 = vmatprep.subr.bf16.mxu1 %v8782_v55  ;;  %v8841_v8 = vld [vmem:[%s11877_s1 + $0x11a4] ss:$12 sps:$4 sm:$0xff]   ;;  %v8843_v55 = vld [vmem:[%s11877_s1 + $0xae8] ss:$12 sps:$4 sm:$0xff]  }
 0x1c5   : > { %5982 = vmatprep.subr.bf16.mxu0 %v8781_v62  ;;  %v8839_v62 = vld [vmem:[%s11877_s1 + $0x11a0] ss:$12 sps:$4 sm:$0xff]  }
 0x1c6   : > { %6435 = vmatmul.mubr.bf16.vlgmr.msra.gmra.mrb[24].mxu1 %v9663_v22  ;;  %v8789_v22 = vld [vmem:[%s11877_s1 + $0x10b0] ss:$12 sps:$4 sm:$0xff]  }
 0x1c7   : > { %5972 = vmatmul.mubr.bf16.vlgmr.msra.gmra.mrb[0].mxu0 %v10750_v40  ;;  %7863 = vmatpush3.bf16.msra.mxu1 %v8783_v2  ;;  %v8847_v2 = vld [vmem:[%s11877_s1 + $0xbc0] ss:$12 sps:$4 sm:$0xff]  }
 0x1c8   : > { %5983 = vmatpush1.bf16.msra.mxu0 %v8779_v1  ;;  %7864 = vmatprep.subr.bf16.mxu1 %v8787_v29  ;;  %v8846_v1 = vld [vmem:[%s11877_s1 + $0x11bc] ss:$12 sps:$4 sm:$0xff]   ;;  %v8848_v29 = vld [vmem:[%s11877_s1 + $0xb00] ss:$12 sps:$4 sm:$0xff]  }
 0x1c9   : > { %5984 = vmatprep.subr.bf16.mxu0 %v8786_v3  ;;  %6475 = vmatprep.mubr.bf16.mxu1 %v9707_v35  ;;  %v8794_v35 = vld [vmem:[%s11877_s1 + $0x10c8] ss:$12 sps:$4 sm:$0xff]   ;;  %v8844_v3 = vld [vmem:[%s11877_s1 + $0x11b8] ss:$12 sps:$4 sm:$0xff]  }
 0x1ca   : > { %6014 = vmatprep.mubr.bf16.mxu0 %v10769_v4 }
 0x1cb   : > { %7865 = vmatpush3.bf16.msra.mxu1 %v8788_v11  ;;  %v8852_v11 = vld [vmem:[%s11877_s1 + $0xbd8] ss:$12 sps:$4 sm:$0xff]  }
 0x1cc   : > { %5985 = vmatpush1.bf16.msra.mxu0 %v8784_v56  ;;  %7866 = vmatprep.subr.bf16.mxu1 %v8792_v44  ;;  %v8851_v56 = vld [vmem:[%s11877_s1 + $0x11d4] ss:$12 sps:$4 sm:$0xff]   ;;  %v8849_v44 = vld [vmem:[%s11877_s1 + $0x11d0] ss:$12 sps:$4 sm:$0xff]  }
 0x1cd   : > { %5986 = vmatprep.subr.bf16.mxu0 %v8791_v12 }
 0x1cf   : > { %7867 = vmatpush3.bf16.msra.mxu1 %v8793_v46 }
 0x1d0   : > { %5987 = vmatpush1.bf16.msra.mxu0 %v8789_v22  ;;  %7868 = vmatprep.subr.bf16.mxu1 %v8797_v13  ;;  %v8853_v22 = vld [vmem:[%s11877_s1 + $0xb18] ss:$12 sps:$4 sm:$0xff]  }
 0x1d1   : > { %5988 = vmatprep.subr.bf16.mxu0 %v8796_v50 }
 0x1d3   : > { %7869 = vmatpush3.bf16.msra.mxu1 %v8798_v14  ;;  %v8856_v14 = vld [vmem:[%s11877_s1 + $0x11ec] ss:$12 sps:$4 sm:$0xff]  }
 0x1d4   : > { %5989 = vmatpush1.bf16.msra.mxu0 %v8794_v35  ;;  %7870 = vmatprep.subr.bf16.mxu1 %v8802_v15 }
 0x1d5   : > { %5990 = vmatprep.subr.bf16.mxu0 %v8801_v48  ;;  %v8857_v48 = vld [vmem:[%s11877_s1 + $0xbf0] ss:$12 sps:$4 sm:$0xff]  }
 0x1d7   : > { %7871 = vmatpush3.bf16.msra.mxu1 %v8803_v33  ;;  %v8858_v33 = vld [vmem:[%s11877_s1 + $0xb30] ss:$12 sps:$4 sm:$0xff]  }
 0x1d8   : > { %5991 = vmatpush1.bf16.msra.mxu0 %v8799_v16  ;;  %7872 = vmatprep.subr.bf16.mxu1 %v8807_v52  ;;  %v8854_v16 = vld [vmem:[%s11877_s1 + $0x11e8] ss:$12 sps:$4 sm:$0xff]  }
 0x1d9   : > { %5992 = vmatprep.subr.bf16.mxu0 %v8806_v17  ;;  %v10832_v24 = vpop.f32.mrb[0].mxu1  ;;  %v8861_v17 = vld [vmem:[%s11877_s1 + $0x1204] ss:$12 sps:$4 sm:$0xff]   ;;  %v8862_v52 = vld [vmem:[%s11877_s1 + $0xcc8] ss:$12 sps:$4 sm:$0xff]  }
 0x1da   : > { %v10840_v36 = vpop.f32.mrb[1].mxu1 }
 0x1db   : > { %v10842_v10 = vpop.f32.mrb[2].mxu1  ;;  %7873 = vmatpush3.bf16.msra.mxu1 %v8808_v19  ;;  %v10970_v19 = vld [vmem:[%s9356_s4 + $0xe0] sm:$0xff] }
 0x1dc   : > { %5993 = vmatpush1.bf16.msra.mxu0 %v8804_v18  ;;  %v10844_v5 = vpop.f32.mrb[3].mxu1  ;;  %7874 = vmatprep.subr.bf16.mxu1 %v8812_v23  ;;  %v10967_v18 = vld [vmem:[%s9356_s4 + $0x60] sm:$0xff] }
 0x1dd   : > { %5994 = vmatprep.subr.bf16.mxu0 %v8811_v21  ;;  %v10974_v21 = vcombine.low %v10743_v63, %v10746_v0  ;;  %v8859_v23 = vld [vmem:[%s11877_s1 + $0x1200] ss:$12 sps:$4 sm:$0xff]   ;;  %v8864_v0 = vld [vmem:[%s11877_s1 + $0x1218] ss:$12 sps:$4 sm:$0xff]  }
 0x1de   : > { %v8867_v63 = vld [vmem:[%s11877_s1 + $0xce0] ss:$12 sps:$4 sm:$0xff]  }
 0x1df   : > { %7875 = vmatpush3.bf16.msra.mxu1 %v8813_v31  ;;  %v8866_v31 = vld [vmem:[%s11877_s1 + $0x121c] ss:$12 sps:$4 sm:$0xff]  }
 0x1e0   : > { %5995 = vmatpush1.bf16.msra.mxu0 %v8809_v30  ;;  %7876 = vmatprep.subr.bf16.mxu1 %v8817_v43  ;;  %v8863_v30 = vld [vmem:[%s11877_s1 + $0xc08] ss:$12 sps:$4 sm:$0xff]   ;;  %v8868_v43 = vld [vmem:[%s11877_s1 + $0xc20] ss:$12 sps:$4 sm:$0xff]  }
 0x1e1   : > { %5996 = vmatprep.subr.bf16.mxu0 %v8816_v37  ;;  %v10993_v37 = vcombine.high %v10967_v18, %v10970_v19 }
 0x1e3   : > { %7877 = vmatpush3.bf16.msra.mxu1 %v8818_v39  ;;  %v8872_v39 = vld [vmem:[%s11877_s1 + $0xcf8] ss:$12 sps:$4 sm:$0xff]  }
 0x1e4   : > { %5997 = vmatpush1.bf16.msra.mxu0 %v8814_v38  ;;  %7884 = vmatprep.subr.bf16.mxu1 %v8822_v41  ;;  %v8871_v38 = vld [vmem:[%s11877_s1 + $0x1234] ss:$12 sps:$4 sm:$0xff]   ;;  %v8876_v41 = vld [vmem:[%s11877_s1 + $0x124c] ss:$12 sps:$4 sm:$0xff]  }
 0x1e5   : > { %5998 = vmatprep.subr.bf16.mxu0 %v8821_v20  ;;  %v8873_v20 = vld [vmem:[%s11877_s1 + $0xc38] ss:$12 sps:$4 sm:$0xff]  }
 0x1e6   : > { %6476 = vmatmul.mubr.bf16.vlgmr.msra.gmra.mrb[28].mxu1 %v9896_v49  ;;  %v8829_v49 = vld [vmem:[%s11877_s1 + $0x1170] ss:$12 sps:$4 sm:$0xff]  }
 0x1e7   : > { %7885 = vmatpush3.bf16.msra.mxu1 %v8823_v32  ;;  %6516 = vmatprep.mubr.bf16.mxu1 %v9919_v34  ;;  %v8834_v34 = vld [vmem:[%s11877_s1 + $0x1188] ss:$12 sps:$4 sm:$0xff]   ;;  %v8877_v32 = vld [vmem:[%s11877_s1 + $0xd10] ss:$12 sps:$4 sm:$0xff]  }
 0x1e8   : > { %5999 = vmatpush1.bf16.msra.mxu0 %v8819_v42  ;;  %7886 = vmatprep.subr.bf16.mxu1 %v8827_v51  ;;  %v1238_v42 = vlaneseq  ;;  %v8881_v51 = vld [vmem:[%s11877_s1 + $0x1264] ss:$12 sps:$4 sm:$0xff]  }
 0x1e9   : > { %6000 = vmatprep.subr.bf16.mxu0 %v8826_v45  ;;  %v8878_v45 = vld [vmem:[%s11877_s1 + $0xc50] ss:$12 sps:$4 sm:$0xff]  }
 0x1eb   : > { %7887 = vmatpush3.bf16.msra.mxu1 %v8828_v28  ;;  %v8882_v28 = vld [vmem:[%s11877_s1 + $0xd28] ss:$12 sps:$4 sm:$0xff]  }
 0x1ec   : > { %6001 = vmatpush1.bf16.msra.mxu0 %v8824_v53  ;;  %7888 = vmatprep.subr.bf16.mxu1 %v8832_v58  ;;  %v11029_v53 = vshrl.u32 %v1238_v42, 7  ;;  %v8919_v42 = vld [vmem:[%s11877_s1 + $0x1320] ss:$12 sps:$4 sm:$0xff]  }
 0x1ed   : > { %6002 = vmatprep.subr.bf16.mxu0 %v8831_v57  ;;  %v8879_v57 = vld [vmem:[%s11877_s1 + $0x1260] ss:$12 sps:$4 sm:$0xff]  }
 0x1ee   : > { %v1248_v58 = vsub.s32 2, %v11029_v53 }
 0x1ef   : > { %7889 = vmatpush3.bf16.msra.mxu1 %v8833_v25  ;;  %v8886_v25 = vld [vmem:[%s11877_s1 + $0x127c] ss:$12 sps:$4 sm:$0xff]  }
 0x1f0   : > { %6003 = vmatpush1.bf16.msra.mxu0 %v8829_v49  ;;  %7890 = vmatprep.subr.bf16.mxu1 %v8837_v60  ;;  %v8883_v49 = vld [vmem:[%s11877_s1 + $0xc68] ss:$12 sps:$4 sm:$0xff]   ;;  %v8887_v60 = vld [vmem:[%s11877_s1 + $0xd40] ss:$12 sps:$4 sm:$0xff]  }
 0x1f1   : > { %6004 = vmatprep.subr.bf16.mxu0 %v8836_v27  ;;  %v1236_v27 = vld [vmem:[%s11878_s2] sm:$0x7] }
 0x1f3   : > { %7891 = vmatpush3.bf16.msra.mxu1 %v8838_v6  ;;  %v8888_v6 = vld [vmem:[%s11877_s1 + $0xc80] ss:$12 sps:$4 sm:$0xff]  }
 0x1f4   : > { %6005 = vmatpush1.bf16.msra.mxu0 %v8834_v34  ;;  %7892 = vmatprep.subr.bf16.mxu1 %v8842_v61  ;;  %v8884_v34 = vld [vmem:[%s11877_s1 + $0x1278] ss:$12 sps:$4 sm:$0xff]   ;;  %v8891_v61 = vld [vmem:[%s11877_s1 + $0x1294] ss:$12 sps:$4 sm:$0xff]  }
 0x1f5   : > { %6006 = vmatprep.subr.bf16.mxu0 %v8841_v8  ;;  %v1249_v8 = vrot.slane %v1236_v27, %v1248_v58  ;;  %v8932_v58 = vld [vmem:[%s11877_s1 + $0xed8] ss:$12 sps:$4 sm:$0xff]  }
 0x1f6   : > { %v8933_v27 = vld [vmem:[%s11877_s1 + $0xe18] ss:$12 sps:$4 sm:$0xff]  }
 0x1f7   : > { %7893 = vmatpush3.bf16.msra.mxu1 %v8843_v55 }
 0x1f8   : > { %6007 = vmatpush1.bf16.msra.mxu0 %v8839_v62  ;;  %7894 = vmatprep.subr.bf16.mxu1 %v8847_v2  ;;  %v8892_v62 = vld [vmem:[%s11877_s1 + $0xd58] ss:$12 sps:$4 sm:$0xff]  }
 0x1f9   : > { %6008 = vmatprep.subr.bf16.mxu0 %v8846_v1  ;;  %v7746_v12 = vpop.f32.mrb[4].mxu1  ;;  %v8889_v1 = vld [vmem:[%s11877_s1 + $0x1290] ss:$12 sps:$4 sm:$0xff]   ;;  %v8893_v2 = vld [vmem:[%s11877_s1 + $0xc98] ss:$12 sps:$4 sm:$0xff]  }
 0x1fa   : > { %v7747_v46 = vpop.f32.mrb[5].mxu1 }
 0x1fb   : > { %v10944_v50 = vadd.f32 %v7747_v46, %v7746_v12  ;;  %v7749_v13 = vpop.f32.mrb[6].mxu1  ;;  %7895 = vmatpush3.bf16.msra.mxu1 %v8848_v29 }
 0x1fc   : > { %6009 = vmatpush1.bf16.msra.mxu0 %v8844_v3  ;;  %v7750_v35 = vpop.f32.mrb[7].mxu1  ;;  %7896 = vmatprep.subr.bf16.mxu1 %v8852_v11 }
 0x1fd   : > { %6010 = vmatprep.subr.bf16.mxu0 %v8851_v56  ;;  %v10952_v15 = vadd.f32 %v7750_v35, %v7749_v13  ;;  %v6232_v29 = vadd.f32 %v10944_v50, %v1249_v8  ;;  %v8894_v35 = vld [vmem:[%s11877_s1 + $0x12a8] ss:$12 sps:$4 sm:$0xff]  }
 0x1ff   : > { %7897 = vmatpush3.bf16.msra.mxu1 %v8853_v22  ;;  %v8897_v22 = vld [vmem:[%s11877_s1 + $0xd70] ss:$12 sps:$4 sm:$0xff]   ;;  %v6235_v46 = vadd.f32 %v10952_v15, %v1249_v8  ;;  %v8902_v15 = vld [vmem:[%s11877_s1 + $0xe48] ss:$12 sps:$4 sm:$0xff]  }
 0x200   : > { %6011 = vmatpush1.bf16.msra.mxu0 %v8849_v44  ;;  %7898 = vmatprep.subr.bf16.mxu1 %v8857_v48  ;;  %v8896_v44 = vld [vmem:[%s11877_s1 + $0x12ac] ss:$12 sps:$4 sm:$0xff]   ;;  %v8898_v48 = vld [vmem:[%s11877_s1 + $0xcb0] ss:$12 sps:$4 sm:$0xff]  }
 0x201   : > { %6012 = vmatprep.subr.bf16.mxu0 %v8856_v14 }
 0x203   : > { %7899 = vmatpush3.bf16.msra.mxu1 %v8858_v33  ;;  %v8899_v33 = vld [vmem:[%s11877_s1 + $0x12c0] ss:$12 sps:$4 sm:$0xff]  }
 0x204   : > { %6013 = vmatpush1.bf16.msra.mxu0 %v8854_v16  ;;  %7906 = vmatprep.subr.bf16.mxu1 %v8862_v52  ;;  %v8901_v16 = vld [vmem:[%s11877_s1 + $0x12c4] ss:$12 sps:$4 sm:$0xff]   ;;  %v8906_v52 = vld [vmem:[%s11877_s1 + $0x12dc] ss:$12 sps:$4 sm:$0xff]  }
 0x205   : > { %6025 = vmatprep.subr.bf16.mxu0 %v8861_v17  ;;  %v8903_v17 = vld [vmem:[%s11877_s1 + $0xd88] ss:$12 sps:$4 sm:$0xff]  }
 0x206   : > { %6517 = vmatmul.mubr.bf16.vlgmr.msra.gmra.mrb[32].mxu1 %v10114_v7  ;;  %v8869_v7 = vld [vmem:[%s11877_s1 + $0x1230] ss:$12 sps:$4 sm:$0xff]  }
 0x207   : > { %6015 = vmatmul.mubr.bf16.vlgmr.msra.gmra.mrb[0].mxu0 %v10974_v21  ;;  %7907 = vmatpush3.bf16.msra.mxu1 %v8863_v30  ;;  %v8904_v30 = vld [vmem:[%s11877_s1 + $0x12d8] ss:$12 sps:$4 sm:$0xff]  }
 0x208   : > { %6026 = vmatpush1.bf16.msra.mxu0 %v8859_v23  ;;  %7908 = vmatprep.subr.bf16.mxu1 %v8867_v63  ;;  %v8907_v23 = vld [vmem:[%s11877_s1 + $0xe60] ss:$12 sps:$4 sm:$0xff]  }
 0x209   : > { %6027 = vmatprep.subr.bf16.mxu0 %v8866_v31  ;;  %6557 = vmatprep.mubr.bf16.mxu1 %v10133_v47  ;;  %v8874_v47 = vld [vmem:[%s11877_s1 + $0x1248] ss:$12 sps:$4 sm:$0xff]   ;;  %v8908_v31 = vld [vmem:[%s11877_s1 + $0xda0] ss:$12 sps:$4 sm:$0xff]  }
 0x20a   : > { %6057 = vmatprep.mubr.bf16.mxu0 %v10993_v37  ;;  %v8911_v63 = vld [vmem:[%s11877_s1 + $0x12f4] ss:$12 sps:$4 sm:$0xff]  }
 0x20b   : > { %7909 = vmatpush3.bf16.msra.mxu1 %v8868_v43  ;;  %v8913_v43 = vld [vmem:[%s11877_s1 + $0xdb8] ss:$12 sps:$4 sm:$0xff]  }
 0x20c   : > { %6028 = vmatpush1.bf16.msra.mxu0 %v8864_v0  ;;  %7910 = vmatprep.subr.bf16.mxu1 %v8872_v39  ;;  %v8912_v0 = vld [vmem:[%s11877_s1 + $0xe78] ss:$12 sps:$4 sm:$0xff]   ;;  %v8917_v39 = vld [vmem:[%s11877_s1 + $0xe90] ss:$12 sps:$4 sm:$0xff]  }
 0x20d   : > { %6029 = vmatprep.subr.bf16.mxu0 %v8871_v38  ;;  %v8916_v38 = vld [vmem:[%s11877_s1 + $0x130c] ss:$12 sps:$4 sm:$0xff]  }
 0x20f   : > { %7911 = vmatpush3.bf16.msra.mxu1 %v8873_v20  ;;  %v8921_v20 = vld [vmem:[%s11877_s1 + $0x1324] ss:$12 sps:$4 sm:$0xff]  }
 0x210   : > { %6030 = vmatpush1.bf16.msra.mxu0 %v8869_v7  ;;  %7912 = vmatprep.subr.bf16.mxu1 %v8877_v32  ;;  %v8918_v7 = vld [vmem:[%s11877_s1 + $0xdd0] ss:$12 sps:$4 sm:$0xff]   ;;  %v8923_v32 = vld [vmem:[%s11877_s1 + $0xde8] ss:$12 sps:$4 sm:$0xff]  }
 0x211   : > { %6031 = vmatprep.subr.bf16.mxu0 %v8876_v41  ;;  %v8922_v41 = vld [vmem:[%s11877_s1 + $0xea8] ss:$12 sps:$4 sm:$0xff]  }
 0x213   : > { %7913 = vmatpush3.bf16.msra.mxu1 %v8878_v45  ;;  %v8927_v45 = vld [vmem:[%s11877_s1 + $0xec0] ss:$12 sps:$4 sm:$0xff]  }
 0x214   : > { %6032 = vmatpush1.bf16.msra.mxu0 %v8874_v47  ;;  %7914 = vmatprep.subr.bf16.mxu1 %v8882_v28  ;;  %v8926_v47 = vld [vmem:[%s11877_s1 + $0x133c] ss:$12 sps:$4 sm:$0xff]   ;;  %v8928_v28 = vld [vmem:[%s11877_s1 + $0xe00] ss:$12 sps:$4 sm:$0xff]  }
 0x215   : > { %6033 = vmatprep.subr.bf16.mxu0 %v8881_v51  ;;  %v8924_v51 = vld [vmem:[%s11877_s1 + $0x1338] ss:$12 sps:$4 sm:$0xff]  }
 0x217   : > { %7915 = vmatpush3.bf16.msra.mxu1 %v8883_v49 }
 0x218   : > { %6034 = vmatpush1.bf16.msra.mxu0 %v8879_v57  ;;  %7916 = vmatprep.subr.bf16.mxu1 %v8887_v60  ;;  %v8931_v57 = vld [vmem:[%s11877_s1 + $0x1354] ss:$12 sps:$4 sm:$0xff]  }
 0x219   : > { %6035 = vmatprep.subr.bf16.mxu0 %v8886_v25  ;;  %v7768_v55 = vpop.f32.mrb[8].mxu1  ;;  %v8929_v25 = vld [vmem:[%s11877_s1 + $0x1350] ss:$12 sps:$4 sm:$0xff]  }
 0x21a   : > { %v7769_v3 = vpop.f32.mrb[9].mxu1 }
 0x21b   : > { %v7770_v56 = vadd.f32 %v7769_v3, %v7768_v55  ;;  %v7771_v11 = vpop.f32.mrb[10].mxu1  ;;  %7917 = vmatpush3.bf16.msra.mxu1 %v8888_v6  ;;  %v8938_v3 = vld [vmem:[%s11877_s1 + $0xe30] ss:$12 sps:$4 sm:$0xff]  }
 0x21c   : > { %6036 = vmatpush1.bf16.msra.mxu0 %v8884_v34  ;;  %v7772_v12 = vpop.f32.mrb[11].mxu1  ;;  %7918 = vmatprep.subr.bf16.mxu1 %v8892_v62  ;;  %v8937_v62 = vld [vmem:[%s11877_s1 + $0xef0] ss:$12 sps:$4 sm:$0xff]  }
 0x21d   : > { %6037 = vmatprep.subr.bf16.mxu0 %v8891_v61  ;;  %v11076_v13 = vadd.f32 %v7770_v56, %v6232_v29  ;;  %v7773_v50 = vadd.f32 %v7772_v12, %v7771_v11  ;;  %v8936_v61 = vld [vmem:[%s11877_s1 + $0x136c] ss:$12 sps:$4 sm:$0xff]   ;;  %v8941_v56 = vld [vmem:[%s11877_s1 + $0x1384] ss:$12 sps:$4 sm:$0xff]   ;;  %v8942_v11 = vld [vmem:[%s11877_s1 + $0xfc8] ss:$12 sps:$4 sm:$0xff]  }
 0x21e   : > { %v11197_v12 = vld [vmem:[%s9356_s4 + $0x68] sm:$0xff] }
 0x21f   : > { %v11081_v14 = vadd.f32 %v7773_v50, %v6235_v46  ;;  %7919 = vmatpush3.bf16.msra.mxu1 %v8893_v2  ;;  %v8934_v2 = vld [vmem:[%s11877_s1 + $0x1368] ss:$12 sps:$4 sm:$0xff]   ;;  %v8939_v46 = vld [vmem:[%s11877_s1 + $0x1380] ss:$12 sps:$4 sm:$0xff]  }
 0x220   : > { %6038 = vmatpush1.bf16.msra.mxu0 %v8889_v1  ;;  %7920 = vmatprep.subr.bf16.mxu1 %v8897_v22  ;;  %v11204_v22 = vcombine.low %v10967_v18, %v10970_v19  ;;  %v8946_v50 = vld [vmem:[%s11877_s1 + $0x139c] ss:$12 sps:$4 sm:$0xff]   ;;  %v8947_v18 = vld [vmem:[%s11877_s1 + $0xfe0] ss:$12 sps:$4 sm:$0xff]   ;;  %v8944_v19 = vld [vmem:[%s11877_s1 + $0x1398] ss:$12 sps:$4 sm:$0xff]  }
 0x221   : > { %6039 = vmatprep.subr.bf16.mxu0 %v8896_v44  ;;  %v11200_v44 = vld [vmem:[%s9356_s4 + $0xe8] sm:$0xff] }
 0x223   : > { %7921 = vmatpush3.bf16.msra.mxu1 %v8898_v48  ;;  %v8951_v48 = vld [vmem:[%s11877_s1 + $0x13b4] ss:$12 sps:$4 sm:$0xff]  }
 0x224   : > { %6040 = vmatpush1.bf16.msra.mxu0 %v8894_v35  ;;  %7928 = vmatprep.subr.bf16.mxu1 %v8902_v15  ;;  %v11223_v35 = vcombine.high %v11197_v12, %v11200_v44  ;;  %v8953_v15 = vld [vmem:[%s11877_s1 + $0xf38] ss:$12 sps:$4 sm:$0xff]  }
 0x225   : > { %6041 = vmatprep.subr.bf16.mxu0 %v8901_v16  ;;  %v8952_v16 = vld [vmem:[%s11877_s1 + $0xff8] ss:$12 sps:$4 sm:$0xff]  }
 0x226   : > { %6558 = vmatmul.mubr.bf16.vlgmr.msra.gmra.mrb[36].mxu1 %v10326_v26  ;;  %v8909_v26 = vld [vmem:[%s11877_s1 + $0x12f0] ss:$12 sps:$4 sm:$0xff]  }
 0x227   : > { %7929 = vmatpush3.bf16.msra.mxu1 %v8903_v17  ;;  %6598 = vmatprep.mubr.bf16.mxu1 %v10345_v9  ;;  %v8914_v9 = vld [vmem:[%s11877_s1 + $0x1308] ss:$12 sps:$4 sm:$0xff]   ;;  %v8957_v17 = vld [vmem:[%s11877_s1 + $0x1010] ss:$12 sps:$4 sm:$0xff]  }
 0x228   : > { %6042 = vmatpush1.bf16.msra.mxu0 %v8899_v33  ;;  %7930 = vmatprep.subr.bf16.mxu1 %v8907_v23  ;;  %v8956_v33 = vld [vmem:[%s11877_s1 + $0x13cc] ss:$12 sps:$4 sm:$0xff]   ;;  %v8961_v23 = vld [vmem:[%s11877_s1 + $0x13e4] ss:$12 sps:$4 sm:$0xff]  }
 0x229   : > { %6043 = vmatprep.subr.bf16.mxu0 %v8906_v52  ;;  %v8958_v52 = vld [vmem:[%s11877_s1 + $0xf50] ss:$12 sps:$4 sm:$0xff]  }
 0x22b   : > { %7931 = vmatpush3.bf16.msra.mxu1 %v8908_v31  ;;  %v8959_v31 = vld [vmem:[%s11877_s1 + $0x13e0] ss:$12 sps:$4 sm:$0xff]  }
 0x22c   : > { %6044 = vmatpush1.bf16.msra.mxu0 %v8904_v30  ;;  %7932 = vmatprep.subr.bf16.mxu1 %v8912_v0  ;;  %v8962_v30 = vld [vmem:[%s11877_s1 + $0x1028] ss:$12 sps:$4 sm:$0xff]  }
 0x22d   : > { %6045 = vmatprep.subr.bf16.mxu0 %v8911_v63  ;;  %v8963_v63 = vld [vmem:[%s11877_s1 + $0xf68] ss:$12 sps:$4 sm:$0xff]  }
 0x22e   : > { %v8966_v0 = vld [vmem:[%s11877_s1 + $0x13fc] ss:$12 sps:$4 sm:$0xff]  }
 0x22f   : > { %7933 = vmatpush3.bf16.msra.mxu1 %v8913_v43  ;;  %v8964_v43 = vld [vmem:[%s11877_s1 + $0x13f8] ss:$12 sps:$4 sm:$0xff]  }
 0x230   : > { %6046 = vmatpush1.bf16.msra.mxu0 %v8909_v26  ;;  %7934 = vmatprep.subr.bf16.mxu1 %v8917_v39  ;;  %v8967_v26 = vld [vmem:[%s11877_s1 + $0x1040] ss:$12 sps:$4 sm:$0xff]  }
 0x231   : > { %6047 = vmatprep.subr.bf16.mxu0 %v8916_v38  ;;  %v8968_v38 = vld [vmem:[%s11877_s1 + $0xf80] ss:$12 sps:$4 sm:$0xff]  }
 0x232   : > { %v8971_v39 = vld [vmem:[%s11877_s1 + $0x1414] ss:$12 sps:$4 sm:$0xff]  }
 0x233   : > { %7935 = vmatpush3.bf16.msra.mxu1 %v8918_v7 }
 0x234   : > { %6048 = vmatpush1.bf16.msra.mxu0 %v8914_v9  ;;  %7936 = vmatprep.subr.bf16.mxu1 %v8922_v41  ;;  %v8972_v9 = vld [vmem:[%s11877_s1 + $0x1058] ss:$12 sps:$4 sm:$0xff]  }
 0x235   : > { %6049 = vmatprep.subr.bf16.mxu0 %v8921_v20 }
 0x237   : > { %7937 = vmatpush3.bf16.msra.mxu1 %v8923_v32  ;;  %v8969_v32 = vld [vmem:[%s11877_s1 + $0x1410] ss:$12 sps:$4 sm:$0xff]  }
 0x238   : > { %6050 = vmatpush1.bf16.msra.mxu0 %v8919_v42  ;;  %7938 = vmatprep.subr.bf16.mxu1 %v8927_v45 }
 0x239   : > { %6051 = vmatprep.subr.bf16.mxu0 %v8926_v47  ;;  %v7790_v49 = vpop.f32.mrb[12].mxu1  ;;  %v8973_v47 = vld [vmem:[%s11877_s1 + $0xf98] ss:$12 sps:$4 sm:$0xff]  }
 0x23a   : > { %v7791_v60 = vpop.f32.mrb[13].mxu1 }
 0x23b   : > { %v7792_v34 = vadd.f32 %v7791_v60, %v7790_v49  ;;  %v7793_v6 = vpop.f32.mrb[14].mxu1  ;;  %7939 = vmatpush3.bf16.msra.mxu1 %v8928_v28  ;;  %v8977_v28 = vld [vmem:[%s11877_s1 + $0x1070] ss:$12 sps:$4 sm:$0xff]  }
 0x23c   : > { %6052 = vmatpush1.bf16.msra.mxu0 %v8924_v51  ;;  %v7794_v8 = vpop.f32.mrb[15].mxu1  ;;  %7940 = vmatprep.subr.bf16.mxu1 %v8932_v58  ;;  %v8976_v51 = vld [vmem:[%s11877_s1 + $0x142c] ss:$12 sps:$4 sm:$0xff]   ;;  %v8981_v60 = vld [vmem:[%s11877_s1 + $0x1444] ss:$12 sps:$4 sm:$0xff]  }
 0x23d   : > { %6053 = vmatprep.subr.bf16.mxu0 %v8931_v57  ;;  %v11179_v55 = vadd.f32 %v7792_v34, %v11076_v13  ;;  %v7795_v1 = vadd.f32 %v7794_v8, %v7793_v6  ;;  %v8943_v13 = vld [vmem:[%s11877_s1 + $0xf08] ss:$12 sps:$4 sm:$0xff]   ;;  %v8979_v6 = vld [vmem:[%s11877_s1 + $0x1440] ss:$12 sps:$4 sm:$0xff]  }
 0x23e   : > { %v8982_v34 = vld [vmem:[%s11877_s1 + $0x1148] ss:$12 sps:$4 sm:$0xff]  }
 0x23f   : > { %v11188_v29 = vadd.f32 %v7795_v1, %v11081_v14  ;;  %7941 = vmatpush3.bf16.msra.mxu1 %v8933_v27  ;;  %v8948_v14 = vld [vmem:[%s11877_s1 + $0xf20] ss:$12 sps:$4 sm:$0xff]   ;;  %v8978_v27 = vld [vmem:[%s11877_s1 + $0xfb0] ss:$12 sps:$4 sm:$0xff]   ;;  %v8983_v8 = vld [vmem:[%s11877_s1 + $0x1088] ss:$12 sps:$4 sm:$0xff]  }
 0x240   : > { %6054 = vmatpush1.bf16.msra.mxu0 %v8929_v25  ;;  %7942 = vmatprep.subr.bf16.mxu1 %v8937_v62  ;;  %v8974_v25 = vld [vmem:[%s11877_s1 + $0x1428] ss:$12 sps:$4 sm:$0xff]   ;;  %v8987_v62 = vld [vmem:[%s11877_s1 + $0x1160] ss:$12 sps:$4 sm:$0xff]  }
 0x241   : > { %6055 = vmatprep.subr.bf16.mxu0 %v8936_v61  ;;  %v8986_v61 = vld [vmem:[%s11877_s1 + $0x145c] ss:$12 sps:$4 sm:$0xff]   ;;  %v8988_v1 = vld [vmem:[%s11877_s1 + $0x10a0] ss:$12 sps:$4 sm:$0xff]  }
 0x243   : > { %7943 = vmatpush3.bf16.msra.mxu1 %v8938_v3  ;;  %v8989_v3 = vld [vmem:[%s11877_s1 + $0x1470] ss:$12 sps:$4 sm:$0xff]  }
 0x244   : > { %6056 = vmatpush1.bf16.msra.mxu0 %v8934_v2  ;;  %7950 = vmatprep.subr.bf16.mxu1 %v8942_v11  ;;  %v8991_v2 = vld [vmem:[%s11877_s1 + $0x1474] ss:$12 sps:$4 sm:$0xff]  }
 0x245   : > { %6068 = vmatprep.subr.bf16.mxu0 %v8941_v56  ;;  %v8996_v56 = vld [vmem:[%s11877_s1 + $0x148c] ss:$12 sps:$4 sm:$0xff]   ;;  %v8994_v11 = vld [vmem:[%s11877_s1 + $0x1488] ss:$12 sps:$4 sm:$0xff]  }
 0x246   : > { %6599 = vmatmul.mubr.bf16.vlgmr.msra.gmra.mrb[40].mxu1 %v10541_v54  ;;  %v8949_v54 = vld [vmem:[%s11877_s1 + $0x13b0] ss:$12 sps:$4 sm:$0xff]  }
 0x247   : > { %6058 = vmatmul.mubr.bf16.vlgmr.msra.gmra.mrb[0].mxu0 %v11204_v22  ;;  %7951 = vmatpush3.bf16.msra.mxu1 %v8943_v13  ;;  %v9001_v13 = vld [vmem:[%s11877_s1 + $0x14a4] ss:$12 sps:$4 sm:$0xff]  }
 0x248   : > { %6069 = vmatpush1.bf16.msra.mxu0 %v8939_v46  ;;  %7952 = vmatprep.subr.bf16.mxu1 %v8947_v18  ;;  %v8998_v46 = vld [vmem:[%s11877_s1 + $0x10d0] ss:$12 sps:$4 sm:$0xff]   ;;  %v8999_v18 = vld [vmem:[%s11877_s1 + $0x14a0] ss:$12 sps:$4 sm:$0xff]  }
 0x249   : > { %6070 = vmatprep.subr.bf16.mxu0 %v8946_v50  ;;  %6639 = vmatprep.mubr.bf16.mxu1 %v10554_v59  ;;  %v8954_v59 = vld [vmem:[%s11877_s1 + $0x13c8] ss:$12 sps:$4 sm:$0xff]  }
 0x24a   : > { %6100 = vmatprep.mubr.bf16.mxu0 %v11223_v35  ;;  %v9002_v50 = vld [vmem:[%s11877_s1 + $0x11a8] ss:$12 sps:$4 sm:$0xff]  }
 0x24b   : > { %7953 = vmatpush3.bf16.msra.mxu1 %v8948_v14  ;;  %v9006_v14 = vld [vmem:[%s11877_s1 + $0x14bc] ss:$12 sps:$4 sm:$0xff]  }
 0x24c   : > { %6071 = vmatpush1.bf16.msra.mxu0 %v8944_v19  ;;  %7954 = vmatprep.subr.bf16.mxu1 %v8952_v16  ;;  %v9003_v19 = vld [vmem:[%s11877_s1 + $0x10e8] ss:$12 sps:$4 sm:$0xff]   ;;  %v9004_v16 = vld [vmem:[%s11877_s1 + $0x14b8] ss:$12 sps:$4 sm:$0xff]  }
 0x24d   : > { %6072 = vmatprep.subr.bf16.mxu0 %v8951_v48  ;;  %v9007_v48 = vld [vmem:[%s11877_s1 + $0x11c0] ss:$12 sps:$4 sm:$0xff]  }
 0x24f   : > { %7955 = vmatpush3.bf16.msra.mxu1 %v8953_v15  ;;  %v9011_v15 = vld [vmem:[%s11877_s1 + $0x14d4] ss:$12 sps:$4 sm:$0xff]  }
 0x250   : > { %6073 = vmatpush1.bf16.msra.mxu0 %v8949_v54  ;;  %7956 = vmatprep.subr.bf16.mxu1 %v8957_v17  ;;  %v9008_v54 = vld [vmem:[%s11877_s1 + $0x1100] ss:$12 sps:$4 sm:$0xff]  }
 0x251   : > { %6074 = vmatprep.subr.bf16.mxu0 %v8956_v33  ;;  %v9012_v33 = vld [vmem:[%s11877_s1 + $0x11d8] ss:$12 sps:$4 sm:$0xff]  }
 0x253   : > { %7957 = vmatpush3.bf16.msra.mxu1 %v8958_v52 }
 0x254   : > { %6075 = vmatpush1.bf16.msra.mxu0 %v8954_v59  ;;  %7958 = vmatprep.subr.bf16.mxu1 %v8962_v30  ;;  %v9009_v30 = vld [vmem:[%s11877_s1 + $0x14d0] ss:$12 sps:$4 sm:$0xff]  }
 0x255   : > { %6076 = vmatprep.subr.bf16.mxu0 %v8961_v23 }
 0x257   : > { %7959 = vmatpush3.bf16.msra.mxu1 %v8963_v63 }
 0x258   : > { %6077 = vmatpush1.bf16.msra.mxu0 %v8959_v31  ;;  %7960 = vmatprep.subr.bf16.mxu1 %v8967_v26  ;;  %v9013_v31 = vld [vmem:[%s11877_s1 + $0x1118] ss:$12 sps:$4 sm:$0xff]   ;;  %v9017_v26 = vld [vmem:[%s11877_s1 + $0x11f0] ss:$12 sps:$4 sm:$0xff]  }
 0x259   : > { %6078 = vmatprep.subr.bf16.mxu0 %v8966_v0  ;;  %v7812_v7 = vpop.f32.mrb[16].mxu1  ;;  %v9016_v0 = vld [vmem:[%s11877_s1 + $0x14ec] ss:$12 sps:$4 sm:$0xff]  }
 0x25a   : > { %v7813_v20 = vpop.f32.mrb[17].mxu1 }
 0x25b   : > { %v7814_v41 = vadd.f32 %v7813_v20, %v7812_v7  ;;  %v7815_v42 = vpop.f32.mrb[18].mxu1  ;;  %7961 = vmatpush3.bf16.msra.mxu1 %v8968_v38  ;;  %v9018_v7 = vld [vmem:[%s11877_s1 + $0x1130] ss:$12 sps:$4 sm:$0xff]  }
 0x25c   : > { %6079 = vmatpush1.bf16.msra.mxu0 %v8964_v43  ;;  %v7816_v45 = vpop.f32.mrb[19].mxu1  ;;  %7962 = vmatprep.subr.bf16.mxu1 %v8972_v9  ;;  %v9014_v9 = vld [vmem:[%s11877_s1 + $0x14e8] ss:$12 sps:$4 sm:$0xff]   ;;  %v9021_v20 = vld [vmem:[%s11877_s1 + $0x1504] ss:$12 sps:$4 sm:$0xff]  }
 0x25d   : > { %6080 = vmatprep.subr.bf16.mxu0 %v8971_v39  ;;  %v11299_v57 = vadd.f32 %v7814_v41, %v11179_v55  ;;  %v7817_v58 = vadd.f32 %v7816_v45, %v7815_v42  ;;  %v8984_v55 = vld [vmem:[%s11877_s1 + $0x1458] ss:$12 sps:$4 sm:$0xff]   ;;  %v9022_v41 = vld [vmem:[%s11877_s1 + $0x12c8] ss:$12 sps:$4 sm:$0xff]   ;;  %v11422_v42 = vcombine.low %v11197_v12, %v11200_v44  ;;  %v9019_v45 = vld [vmem:[%s11877_s1 + $0x1500] ss:$12 sps:$4 sm:$0xff]  }
 0x25e   : > { %v9026_v12 = vld [vmem:[%s11877_s1 + $0x151c] ss:$12 sps:$4 sm:$0xff]   ;;  %v9027_v44 = vld [vmem:[%s11877_s1 + $0x12e0] ss:$12 sps:$4 sm:$0xff]  }
 0x25f   : > { %v11302_v49 = vadd.f32 %v7817_v58, %v11188_v29  ;;  %7963 = vmatpush3.bf16.msra.mxu1 %v8973_v47  ;;  %v8993_v29 = vld [vmem:[%s11877_s1 + $0x10b8] ss:$12 sps:$4 sm:$0xff]   ;;  %v11428_v47 = vld [vmem:[%s9356_s4 + $0xf0] sm:$0xff]  ;;  %v9028_v58 = vld [vmem:[%s11877_s1 + $0x1220] ss:$12 sps:$4 sm:$0xff]  }
 0x260   : > { %6081 = vmatpush1.bf16.msra.mxu0 %v8969_v32  ;;  %7964 = vmatprep.subr.bf16.mxu1 %v8977_v28  ;;  %v11425_v32 = vld [vmem:[%s9356_s4 + $0x70] sm:$0xff] }
 0x261   : > { %6082 = vmatprep.subr.bf16.mxu0 %v8976_v51  ;;  %v9023_v51 = vld [vmem:[%s11877_s1 + $0x1208] ss:$12 sps:$4 sm:$0xff]   ;;  %v11444_v28 = vcombine.high %v11425_v32, %v11428_v47 }
 0x263   : > { %7965 = vmatpush3.bf16.msra.mxu1 %v8978_v27  ;;  %v9033_v27 = vld [vmem:[%s11877_s1 + $0x1238] ss:$12 sps:$4 sm:$0xff]  }
 0x264   : > { %6083 = vmatpush1.bf16.msra.mxu0 %v8974_v25  ;;  %7972 = vmatprep.subr.bf16.mxu1 %v8982_v34  ;;  %v9029_v25 = vld [vmem:[%s11877_s1 + $0x1530] ss:$12 sps:$4 sm:$0xff]   ;;  %v9034_v34 = vld [vmem:[%s11877_s1 + $0x1548] ss:$12 sps:$4 sm:$0xff]  }
 0x265   : > { %6084 = vmatprep.subr.bf16.mxu0 %v8981_v60  ;;  %v9036_v60 = vld [vmem:[%s11877_s1 + $0x154c] ss:$12 sps:$4 sm:$0xff]  }
 0x266   : > { %6640 = vmatmul.mubr.bf16.vlgmr.msra.gmra.mrb[44].mxu1 %v10750_v40  ;;  %v8992_v40 = vld [vmem:[%s11877_s1 + $0x1178] ss:$12 sps:$4 sm:$0xff]  }
 0x267   : > { %7973 = vmatpush3.bf16.msra.mxu1 %v8983_v8  ;;  %6680 = vmatprep.mubr.bf16.mxu1 %v10769_v4  ;;  %v8997_v4 = vld [vmem:[%s11877_s1 + $0x1190] ss:$12 sps:$4 sm:$0xff]  }
 0x268   : > { %6085 = vmatpush1.bf16.msra.mxu0 %v8979_v6  ;;  %7974 = vmatprep.subr.bf16.mxu1 %v8987_v62  ;;  %v9038_v6 = vld [vmem:[%s11877_s1 + $0x1250] ss:$12 sps:$4 sm:$0xff]   ;;  %v9039_v62 = vld [vmem:[%s11877_s1 + $0x1560] ss:$12 sps:$4 sm:$0xff]  }
 0x269   : > { %6086 = vmatprep.subr.bf16.mxu0 %v8986_v61  ;;  %v9041_v8 = vld [vmem:[%s11877_s1 + $0x1564] ss:$12 sps:$4 sm:$0xff]   ;;  %v9042_v61 = vld [vmem:[%s11877_s1 + $0x1328] ss:$12 sps:$4 sm:$0xff]  }
 0x26b   : > { %7975 = vmatpush3.bf16.msra.mxu1 %v8988_v1  ;;  %v9046_v1 = vld [vmem:[%s11877_s1 + $0x157c] ss:$12 sps:$4 sm:$0xff]  }
 0x26c   : > { %6087 = vmatpush1.bf16.msra.mxu0 %v8984_v55  ;;  %7976 = vmatprep.subr.bf16.mxu1 %v8992_v40  ;;  %v9043_v55 = vld [vmem:[%s11877_s1 + $0x1268] ss:$12 sps:$4 sm:$0xff]   ;;  %v9044_v40 = vld [vmem:[%s11877_s1 + $0x1578] ss:$12 sps:$4 sm:$0xff]  }
 0x26d   : > { %6088 = vmatprep.subr.bf16.mxu0 %v8991_v2  ;;  %v9047_v2 = vld [vmem:[%s11877_s1 + $0x1340] ss:$12 sps:$4 sm:$0xff]  }
 0x26f   : > { %7977 = vmatpush3.bf16.msra.mxu1 %v8993_v29  ;;  %v9051_v29 = vld [vmem:[%s11877_s1 + $0x1594] ss:$12 sps:$4 sm:$0xff]  }
 0x270   : > { %6089 = vmatpush1.bf16.msra.mxu0 %v8989_v3  ;;  %7978 = vmatprep.subr.bf16.mxu1 %v8997_v4  ;;  %v9048_v3 = vld [vmem:[%s11877_s1 + $0x1280] ss:$12 sps:$4 sm:$0xff]  }
 0x271   : > { %6090 = vmatprep.subr.bf16.mxu0 %v8996_v56  ;;  %v9052_v56 = vld [vmem:[%s11877_s1 + $0x1358] ss:$12 sps:$4 sm:$0xff]  }
 0x273   : > { %7979 = vmatpush3.bf16.msra.mxu1 %v8998_v46 }
 0x274   : > { %6091 = vmatpush1.bf16.msra.mxu0 %v8994_v11  ;;  %7980 = vmatprep.subr.bf16.mxu1 %v9002_v50  ;;  %v9049_v50 = vld [vmem:[%s11877_s1 + $0x1590] ss:$12 sps:$4 sm:$0xff]  }
 0x275   : > { %6092 = vmatprep.subr.bf16.mxu0 %v9001_v13 }
 0x277   : > { %7981 = vmatpush3.bf16.msra.mxu1 %v9003_v19 }
 0x278   : > { %6093 = vmatpush1.bf16.msra.mxu0 %v8999_v18  ;;  %7982 = vmatprep.subr.bf16.mxu1 %v9007_v48  ;;  %v9053_v18 = vld [vmem:[%s11877_s1 + $0x1298] ss:$12 sps:$4 sm:$0xff]   ;;  %v9057_v48 = vld [vmem:[%s11877_s1 + $0x1370] ss:$12 sps:$4 sm:$0xff]  }
 0x279   : > { %6094 = vmatprep.subr.bf16.mxu0 %v9006_v14  ;;  %v7834_v17 = vpop.f32.mrb[20].mxu1  ;;  %v9056_v14 = vld [vmem:[%s11877_s1 + $0x15ac] ss:$12 sps:$4 sm:$0xff]  }
 0x27a   : > { %v7835_v59 = vpop.f32.mrb[21].mxu1 }
 0x27b   : > { %v7836_v52 = vadd.f32 %v7835_v59, %v7834_v17  ;;  %v7837_v23 = vpop.f32.mrb[22].mxu1  ;;  %7983 = vmatpush3.bf16.msra.mxu1 %v9008_v54  ;;  %v9058_v17 = vld [vmem:[%s11877_s1 + $0x12b0] ss:$12 sps:$4 sm:$0xff]  }
 0x27c   : > { %6095 = vmatpush1.bf16.msra.mxu0 %v9004_v16  ;;  %v7838_v63 = vpop.f32.mrb[23].mxu1  ;;  %7984 = vmatprep.subr.bf16.mxu1 %v9012_v33  ;;  %v9054_v33 = vld [vmem:[%s11877_s1 + $0x15a8] ss:$12 sps:$4 sm:$0xff]   ;;  %v9061_v59 = vld [vmem:[%s11877_s1 + $0x15c4] ss:$12 sps:$4 sm:$0xff]  }
 0x27d   : > { %6096 = vmatprep.subr.bf16.mxu0 %v9011_v15  ;;  %v11403_v43 = vadd.f32 %v7836_v52, %v11299_v57  ;;  %v7839_v38 = vadd.f32 %v7838_v63, %v7837_v23  ;;  %v9024_v57 = vld [vmem:[%s11877_s1 + $0x1518] ss:$12 sps:$4 sm:$0xff]   ;;  %v9062_v52 = vld [vmem:[%s11877_s1 + $0x1448] ss:$12 sps:$4 sm:$0xff]   ;;  %v9059_v23 = vld [vmem:[%s11877_s1 + $0x15c0] ss:$12 sps:$4 sm:$0xff]  }
 0x27e   : > { %v9067_v63 = vld [vmem:[%s11877_s1 + $0x1460] ss:$12 sps:$4 sm:$0xff]  }
 0x27f   : > { %v11406_v39 = vadd.f32 %v7839_v38, %v11302_v49  ;;  %7985 = vmatpush3.bf16.msra.mxu1 %v9013_v31  ;;  %v9031_v49 = vld [vmem:[%s11877_s1 + $0x1534] ss:$12 sps:$4 sm:$0xff]   ;;  %v9066_v31 = vld [vmem:[%s11877_s1 + $0x15dc] ss:$12 sps:$4 sm:$0xff]  }
 0x280   : > { %6097 = vmatpush1.bf16.msra.mxu0 %v9009_v30  ;;  %7986 = vmatprep.subr.bf16.mxu1 %v9017_v26  ;;  %v9063_v30 = vld [vmem:[%s11877_s1 + $0x1388] ss:$12 sps:$4 sm:$0xff]   ;;  %v9068_v26 = vld [vmem:[%s11877_s1 + $0x13a0] ss:$12 sps:$4 sm:$0xff]   ;;  %v9069_v38 = vld [vmem:[%s11877_s1 + $0x15f0] ss:$12 sps:$4 sm:$0xff]  }
 0x281   : > { %6098 = vmatprep.subr.bf16.mxu0 %v9016_v0  ;;  %v9064_v0 = vld [vmem:[%s11877_s1 + $0x15d8] ss:$12 sps:$4 sm:$0xff]  }
 0x283   : > { %7987 = vmatpush3.bf16.msra.mxu1 %v9018_v7  ;;  %v9074_v7 = vld [vmem:[%s11877_s1 + $0x1608] ss:$12 sps:$4 sm:$0xff]  }
 0x284   : > { %6099 = vmatpush1.bf16.msra.mxu0 %v9014_v9  ;;  %7994 = vmatprep.subr.bf16.mxu1 %v9022_v41  ;;  %v9076_v9 = vld [vmem:[%s11877_s1 + $0x160c] ss:$12 sps:$4 sm:$0xff]   ;;  %v9081_v41 = vld [vmem:[%s11877_s1 + $0x1624] ss:$12 sps:$4 sm:$0xff]  }
 0x285   : > { %6111 = vmatprep.subr.bf16.mxu0 %v9021_v20  ;;  %v9078_v20 = vld [vmem:[%s11877_s1 + $0x13d0] ss:$12 sps:$4 sm:$0xff]  }
 0x286   : > { %6681 = vmatmul.mubr.bf16.vlgmr.msra.gmra.mrb[48].mxu1 %v10974_v21  ;;  %v9032_v21 = vld [vmem:[%s11877_s1 + $0x12f8] ss:$12 sps:$4 sm:$0xff]  }
 0x287   : > { %6101 = vmatmul.mubr.bf16.vlgmr.msra.gmra.mrb[0].mxu0 %v11422_v42  ;;  %7995 = vmatpush3.bf16.msra.mxu1 %v9023_v51  ;;  %v9079_v51 = vld [vmem:[%s11877_s1 + $0x1620] ss:$12 sps:$4 sm:$0xff]  }
 0x288   : > { %6112 = vmatpush1.bf16.msra.mxu0 %v9019_v45  ;;  %7996 = vmatprep.subr.bf16.mxu1 %v9027_v44  ;;  %v9082_v45 = vld [vmem:[%s11877_s1 + $0x14a8] ss:$12 sps:$4 sm:$0xff]  }
 0x289   : > { %6113 = vmatprep.subr.bf16.mxu0 %v9026_v12  ;;  %6721 = vmatprep.mubr.bf16.mxu1 %v10993_v37  ;;  %v9037_v37 = vld [vmem:[%s11877_s1 + $0x1310] ss:$12 sps:$4 sm:$0xff]   ;;  %v9083_v12 = vld [vmem:[%s11877_s1 + $0x13e8] ss:$12 sps:$4 sm:$0xff]  }
 0x28a   : > { %6143 = vmatprep.mubr.bf16.mxu0 %v11444_v28  ;;  %v9086_v44 = vld [vmem:[%s11877_s1 + $0x163c] ss:$12 sps:$4 sm:$0xff]  }
 0x28b   : > { %7997 = vmatpush3.bf16.msra.mxu1 %v9028_v58  ;;  %v9084_v58 = vld [vmem:[%s11877_s1 + $0x1638] ss:$12 sps:$4 sm:$0xff]  }
 0x28c   : > { %6114 = vmatpush1.bf16.msra.mxu0 %v9024_v57  ;;  %7998 = vmatprep.subr.bf16.mxu1 %v9032_v21  ;;  %v9087_v57 = vld [vmem:[%s11877_s1 + $0x14c0] ss:$12 sps:$4 sm:$0xff]  }
 0x28d   : > { %6115 = vmatprep.subr.bf16.mxu0 %v9031_v49  ;;  %v9088_v49 = vld [vmem:[%s11877_s1 + $0x1400] ss:$12 sps:$4 sm:$0xff]  }
 0x28e   : > { %v9091_v21 = vld [vmem:[%s11877_s1 + $0x1654] ss:$12 sps:$4 sm:$0xff]  }
 0x28f   : > { %7999 = vmatpush3.bf16.msra.mxu1 %v9033_v27 }
 0x290   : > { %6116 = vmatpush1.bf16.msra.mxu0 %v9029_v25  ;;  %8000 = vmatprep.subr.bf16.mxu1 %v9037_v37  ;;  %v9092_v25 = vld [vmem:[%s11877_s1 + $0x14d8] ss:$12 sps:$4 sm:$0xff]  }
 0x291   : > { %6117 = vmatprep.subr.bf16.mxu0 %v9036_v60 }
 0x293   : > { %8001 = vmatpush3.bf16.msra.mxu1 %v9038_v6  ;;  %v9089_v6 = vld [vmem:[%s11877_s1 + $0x1650] ss:$12 sps:$4 sm:$0xff]  }
 0x294   : > { %6118 = vmatpush1.bf16.msra.mxu0 %v9034_v34  ;;  %8002 = vmatprep.subr.bf16.mxu1 %v9042_v61 }
 0x295   : > { %6119 = vmatprep.subr.bf16.mxu0 %v9041_v8  ;;  %v9093_v8 = vld [vmem:[%s11877_s1 + $0x1418] ss:$12 sps:$4 sm:$0xff]  }
 0x297   : > { %8003 = vmatpush3.bf16.msra.mxu1 %v9043_v55  ;;  %v9097_v55 = vld [vmem:[%s11877_s1 + $0x14f0] ss:$12 sps:$4 sm:$0xff]  }
 0x298   : > { %6120 = vmatpush1.bf16.msra.mxu0 %v9039_v62  ;;  %8004 = vmatprep.subr.bf16.mxu1 %v9047_v2  ;;  %v9096_v62 = vld [vmem:[%s11877_s1 + $0x166c] ss:$12 sps:$4 sm:$0xff]  }
 0x299   : > { %6121 = vmatprep.subr.bf16.mxu0 %v9046_v1  ;;  %v7856_v4 = vpop.f32.mrb[24].mxu1 }
 0x29a   : > { %v7857_v11 = vpop.f32.mrb[25].mxu1 }
 0x29b   : > { %v7858_v46 = vadd.f32 %v7857_v11, %v7856_v4  ;;  %v7859_v13 = vpop.f32.mrb[26].mxu1  ;;  %8005 = vmatpush3.bf16.msra.mxu1 %v9048_v3  ;;  %v9094_v3 = vld [vmem:[%s11877_s1 + $0x1668] ss:$12 sps:$4 sm:$0xff]   ;;  %v11646_v11 = vcombine.low %v11425_v32, %v11428_v47  ;;  %v9107_v47 = vld [vmem:[%s11877_s1 + $0x15e0] ss:$12 sps:$4 sm:$0xff]  }
 0x29c   : > { %6122 = vmatpush1.bf16.msra.mxu0 %v9044_v40  ;;  %v7860_v19 = vpop.f32.mrb[27].mxu1  ;;  %8006 = vmatprep.subr.bf16.mxu1 %v9052_v56  ;;  %v9101_v56 = vld [vmem:[%s11877_s1 + $0x1684] ss:$12 sps:$4 sm:$0xff]   ;;  %v9102_v4 = vld [vmem:[%s11877_s1 + $0x15c8] ss:$12 sps:$4 sm:$0xff]  }
 0x29d   : > { %6123 = vmatprep.subr.bf16.mxu0 %v9051_v29  ;;  %v11523_v16 = vadd.f32 %v7858_v46, %v11403_v43  ;;  %v7861_v54 = vadd.f32 %v7860_v19, %v7859_v13  ;;  %v9071_v43 = vld [vmem:[%s11877_s1 + $0x15f4] ss:$12 sps:$4 sm:$0xff]   ;;  %v9098_v29 = vld [vmem:[%s11877_s1 + $0x1430] ss:$12 sps:$4 sm:$0xff]  }
 0x29e   : > { %v11649_v46 = vld [vmem:[%s9356_s4 + $0x78] sm:$0xff] }
 0x29f   : > { %v11526_v15 = vadd.f32 %v7861_v54, %v11406_v39  ;;  %8007 = vmatpush3.bf16.msra.mxu1 %v9053_v18  ;;  %v9073_v39 = vld [vmem:[%s11877_s1 + $0x13b8] ss:$12 sps:$4 sm:$0xff]   ;;  %v9103_v18 = vld [vmem:[%s11877_s1 + $0x1508] ss:$12 sps:$4 sm:$0xff]   ;;  %v9109_v54 = vld [vmem:[%s11877_s1 + $0x16b0] ss:$12 sps:$4 sm:$0xff]  }
 0x2a0   : > { %6124 = vmatpush1.bf16.msra.mxu0 %v9049_v50  ;;  %8008 = vmatprep.subr.bf16.mxu1 %v9057_v48  ;;  %v11652_v13 = vld [vmem:[%s9356_s4 + $0xf8] sm:$0xff]  ;;  %v9099_v50 = vld [vmem:[%s11877_s1 + $0x1680] ss:$12 sps:$4 sm:$0xff]  }
 0x2a1   : > { %6125 = vmatprep.subr.bf16.mxu0 %v9056_v14  ;;  %v9106_v32 = vld [vmem:[%s11877_s1 + $0x169c] ss:$12 sps:$4 sm:$0xff]   ;;  %v11668_v19 = vcombine.high %v11649_v46, %v11652_v13  ;;  %v9104_v14 = vld [vmem:[%s11877_s1 + $0x1698] ss:$12 sps:$4 sm:$0xff]   ;;  %v9108_v48 = vld [vmem:[%s11877_s1 + $0x1520] ss:$12 sps:$4 sm:$0xff]  }
 0x2a3   : > { %8009 = vmatpush3.bf16.msra.mxu1 %v9058_v17  ;;  %v9114_v17 = vld [vmem:[%s11877_s1 + $0x16c8] ss:$12 sps:$4 sm:$0xff]  }
 0x2a4   : > { %6126 = vmatpush1.bf16.msra.mxu0 %v9054_v33  ;;  %8016 = vmatprep.subr.bf16.mxu1 %v9062_v52  ;;  %v9116_v33 = vld [vmem:[%s11877_s1 + $0x16cc] ss:$12 sps:$4 sm:$0xff]   ;;  %v9121_v52 = vld [vmem:[%s11877_s1 + $0x16e4] ss:$12 sps:$4 sm:$0xff]  }
 0x2a5   : > { %6127 = vmatprep.subr.bf16.mxu0 %v9061_v59  ;;  %v9118_v59 = vld [vmem:[%s11877_s1 + $0x1550] ss:$12 sps:$4 sm:$0xff]  }
 0x2a6   : > { %6722 = vmatmul.mubr.bf16.vlgmr.msra.gmra.mrb[52].mxu1 %v11204_v22  ;;  %v9072_v22 = vld [vmem:[%s11877_s1 + $0x1478] ss:$12 sps:$4 sm:$0xff]  }
 0x2a7   : > { %8017 = vmatpush3.bf16.msra.mxu1 %v9063_v30  ;;  %6762 = vmatprep.mubr.bf16.mxu1 %v11223_v35  ;;  %v9077_v35 = vld [vmem:[%s11877_s1 + $0x1490] ss:$12 sps:$4 sm:$0xff]   ;;  %v9119_v30 = vld [vmem:[%s11877_s1 + $0x16e0] ss:$12 sps:$4 sm:$0xff]  }
 0x2a8   : > { %6128 = vmatpush1.bf16.msra.mxu0 %v9059_v23  ;;  %8018 = vmatprep.subr.bf16.mxu1 %v9067_v63  ;;  %v9122_v23 = vld [vmem:[%s11877_s1 + $0x1628] ss:$12 sps:$4 sm:$0xff]  }
 0x2a9   : > { %6129 = vmatprep.subr.bf16.mxu0 %v9066_v31  ;;  %v9123_v31 = vld [vmem:[%s11877_s1 + $0x1568] ss:$12 sps:$4 sm:$0xff]  }
 0x2aa   : > { %v9126_v63 = vld [vmem:[%s11877_s1 + $0x16fc] ss:$12 sps:$4 sm:$0xff]  }
 0x2ab   : > { %8019 = vmatpush3.bf16.msra.mxu1 %v9068_v26  ;;  %v9124_v26 = vld [vmem:[%s11877_s1 + $0x16f8] ss:$12 sps:$4 sm:$0xff]  }
 0x2ac   : > { %6130 = vmatpush1.bf16.msra.mxu0 %v9064_v0  ;;  %8020 = vmatprep.subr.bf16.mxu1 %v9072_v22  ;;  %v9127_v0 = vld [vmem:[%s11877_s1 + $0x1640] ss:$12 sps:$4 sm:$0xff]  }
 0x2ad   : > { %6131 = vmatprep.subr.bf16.mxu0 %v9071_v43  ;;  %v9128_v43 = vld [vmem:[%s11877_s1 + $0x1580] ss:$12 sps:$4 sm:$0xff]  }
 0x2ae   : > { %v9131_v22 = vld [vmem:[%s11877_s1 + $0x1714] ss:$12 sps:$4 sm:$0xff]  }
 0x2af   : > { %8021 = vmatpush3.bf16.msra.mxu1 %v9073_v39 }
 0x2b0   : > { %6132 = vmatpush1.bf16.msra.mxu0 %v9069_v38  ;;  %8022 = vmatprep.subr.bf16.mxu1 %v9077_v35  ;;  %v9132_v38 = vld [vmem:[%s11877_s1 + $0x1658] ss:$12 sps:$4 sm:$0xff]  }
 0x2b1   : > { %6133 = vmatprep.subr.bf16.mxu0 %v9076_v9 }
 0x2b3   : > { %8023 = vmatpush3.bf16.msra.mxu1 %v9078_v20  ;;  %v9129_v20 = vld [vmem:[%s11877_s1 + $0x1710] ss:$12 sps:$4 sm:$0xff]  }
 0x2b4   : > { %6134 = vmatpush1.bf16.msra.mxu0 %v9074_v7  ;;  %8024 = vmatprep.subr.bf16.mxu1 %v9082_v45 }
 0x2b5   : > { %6135 = vmatprep.subr.bf16.mxu0 %v9081_v41  ;;  %v9133_v41 = vld [vmem:[%s11877_s1 + $0x1598] ss:$12 sps:$4 sm:$0xff]  }
 0x2b7   : > { %8025 = vmatpush3.bf16.msra.mxu1 %v9083_v12  ;;  %v9137_v12 = vld [vmem:[%s11877_s1 + $0x1670] ss:$12 sps:$4 sm:$0xff]  }
 0x2b8   : > { %6136 = vmatpush1.bf16.msra.mxu0 %v9079_v51  ;;  %8026 = vmatprep.subr.bf16.mxu1 %v9087_v57  ;;  %v9136_v51 = vld [vmem:[%s11877_s1 + $0x172c] ss:$12 sps:$4 sm:$0xff]  }
 0x2b9   : > { %6137 = vmatprep.subr.bf16.mxu0 %v9086_v44  ;;  %v7878_v27 = vpop.f32.mrb[28].mxu1 }
 0x2ba   : > { %v7879_v60 = vpop.f32.mrb[29].mxu1 }
 0x2bb   : > { %v7880_v37 = vadd.f32 %v7879_v60, %v7878_v27  ;;  %v7881_v34 = vpop.f32.mrb[30].mxu1  ;;  %8027 = vmatpush3.bf16.msra.mxu1 %v9088_v49  ;;  %v9134_v49 = vld [vmem:[%s11877_s1 + $0x1728] ss:$12 sps:$4 sm:$0xff]   ;;  %v9139_v60 = vld [vmem:[%s11877_s1 + $0x1740] ss:$12 sps:$4 sm:$0xff]  }
 0x2bc   : > { %6138 = vmatpush1.bf16.msra.mxu0 %v9084_v58  ;;  %v7882_v61 = vpop.f32.mrb[31].mxu1  ;;  %8028 = vmatprep.subr.bf16.mxu1 %v9092_v25  ;;  %v9141_v25 = vld [vmem:[%s11877_s1 + $0x1744] ss:$12 sps:$4 sm:$0xff]   ;;  %v9142_v27 = vld [vmem:[%s11877_s1 + $0x1748] ss:$12 sps:$4 sm:$0xff]  }
 0x2bd   : > { %6139 = vmatprep.subr.bf16.mxu0 %v9091_v21  ;;  %v11627_v1 = vadd.f32 %v7880_v37, %v11523_v16  ;;  %v7883_v2 = vadd.f32 %v7882_v61, %v7881_v34  ;;  %v9111_v16 = vld [vmem:[%s11877_s1 + $0x16b4] ss:$12 sps:$4 sm:$0xff]   ;;  %v9138_v21 = vld [vmem:[%s11877_s1 + $0x15b0] ss:$12 sps:$4 sm:$0xff]  }
 0x2be   : > { %v9143_v37 = vld [vmem:[%s11877_s1 + $0x1688] ss:$12 sps:$4 sm:$0xff]   ;;  %v9148_v61 = vld [vmem:[%s11877_s1 + $0x16a0] ss:$12 sps:$4 sm:$0xff]  }
 0x2bf   : > { %v11630_v40 = vadd.f32 %v7883_v2, %v11526_v15  ;;  %8029 = vmatpush3.bf16.msra.mxu1 %v9093_v8  ;;  %v9113_v15 = vld [vmem:[%s11877_s1 + $0x1538] ss:$12 sps:$4 sm:$0xff]   ;;  %v9146_v34 = vld [vmem:[%s11877_s1 + $0x175c] ss:$12 sps:$4 sm:$0xff]  }
 0x2c0   : > { %6140 = vmatpush1.bf16.msra.mxu0 %v9089_v6  ;;  %8030 = vmatprep.subr.bf16.mxu1 %v9097_v55  ;;  %v9147_v6 = vld [vmem:[%s11877_s1 + $0x1760] ss:$12 sps:$4 sm:$0xff]   ;;  %v9144_v8 = vld [vmem:[%s11877_s1 + $0x1758] ss:$12 sps:$4 sm:$0xff]  }
 0x2c1   : > { %6141 = vmatprep.subr.bf16.mxu0 %v9096_v62  ;;  %v9151_v62 = vld [vmem:[%s11877_s1 + $0x1774] ss:$12 sps:$4 sm:$0xff]   ;;  %v9152_v55 = vld [vmem:[%s11877_s1 + $0x1778] ss:$12 sps:$4 sm:$0xff]  }
 0x2c2   : > { %v9153_v2 = vld [vmem:[%s11877_s1 + $0x16b8] ss:$12 sps:$4 sm:$0xff]  }
 0x2c3   : > { %8031 = vmatpush3.bf16.msra.mxu1 %v9098_v29  ;;  %v9154_v29 = vld [vmem:[%s11877_s1 + $0x1788] ss:$12 sps:$4 sm:$0xff]  }
 0x2c4   : > { %6142 = vmatpush1.bf16.msra.mxu0 %v9094_v3  ;;  %8038 = vmatprep.subr.bf16.mxu1 %v9102_v4  ;;  %v9157_v3 = vld [vmem:[%s11877_s1 + $0x1790] ss:$12 sps:$4 sm:$0xff]  }
 0x2c5   : > { %6154 = vmatprep.subr.bf16.mxu0 %v9101_v56  ;;  %v9158_v56 = vld [vmem:[%s11877_s1 + $0x16d0] ss:$12 sps:$4 sm:$0xff]  }
 0x2c6   : > { %6763 = vmatmul.mubr.bf16.vlgmr.msra.gmra.mrb[56].mxu1 %v11422_v42  ;;  %v9112_v42 = vld [vmem:[%s11877_s1 + $0x15f8] ss:$12 sps:$4 sm:$0xff]  }
 0x2c7   : > { %6144 = vmatmul.mubr.bf16.vlgmr.msra.gmra.mrb[0].mxu0 %v11646_v11  ;;  %8039 = vmatpush3.bf16.msra.mxu1 %v9103_v18  ;;  %v9161_v4 = vld [vmem:[%s11877_s1 + $0x17a4] ss:$12 sps:$4 sm:$0xff]   ;;  %v9163_v18 = vld [vmem:[%s11877_s1 + $0x16e8] ss:$12 sps:$4 sm:$0xff]  }
 0x2c8   : > { %6155 = vmatpush1.bf16.msra.mxu0 %v9099_v50  ;;  %8040 = vmatprep.subr.bf16.mxu1 %v9107_v47  ;;  %v9159_v50 = vld [vmem:[%s11877_s1 + $0x17a0] ss:$12 sps:$4 sm:$0xff]  }
 0x2c9   : > { %6156 = vmatprep.subr.bf16.mxu0 %v9106_v32  ;;  %6803 = vmatprep.mubr.bf16.mxu1 %v11444_v28  ;;  %v9117_v28 = vld [vmem:[%s11877_s1 + $0x1610] ss:$12 sps:$4 sm:$0xff]   ;;  %v9167_v47 = vld [vmem:[%s11877_s1 + $0x17c0] ss:$12 sps:$4 sm:$0xff]  }
 0x2ca   : > { %6186 = vmatprep.mubr.bf16.mxu0 %v11668_v19  ;;  %v9166_v32 = vld [vmem:[%s11877_s1 + $0x17bc] ss:$12 sps:$4 sm:$0xff]  }
 0x2cb   : > { %8041 = vmatpush3.bf16.msra.mxu1 %v9108_v48  ;;  %v9171_v48 = vld [vmem:[%s11877_s1 + $0x17d4] ss:$12 sps:$4 sm:$0xff]  }
 0x2cc   : > { %6157 = vmatpush1.bf16.msra.mxu0 %v9104_v14  ;;  %8042 = vmatprep.subr.bf16.mxu1 %v9112_v42  ;;  %v9168_v14 = vld [vmem:[%s11877_s1 + $0x1700] ss:$12 sps:$4 sm:$0xff]  }
 0x2cd   : > { %6158 = vmatprep.subr.bf16.mxu0 %v9111_v16  ;;  %v9172_v16 = vld [vmem:[%s11877_s1 + $0x17d8] ss:$12 sps:$4 sm:$0xff]  }
 0x2cf   : > { %8043 = vmatpush3.bf16.msra.mxu1 %v9113_v15 }
 0x2d0   : > { %6159 = vmatpush1.bf16.msra.mxu0 %v9109_v54  ;;  %8044 = vmatprep.subr.bf16.mxu1 %v9117_v28  ;;  %v9169_v28 = vld [vmem:[%s11877_s1 + $0x17d0] ss:$12 sps:$4 sm:$0xff]  }
 0x2d1   : > { %6160 = vmatprep.subr.bf16.mxu0 %v9116_v33 }
 0x2d3   : > { %8045 = vmatpush3.bf16.msra.mxu1 %v9118_v59 }
 0x2d4   : > { %6161 = vmatpush1.bf16.msra.mxu0 %v9114_v17  ;;  %8046 = vmatprep.subr.bf16.mxu1 %v9122_v23  ;;  %v9173_v17 = vld [vmem:[%s11877_s1 + $0x1718] ss:$12 sps:$4 sm:$0xff]   ;;  %v9177_v23 = vld [vmem:[%s11877_s1 + $0x17f0] ss:$12 sps:$4 sm:$0xff]  }
 0x2d5   : > { %6162 = vmatprep.subr.bf16.mxu0 %v9121_v52  ;;  %v9176_v52 = vld [vmem:[%s11877_s1 + $0x17ec] ss:$12 sps:$4 sm:$0xff]  }
 0x2d7   : > { %8047 = vmatpush3.bf16.msra.mxu1 %v9123_v31 }
 0x2d8   : > { %6163 = vmatpush1.bf16.msra.mxu0 %v9119_v30  ;;  %8048 = vmatprep.subr.bf16.mxu1 %v9127_v0  ;;  %v9174_v0 = vld [vmem:[%s11877_s1 + $0x17e8] ss:$12 sps:$4 sm:$0xff]  }
 0x2d9   : > { %6164 = vmatprep.subr.bf16.mxu0 %v9126_v63  ;;  %v7900_v39 = vpop.f32.mrb[32].mxu1 }
 0x2da   : > { %v7901_v9 = vpop.f32.mrb[33].mxu1 }
 0x2db   : > { %v7902_v35 = vadd.f32 %v7901_v9, %v7900_v39  ;;  %v7903_v7 = vpop.f32.mrb[34].mxu1  ;;  %8049 = vmatpush3.bf16.msra.mxu1 %v9128_v43  ;;  %v6957_v43 = vcombine.low %v11649_v46, %v11652_v13 }
 0x2dc   : > { %6165 = vmatpush1.bf16.msra.mxu0 %v9124_v26  ;;  %v7904_v45 = vpop.f32.mrb[35].mxu1  ;;  %8050 = vmatprep.subr.bf16.mxu1 %v9132_v38  ;;  %v9178_v26 = vld [vmem:[%s11877_s1 + $0x1730] ss:$12 sps:$4 sm:$0xff]  }
 0x2dd   : > { %6166 = vmatprep.subr.bf16.mxu0 %v9131_v22  ;;  %v11747_v44 = vadd.f32 %v7902_v35, %v11627_v1  ;;  %v7905_v57 = vadd.f32 %v7904_v45, %v7903_v7  ;;  %v9149_v1 = vld [vmem:[%s11877_s1 + $0x1770] ss:$12 sps:$4 sm:$0xff]  }
 0x2df   : > { %v11750_v58 = vadd.f32 %v7905_v57, %v11630_v40  ;;  %8051 = vmatpush3.bf16.msra.mxu1 %v9133_v41  ;;  %v9156_v40 = vld [vmem:[%s11877_s1 + $0x178c] ss:$12 sps:$4 sm:$0xff]  }
 0x2e0   : > { %6167 = vmatpush1.bf16.msra.mxu0 %v9129_v20  ;;  %8052 = vmatprep.subr.bf16.mxu1 %v9137_v12 }
 0x2e1   : > { %6168 = vmatprep.subr.bf16.mxu0 %v9136_v51 }
 0x2e3   : > { %8053 = vmatpush3.bf16.msra.mxu1 %v9138_v21 }
 0x2e4   : > { %6169 = vmatpush1.bf16.msra.mxu0 %v9134_v49  ;;  %8060 = vmatprep.subr.bf16.mxu1 %v9142_v27 }
 0x2e5   : > { %6170 = vmatprep.subr.bf16.mxu0 %v9141_v25 }
 0x2e6   : > { %6804 = vmatmul.mubr.bf16.vlgmr.msra.gmra.mrb[60].mxu1 %v11646_v11  ;;  %v9162_v11 = vld [vmem:[%s11877_s1 + $0x17a8] ss:$12 sps:$4 sm:$0xff]  }
 0x2e7   : > { %8061 = vmatpush3.bf16.msra.mxu1 %v9143_v37  ;;  %6844 = vmatprep.mubr.bf16.mxu1 %v11668_v19  ;;  %v9164_v19 = vld [vmem:[%s11877_s1 + $0x17b8] ss:$12 sps:$4 sm:$0xff]  }
 0x2e8   : > { %6171 = vmatpush1.bf16.msra.mxu0 %v9139_v60  ;;  %8062 = vmatprep.subr.bf16.mxu1 %v9147_v6 }
 0x2e9   : > { %6172 = vmatprep.subr.bf16.mxu0 %v9146_v34 }
 0x2eb   : > { %8063 = vmatpush3.bf16.msra.mxu1 %v9148_v61 }
 0x2ec   : > { %6173 = vmatpush1.bf16.msra.mxu0 %v9144_v8  ;;  %8064 = vmatprep.subr.bf16.mxu1 %v9152_v55 }
 0x2ed   : > { %6174 = vmatprep.subr.bf16.mxu0 %v9151_v62 }
 0x2ef   : > { %8065 = vmatpush3.bf16.msra.mxu1 %v9153_v2 }
 0x2f0   : > { %6175 = vmatpush1.bf16.msra.mxu0 %v9149_v1  ;;  %8066 = vmatprep.subr.bf16.mxu1 %v9157_v3 }
 0x2f1   : > { %6176 = vmatprep.subr.bf16.mxu0 %v9156_v40 }
 0x2f3   : > { %8067 = vmatpush3.bf16.msra.mxu1 %v9158_v56 }
 0x2f4   : > { %6177 = vmatpush1.bf16.msra.mxu0 %v9154_v29  ;;  %8068 = vmatprep.subr.bf16.mxu1 %v9162_v11 }
 0x2f5   : > { %6178 = vmatprep.subr.bf16.mxu0 %v9161_v4 }
 0x2f7   : > { %8069 = vmatpush3.bf16.msra.mxu1 %v9163_v18 }
 0x2f8   : > { %6179 = vmatpush1.bf16.msra.mxu0 %v9159_v50  ;;  %8070 = vmatprep.subr.bf16.mxu1 %v9167_v47 }
 0x2f9   : > { %6180 = vmatprep.subr.bf16.mxu0 %v9166_v32  ;;  %v7922_v42 = vpop.f32.mrb[36].mxu1 }
 0x2fa   : > { %v7923_v54 = vpop.f32.mrb[37].mxu1 }
 0x2fb   : > { %v7924_v15 = vadd.f32 %v7923_v54, %v7922_v42  ;;  %v7925_v33 = vpop.f32.mrb[38].mxu1  ;;  %8071 = vmatpush3.bf16.msra.mxu1 %v9168_v14 }
 0x2fc   : > { %6181 = vmatpush1.bf16.msra.mxu0 %v9164_v19  ;;  %v7926_v59 = vpop.f32.mrb[39].mxu1  ;;  %8072 = vmatprep.subr.bf16.mxu1 %v9172_v16 }
 0x2fd   : > { %6182 = vmatprep.subr.bf16.mxu0 %v9171_v48  ;;  %v6560_v30 = vadd.f32 %v7924_v15, %v11747_v44  ;;  %v7927_v31 = vadd.f32 %v7926_v59, %v7925_v33  ;;  %v9179_v59 = vld [vmem:[%s11878_s2] sm:$0x7] }
 0x2ff   : > { %v6563_v63 = vadd.f32 %v7927_v31, %v11750_v58  ;;  %8073 = vmatpush3.bf16.msra.mxu1 %v9173_v17  ;;  %v1244_v17 = vsub.s32 1, %v11029_v53 }
 0x300   : > { %6183 = vmatpush1.bf16.msra.mxu0 %v9169_v28  ;;  %8074 = vmatprep.subr.bf16.mxu1 %v9177_v23  ;;  %v1240_v28 = vsub.s32 0, %v11029_v53 }
 0x301   : > { %6184 = vmatprep.subr.bf16.mxu0 %v9176_v52  ;;  %v1245_v23 = vrot.slane %v9179_v59, %v1244_v17 }
 0x302   : > { %v1241_v52 = vrot.slane %v9179_v59, %v1240_v28 }
 0x303   : > { %8075 = vmatpush3.bf16.msra.mxu1 %v9178_v26  ;;  %v8084_v31 = vadd.f32 %v10840_v36, %v1245_v23 }
 0x304   : > { %6185 = vmatpush1.bf16.msra.mxu0 %v9174_v0  ;;  %v8086_v26 = vadd.f32 %v10842_v10, %v1241_v52 }
 0x306   : > { %6845 = vmatmul.mubr.bf16.vlgmr.msra.gmra.mrb[64].mxu1 %v6957_v43 }
 0x307   : > { %6187 = vmatmul.mubr.bf16.vlgmr.msra.gmra.mrb[0].mxu0 %v6957_v43 }
 0x319   : > { %v7944_v22 = vpop.f32.mrb[40].mxu1 }
 0x31a   : > { %v7945_v38 = vpop.f32.mrb[41].mxu1 }
 0x31b   : > { %v7946_v39 = vadd.f32 %v7945_v38, %v7944_v22  ;;  %v7947_v9 = vpop.f32.mrb[42].mxu1  ;;  %v8088_v38 = vadd.f32 %v10844_v5, %v1245_v23 }
 0x31c   : > { %v7948_v35 = vpop.f32.mrb[43].mxu1 }
 0x31d   : > { %v6601_v7 = vadd.f32 %v7946_v39, %v6560_v30  ;;  %v7949_v20 = vadd.f32 %v7948_v35, %v7947_v9  ;;  %v8082_v30 = vadd.f32 %v10832_v24, %v1241_v52 }
 0x31f   : > { %v6604_v41 = vadd.f32 %v7949_v20, %v6563_v63 }
 0x339   : > { %v7966_v45 = vpop.f32.mrb[44].mxu1 }
 0x33a   : > { %v7967_v51 = vpop.f32.mrb[45].mxu1 }
 0x33b   : > { %v7968_v12 = vadd.f32 %v7967_v51, %v7966_v45  ;;  %v7969_v44 = vpop.f32.mrb[46].mxu1 }
 0x33c   : > { %v7970_v57 = vpop.f32.mrb[47].mxu1 }
 0x33d   : > { %v6642_v58 = vadd.f32 %v7968_v12, %v6601_v7  ;;  %v7971_v49 = vadd.f32 %v7970_v57, %v7969_v44 }
 0x33f   : > { %v6645_v46 = vadd.f32 %v7971_v49, %v6604_v41 }
 0x359   : > { %v7988_v13 = vpop.f32.mrb[48].mxu1 }
 0x35a   : > { %v7989_v21 = vpop.f32.mrb[49].mxu1 }
 0x35b   : > { %v7990_v25 = vadd.f32 %v7989_v21, %v7988_v13  ;;  %v7991_v27 = vpop.f32.mrb[50].mxu1 }
 0x35c   : > { %v7992_v60 = vpop.f32.mrb[51].mxu1 }
 0x35d   : > { %v6683_v37 = vadd.f32 %v7990_v25, %v6642_v58  ;;  %v7993_v34 = vadd.f32 %v7992_v60, %v7991_v27 }
 0x35f   : > { %v6686_v6 = vadd.f32 %v7993_v34, %v6645_v46 }
 0x379   : > { %v8010_v8 = vpop.f32.mrb[52].mxu1 }
 0x37a   : > { %v8011_v61 = vpop.f32.mrb[53].mxu1 }
 0x37b   : > { %v8012_v62 = vadd.f32 %v8011_v61, %v8010_v8  ;;  %v8013_v55 = vpop.f32.mrb[54].mxu1 }
 0x37c   : > { %v8014_v1 = vpop.f32.mrb[55].mxu1 }
 0x37d   : > { %v6724_v2 = vadd.f32 %v8012_v62, %v6683_v37  ;;  %v8015_v40 = vadd.f32 %v8014_v1, %v8013_v55 }
 0x37f   : > { %v6727_v3 = vadd.f32 %v8015_v40, %v6686_v6 }
 0x399   : > { %v8032_v29 = vpop.f32.mrb[56].mxu1 }
 0x39a   : > { %v8033_v56 = vpop.f32.mrb[57].mxu1 }
 0x39b   : > { %v8034_v4 = vadd.f32 %v8033_v56, %v8032_v29  ;;  %v8035_v11 = vpop.f32.mrb[58].mxu1 }
 0x39c   : > { %v8036_v50 = vpop.f32.mrb[59].mxu1 }
 0x39d   : > { %v6765_v18 = vadd.f32 %v8034_v4, %v6724_v2  ;;  %v8037_v32 = vadd.f32 %v8036_v50, %v8035_v11 }
 0x39f   : > { %v6768_v47 = vadd.f32 %v8037_v32, %v6727_v3 }
 0x3b9   : > { %v8054_v19 = vpop.f32.mrb[60].mxu1 }
 0x3ba   : > { %v8055_v14 = vpop.f32.mrb[61].mxu1 }
 0x3bb   : > { %v8056_v48 = vadd.f32 %v8055_v14, %v8054_v19  ;;  %v8057_v16 = vpop.f32.mrb[62].mxu1 }
 0x3bc   : > { %v8058_v42 = vpop.f32.mrb[63].mxu1 }
 0x3bd   : > { %v6806_v54 = vadd.f32 %v8056_v48, %v6765_v18  ;;  %v8059_v15 = vadd.f32 %v8058_v42, %v8057_v16 }
 0x3bf   : > { %v6809_v33 = vadd.f32 %v8059_v15, %v6768_v47 }
 0x3d9   : > { %v8076_v0 = vpop.f32.mrb[64].mxu1 }
 0x3da   : > { %v6188_v63 = vpop.f32.mrb[0].mxu0  ;;  %v8077_v22 = vpop.f32.mrb[65].mxu1 }
 0x3db   : > { %v8083_v53 = vadd.f32 %v8082_v30, %v6188_v63  ;;  %v6190_v43 = vpop.f32.mrb[1].mxu0  ;;  %v8078_v9 = vadd.f32 %v8077_v22, %v8076_v0  ;;  %v8079_v7 = vpop.f32.mrb[66].mxu1 }
 0x3dc   : > { %v8085_v39 = vadd.f32 %v8084_v31, %v6190_v43  ;;  %v6192_v35 = vpop.f32.mrb[2].mxu0  ;;  %v8080_v20 = vpop.f32.mrb[67].mxu1 }
 0x3dd   : > { %6853 = vst [vmem:[%s177_s16] sm:$0xff] %v8083_v53  ;;  %v8087_v24 = vadd.f32 %v8086_v26, %v6192_v35  ;;  %v6194_v36 = vpop.f32.mrb[3].mxu0  ;;  %v6847_v41 = vadd.f32 %v8078_v9, %v6806_v54  ;;  %v8081_v51 = vadd.f32 %v8080_v20, %v8079_v7 }
 0x3de   : > { %6854 = vst [vmem:[%s177_s16 + $0x8] sm:$0xff] %v8085_v39  ;;  %v8089_v45 = vadd.f32 %v8088_v38, %v6194_v36 }
 0x3df   : > { %6856 = vst [vmem:[%s177_s16 + $0x18] sm:$0xff] %v8087_v24  ;;  %6855 = vst [vmem:[%s177_s16 + $0x10] sm:$0xff] %v6847_v41  ;;  %v6850_v10 = vadd.f32 %v8081_v51, %v6809_v33 }
 0x3e0   : > { %6857 = vst [vmem:[%s177_s16 + $0x20] sm:$0xff] %v8089_v45 }
 0x3e1   : > { %6858 = vst [vmem:[%s177_s16 + $0x28] sm:$0xff] %v6850_v10 }
 0x3e2 PF: > { %s13_s12 = sadd.s32 1, %s9186_s12  }
 0x3e3   : > { %p10_p4 = scmp.ge.s32.totalorder %s13_s12, 4  }
 0x3e5   :  { %12 = sbr.rel (!%p10_p4) target bundleno = 1 (0x1), region = 62 }

</bundles_post_ra>
